<compile_context>
chip_gen: v7x
topology: tpu7x:2x2x1
jax: 0.10.0
libtpu: 0.0.40
codegen_flags: <defaults>
</compile_context>

<pallas_src>
import numpy as np
import jax
import jax.numpy as jnp
from jax import lax
from jax.experimental import pallas as pl
from jax.experimental.pallas import tpu as pltpu


def _round_up(x, m):
    return (x + m - 1) // m * m


# ---------------------------------------------------------------------------
# Pallas kernels
# ---------------------------------------------------------------------------
def _make_conv3x3_kernel(Wp, G, Qp, Li, Cout):
    """3x3 'same' conv on a flattened zero-padded NHWC slab (one image per grid step).

    Slab layout (per image, shape (Li, C)): row p holds the zero-padded image pixel with
    flat padded index (p - G); rows outside [G, G + Hp*Wp) are zeros.  The output is written
    in the *same* slab layout so convs chain with no glue, and per-image partial sums /
    sums-of-squares over the valid (interior) pixels are emitted for a following BatchNorm.
    """
    D0 = G - (Wp + 1)  # shift so all 9 tap read-offsets are >= 0

    def kernel(x_ref, w_ref, b_ref, m_ref, o_ref, ps_ref, pq_ref):
        acc = jnp.zeros((Qp, Cout), jnp.float32)
        for t in range(9):                      # fused im2col: 9 shifted MXU matmuls
            dy, dx = t // 3, t % 3
            off = D0 + dy * Wp + dx
            acc = acc + jnp.dot(x_ref[0, off:off + Qp, :], w_ref[t],
                                preferred_element_type=jnp.float32)
        res = (acc + b_ref[...]) * m_ref[...]   # zero the padding / garbage rows
        # aligned stores: [0,G) zeros | [G, G+Qp) result | [G+Qp, Li) zeros
        o_ref[0, 0:G, :] = jnp.zeros((G, Cout), o_ref.dtype)
        o_ref[0, G:G + Qp, :] = res.astype(o_ref.dtype)
        o_ref[0, G + Qp:Li, :] = jnp.zeros((Li - G - Qp, Cout), o_ref.dtype)
        # fused BatchNorm partial statistics (interior pixels only; rest are exactly zero)
        ps_ref[0, :, :] = jnp.sum(res, axis=0, keepdims=True)
        pq_ref[0, :, :] = jnp.sum(res * res, axis=0, keepdims=True)

    return kernel


def _make_bn_relu_upconv_kernel(G, Qp):
    """Fused: BN1 affine + ReLU + ConvTranspose2d(k=2, s=2) matmul + BN2 partial stats."""

    def kernel(y_ref, sc_ref, sh_ref, m_ref, w_ref, b_ref, z_ref, ps_ref, pq_ref):
        t = y_ref[0, G:G + Qp, :]                              # conv2 output slab rows
        t = jnp.maximum(t * sc_ref[...] + sh_ref[...], 0.0)    # BN1 affine + ReLU
        z = jnp.dot(t, w_ref[...], preferred_element_type=jnp.float32) + b_ref[...]
        z_ref[0, :, :] = z.astype(z_ref.dtype)
        zm = z * m_ref[...]                                    # stats over valid pixels only
        ps_ref[0, :, :] = jnp.sum(zm, axis=0, keepdims=True)
        pq_ref[0, :, :] = jnp.sum(z * zm, axis=0, keepdims=True)

    return kernel


def _affine_relu_kernel(x_ref, sc_ref, sh_ref, o_ref):
    y = x_ref[0] * sc_ref[...] + sh_ref[...]
    o_ref[0, :, :] = jnp.maximum(y, 0.0).astype(o_ref.dtype)


# ---------------------------------------------------------------------------
# Wrapper
# ---------------------------------------------------------------------------
def bridge_up(x, params, eps=1e-5):
    """Forward pass of BridgeUP. x: (N, Cin, H, W) float32 (NCHW, like PyTorch)."""
    N, Cin, H, W = x.shape
    Co = params["wt"].shape[1]
    Hp, Wp = H + 2, W + 2
    G = _round_up(Wp + 1, 8)          # front guard (>= Wp+1 so every tap read is in-bounds)
    Qp = _round_up(Hp * Wp, 8)        # computed rows per image (padded-image positions)
    Li = G + Qp + G                   # slab rows per image (all multiples of 8)
    cparams = pltpu.CompilerParams(dimension_semantics=("parallel",))

    # ---- boundary layout work (once): NCHW -> NHWC -> padded flat slab -------------------
    x_nhwc = jnp.transpose(x, (0, 2, 3, 1))
    xp = jnp.pad(x_nhwc, ((0, 0), (1, 1), (1, 1), (0, 0))).reshape(N, Hp * Wp, Cin)
    slab0 = jnp.pad(xp, ((0, 0), (G, Li - G - Hp * Wp), (0, 0)))

    # interior-pixel mask over the Qp computed rows (1.0 = real output pixel)
    q = np.arange(Qp)
    sy, sx = q // Wp, q % Wp
    mask = jnp.asarray(((sy >= 1) & (sy <= H) & (sx >= 1) & (sx <= W))
                       .astype(np.float32).reshape(Qp, 1))

    # ---- conv1 / conv2 (shared pallas_call: both are Cin -> Cin) ---------------------------
    w9_1 = params["w1"].transpose(2, 3, 1, 0).reshape(9, Cin, Cin)   # (tap, ci, co)
    w9_2 = params["w2"].transpose(2, 3, 1, 0).reshape(9, Cin, Cin)
    b1 = params["b1"].reshape(1, Cin)
    b2 = params["b2"].reshape(1, Cin)

    conv_call = pl.pallas_call(
        _make_conv3x3_kernel(Wp, G, Qp, Li, Cin),
        out_shape=(jax.ShapeDtypeStruct((N, Li, Cin), jnp.float32),
                   jax.ShapeDtypeStruct((N, 1, Cin), jnp.float32),
                   jax.ShapeDtypeStruct((N, 1, Cin), jnp.float32)),
        grid=(N,),
        in_specs=[pl.BlockSpec((1, Li, Cin), lambda n: (n, 0, 0)),
                  pl.BlockSpec((9, Cin, Cin), lambda n: (0, 0, 0)),
                  pl.BlockSpec((1, Cin), lambda n: (0, 0)),
                  pl.BlockSpec((Qp, 1), lambda n: (0, 0))],
        out_specs=(pl.BlockSpec((1, Li, Cin), lambda n: (n, 0, 0)),
                   pl.BlockSpec((1, 1, Cin), lambda n: (n, 0, 0)),
                   pl.BlockSpec((1, 1, Cin), lambda n: (n, 0, 0))),
        compiler_params=cparams,
    )

    y1_slab, _, _ = conv_call(slab0, w9_1, b1, mask)          # conv1 (stats unused)
    y2_slab, ps1, pq1 = conv_call(y1_slab, w9_2, b2, mask)    # conv2 + BN1 partial stats

    # ---- BatchNorm1 statistics (tiny per-channel finalize in plain JAX) --------------------
    cnt1 = float(N * H * W)
    mean1 = jnp.sum(ps1, axis=(0, 1)) / cnt1
    var1 = jnp.sum(pq1, axis=(0, 1)) / cnt1 - mean1 * mean1   # biased, training-mode
    scale1 = params["gamma1"] / jnp.sqrt(var1 + eps)
    shift1 = params["beta1"] - mean1 * scale1

    # ---- fused BN1 affine + ReLU + ConvTranspose2d(k=2,s=2) + BN2 partial stats -------------
    C4 = 4 * Co
    wup = params["wt"].transpose(0, 2, 3, 1).reshape(Cin, C4)   # cols: (dy*2+dx)*Co + co
    bup = jnp.tile(params["bt"], 4).reshape(1, C4)

    z, ps2, pq2 = pl.pallas_call(
        _make_bn_relu_upconv_kernel(G, Qp),
        out_shape=(jax.ShapeDtypeStruct((N, Qp, C4), jnp.float32),
                   jax.ShapeDtypeStruct((N, 1, C4), jnp.float32),
                   jax.ShapeDtypeStruct((N, 1, C4), jnp.float32)),
        grid=(N,),
        in_specs=[pl.BlockSpec((1, Li, Cin), lambda n: (n, 0, 0)),
                  pl.BlockSpec((1, Cin), lambda n: (0, 0)),
                  pl.BlockSpec((1, Cin), lambda n: (0, 0)),
                  pl.BlockSpec((Qp, 1), lambda n: (0, 0)),
                  pl.BlockSpec((Cin, C4), lambda n: (0, 0)),
                  pl.BlockSpec((1, C4), lambda n: (0, 0))],
        out_specs=(pl.BlockSpec((1, Qp, C4), lambda n: (n, 0, 0)),
                   pl.BlockSpec((1, 1, C4), lambda n: (n, 0, 0)),
                   pl.BlockSpec((1, 1, C4), lambda n: (n, 0, 0))),
        compiler_params=cparams,
    )(y2_slab, scale1.reshape(1, Cin), shift1.reshape(1, Cin), mask, wup, bup)

    # ---- BatchNorm2 statistics ---------------------------------------------------------------
    cnt2 = float(N * (2 * H) * (2 * W))
    mean2 = jnp.sum(ps2, axis=(0, 1)).reshape(4, Co).sum(axis=0) / cnt2
    ex2 = jnp.sum(pq2, axis=(0, 1)).reshape(4, Co).sum(axis=0) / cnt2
    var2 = ex2 - mean2 * mean2
    scale2 = params["gamma2"] / jnp.sqrt(var2 + eps)
    shift2 = params["beta2"] - mean2 * scale2

    # ---- BN2 affine + ReLU --------------------------------------------------------------------
    zr = pl.pallas_call(
        _affine_relu_kernel,
        out_shape=jax.ShapeDtypeStruct((N, Qp, C4), jnp.float32),
        grid=(N,),
        in_specs=[pl.BlockSpec((1, Qp, C4), lambda n: (n, 0, 0)),
                  pl.BlockSpec((1, C4), lambda n: (0, 0)),
                  pl.BlockSpec((1, C4), lambda n: (0, 0))],
        out_specs=pl.BlockSpec((1, Qp, C4), lambda n: (n, 0, 0)),
        compiler_params=cparams,
    )(z, jnp.tile(scale2, 4).reshape(1, C4), jnp.tile(shift2, 4).reshape(1, C4))

    # ---- boundary layout work (once): gather interior rows, 2x2 interleave, NHWC -> NCHW ------
    out = zr[:, :Hp * Wp, :].reshape(N, Hp, Wp, 2, 2, Co)[:, 1:H + 1, 1:W + 1]
    out = out.transpose(0, 1, 3, 2, 4, 5).reshape(N, 2 * H, 2 * W, Co)
    return out.transpose(0, 3, 1, 2)


# ---------------------------------------------------------------------------
# Pure-JAX reference (for correctness check)
# ---------------------------------------------------------------------------
def _bn_relu_ref(y, gamma, beta, eps):
    mean = y.mean(axis=(0, 2, 3), keepdims=True)
    var = ((y - mean) ** 2).mean(axis=(0, 2, 3), keepdims=True)
    y = (y - mean) / jnp.sqrt(var + eps) * gamma[None, :, None, None] + beta[None, :, None, None]
    return jnp.maximum(y, 0.0)


def _ref_forward(x, params, eps=1e-5):
    dn = ("NCHW", "OIHW", "NCHW")
    hi = lax.Precision.HIGHEST
    y = lax.conv_general_dilated(x, params["w1"], (1, 1), "SAME",
                                 dimension_numbers=dn, precision=hi)
    y = y + params["b1"][None, :, None, None]
    y = lax.conv_general_dilated(y, params["w2"], (1, 1), "SAME",
                                 dimension_numbers=dn, precision=hi)
    y = y + params["b2"][None, :, None, None]
    y = _bn_relu_ref(y, params["gamma1"], params["beta1"], eps)
    # ConvTranspose2d(k=2, s=2) == input-dilated conv with the flipped, transposed kernel
    wflip = jnp.flip(params["wt"], axis=(2, 3)).transpose(1, 0, 2, 3)
    y = lax.conv_general_dilated(y, wflip, window_strides=(1, 1),
                                 padding=((1, 1), (1, 1)), lhs_dilation=(2, 2),
                                 dimension_numbers=dn, precision=hi)
    y = y + params["bt"][None, :, None, None]
    return _bn_relu_ref(y, params["gamma2"], params["beta2"], eps)


# ---------------------------------------------------------------------------
# Main
# ---------------------------------------------------------------------------
if __name__ == "__main__":
    N, Cin, Cout, H, W = 2, 4, 8, 16, 16
    key = jax.random.PRNGKey(0)
    ks = jax.random.split(key, 11)

    x = jax.random.normal(ks[0], (N, Cin, H, W), dtype=jnp.float32)
    params = {
        # DoubleConvBlock(in_channels, in_channels)
        "w1": 0.2 * jax.random.normal(ks[1], (Cin, Cin, 3, 3), dtype=jnp.float32),
        "b1": 0.1 * jax.random.normal(ks[2], (Cin,), dtype=jnp.float32),
        "w2": 0.2 * jax.random.normal(ks[3], (Cin, Cin, 3, 3), dtype=jnp.float32),
        "b2": 0.1 * jax.random.normal(ks[4], (Cin,), dtype=jnp.float32),
        "gamma1": 1.0 + 0.1 * jax.random.normal(ks[5], (Cin,), dtype=jnp.float32),
        "beta1": 0.1 * jax.random.normal(ks[6], (Cin,), dtype=jnp.float32),
        # ConvTranspose2d(in_channels, out_channels, 2, 2) + BatchNorm2d(out_channels)
        "wt": 0.2 * jax.random.normal(ks[7], (Cin, Cout, 2, 2), dtype=jnp.float32),
        "bt": 0.1 * jax.random.normal(ks[8], (Cout,), dtype=jnp.float32),
        "gamma2": 1.0 + 0.1 * jax.random.normal(ks[9], (Cout,), dtype=jnp.float32),
        "beta2": 0.1 * jax.random.normal(ks[10], (Cout,), dtype=jnp.float32),
    }

    out = jax.block_until_ready(jax.jit(bridge_up)(x, params))
    ref = jax.block_until_ready(_ref_forward(x, params))

    assert out.shape == (N, Cout, 2 * H, 2 * W), out.shape
    err = float(jnp.max(jnp.abs(out - ref)))
    assert jnp.allclose(out, ref, atol=5e-4, rtol=5e-4), f"max abs diff {err}"
    print("KERNEL_OK")
</pallas_src>

<mosaic_0001>
module attributes {stable_mosaic.version = 11 : i64} {
  func.func @kernel(%arg0: i32, %arg1: memref<1x376x4xf32, #tpu.memory_space<vmem>>, %arg2: memref<9x4x4xf32, #tpu.memory_space<vmem>>, %arg3: memref<1x4xf32, #tpu.memory_space<vmem>>, %arg4: memref<328x1xf32, #tpu.memory_space<vmem>>, %arg5: memref<1x376x4xf32, #tpu.memory_space<vmem>>, %arg6: memref<1x1x4xf32, #tpu.memory_space<vmem>>, %arg7: memref<1x1x4xf32, #tpu.memory_space<vmem>>) attributes {dimension_semantics = [#tpu.dimension_semantics<parallel>], iteration_bounds = array<i64: 2>, scalar_prefetch = 0 : i64, scratch_operands = 0 : i64, tpu.core_type = #tpu.core_type<tc>, window_params = [{transform_indices = @transform_0, window_bounds = array<i64: 1, 376, 4>}, {pipeline_mode = #tpu.pipeline_mode<synchronous>, transform_indices = @transform_1, window_bounds = array<i64: 9, 4, 4>}, {pipeline_mode = #tpu.pipeline_mode<synchronous>, transform_indices = @transform_2, window_bounds = array<i64: 1, 4>}, {pipeline_mode = #tpu.pipeline_mode<synchronous>, transform_indices = @transform_3, window_bounds = array<i64: 328, 1>}, {transform_indices = @transform_4, window_bounds = array<i64: 1, 376, 4>}, {transform_indices = @transform_5, window_bounds = array<i64: 1, 1, 4>}, {transform_indices = @transform_6, window_bounds = array<i64: 1, 1, 4>}]} {
    %cst = arith.constant 0.000000e+00 : f32
    %0 = vector.broadcast %cst : f32 to vector<328x4xf32>
    %c0 = arith.constant 0 : index
    %c5 = arith.constant 5 : index
    %c0_0 = arith.constant 0 : index
    %1 = vector.load %arg1[%c0, %c5, %c0_0] : memref<1x376x4xf32, #tpu.memory_space<vmem>>, vector<1x328x4xf32>
    %2 = vector.shape_cast %1 : vector<1x328x4xf32> to vector<328x4xf32>
    %c0_1 = arith.constant 0 : index
    %c0_2 = arith.constant 0 : index
    %c0_3 = arith.constant 0 : index
    %3 = vector.load %arg2[%c0_1, %c0_2, %c0_3] : memref<9x4x4xf32, #tpu.memory_space<vmem>>, vector<1x4x4xf32>
    %4 = vector.shape_cast %3 : vector<1x4x4xf32> to vector<4x4xf32>
    %cst_4 = arith.constant dense<0.000000e+00> : vector<328x4xf32>
    %5 = tpu.matmul %2, %4, %cst_4 {dimension_numbers = #tpu.dot_dimension_numbers<[1], [0], [0], [1], [0, 0, 1, 1], [], []>} : vector<328x4xf32>, vector<4x4xf32>, vector<328x4xf32> -> vector<328x4xf32>
    %6 = arith.addf %0, %5 : vector<328x4xf32>
    %c0_5 = arith.constant 0 : index
    %c6 = arith.constant 6 : index
    %c0_6 = arith.constant 0 : index
    %7 = vector.load %arg1[%c0_5, %c6, %c0_6] : memref<1x376x4xf32, #tpu.memory_space<vmem>>, vector<1x328x4xf32>
    %8 = vector.shape_cast %7 : vector<1x328x4xf32> to vector<328x4xf32>
    %c1 = arith.constant 1 : index
    %c0_7 = arith.constant 0 : index
    %c0_8 = arith.constant 0 : index
    %9 = vector.load %arg2[%c1, %c0_7, %c0_8] : memref<9x4x4xf32, #tpu.memory_space<vmem>>, vector<1x4x4xf32>
    %10 = vector.shape_cast %9 : vector<1x4x4xf32> to vector<4x4xf32>
    %cst_9 = arith.constant dense<0.000000e+00> : vector<328x4xf32>
    %11 = tpu.matmul %8, %10, %cst_9 {dimension_numbers = #tpu.dot_dimension_numbers<[1], [0], [0], [1], [0, 0, 1, 1], [], []>} : vector<328x4xf32>, vector<4x4xf32>, vector<328x4xf32> -> vector<328x4xf32>
    %12 = arith.addf %6, %11 : vector<328x4xf32>
    %c0_10 = arith.constant 0 : index
    %c7 = arith.constant 7 : index
    %c0_11 = arith.constant 0 : index
    %13 = vector.load %arg1[%c0_10, %c7, %c0_11] : memref<1x376x4xf32, #tpu.memory_space<vmem>>, vector<1x328x4xf32>
    %14 = vector.shape_cast %13 : vector<1x328x4xf32> to vector<328x4xf32>
    %c2 = arith.constant 2 : index
    %c0_12 = arith.constant 0 : index
    %c0_13 = arith.constant 0 : index
    %15 = vector.load %arg2[%c2, %c0_12, %c0_13] : memref<9x4x4xf32, #tpu.memory_space<vmem>>, vector<1x4x4xf32>
    %16 = vector.shape_cast %15 : vector<1x4x4xf32> to vector<4x4xf32>
    %cst_14 = arith.constant dense<0.000000e+00> : vector<328x4xf32>
    %17 = tpu.matmul %14, %16, %cst_14 {dimension_numbers = #tpu.dot_dimension_numbers<[1], [0], [0], [1], [0, 0, 1, 1], [], []>} : vector<328x4xf32>, vector<4x4xf32>, vector<328x4xf32> -> vector<328x4xf32>
    %18 = arith.addf %12, %17 : vector<328x4xf32>
    %c0_15 = arith.constant 0 : index
    %c23 = arith.constant 23 : index
    %c0_16 = arith.constant 0 : index
    %19 = vector.load %arg1[%c0_15, %c23, %c0_16] : memref<1x376x4xf32, #tpu.memory_space<vmem>>, vector<1x328x4xf32>
    %20 = vector.shape_cast %19 : vector<1x328x4xf32> to vector<328x4xf32>
    %c3 = arith.constant 3 : index
    %c0_17 = arith.constant 0 : index
    %c0_18 = arith.constant 0 : index
    %21 = vector.load %arg2[%c3, %c0_17, %c0_18] : memref<9x4x4xf32, #tpu.memory_space<vmem>>, vector<1x4x4xf32>
    %22 = vector.shape_cast %21 : vector<1x4x4xf32> to vector<4x4xf32>
    %cst_19 = arith.constant dense<0.000000e+00> : vector<328x4xf32>
    %23 = tpu.matmul %20, %22, %cst_19 {dimension_numbers = #tpu.dot_dimension_numbers<[1], [0], [0], [1], [0, 0, 1, 1], [], []>} : vector<328x4xf32>, vector<4x4xf32>, vector<328x4xf32> -> vector<328x4xf32>
    %24 = arith.addf %18, %23 : vector<328x4xf32>
    %c0_20 = arith.constant 0 : index
    %c24 = arith.constant 24 : index
    %c0_21 = arith.constant 0 : index
    %25 = vector.load %arg1[%c0_20, %c24, %c0_21] : memref<1x376x4xf32, #tpu.memory_space<vmem>>, vector<1x328x4xf32>
    %26 = vector.shape_cast %25 : vector<1x328x4xf32> to vector<328x4xf32>
    %c4 = arith.constant 4 : index
    %c0_22 = arith.constant 0 : index
    %c0_23 = arith.constant 0 : index
    %27 = vector.load %arg2[%c4, %c0_22, %c0_23] : memref<9x4x4xf32, #tpu.memory_space<vmem>>, vector<1x4x4xf32>
    %28 = vector.shape_cast %27 : vector<1x4x4xf32> to vector<4x4xf32>
    %cst_24 = arith.constant dense<0.000000e+00> : vector<328x4xf32>
    %29 = tpu.matmul %26, %28, %cst_24 {dimension_numbers = #tpu.dot_dimension_numbers<[1], [0], [0], [1], [0, 0, 1, 1], [], []>} : vector<328x4xf32>, vector<4x4xf32>, vector<328x4xf32> -> vector<328x4xf32>
    %30 = arith.addf %24, %29 : vector<328x4xf32>
    %c0_25 = arith.constant 0 : index
    %c25 = arith.constant 25 : index
    %c0_26 = arith.constant 0 : index
    %31 = vector.load %arg1[%c0_25, %c25, %c0_26] : memref<1x376x4xf32, #tpu.memory_space<vmem>>, vector<1x328x4xf32>
    %32 = vector.shape_cast %31 : vector<1x328x4xf32> to vector<328x4xf32>
    %c5_27 = arith.constant 5 : index
    %c0_28 = arith.constant 0 : index
    %c0_29 = arith.constant 0 : index
    %33 = vector.load %arg2[%c5_27, %c0_28, %c0_29] : memref<9x4x4xf32, #tpu.memory_space<vmem>>, vector<1x4x4xf32>
    %34 = vector.shape_cast %33 : vector<1x4x4xf32> to vector<4x4xf32>
    %cst_30 = arith.constant dense<0.000000e+00> : vector<328x4xf32>
    %35 = tpu.matmul %32, %34, %cst_30 {dimension_numbers = #tpu.dot_dimension_numbers<[1], [0], [0], [1], [0, 0, 1, 1], [], []>} : vector<328x4xf32>, vector<4x4xf32>, vector<328x4xf32> -> vector<328x4xf32>
    %36 = arith.addf %30, %35 : vector<328x4xf32>
    %c0_31 = arith.constant 0 : index
    %c41 = arith.constant 41 : index
    %c0_32 = arith.constant 0 : index
    %37 = vector.load %arg1[%c0_31, %c41, %c0_32] : memref<1x376x4xf32, #tpu.memory_space<vmem>>, vector<1x328x4xf32>
    %38 = vector.shape_cast %37 : vector<1x328x4xf32> to vector<328x4xf32>
    %c6_33 = arith.constant 6 : index
    %c0_34 = arith.constant 0 : index
    %c0_35 = arith.constant 0 : index
    %39 = vector.load %arg2[%c6_33, %c0_34, %c0_35] : memref<9x4x4xf32, #tpu.memory_space<vmem>>, vector<1x4x4xf32>
    %40 = vector.shape_cast %39 : vector<1x4x4xf32> to vector<4x4xf32>
    %cst_36 = arith.constant dense<0.000000e+00> : vector<328x4xf32>
    %41 = tpu.matmul %38, %40, %cst_36 {dimension_numbers = #tpu.dot_dimension_numbers<[1], [0], [0], [1], [0, 0, 1, 1], [], []>} : vector<328x4xf32>, vector<4x4xf32>, vector<328x4xf32> -> vector<328x4xf32>
    %42 = arith.addf %36, %41 : vector<328x4xf32>
    %c0_37 = arith.constant 0 : index
    %c42 = arith.constant 42 : index
    %c0_38 = arith.constant 0 : index
    %43 = vector.load %arg1[%c0_37, %c42, %c0_38] : memref<1x376x4xf32, #tpu.memory_space<vmem>>, vector<1x328x4xf32>
    %44 = vector.shape_cast %43 : vector<1x328x4xf32> to vector<328x4xf32>
    %c7_39 = arith.constant 7 : index
    %c0_40 = arith.constant 0 : index
    %c0_41 = arith.constant 0 : index
    %45 = vector.load %arg2[%c7_39, %c0_40, %c0_41] : memref<9x4x4xf32, #tpu.memory_space<vmem>>, vector<1x4x4xf32>
    %46 = vector.shape_cast %45 : vector<1x4x4xf32> to vector<4x4xf32>
    %cst_42 = arith.constant dense<0.000000e+00> : vector<328x4xf32>
    %47 = tpu.matmul %44, %46, %cst_42 {dimension_numbers = #tpu.dot_dimension_numbers<[1], [0], [0], [1], [0, 0, 1, 1], [], []>} : vector<328x4xf32>, vector<4x4xf32>, vector<328x4xf32> -> vector<328x4xf32>
    %48 = arith.addf %42, %47 : vector<328x4xf32>
    %c0_43 = arith.constant 0 : index
    %c43 = arith.constant 43 : index
    %c0_44 = arith.constant 0 : index
    %49 = vector.load %arg1[%c0_43, %c43, %c0_44] : memref<1x376x4xf32, #tpu.memory_space<vmem>>, vector<1x328x4xf32>
    %50 = vector.shape_cast %49 : vector<1x328x4xf32> to vector<328x4xf32>
    %c8 = arith.constant 8 : index
    %c0_45 = arith.constant 0 : index
    %c0_46 = arith.constant 0 : index
    %51 = vector.load %arg2[%c8, %c0_45, %c0_46] : memref<9x4x4xf32, #tpu.memory_space<vmem>>, vector<1x4x4xf32>
    %52 = vector.shape_cast %51 : vector<1x4x4xf32> to vector<4x4xf32>
    %cst_47 = arith.constant dense<0.000000e+00> : vector<328x4xf32>
    %53 = tpu.matmul %50, %52, %cst_47 {dimension_numbers = #tpu.dot_dimension_numbers<[1], [0], [0], [1], [0, 0, 1, 1], [], []>} : vector<328x4xf32>, vector<4x4xf32>, vector<328x4xf32> -> vector<328x4xf32>
    %54 = arith.addf %48, %53 : vector<328x4xf32>
    %c0_48 = arith.constant 0 : index
    %c0_49 = arith.constant 0 : index
    %55 = vector.load %arg3[%c0_48, %c0_49] : memref<1x4xf32, #tpu.memory_space<vmem>>, vector<1x4xf32>
    %56 = vector.broadcast %55 : vector<1x4xf32> to vector<328x4xf32>
    %57 = arith.addf %54, %56 : vector<328x4xf32>
    %c0_50 = arith.constant 0 : index
    %c0_51 = arith.constant 0 : index
    %58 = vector.load %arg4[%c0_50, %c0_51] : memref<328x1xf32, #tpu.memory_space<vmem>>, vector<328x1xf32>
    %59 = vector.broadcast %58 : vector<328x1xf32> to vector<328x4xf32>
    %60 = arith.mulf %57, %59 : vector<328x4xf32>
    %cst_52 = arith.constant 0.000000e+00 : f32
    %61 = vector.broadcast %cst_52 : f32 to vector<24x4xf32>
    %c0_53 = arith.constant 0 : index
    %c0_54 = arith.constant 0 : index
    %c0_55 = arith.constant 0 : index
    %62 = vector.load %arg5[%c0_53, %c0_54, %c0_55] : memref<1x376x4xf32, #tpu.memory_space<vmem>>, vector<1x24x4xf32>
    %63 = vector.shape_cast %62 : vector<1x24x4xf32> to vector<24x4xf32>
    %64 = vector.shape_cast %61 : vector<24x4xf32> to vector<1x24x4xf32>
    tpu.vector_store %arg5[%c0_53, %c0_54, %c0_55], %64 {strides = array<i32>} : memref<1x376x4xf32, #tpu.memory_space<vmem>>, vector<1x24x4xf32>,
    %c0_56 = arith.constant 0 : index
    %c24_57 = arith.constant 24 : index
    %c0_58 = arith.constant 0 : index
    %65 = vector.load %arg5[%c0_56, %c24_57, %c0_58] : memref<1x376x4xf32, #tpu.memory_space<vmem>>, vector<1x328x4xf32>
    %66 = vector.shape_cast %65 : vector<1x328x4xf32> to vector<328x4xf32>
    %67 = vector.shape_cast %60 : vector<328x4xf32> to vector<1x328x4xf32>
    tpu.vector_store %arg5[%c0_56, %c24_57, %c0_58], %67 {strides = array<i32>} : memref<1x376x4xf32, #tpu.memory_space<vmem>>, vector<1x328x4xf32>,
    %cst_59 = arith.constant 0.000000e+00 : f32
    %68 = vector.broadcast %cst_59 : f32 to vector<24x4xf32>
    %c0_60 = arith.constant 0 : index
    %c352 = arith.constant 352 : index
    %c0_61 = arith.constant 0 : index
    %69 = vector.load %arg5[%c0_60, %c352, %c0_61] : memref<1x376x4xf32, #tpu.memory_space<vmem>>, vector<1x24x4xf32>
    %70 = vector.shape_cast %69 : vector<1x24x4xf32> to vector<24x4xf32>
    %71 = vector.shape_cast %68 : vector<24x4xf32> to vector<1x24x4xf32>
    tpu.vector_store %arg5[%c0_60, %c352, %c0_61], %71 {strides = array<i32>} : memref<1x376x4xf32, #tpu.memory_space<vmem>>, vector<1x24x4xf32>,
    %cst_62 = arith.constant dense<0.000000e+00> : vector<4xf32>
    %72 = vector.multi_reduction <add>, %60, %cst_62 [0] : vector<328x4xf32> to vector<4xf32>
    %73 = vector.shape_cast %72 : vector<4xf32> to vector<1x4xf32>
    %c0_63 = arith.constant 0 : index
    %c0_64 = arith.constant 0 : index
    %c0_65 = arith.constant 0 : index
    %74 = vector.load %arg6[%c0_63, %c0_64, %c0_65] : memref<1x1x4xf32, #tpu.memory_space<vmem>>, vector<1x1x4xf32>
    %75 = vector.shape_cast %74 : vector<1x1x4xf32> to vector<1x4xf32>
    %76 = vector.shape_cast %73 : vector<1x4xf32> to vector<1x1x4xf32>
    tpu.vector_store %arg6[%c0_63, %c0_64, %c0_65], %76 {strides = array<i32>} : memref<1x1x4xf32, #tpu.memory_space<vmem>>, vector<1x1x4xf32>,
    %77 = arith.mulf %60, %60 : vector<328x4xf32>
    %cst_66 = arith.constant dense<0.000000e+00> : vector<4xf32>
    %78 = vector.multi_reduction <add>, %77, %cst_66 [0] : vector<328x4xf32> to vector<4xf32>
    %79 = vector.shape_cast %78 : vector<4xf32> to vector<1x4xf32>
    %c0_67 = arith.constant 0 : index
    %c0_68 = arith.constant 0 : index
    %c0_69 = arith.constant 0 : index
    %80 = vector.load %arg7[%c0_67, %c0_68, %c0_69] : memref<1x1x4xf32, #tpu.memory_space<vmem>>, vector<1x1x4xf32>
    %81 = vector.shape_cast %80 : vector<1x1x4xf32> to vector<1x4xf32>
    %82 = vector.shape_cast %79 : vector<1x4xf32> to vector<1x1x4xf32>
    tpu.vector_store %arg7[%c0_67, %c0_68, %c0_69], %82 {strides = array<i32>} : memref<1x1x4xf32, #tpu.memory_space<vmem>>, vector<1x1x4xf32>,
    return
  }
  func.func @transform_0(%arg0: i32) -> (i32, i32, i32) {
    %c0_i32 = arith.constant 0 : i32
    %c0_i32_0 = arith.constant 0 : i32
    %c0_i32_1 = arith.constant 0 : i32
    return %arg0, %c0_i32, %c0_i32_0 : i32, i32, i32
  }
  func.func @transform_1(%arg0: i32) -> (i32, i32, i32) {
    %c0_i32 = arith.constant 0 : i32
    %c0_i32_0 = arith.constant 0 : i32
    %c0_i32_1 = arith.constant 0 : i32
    %c0_i32_2 = arith.constant 0 : i32
    return %c0_i32, %c0_i32_0, %c0_i32_1 : i32, i32, i32
  }
  func.func @transform_2(%arg0: i32) -> (i32, i32) {
    %c0_i32 = arith.constant 0 : i32
    %c0_i32_0 = arith.constant 0 : i32
    %c0_i32_1 = arith.constant 0 : i32
    return %c0_i32, %c0_i32_0 : i32, i32
  }
  func.func @transform_3(%arg0: i32) -> (i32, i32) {
    %c0_i32 = arith.constant 0 : i32
    %c0_i32_0 = arith.constant 0 : i32
    %c0_i32_1 = arith.constant 0 : i32
    return %c0_i32, %c0_i32_0 : i32, i32
  }
  func.func @transform_4(%arg0: i32) -> (i32, i32, i32) {
    %c0_i32 = arith.constant 0 : i32
    %c0_i32_0 = arith.constant 0 : i32
    %c0_i32_1 = arith.constant 0 : i32
    return %arg0, %c0_i32, %c0_i32_0 : i32, i32, i32
  }
  func.func @transform_5(%arg0: i32) -> (i32, i32, i32) {
    %c0_i32 = arith.constant 0 : i32
    %c0_i32_0 = arith.constant 0 : i32
    %c0_i32_1 = arith.constant 0 : i32
    return %arg0, %c0_i32, %c0_i32_0 : i32, i32, i32
  }
  func.func @transform_6(%arg0: i32) -> (i32, i32, i32) {
    %c0_i32 = arith.constant 0 : i32
    %c0_i32_0 = arith.constant 0 : i32
    %c0_i32_1 = arith.constant 0 : i32
    return %arg0, %c0_i32, %c0_i32_0 : i32, i32, i32
  }
}

module attributes {stable_mosaic.version = 11 : i64} {
  func.func @kernel(%arg0: i32, %arg1: memref<1x376x4xf32, #tpu.memory_space<vmem>>, %arg2: memref<9x4x4xf32, #tpu.memory_space<vmem>>, %arg3: memref<1x4xf32, #tpu.memory_space<vmem>>, %arg4: memref<328x1xf32, #tpu.memory_space<vmem>>, %arg5: memref<1x376x4xf32, #tpu.memory_space<vmem>>, %arg6: memref<1x1x4xf32, #tpu.memory_space<vmem>>, %arg7: memref<1x1x4xf32, #tpu.memory_space<vmem>>) attributes {dimension_semantics = [#tpu.dimension_semantics<parallel>], iteration_bounds = array<i64: 2>, scalar_prefetch = 0 : i64, scratch_operands = 0 : i64, tpu.core_type = #tpu.core_type<tc>, window_params = [{transform_indices = @transform_0, window_bounds = array<i64: 1, 376, 4>}, {pipeline_mode = #tpu.pipeline_mode<synchronous>, transform_indices = @transform_1, window_bounds = array<i64: 9, 4, 4>}, {pipeline_mode = #tpu.pipeline_mode<synchronous>, transform_indices = @transform_2, window_bounds = array<i64: 1, 4>}, {pipeline_mode = #tpu.pipeline_mode<synchronous>, transform_indices = @transform_3, window_bounds = array<i64: 328, 1>}, {transform_indices = @transform_4, window_bounds = array<i64: 1, 376, 4>}, {transform_indices = @transform_5, window_bounds = array<i64: 1, 1, 4>}, {transform_indices = @transform_6, window_bounds = array<i64: 1, 1, 4>}]} {
    %cst = arith.constant 0.000000e+00 : f32
    %0 = vector.broadcast %cst : f32 to vector<328x4xf32>
    %c0 = arith.constant 0 : index
    %c5 = arith.constant 5 : index
    %c0_0 = arith.constant 0 : index
    %1 = vector.load %arg1[%c0, %c5, %c0_0] : memref<1x376x4xf32, #tpu.memory_space<vmem>>, vector<1x328x4xf32>
    %2 = vector.shape_cast %1 : vector<1x328x4xf32> to vector<328x4xf32>
    %c0_1 = arith.constant 0 : index
    %c0_2 = arith.constant 0 : index
    %c0_3 = arith.constant 0 : index
    %3 = vector.load %arg2[%c0_1, %c0_2, %c0_3] : memref<9x4x4xf32, #tpu.memory_space<vmem>>, vector<1x4x4xf32>
    %4 = vector.shape_cast %3 : vector<1x4x4xf32> to vector<4x4xf32>
    %cst_4 = arith.constant dense<0.000000e+00> : vector<328x4xf32>
    %5 = tpu.matmul %2, %4, %cst_4 {dimension_numbers = #tpu.dot_dimension_numbers<[1], [0], [0], [1], [0, 0, 1, 1], [], []>} : vector<328x4xf32>, vector<4x4xf32>, vector<328x4xf32> -> vector<328x4xf32>
    %6 = arith.addf %0, %5 : vector<328x4xf32>
    %c0_5 = arith.constant 0 : index
    %c6 = arith.constant 6 : index
    %c0_6 = arith.constant 0 : index
    %7 = vector.load %arg1[%c0_5, %c6, %c0_6] : memref<1x376x4xf32, #tpu.memory_space<vmem>>, vector<1x328x4xf32>
    %8 = vector.shape_cast %7 : vector<1x328x4xf32> to vector<328x4xf32>
    %c1 = arith.constant 1 : index
    %c0_7 = arith.constant 0 : index
    %c0_8 = arith.constant 0 : index
    %9 = vector.load %arg2[%c1, %c0_7, %c0_8] : memref<9x4x4xf32, #tpu.memory_space<vmem>>, vector<1x4x4xf32>
    %10 = vector.shape_cast %9 : vector<1x4x4xf32> to vector<4x4xf32>
    %cst_9 = arith.constant dense<0.000000e+00> : vector<328x4xf32>
    %11 = tpu.matmul %8, %10, %cst_9 {dimension_numbers = #tpu.dot_dimension_numbers<[1], [0], [0], [1], [0, 0, 1, 1], [], []>} : vector<328x4xf32>, vector<4x4xf32>, vector<328x4xf32> -> vector<328x4xf32>
    %12 = arith.addf %6, %11 : vector<328x4xf32>
    %c0_10 = arith.constant 0 : index
    %c7 = arith.constant 7 : index
    %c0_11 = arith.constant 0 : index
    %13 = vector.load %arg1[%c0_10, %c7, %c0_11] : memref<1x376x4xf32, #tpu.memory_space<vmem>>, vector<1x328x4xf32>
    %14 = vector.shape_cast %13 : vector<1x328x4xf32> to vector<328x4xf32>
    %c2 = arith.constant 2 : index
    %c0_12 = arith.constant 0 : index
    %c0_13 = arith.constant 0 : index
    %15 = vector.load %arg2[%c2, %c0_12, %c0_13] : memref<9x4x4xf32, #tpu.memory_space<vmem>>, vector<1x4x4xf32>
    %16 = vector.shape_cast %15 : vector<1x4x4xf32> to vector<4x4xf32>
    %cst_14 = arith.constant dense<0.000000e+00> : vector<328x4xf32>
    %17 = tpu.matmul %14, %16, %cst_14 {dimension_numbers = #tpu.dot_dimension_numbers<[1], [0], [0], [1], [0, 0, 1, 1], [], []>} : vector<328x4xf32>, vector<4x4xf32>, vector<328x4xf32> -> vector<328x4xf32>
    %18 = arith.addf %12, %17 : vector<328x4xf32>
    %c0_15 = arith.constant 0 : index
    %c23 = arith.constant 23 : index
    %c0_16 = arith.constant 0 : index
    %19 = vector.load %arg1[%c0_15, %c23, %c0_16] : memref<1x376x4xf32, #tpu.memory_space<vmem>>, vector<1x328x4xf32>
    %20 = vector.shape_cast %19 : vector<1x328x4xf32> to vector<328x4xf32>
    %c3 = arith.constant 3 : index
    %c0_17 = arith.constant 0 : index
    %c0_18 = arith.constant 0 : index
    %21 = vector.load %arg2[%c3, %c0_17, %c0_18] : memref<9x4x4xf32, #tpu.memory_space<vmem>>, vector<1x4x4xf32>
    %22 = vector.shape_cast %21 : vector<1x4x4xf32> to vector<4x4xf32>
    %cst_19 = arith.constant dense<0.000000e+00> : vector<328x4xf32>
    %23 = tpu.matmul %20, %22, %cst_19 {dimension_numbers = #tpu.dot_dimension_numbers<[1], [0], [0], [1], [0, 0, 1, 1], [], []>} : vector<328x4xf32>, vector<4x4xf32>, vector<328x4xf32> -> vector<328x4xf32>
    %24 = arith.addf %18, %23 : vector<328x4xf32>
    %c0_20 = arith.constant 0 : index
    %c24 = arith.constant 24 : index
    %c0_21 = arith.constant 0 : index
    %25 = vector.load %arg1[%c0_20, %c24, %c0_21] : memref<1x376x4xf32, #tpu.memory_space<vmem>>, vector<1x328x4xf32>
    %26 = vector.shape_cast %25 : vector<1x328x4xf32> to vector<328x4xf32>
    %c4 = arith.constant 4 : index
    %c0_22 = arith.constant 0 : index
    %c0_23 = arith.constant 0 : index
    %27 = vector.load %arg2[%c4, %c0_22, %c0_23] : memref<9x4x4xf32, #tpu.memory_space<vmem>>, vector<1x4x4xf32>
    %28 = vector.shape_cast %27 : vector<1x4x4xf32> to vector<4x4xf32>
    %cst_24 = arith.constant dense<0.000000e+00> : vector<328x4xf32>
    %29 = tpu.matmul %26, %28, %cst_24 {dimension_numbers = #tpu.dot_dimension_numbers<[1], [0], [0], [1], [0, 0, 1, 1], [], []>} : vector<328x4xf32>, vector<4x4xf32>, vector<328x4xf32> -> vector<328x4xf32>
    %30 = arith.addf %24, %29 : vector<328x4xf32>
    %c0_25 = arith.constant 0 : index
    %c25 = arith.constant 25 : index
    %c0_26 = arith.constant 0 : index
    %31 = vector.load %arg1[%c0_25, %c25, %c0_26] : memref<1x376x4xf32, #tpu.memory_space<vmem>>, vector<1x328x4xf32>
    %32 = vector.shape_cast %31 : vector<1x328x4xf32> to vector<328x4xf32>
    %c5_27 = arith.constant 5 : index
    %c0_28 = arith.constant 0 : index
    %c0_29 = arith.constant 0 : index
    %33 = vector.load %arg2[%c5_27, %c0_28, %c0_29] : memref<9x4x4xf32, #tpu.memory_space<vmem>>, vector<1x4x4xf32>
    %34 = vector.shape_cast %33 : vector<1x4x4xf32> to vector<4x4xf32>
    %cst_30 = arith.constant dense<0.000000e+00> : vector<328x4xf32>
    %35 = tpu.matmul %32, %34, %cst_30 {dimension_numbers = #tpu.dot_dimension_numbers<[1], [0], [0], [1], [0, 0, 1, 1], [], []>} : vector<328x4xf32>, vector<4x4xf32>, vector<328x4xf32> -> vector<328x4xf32>
    %36 = arith.addf %30, %35 : vector<328x4xf32>
    %c0_31 = arith.constant 0 : index
    %c41 = arith.constant 41 : index
    %c0_32 = arith.constant 0 : index
    %37 = vector.load %arg1[%c0_31, %c41, %c0_32] : memref<1x376x4xf32, #tpu.memory_space<vmem>>, vector<1x328x4xf32>
    %38 = vector.shape_cast %37 : vector<1x328x4xf32> to vector<328x4xf32>
    %c6_33 = arith.constant 6 : index
    %c0_34 = arith.constant 0 : index
    %c0_35 = arith.constant 0 : index
    %39 = vector.load %arg2[%c6_33, %c0_34, %c0_35] : memref<9x4x4xf32, #tpu.memory_space<vmem>>, vector<1x4x4xf32>
    %40 = vector.shape_cast %39 : vector<1x4x4xf32> to vector<4x4xf32>
    %cst_36 = arith.constant dense<0.000000e+00> : vector<328x4xf32>
    %41 = tpu.matmul %38, %40, %cst_36 {dimension_numbers = #tpu.dot_dimension_numbers<[1], [0], [0], [1], [0, 0, 1, 1], [], []>} : vector<328x4xf32>, vector<4x4xf32>, vector<328x4xf32> -> vector<328x4xf32>
    %42 = arith.addf %36, %41 : vector<328x4xf32>
    %c0_37 = arith.constant 0 : index
    %c42 = arith.constant 42 : index
    %c0_38 = arith.constant 0 : index
    %43 = vector.load %arg1[%c0_37, %c42, %c0_38] : memref<1x376x4xf32, #tpu.memory_space<vmem>>, vector<1x328x4xf32>
    %44 = vector.shape_cast %43 : vector<1x328x4xf32> to vector<328x4xf32>
    %c7_39 = arith.constant 7 : index
    %c0_40 = arith.constant 0 : index
    %c0_41 = arith.constant 0 : index
    %45 = vector.load %arg2[%c7_39, %c0_40, %c0_41] : memref<9x4x4xf32, #tpu.memory_space<vmem>>, vector<1x4x4xf32>
    %46 = vector.shape_cast %45 : vector<1x4x4xf32> to vector<4x4xf32>
    %cst_42 = arith.constant dense<0.000000e+00> : vector<328x4xf32>
    %47 = tpu.matmul %44, %46, %cst_42 {dimension_numbers = #tpu.dot_dimension_numbers<[1], [0], [0], [1], [0, 0, 1, 1], [], []>} : vector<328x4xf32>, vector<4x4xf32>, vector<328x4xf32> -> vector<328x4xf32>
    %48 = arith.addf %42, %47 : vector<328x4xf32>
    %c0_43 = arith.constant 0 : index
    %c43 = arith.constant 43 : index
    %c0_44 = arith.constant 0 : index
    %49 = vector.load %arg1[%c0_43, %c43, %c0_44] : memref<1x376x4xf32, #tpu.memory_space<vmem>>, vector<1x328x4xf32>
    %50 = vector.shape_cast %49 : vector<1x328x4xf32> to vector<328x4xf32>
    %c8 = arith.constant 8 : index
    %c0_45 = arith.constant 0 : index
    %c0_46 = arith.constant 0 : index
    %51 = vector.load %arg2[%c8, %c0_45, %c0_46] : memref<9x4x4xf32, #tpu.memory_space<vmem>>, vector<1x4x4xf32>
    %52 = vector.shape_cast %51 : vector<1x4x4xf32> to vector<4x4xf32>
    %cst_47 = arith.constant dense<0.000000e+00> : vector<328x4xf32>
    %53 = tpu.matmul %50, %52, %cst_47 {dimension_numbers = #tpu.dot_dimension_numbers<[1], [0], [0], [1], [0, 0, 1, 1], [], []>} : vector<328x4xf32>, vector<4x4xf32>, vector<328x4xf32> -> vector<328x4xf32>
    %54 = arith.addf %48, %53 : vector<328x4xf32>
    %c0_48 = arith.constant 0 : index
    %c0_49 = arith.constant 0 : index
    %55 = vector.load %arg3[%c0_48, %c0_49] : memref<1x4xf32, #tpu.memory_space<vmem>>, vector<1x4xf32>
    %56 = vector.broadcast %55 : vector<1x4xf32> to vector<328x4xf32>
    %57 = arith.addf %54, %56 : vector<328x4xf32>
    %c0_50 = arith.constant 0 : index
    %c0_51 = arith.constant 0 : index
    %58 = vector.load %arg4[%c0_50, %c0_51] : memref<328x1xf32, #tpu.memory_space<vmem>>, vector<328x1xf32>
    %59 = vector.broadcast %58 : vector<328x1xf32> to vector<328x4xf32>
    %60 = arith.mulf %57, %59 : vector<328x4xf32>
    %cst_52 = arith.constant 0.000000e+00 : f32
    %61 = vector.broadcast %cst_52 : f32 to vector<24x4xf32>
    %c0_53 = arith.constant 0 : index
    %c0_54 = arith.constant 0 : index
    %c0_55 = arith.constant 0 : index
    %62 = vector.load %arg5[%c0_53, %c0_54, %c0_55] : memref<1x376x4xf32, #tpu.memory_space<vmem>>, vector<1x24x4xf32>
    %63 = vector.shape_cast %62 : vector<1x24x4xf32> to vector<24x4xf32>
    %64 = vector.shape_cast %61 : vector<24x4xf32> to vector<1x24x4xf32>
    tpu.vector_store %arg5[%c0_53, %c0_54, %c0_55], %64 {strides = array<i32>} : memref<1x376x4xf32, #tpu.memory_space<vmem>>, vector<1x24x4xf32>,
    %c0_56 = arith.constant 0 : index
    %c24_57 = arith.constant 24 : index
    %c0_58 = arith.constant 0 : index
    %65 = vector.load %arg5[%c0_56, %c24_57, %c0_58] : memref<1x376x4xf32, #tpu.memory_space<vmem>>, vector<1x328x4xf32>
    %66 = vector.shape_cast %65 : vector<1x328x4xf32> to vector<328x4xf32>
    %67 = vector.shape_cast %60 : vector<328x4xf32> to vector<1x328x4xf32>
    tpu.vector_store %arg5[%c0_56, %c24_57, %c0_58], %67 {strides = array<i32>} : memref<1x376x4xf32, #tpu.memory_space<vmem>>, vector<1x328x4xf32>,
    %cst_59 = arith.constant 0.000000e+00 : f32
    %68 = vector.broadcast %cst_59 : f32 to vector<24x4xf32>
    %c0_60 = arith.constant 0 : index
    %c352 = arith.constant 352 : index
    %c0_61 = arith.constant 0 : index
    %69 = vector.load %arg5[%c0_60, %c352, %c0_61] : memref<1x376x4xf32, #tpu.memory_space<vmem>>, vector<1x24x4xf32>
    %70 = vector.shape_cast %69 : vector<1x24x4xf32> to vector<24x4xf32>
    %71 = vector.shape_cast %68 : vector<24x4xf32> to vector<1x24x4xf32>
    tpu.vector_store %arg5[%c0_60, %c352, %c0_61], %71 {strides = array<i32>} : memref<1x376x4xf32, #tpu.memory_space<vmem>>, vector<1x24x4xf32>,
    %cst_62 = arith.constant dense<0.000000e+00> : vector<4xf32>
    %72 = vector.multi_reduction <add>, %60, %cst_62 [0] : vector<328x4xf32> to vector<4xf32>
    %73 = vector.shape_cast %72 : vector<4xf32> to vector<1x4xf32>
    %c0_63 = arith.constant 0 : index
    %c0_64 = arith.constant 0 : index
    %c0_65 = arith.constant 0 : index
    %74 = vector.load %arg6[%c0_63, %c0_64, %c0_65] : memref<1x1x4xf32, #tpu.memory_space<vmem>>, vector<1x1x4xf32>
    %75 = vector.shape_cast %74 : vector<1x1x4xf32> to vector<1x4xf32>
    %76 = vector.shape_cast %73 : vector<1x4xf32> to vector<1x1x4xf32>
    tpu.vector_store %arg6[%c0_63, %c0_64, %c0_65], %76 {strides = array<i32>} : memref<1x1x4xf32, #tpu.memory_space<vmem>>, vector<1x1x4xf32>,
    %77 = arith.mulf %60, %60 : vector<328x4xf32>
    %cst_66 = arith.constant dense<0.000000e+00> : vector<4xf32>
    %78 = vector.multi_reduction <add>, %77, %cst_66 [0] : vector<328x4xf32> to vector<4xf32>
    %79 = vector.shape_cast %78 : vector<4xf32> to vector<1x4xf32>
    %c0_67 = arith.constant 0 : index
    %c0_68 = arith.constant 0 : index
    %c0_69 = arith.constant 0 : index
    %80 = vector.load %arg7[%c0_67, %c0_68, %c0_69] : memref<1x1x4xf32, #tpu.memory_space<vmem>>, vector<1x1x4xf32>
    %81 = vector.shape_cast %80 : vector<1x1x4xf32> to vector<1x4xf32>
    %82 = vector.shape_cast %79 : vector<1x4xf32> to vector<1x1x4xf32>
    tpu.vector_store %arg7[%c0_67, %c0_68, %c0_69], %82 {strides = array<i32>} : memref<1x1x4xf32, #tpu.memory_space<vmem>>, vector<1x1x4xf32>,
    return
  }
  func.func @transform_0(%arg0: i32) -> (i32, i32, i32) {
    %c0_i32 = arith.constant 0 : i32
    %c0_i32_0 = arith.constant 0 : i32
    %c0_i32_1 = arith.constant 0 : i32
    return %arg0, %c0_i32, %c0_i32_0 : i32, i32, i32
  }
  func.func @transform_1(%arg0: i32) -> (i32, i32, i32) {
    %c0_i32 = arith.constant 0 : i32
    %c0_i32_0 = arith.constant 0 : i32
    %c0_i32_1 = arith.constant 0 : i32
    %c0_i32_2 = arith.constant 0 : i32
    return %c0_i32, %c0_i32_0, %c0_i32_1 : i32, i32, i32
  }
  func.func @transform_2(%arg0: i32) -> (i32, i32) {
    %c0_i32 = arith.constant 0 : i32
    %c0_i32_0 = arith.constant 0 : i32
    %c0_i32_1 = arith.constant 0 : i32
    return %c0_i32, %c0_i32_0 : i32, i32
  }
  func.func @transform_3(%arg0: i32) -> (i32, i32) {
    %c0_i32 = arith.constant 0 : i32
    %c0_i32_0 = arith.constant 0 : i32
    %c0_i32_1 = arith.constant 0 : i32
    return %c0_i32, %c0_i32_0 : i32, i32
  }
  func.func @transform_4(%arg0: i32) -> (i32, i32, i32) {
    %c0_i32 = arith.constant 0 : i32
    %c0_i32_0 = arith.constant 0 : i32
    %c0_i32_1 = arith.constant 0 : i32
    return %arg0, %c0_i32, %c0_i32_0 : i32, i32, i32
  }
  func.func @transform_5(%arg0: i32) -> (i32, i32, i32) {
    %c0_i32 = arith.constant 0 : i32
    %c0_i32_0 = arith.constant 0 : i32
    %c0_i32_1 = arith.constant 0 : i32
    return %arg0, %c0_i32, %c0_i32_0 : i32, i32, i32
  }
  func.func @transform_6(%arg0: i32) -> (i32, i32, i32) {
    %c0_i32 = arith.constant 0 : i32
    %c0_i32_0 = arith.constant 0 : i32
    %c0_i32_1 = arith.constant 0 : i32
    return %arg0, %c0_i32, %c0_i32_0 : i32, i32, i32
  }
}

module attributes {stable_mosaic.version = 11 : i64} {
  func.func @kernel(%arg0: i32, %arg1: memref<1x376x4xf32, #tpu.memory_space<vmem>>, %arg2: memref<1x4xf32, #tpu.memory_space<vmem>>, %arg3: memref<1x4xf32, #tpu.memory_space<vmem>>, %arg4: memref<328x1xf32, #tpu.memory_space<vmem>>, %arg5: memref<4x32xf32, #tpu.memory_space<vmem>>, %arg6: memref<1x32xf32, #tpu.memory_space<vmem>>, %arg7: memref<1x328x32xf32, #tpu.memory_space<vmem>>, %arg8: memref<1x1x32xf32, #tpu.memory_space<vmem>>, %arg9: memref<1x1x32xf32, #tpu.memory_space<vmem>>) attributes {dimension_semantics = [#tpu.dimension_semantics<parallel>], iteration_bounds = array<i64: 2>, scalar_prefetch = 0 : i64, scratch_operands = 0 : i64, tpu.core_type = #tpu.core_type<tc>, window_params = [{transform_indices = @transform_0, window_bounds = array<i64: 1, 376, 4>}, {pipeline_mode = #tpu.pipeline_mode<synchronous>, transform_indices = @transform_1, window_bounds = array<i64: 1, 4>}, {pipeline_mode = #tpu.pipeline_mode<synchronous>, transform_indices = @transform_2, window_bounds = array<i64: 1, 4>}, {pipeline_mode = #tpu.pipeline_mode<synchronous>, transform_indices = @transform_3, window_bounds = array<i64: 328, 1>}, {pipeline_mode = #tpu.pipeline_mode<synchronous>, transform_indices = @transform_4, window_bounds = array<i64: 4, 32>}, {pipeline_mode = #tpu.pipeline_mode<synchronous>, transform_indices = @transform_5, window_bounds = array<i64: 1, 32>}, {transform_indices = @transform_6, window_bounds = array<i64: 1, 328, 32>}, {transform_indices = @transform_7, window_bounds = array<i64: 1, 1, 32>}, {transform_indices = @transform_8, window_bounds = array<i64: 1, 1, 32>}]} {
    %c0 = arith.constant 0 : index
    %c24 = arith.constant 24 : index
    %c0_0 = arith.constant 0 : index
    %0 = vector.load %arg1[%c0, %c24, %c0_0] : memref<1x376x4xf32, #tpu.memory_space<vmem>>, vector<1x328x4xf32>
    %1 = vector.shape_cast %0 : vector<1x328x4xf32> to vector<328x4xf32>
    %c0_1 = arith.constant 0 : index
    %c0_2 = arith.constant 0 : index
    %2 = vector.load %arg2[%c0_1, %c0_2] : memref<1x4xf32, #tpu.memory_space<vmem>>, vector<1x4xf32>
    %3 = vector.broadcast %2 : vector<1x4xf32> to vector<328x4xf32>
    %4 = arith.mulf %1, %3 : vector<328x4xf32>
    %c0_3 = arith.constant 0 : index
    %c0_4 = arith.constant 0 : index
    %5 = vector.load %arg3[%c0_3, %c0_4] : memref<1x4xf32, #tpu.memory_space<vmem>>, vector<1x4xf32>
    %6 = vector.broadcast %5 : vector<1x4xf32> to vector<328x4xf32>
    %7 = arith.addf %4, %6 : vector<328x4xf32>
    %cst = arith.constant 0.000000e+00 : f32
    %8 = vector.broadcast %cst : f32 to vector<328x4xf32>
    %9 = arith.maximumf %7, %8 : vector<328x4xf32>
    %c0_5 = arith.constant 0 : index
    %c0_6 = arith.constant 0 : index
    %10 = vector.load %arg5[%c0_5, %c0_6] : memref<4x32xf32, #tpu.memory_space<vmem>>, vector<4x32xf32>
    %cst_7 = arith.constant dense<0.000000e+00> : vector<328x32xf32>
    %11 = tpu.matmul %9, %10, %cst_7 {dimension_numbers = #tpu.dot_dimension_numbers<[1], [0], [0], [1], [0, 0, 1, 1], [], []>} : vector<328x4xf32>, vector<4x32xf32>, vector<328x32xf32> -> vector<328x32xf32>
    %c0_8 = arith.constant 0 : index
    %c0_9 = arith.constant 0 : index
    %12 = vector.load %arg6[%c0_8, %c0_9] : memref<1x32xf32, #tpu.memory_space<vmem>>, vector<1x32xf32>
    %13 = vector.broadcast %12 : vector<1x32xf32> to vector<328x32xf32>
    %14 = arith.addf %11, %13 : vector<328x32xf32>
    %c0_10 = arith.constant 0 : index
    %c0_11 = arith.constant 0 : index
    %c0_12 = arith.constant 0 : index
    %15 = vector.load %arg7[%c0_10, %c0_11, %c0_12] : memref<1x328x32xf32, #tpu.memory_space<vmem>>, vector<1x328x32xf32>
    %16 = vector.shape_cast %15 : vector<1x328x32xf32> to vector<328x32xf32>
    %17 = vector.shape_cast %14 : vector<328x32xf32> to vector<1x328x32xf32>
    tpu.vector_store %arg7[%c0_10, %c0_11, %c0_12], %17 {strides = array<i32>} : memref<1x328x32xf32, #tpu.memory_space<vmem>>, vector<1x328x32xf32>,
    %c0_13 = arith.constant 0 : index
    %c0_14 = arith.constant 0 : index
    %18 = vector.load %arg4[%c0_13, %c0_14] : memref<328x1xf32, #tpu.memory_space<vmem>>, vector<328x1xf32>
    %19 = vector.broadcast %18 : vector<328x1xf32> to vector<328x32xf32>
    %20 = arith.mulf %14, %19 : vector<328x32xf32>
    %cst_15 = arith.constant dense<0.000000e+00> : vector<32xf32>
    %21 = vector.multi_reduction <add>, %20, %cst_15 [0] : vector<328x32xf32> to vector<32xf32>
    %22 = vector.shape_cast %21 : vector<32xf32> to vector<1x32xf32>
    %c0_16 = arith.constant 0 : index
    %c0_17 = arith.constant 0 : index
    %c0_18 = arith.constant 0 : index
    %23 = vector.load %arg8[%c0_16, %c0_17, %c0_18] : memref<1x1x32xf32, #tpu.memory_space<vmem>>, vector<1x1x32xf32>
    %24 = vector.shape_cast %23 : vector<1x1x32xf32> to vector<1x32xf32>
    %25 = vector.shape_cast %22 : vector<1x32xf32> to vector<1x1x32xf32>
    tpu.vector_store %arg8[%c0_16, %c0_17, %c0_18], %25 {strides = array<i32>} : memref<1x1x32xf32, #tpu.memory_space<vmem>>, vector<1x1x32xf32>,
    %26 = arith.mulf %14, %20 : vector<328x32xf32>
    %cst_19 = arith.constant dense<0.000000e+00> : vector<32xf32>
    %27 = vector.multi_reduction <add>, %26, %cst_19 [0] : vector<328x32xf32> to vector<32xf32>
    %28 = vector.shape_cast %27 : vector<32xf32> to vector<1x32xf32>
    %c0_20 = arith.constant 0 : index
    %c0_21 = arith.constant 0 : index
    %c0_22 = arith.constant 0 : index
    %29 = vector.load %arg9[%c0_20, %c0_21, %c0_22] : memref<1x1x32xf32, #tpu.memory_space<vmem>>, vector<1x1x32xf32>
    %30 = vector.shape_cast %29 : vector<1x1x32xf32> to vector<1x32xf32>
    %31 = vector.shape_cast %28 : vector<1x32xf32> to vector<1x1x32xf32>
    tpu.vector_store %arg9[%c0_20, %c0_21, %c0_22], %31 {strides = array<i32>} : memref<1x1x32xf32, #tpu.memory_space<vmem>>, vector<1x1x32xf32>,
    return
  }
  func.func @transform_0(%arg0: i32) -> (i32, i32, i32) {
    %c0_i32 = arith.constant 0 : i32
    %c0_i32_0 = arith.constant 0 : i32
    %c0_i32_1 = arith.constant 0 : i32
    return %arg0, %c0_i32, %c0_i32_0 : i32, i32, i32
  }
  func.func @transform_1(%arg0: i32) -> (i32, i32) {
    %c0_i32 = arith.constant 0 : i32
    %c0_i32_0 = arith.constant 0 : i32
    %c0_i32_1 = arith.constant 0 : i32
    return %c0_i32, %c0_i32_0 : i32, i32
  }
  func.func @transform_2(%arg0: i32) -> (i32, i32) {
    %c0_i32 = arith.constant 0 : i32
    %c0_i32_0 = arith.constant 0 : i32
    %c0_i32_1 = arith.constant 0 : i32
    return %c0_i32, %c0_i32_0 : i32, i32
  }
  func.func @transform_3(%arg0: i32) -> (i32, i32) {
    %c0_i32 = arith.constant 0 : i32
    %c0_i32_0 = arith.constant 0 : i32
    %c0_i32_1 = arith.constant 0 : i32
    return %c0_i32, %c0_i32_0 : i32, i32
  }
  func.func @transform_4(%arg0: i32) -> (i32, i32) {
    %c0_i32 = arith.constant 0 : i32
    %c0_i32_0 = arith.constant 0 : i32
    %c0_i32_1 = arith.constant 0 : i32
    return %c0_i32, %c0_i32_0 : i32, i32
  }
  func.func @transform_5(%arg0: i32) -> (i32, i32) {
    %c0_i32 = arith.constant 0 : i32
    %c0_i32_0 = arith.constant 0 : i32
    %c0_i32_1 = arith.constant 0 : i32
    return %c0_i32, %c0_i32_0 : i32, i32
  }
  func.func @transform_6(%arg0: i32) -> (i32, i32, i32) {
    %c0_i32 = arith.constant 0 : i32
    %c0_i32_0 = arith.constant 0 : i32
    %c0_i32_1 = arith.constant 0 : i32
    return %arg0, %c0_i32, %c0_i32_0 : i32, i32, i32
  }
  func.func @transform_7(%arg0: i32) -> (i32, i32, i32) {
    %c0_i32 = arith.constant 0 : i32
    %c0_i32_0 = arith.constant 0 : i32
    %c0_i32_1 = arith.constant 0 : i32
    return %arg0, %c0_i32, %c0_i32_0 : i32, i32, i32
  }
  func.func @transform_8(%arg0: i32) -> (i32, i32, i32) {
    %c0_i32 = arith.constant 0 : i32
    %c0_i32_0 = arith.constant 0 : i32
    %c0_i32_1 = arith.constant 0 : i32
    return %arg0, %c0_i32, %c0_i32_0 : i32, i32, i32
  }
}

module attributes {stable_mosaic.version = 11 : i64} {
  func.func @_affine_relu_kernel(%arg0: i32, %arg1: memref<1x328x32xf32, #tpu.memory_space<vmem>>, %arg2: memref<1x32xf32, #tpu.memory_space<vmem>>, %arg3: memref<1x32xf32, #tpu.memory_space<vmem>>, %arg4: memref<1x328x32xf32, #tpu.memory_space<vmem>>) attributes {dimension_semantics = [#tpu.dimension_semantics<parallel>], iteration_bounds = array<i64: 2>, scalar_prefetch = 0 : i64, scratch_operands = 0 : i64, tpu.core_type = #tpu.core_type<tc>, window_params = [{transform_indices = @transform_0, window_bounds = array<i64: 1, 328, 32>}, {pipeline_mode = #tpu.pipeline_mode<synchronous>, transform_indices = @transform_1, window_bounds = array<i64: 1, 32>}, {pipeline_mode = #tpu.pipeline_mode<synchronous>, transform_indices = @transform_2, window_bounds = array<i64: 1, 32>}, {transform_indices = @transform_3, window_bounds = array<i64: 1, 328, 32>}]} {
    %c0 = arith.constant 0 : index
    %c0_0 = arith.constant 0 : index
    %c0_1 = arith.constant 0 : index
    %0 = vector.load %arg1[%c0, %c0_0, %c0_1] : memref<1x328x32xf32, #tpu.memory_space<vmem>>, vector<1x328x32xf32>
    %1 = vector.shape_cast %0 : vector<1x328x32xf32> to vector<328x32xf32>
    %c0_2 = arith.constant 0 : index
    %c0_3 = arith.constant 0 : index
    %2 = vector.load %arg2[%c0_2, %c0_3] : memref<1x32xf32, #tpu.memory_space<vmem>>, vector<1x32xf32>
    %3 = vector.broadcast %2 : vector<1x32xf32> to vector<328x32xf32>
    %4 = arith.mulf %1, %3 : vector<328x32xf32>
    %c0_4 = arith.constant 0 : index
    %c0_5 = arith.constant 0 : index
    %5 = vector.load %arg3[%c0_4, %c0_5] : memref<1x32xf32, #tpu.memory_space<vmem>>, vector<1x32xf32>
    %6 = vector.broadcast %5 : vector<1x32xf32> to vector<328x32xf32>
    %7 = arith.addf %4, %6 : vector<328x32xf32>
    %cst = arith.constant 0.000000e+00 : f32
    %8 = vector.broadcast %cst : f32 to vector<328x32xf32>
    %9 = arith.maximumf %7, %8 : vector<328x32xf32>
    %c0_6 = arith.constant 0 : index
    %c0_7 = arith.constant 0 : index
    %c0_8 = arith.constant 0 : index
    %10 = vector.load %arg4[%c0_6, %c0_7, %c0_8] : memref<1x328x32xf32, #tpu.memory_space<vmem>>, vector<1x328x32xf32>
    %11 = vector.shape_cast %10 : vector<1x328x32xf32> to vector<328x32xf32>
    %12 = vector.shape_cast %9 : vector<328x32xf32> to vector<1x328x32xf32>
    tpu.vector_store %arg4[%c0_6, %c0_7, %c0_8], %12 {strides = array<i32>} : memref<1x328x32xf32, #tpu.memory_space<vmem>>, vector<1x328x32xf32>,
    return
  }
  func.func @transform_0(%arg0: i32) -> (i32, i32, i32) {
    %c0_i32 = arith.constant 0 : i32
    %c0_i32_0 = arith.constant 0 : i32
    %c0_i32_1 = arith.constant 0 : i32
    return %arg0, %c0_i32, %c0_i32_0 : i32, i32, i32
  }
  func.func @transform_1(%arg0: i32) -> (i32, i32) {
    %c0_i32 = arith.constant 0 : i32
    %c0_i32_0 = arith.constant 0 : i32
    %c0_i32_1 = arith.constant 0 : i32
    return %c0_i32, %c0_i32_0 : i32, i32
  }
  func.func @transform_2(%arg0: i32) -> (i32, i32) {
    %c0_i32 = arith.constant 0 : i32
    %c0_i32_0 = arith.constant 0 : i32
    %c0_i32_1 = arith.constant 0 : i32
    return %c0_i32, %c0_i32_0 : i32, i32
  }
  func.func @transform_3(%arg0: i32) -> (i32, i32, i32) {
    %c0_i32 = arith.constant 0 : i32
    %c0_i32_0 = arith.constant 0 : i32
    %c0_i32_1 = arith.constant 0 : i32
    return %arg0, %c0_i32, %c0_i32_0 : i32, i32, i32
  }
}

</mosaic_0001>

<bundles_post_ra>
// kernel: tile.19
= control target key start
LH: loop header
LB: loop body
LE: loop exit
PB: predicated region body
PF: predicated region fallthrough
CT: control target
= control target key end

     0   :  { %vm7_vm0 = vcmask 64512   ;;  %s37_s8 = smov 8   ;;  %s38_s9 = smov 16   ;;  %vm13_vm1 = vcmask 261312   ;;  %vm19_vm2 = vcmask 195712   ;;  %vm25_vm3 = vcmask 130112   ;;  %s55_s0 = inlined_call_operand.vmem [shape: f32[4,8], index: 0, kind: input, shape index: {}]   ;;  %s56_s1 = inlined_call_operand.vmem [shape: f32[1,32], index: 1, kind: output, shape index: {}]  }
   0x1   :  { %v4_v0 = vld [vmem:[%s55_s0] sm:$0xf]  ;;  %s36_s0 = smov 24  }
   0x2   :  { %5 = vst [vmem:[#allocation1] sm:$0xf] %v4_v0 }
   0x9   :  { %v10_v1 = vld [vmem:[#allocation1 + $0x3] sm:$0x1]   ;;  %v22_v2 = vld [vmem:[#allocation1 + $0x1] sm:$0x1]   ;;  %v6_v3 = vld [vmem:[#allocation1] sm:$0x1]  }
   0xa   :  { %11 = vrot.lane.b32.xlu0 %v10_v1, %s36_s0  ;;  %23 = vrot.lane.b32.xlu1 %v22_v2, %s37_s8  ;;  %v16_v4 = vld [vmem:[#allocation1 + $0x2] sm:$0x1]   ;;  %8 = vst.msk [vmem:[#allocation0] sm:$0x1] %vm7_vm0, %v6_v3  }
   0xe   :  { %17 = vrot.lane.b32.xlu0 %v16_v4, %s38_s9 }
  0x7c   :  { %v12_v5 = vpop.permute.xlu0 %11   ;;  %v24_v6 = vpop.permute.xlu1 %23  }
  0x7d   :  { %14 = vst.msk [vmem:[#allocation0] sm:$0x1] %vm13_vm1, %v12_v5  }
  0x80   :  { %v18_v7 = vpop.permute.xlu0 %17  }
  0x81   :  { %20 = vst.msk [vmem:[#allocation0] sm:$0x1] %vm19_vm2, %v18_v7  }
  0x82   :  { %26 = vst.msk [vmem:[#allocation0] sm:$0x1] %vm25_vm3, %v24_v6  }
  0x89   :  { %v30_v8 = vld [vmem:[#allocation0] sm:$0x1] }
  0x8a   :  { %32 = vst [vmem:[%s56_s1] sm:$0x1] %v30_v8 }

// kernel: tile.18
= control target key start
LH: loop header
LB: loop body
LE: loop exit
PB: predicated region body
PF: predicated region fallthrough
CT: control target
= control target key end

     0   :  { %2 = vsyncpa [#allocation1], 0  ;;  %s44_s6 = smov [#allocation0]   ;;  %s70_s0 = inlined_call_operand.hbm [shape: f32[8], index: 0, kind: input, shape index: {}]   ;;  %s71_s1 = inlined_call_operand.vmem [shape: f32[4,8], index: 1, kind: output, shape index: {}]  }
   0x1   :  { %s9_s7 = sshll.u32 %s44_s6, 4  ;;  %s20_s10 = scalar_lea.hbm %s70_s0, 16  ;;  %s10_s7 = int_to_ptr.vmem [resolvable:$true] %s9_s7 }
   0x2   :  { %p21_p0 = scmp.ne.s32.totalorder %s70_s0, %s20_s10  ;;  %p24_p1 = scmp.lt.u32.totalorder %s20_s10, %s70_s0 }
   0x4   :  { %p26_p2 = pnand %p24_p1, %p21_p0 }
   0x6   :  { %29 = shalt.err (!%p26_p2)
}
   0x7   :  { %s30_s15 = scalar_lea.vmem %s10_s7, 16  ;;  %s34_s16 = scalar_lea.vmem %s10_s7, 32 }
   0x8   :  { %p31_p3 = scmp.ne.s32.totalorder %s10_s7, %s30_s15  ;;  %p35_p4 = scmp.lt.s32.totalorder %s10_s7, %s10_s7 }
   0x9   :  { %p36_p5 = scmp.lt.s32.totalorder %s34_s16, %s30_s15 }
   0xb   :  { %p37_p6 = por %p36_p5, %p35_p4 }
   0xd   :  { %p38_p7 = pnand %p37_p6, %p31_p3 }
   0xf   :  { %41 = shalt.err (!%p38_p7)
}
  0x10   :  { %12 = dma.hbm_to_vmem [thread:$0]  %s70_s0, 16, %s10_s7, [#allocation1]  }
  0x11   :  { %42 = dma.done.wait [#allocation1], 16  }
  0x12   :  { %43 = vsyncadd [#allocation1], 4294967280  ;;  %v16_v0 = vld [vmem:[#allocation0] ss:$0 sm:$0xff] }
  0x13   :  { %17 = vst [vmem:[%s71_s1] sm:$0xf] %v16_v0 }
  0x14   :  { %18 = vsyncpa [#allocation1], 1 }

// kernel: tile.28
= control target key start
LH: loop header
LB: loop body
LE: loop exit
PB: predicated region body
PF: predicated region fallthrough
CT: control target
= control target key end

     0   :  { %s22_s0 = inlined_call_operand.vmem [shape: f32[8], index: 0, kind: input, shape index: {}]   ;;  %s23_s1 = inlined_call_operand.vmem [shape: f32[4,8], index: 1, kind: output, shape index: {}]  }
   0x1   :  { %v4_v0 = vld [vmem:[%s22_s0] ss:$0 sm:$0xff] }
   0x2   :  { %5 = vst [vmem:[%s23_s1] sm:$0xf] %v4_v0 }

// kernel: bridge_up.7
= control target key start
LH: loop header
LB: loop body
LE: loop exit
PB: predicated region body
PF: predicated region fallthrough
CT: control target
= control target key end

     0   :  { %s494_s12 = smov 0   ;;  %s730_s0 = inlined_call_operand.vmem [shape: f32[2,328,32], index: 0, kind: input, shape index: {}]   ;;  %s731_s1 = inlined_call_operand.vmem [shape: f32[1,32], index: 1, kind: input, shape index: {}]   ;;  %s732_s2 = inlined_call_operand.vmem [shape: f32[1,32], index: 2, kind: input, shape index: {}]   ;;  %s733_s3 = inlined_call_operand.vmem [shape: f32[2,328,32], index: 3, kind: output, shape index: {}]  }
   0x1 LB: > { %s446_s13 = sadd.s32 4294967295, %s472_s12   ;;  %p450_p0 = scmp.ge.s32.totalorder %s472_s12, 1  ;;  %s472_s12 = sphi %s494_s12, %s13_s12  }
   0x2   : > { %p137_p1 = scmp.lt.s32.totalorder %s472_s12, 3 }
   0x4   : > { %p138_p2 = pnand %p450_p0, %p137_p1 }
   0x5   : > { %p161_p3 = scmp.lt.s32.totalorder (!%p138_p2), %s446_s13, 1  ;;  %v505_v0 = vld [vmem:[%s731_s1] ss:$0 sm:$0xff] (!%p138_p2)  ;;  %vm349_vm0 = vcmask (!%p138_p2), 261120  }
   0x6   : > { %141 = sbr.rel (%p138_p2) target bundleno = 55 (0x37), region = 32  ;;  %v515_v1 = vld [vmem:[%s732_s2] ss:$0 sm:$0xff] (!%p138_p2) }
   0xd   : > { %s735_s13 = smov (!%p161_p3, %s446_s13), 1 }
   0xe   : > { %s457_s14 = smul.u32 328, %s735_s13 }
  0x10   : > { %s510_s19 = scalar_lea.vmem %s730_s0, %s457_s14  ;;  %s538_s24 = scalar_lea.vmem %s733_s3, %s457_s14 }
  0x11   : > { %v171_v2 = vld [vmem:[%s510_s19] sm:$0xff]  ;;  %v172_v3 = vld [vmem:[%s510_s19 + $0x8] sm:$0xff]  ;;  %v173_v4 = vld [vmem:[%s510_s19 + $0x10] sm:$0xff] }
  0x12   : > { %v219_v5 = vmul.f32 %v505_v0, %v171_v2  ;;  %v220_v6 = vmul.f32 %v505_v0, %v172_v3  ;;  %v221_v7 = vmul.f32 %v505_v0, %v173_v4  ;;  %v174_v8 = vld [vmem:[%s510_s19 + $0x18] sm:$0xff]  ;;  %v175_v9 = vld [vmem:[%s510_s19 + $0x20] sm:$0xff]  ;;  %v176_v10 = vld [vmem:[%s510_s19 + $0x28] sm:$0xff] }
  0x13   : > { %v222_v11 = vmul.f32 %v505_v0, %v174_v8  ;;  %v223_v12 = vmul.f32 %v505_v0, %v175_v9  ;;  %v224_v13 = vmul.f32 %v505_v0, %v176_v10  ;;  %v177_v14 = vld [vmem:[%s510_s19 + $0x30] sm:$0xff]  ;;  %v178_v15 = vld [vmem:[%s510_s19 + $0x38] sm:$0xff]  ;;  %v179_v24 = vld [vmem:[%s510_s19 + $0x40] sm:$0xff] }
  0x14   : > { %v267_v16 = vadd.f32 %v515_v1, %v219_v5  ;;  %v268_v17 = vadd.f32 %v515_v1, %v220_v6  ;;  %v269_v18 = vadd.f32 %v515_v1, %v221_v7  ;;  %v225_v19 = vmul.f32 %v505_v0, %v177_v14  ;;  %v180_v25 = vld [vmem:[%s510_s19 + $0x48] sm:$0xff]  ;;  %v181_v26 = vld [vmem:[%s510_s19 + $0x50] sm:$0xff]  ;;  %v182_v31 = vld [vmem:[%s510_s19 + $0x58] sm:$0xff] }
  0x15   : > { %v270_v20 = vadd.f32 %v515_v1, %v222_v11  ;;  %v271_v21 = vadd.f32 %v515_v1, %v223_v12  ;;  %v272_v22 = vadd.f32 %v515_v1, %v224_v13  ;;  %v226_v23 = vmul.f32 %v505_v0, %v178_v15  ;;  %v183_v32 = vld [vmem:[%s510_s19 + $0x60] sm:$0xff]  ;;  %v184_v33 = vld [vmem:[%s510_s19 + $0x68] sm:$0xff]  ;;  %v185_v38 = vld [vmem:[%s510_s19 + $0x70] sm:$0xff] }
  0x16   : > { %v308_v27 = vmax.f32 %v267_v16, 0.0  ;;  %v309_v28 = vmax.f32 %v268_v17, 0.0  ;;  %v310_v29 = vmax.f32 %v269_v18, 0.0  ;;  %v273_v30 = vadd.f32 %v515_v1, %v225_v19  ;;  %v186_v43 = vld [vmem:[%s510_s19 + $0x78] sm:$0xff]  ;;  %v187_v56 = vld [vmem:[%s510_s19 + $0x80] sm:$0xff]  ;;  %v188_v57 = vld [vmem:[%s510_s19 + $0x88] sm:$0xff] }
  0x17   : > { %v311_v34 = vmax.f32 %v270_v20, 0.0  ;;  %v312_v35 = vmax.f32 %v271_v21, 0.0  ;;  %v313_v36 = vmax.f32 %v272_v22, 0.0  ;;  %v274_v37 = vadd.f32 %v515_v1, %v226_v23  ;;  %v189_v58 = vld [vmem:[%s510_s19 + $0x90] sm:$0xff]  ;;  %v190_v63 = vld [vmem:[%s510_s19 + $0x98] sm:$0xff]  ;;  %v191_v2 = vld [vmem:[%s510_s19 + $0xa0] sm:$0xff] }
  0x18   : > { %350 = vst.msk [vmem:[%s538_s24] sm:$0xff] %vm349_vm0, %v308_v27  ;;  %351 = vst.msk [vmem:[%s538_s24 + $0x8] sm:$0xff] %vm349_vm0, %v309_v28  ;;  %v314_v39 = vmax.f32 %v273_v30, 0.0  ;;  %v227_v40 = vmul.f32 %v505_v0, %v179_v24  ;;  %v228_v41 = vmul.f32 %v505_v0, %v180_v25  ;;  %v229_v42 = vmul.f32 %v505_v0, %v181_v26  ;;  %v192_v3 = vld [vmem:[%s510_s19 + $0xa8] sm:$0xff]  ;;  %v193_v8 = vld [vmem:[%s510_s19 + $0xb0] sm:$0xff] }
  0x19   : > { %352 = vst.msk [vmem:[%s538_s24 + $0x10] sm:$0xff] %vm349_vm0, %v310_v29  ;;  %353 = vst.msk [vmem:[%s538_s24 + $0x18] sm:$0xff] %vm349_vm0, %v311_v34  ;;  %v315_v44 = vmax.f32 %v274_v37, 0.0  ;;  %v230_v45 = vmul.f32 %v505_v0, %v182_v31  ;;  %v231_v46 = vmul.f32 %v505_v0, %v183_v32  ;;  %v232_v47 = vmul.f32 %v505_v0, %v184_v33  ;;  %v194_v13 = vld [vmem:[%s510_s19 + $0xb8] sm:$0xff]  ;;  %v195_v26 = vld [vmem:[%s510_s19 + $0xc0] sm:$0xff] }
  0x1a   : > { %354 = vst.msk [vmem:[%s538_s24 + $0x20] sm:$0xff] %vm349_vm0, %v312_v35  ;;  %355 = vst.msk [vmem:[%s538_s24 + $0x28] sm:$0xff] %vm349_vm0, %v313_v36  ;;  %v275_v48 = vadd.f32 %v515_v1, %v227_v40  ;;  %v276_v49 = vadd.f32 %v515_v1, %v228_v41  ;;  %v277_v50 = vadd.f32 %v515_v1, %v229_v42  ;;  %v196_v27 = vld [vmem:[%s510_s19 + $0xc8] sm:$0xff]  ;;  %v197_v28 = vld [vmem:[%s510_s19 + $0xd0] sm:$0xff] }
  0x1b   : > { %356 = vst.msk [vmem:[%s538_s24 + $0x30] sm:$0xff] %vm349_vm0, %v314_v39  ;;  %v233_v51 = vmul.f32 %v505_v0, %v185_v38  ;;  %357 = vst.msk [vmem:[%s538_s24 + $0x38] sm:$0xff] %vm349_vm0, %v315_v44  ;;  %v278_v52 = vadd.f32 %v515_v1, %v230_v45  ;;  %v279_v53 = vadd.f32 %v515_v1, %v231_v46  ;;  %v198_v33 = vld [vmem:[%s510_s19 + $0xd8] sm:$0xff]  ;;  %v199_v34 = vld [vmem:[%s510_s19 + $0xe0] sm:$0xff] }
  0x1c   : > { %v280_v54 = vadd.f32 %v515_v1, %v232_v47  ;;  %v234_v55 = vmul.f32 %v505_v0, %v186_v43  ;;  %v316_v59 = vmax.f32 %v275_v48, 0.0  ;;  %v317_v60 = vmax.f32 %v276_v49, 0.0  ;;  %v200_v35 = vld [vmem:[%s510_s19 + $0xe8] sm:$0xff]  ;;  %v201_v40 = vld [vmem:[%s510_s19 + $0xf0] sm:$0xff]  ;;  %v202_v45 = vld [vmem:[%s510_s19 + $0xf8] sm:$0xff] }
  0x1d   : > { %v318_v61 = vmax.f32 %v277_v50, 0.0  ;;  %v281_v62 = vadd.f32 %v515_v1, %v233_v51  ;;  %v319_v4 = vmax.f32 %v278_v52, 0.0  ;;  %v320_v5 = vmax.f32 %v279_v53, 0.0 }
  0x1e   : > { %v321_v6 = vmax.f32 %v280_v54, 0.0  ;;  %v282_v7 = vadd.f32 %v515_v1, %v234_v55  ;;  %358 = vst.msk [vmem:[%s538_s24 + $0x40] sm:$0xff] %vm349_vm0, %v316_v59  ;;  %359 = vst.msk [vmem:[%s538_s24 + $0x48] sm:$0xff] %vm349_vm0, %v317_v60  ;;  %v235_v10 = vmul.f32 %v505_v0, %v187_v56  ;;  %v236_v11 = vmul.f32 %v505_v0, %v188_v57  ;;  %v204_v59 = vld [vmem:[%s510_s19 + $0x108] sm:$0xff]  ;;  %v205_v60 = vld [vmem:[%s510_s19 + $0x110] sm:$0xff] }
  0x1f   : > { %360 = vst.msk [vmem:[%s538_s24 + $0x50] sm:$0xff] %vm349_vm0, %v318_v61  ;;  %v322_v9 = vmax.f32 %v281_v62, 0.0  ;;  %v237_v12 = vmul.f32 %v505_v0, %v189_v58  ;;  %361 = vst.msk [vmem:[%s538_s24 + $0x58] sm:$0xff] %vm349_vm0, %v319_v4  ;;  %v238_v15 = vmul.f32 %v505_v0, %v190_v63  ;;  %v239_v16 = vmul.f32 %v505_v0, %v191_v2  ;;  %v203_v58 = vld [vmem:[%s510_s19 + $0x100] sm:$0xff] }
  0x20   : > { %362 = vst.msk [vmem:[%s538_s24 + $0x60] sm:$0xff] %vm349_vm0, %v320_v5  ;;  %363 = vst.msk [vmem:[%s538_s24 + $0x68] sm:$0xff] %vm349_vm0, %v321_v6  ;;  %v323_v14 = vmax.f32 %v282_v7, 0.0  ;;  %v240_v17 = vmul.f32 %v505_v0, %v192_v3  ;;  %v283_v18 = vadd.f32 %v515_v1, %v235_v10  ;;  %v284_v19 = vadd.f32 %v515_v1, %v236_v11  ;;  %v206_v3 = vld [vmem:[%s510_s19 + $0x118] sm:$0xff]  ;;  %v207_v4 = vld [vmem:[%s510_s19 + $0x120] sm:$0xff] }
  0x21   : > { %364 = vst.msk [vmem:[%s538_s24 + $0x70] sm:$0xff] %vm349_vm0, %v322_v9  ;;  %v285_v20 = vadd.f32 %v515_v1, %v237_v12  ;;  %v241_v21 = vmul.f32 %v505_v0, %v193_v8  ;;  %v286_v22 = vadd.f32 %v515_v1, %v238_v15  ;;  %v287_v23 = vadd.f32 %v515_v1, %v239_v16  ;;  %v208_v5 = vld [vmem:[%s510_s19 + $0x128] sm:$0xff]  ;;  %v209_v10 = vld [vmem:[%s510_s19 + $0x130] sm:$0xff]  ;;  %v210_v15 = vld [vmem:[%s510_s19 + $0x138] sm:$0xff] }
  0x22   : > { %365 = vst.msk [vmem:[%s538_s24 + $0x78] sm:$0xff] %vm349_vm0, %v323_v14  ;;  %v288_v24 = vadd.f32 %v515_v1, %v240_v17  ;;  %v242_v25 = vmul.f32 %v505_v0, %v194_v13  ;;  %v324_v29 = vmax.f32 %v283_v18, 0.0  ;;  %v325_v30 = vmax.f32 %v284_v19, 0.0 }
  0x23   : > { %v326_v31 = vmax.f32 %v285_v20, 0.0  ;;  %v289_v32 = vadd.f32 %v515_v1, %v241_v21  ;;  %v327_v36 = vmax.f32 %v286_v22, 0.0  ;;  %v328_v37 = vmax.f32 %v287_v23, 0.0 }
  0x24   : > { %v329_v38 = vmax.f32 %v288_v24, 0.0  ;;  %v290_v39 = vadd.f32 %v515_v1, %v242_v25  ;;  %366 = vst.msk [vmem:[%s538_s24 + $0x80] sm:$0xff] %vm349_vm0, %v324_v29  ;;  %367 = vst.msk [vmem:[%s538_s24 + $0x88] sm:$0xff] %vm349_vm0, %v325_v30  ;;  %v243_v42 = vmul.f32 %v505_v0, %v195_v26  ;;  %v244_v43 = vmul.f32 %v505_v0, %v196_v27 }
  0x25   : > { %368 = vst.msk [vmem:[%s538_s24 + $0x90] sm:$0xff] %vm349_vm0, %v326_v31  ;;  %v330_v41 = vmax.f32 %v289_v32, 0.0  ;;  %v245_v44 = vmul.f32 %v505_v0, %v197_v28  ;;  %369 = vst.msk [vmem:[%s538_s24 + $0x98] sm:$0xff] %vm349_vm0, %v327_v36  ;;  %v246_v47 = vmul.f32 %v505_v0, %v198_v33  ;;  %v247_v48 = vmul.f32 %v505_v0, %v199_v34  ;;  %v211_v28 = vld [vmem:[%s510_s19 + $0x140] sm:$0xff] }
  0x26   : > { %370 = vst.msk [vmem:[%s538_s24 + $0xa0] sm:$0xff] %vm349_vm0, %v328_v37  ;;  %371 = vst.msk [vmem:[%s538_s24 + $0xa8] sm:$0xff] %vm349_vm0, %v329_v38  ;;  %v331_v46 = vmax.f32 %v290_v39, 0.0  ;;  %v248_v49 = vmul.f32 %v505_v0, %v200_v35  ;;  %v291_v50 = vadd.f32 %v515_v1, %v243_v42  ;;  %v292_v51 = vadd.f32 %v515_v1, %v244_v43 }
  0x27   : > { %372 = vst.msk [vmem:[%s538_s24 + $0xb0] sm:$0xff] %vm349_vm0, %v330_v41  ;;  %v293_v52 = vadd.f32 %v515_v1, %v245_v44  ;;  %v249_v53 = vmul.f32 %v505_v0, %v201_v40  ;;  %v294_v54 = vadd.f32 %v515_v1, %v246_v47  ;;  %v295_v55 = vadd.f32 %v515_v1, %v247_v48 }
  0x28   : > { %373 = vst.msk [vmem:[%s538_s24 + $0xb8] sm:$0xff] %vm349_vm0, %v331_v46  ;;  %v296_v56 = vadd.f32 %v515_v1, %v248_v49  ;;  %v250_v57 = vmul.f32 %v505_v0, %v202_v45  ;;  %v332_v61 = vmax.f32 %v291_v50, 0.0  ;;  %v333_v62 = vmax.f32 %v292_v51, 0.0 }
  0x29   : > { %v334_v63 = vmax.f32 %v293_v52, 0.0  ;;  %v297_v2 = vadd.f32 %v515_v1, %v249_v53  ;;  %v335_v6 = vmax.f32 %v294_v54, 0.0  ;;  %v336_v7 = vmax.f32 %v295_v55, 0.0 }
  0x2a   : > { %v337_v8 = vmax.f32 %v296_v56, 0.0  ;;  %v298_v9 = vadd.f32 %v515_v1, %v250_v57  ;;  %374 = vst.msk [vmem:[%s538_s24 + $0xc0] sm:$0xff] %vm349_vm0, %v332_v61  ;;  %375 = vst.msk [vmem:[%s538_s24 + $0xc8] sm:$0xff] %vm349_vm0, %v333_v62  ;;  %v251_v12 = vmul.f32 %v505_v0, %v203_v58  ;;  %v252_v13 = vmul.f32 %v505_v0, %v204_v59 }
  0x2b   : > { %376 = vst.msk [vmem:[%s538_s24 + $0xd0] sm:$0xff] %vm349_vm0, %v334_v63  ;;  %v338_v11 = vmax.f32 %v297_v2, 0.0  ;;  %v253_v14 = vmul.f32 %v505_v0, %v205_v60  ;;  %377 = vst.msk [vmem:[%s538_s24 + $0xd8] sm:$0xff] %vm349_vm0, %v335_v6  ;;  %v254_v17 = vmul.f32 %v505_v0, %v206_v3  ;;  %v255_v18 = vmul.f32 %v505_v0, %v207_v4 }
  0x2c   : > { %378 = vst.msk [vmem:[%s538_s24 + $0xe0] sm:$0xff] %vm349_vm0, %v336_v7  ;;  %379 = vst.msk [vmem:[%s538_s24 + $0xe8] sm:$0xff] %vm349_vm0, %v337_v8  ;;  %v339_v16 = vmax.f32 %v298_v9, 0.0  ;;  %v256_v19 = vmul.f32 %v505_v0, %v208_v5  ;;  %v299_v20 = vadd.f32 %v515_v1, %v251_v12  ;;  %v300_v21 = vadd.f32 %v515_v1, %v252_v13 }
  0x2d   : > { %380 = vst.msk [vmem:[%s538_s24 + $0xf0] sm:$0xff] %vm349_vm0, %v338_v11  ;;  %v301_v22 = vadd.f32 %v515_v1, %v253_v14  ;;  %v257_v23 = vmul.f32 %v505_v0, %v209_v10  ;;  %v302_v24 = vadd.f32 %v515_v1, %v254_v17  ;;  %v303_v25 = vadd.f32 %v515_v1, %v255_v18 }
  0x2e   : > { %381 = vst.msk [vmem:[%s538_s24 + $0xf8] sm:$0xff] %vm349_vm0, %v339_v16  ;;  %v304_v26 = vadd.f32 %v515_v1, %v256_v19  ;;  %v258_v27 = vmul.f32 %v505_v0, %v210_v15  ;;  %v340_v29 = vmax.f32 %v299_v20, 0.0  ;;  %v341_v30 = vmax.f32 %v300_v21, 0.0 }
  0x2f   : > { %v342_v31 = vmax.f32 %v301_v22, 0.0  ;;  %v305_v32 = vadd.f32 %v515_v1, %v257_v23  ;;  %v343_v33 = vmax.f32 %v302_v24, 0.0  ;;  %v344_v34 = vmax.f32 %v303_v25, 0.0 }
  0x30   : > { %v345_v35 = vmax.f32 %v304_v26, 0.0  ;;  %v306_v36 = vadd.f32 %v515_v1, %v258_v27  ;;  %382 = vst.msk [vmem:[%s538_s24 + $0x100] sm:$0xff] %vm349_vm0, %v340_v29  ;;  %383 = vst.msk [vmem:[%s538_s24 + $0x108] sm:$0xff] %vm349_vm0, %v341_v30  ;;  %v259_v38 = vmul.f32 %v505_v0, %v211_v28 }
  0x31   : > { %384 = vst.msk [vmem:[%s538_s24 + $0x110] sm:$0xff] %vm349_vm0, %v342_v31  ;;  %v346_v37 = vmax.f32 %v305_v32, 0.0  ;;  %385 = vst.msk [vmem:[%s538_s24 + $0x118] sm:$0xff] %vm349_vm0, %v343_v33 }
  0x32   : > { %386 = vst.msk [vmem:[%s538_s24 + $0x120] sm:$0xff] %vm349_vm0, %v344_v34  ;;  %387 = vst.msk [vmem:[%s538_s24 + $0x128] sm:$0xff] %vm349_vm0, %v345_v35  ;;  %v347_v39 = vmax.f32 %v306_v36, 0.0  ;;  %v307_v40 = vadd.f32 %v515_v1, %v259_v38 }
  0x33   : > { %388 = vst.msk [vmem:[%s538_s24 + $0x130] sm:$0xff] %vm349_vm0, %v346_v37 }
  0x34   : > { %389 = vst.msk [vmem:[%s538_s24 + $0x138] sm:$0xff] %vm349_vm0, %v347_v39  ;;  %v348_v41 = vmax.f32 %v307_v40, 0.0 }
  0x36   : > { %390 = vst.msk [vmem:[%s538_s24 + $0x140] sm:$0xff] %vm349_vm0, %v348_v41 }
  0x37 PF: > { %s13_s12 = sadd.s32 1, %s472_s12  }
  0x38   : > { %p10_p4 = scmp.ge.s32.totalorder %s13_s12, 4  }
  0x3a   :  { %12 = sbr.rel (!%p10_p4) target bundleno = 1 (0x1), region = 62 }

// kernel: bridge_up.6
= control target key start
LH: loop header
LB: loop body
LE: loop exit
PB: predicated region body
PF: predicated region fallthrough
CT: control target
= control target key end

     0   :  { %s1853_s27 = smov 0   ;;  %s2684_s0 = inlined_call_operand.vmem [shape: f32[2,376,4], index: 0, kind: input, shape index: {}]   ;;  %s2685_s1 = inlined_call_operand.vmem [shape: f32[1,4], index: 1, kind: input, shape index: {}]   ;;  %s2686_s2 = inlined_call_operand.vmem [shape: f32[1,4], index: 2, kind: input, shape index: {}]   ;;  %s2687_s3 = inlined_call_operand.vmem [shape: f32[328,1], index: 3, kind: input, shape index: {}]   ;;  %s2688_s4 = inlined_call_operand.vmem [shape: f32[4,32], index: 4, kind: input, shape index: {}]   ;;  %s2689_s5 = inlined_call_operand.vmem [shape: f32[1,32], index: 5, kind: input, shape index: {}]   ;;  %s2690_s6 = inlined_call_operand.vmem [shape: f32[2,328,32], index: 6, kind: output, shape index: {0}]   ;;  %s2691_s7 = inlined_call_operand.vmem [shape: f32[2,1,32], index: 7, kind: output, shape index: {1}]   ;;  %s2692_s8 = inlined_call_operand.vmem [shape: f32[2,1,32], index: 8, kind: output, shape index: {2}]  }
   0x1 LB: > { %s1559_s28 = sadd.s32 4294967295, %s1803_s27   ;;  %p1563_p0 = scmp.ge.s32.totalorder %s1803_s27, 1  ;;  %s1803_s27 = sphi %s1853_s27, %s19_s27  }
   0x2   : > { %p267_p1 = scmp.lt.s32.totalorder %s1803_s27, 3 }
   0x4   : > { %p268_p2 = pnand %p1563_p0, %p267_p1 }
   0x5   : > { %v501_v0 = vld [vmem:[%s2688_s4] sm:$0xf] (!%p268_p2)  ;;  %vm633_vm0 = vcmask (!%p268_p2), 1043456   ;;  %p307_p3 = scmp.lt.s32.totalorder (!%p268_p2), %s1559_s28, 1  ;;  %v1805_v1 = vmov (!%p268_p2), 0.0   ;;  %v951_v3 = vld [vmem:[%s2687_s3 + $0x10] sm:$0xff] (!%p268_p2) }
   0x6   : > { %271 = sbr.rel (%p268_p2) target bundleno = 378 (0x17a), region = 44  ;;  %1655 = vmatprep.subr.mxu0 (!%p268_p2), %v1805_v1  ;;  %1780 = vmatprep.subr.mxu1 (!%p268_p2), %v1805_v1  ;;  %v949_v2 = vld [vmem:[%s2687_s3] sm:$0xff] (!%p268_p2)  ;;  %vm1806_vm1 = vmmov (!%p268_p2), 0   ;;  %v1807_v4 = vmov (!%p268_p2), 0   ;;  %v950_v7 = vld [vmem:[%s2687_s3 + $0x8] sm:$0xff] (!%p268_p2)  ;;  %v952_v8 = vld [vmem:[%s2687_s3 + $0x18] sm:$0xff] (!%p268_p2) }
   0x7   : > { %1656 = vmatpush3.msk.msra.mxu0 (!%p268_p2), %vm633_vm0, %v501_v0  ;;  %1781 = vmatpush3.msk.msra.mxu1 (!%p268_p2), %vm633_vm0, %v501_v0  ;;  %v1882_v5 = vld [vmem:[%s2685_s1] ss:$0 sm:$0xff] (!%p268_p2)  ;;  %v954_v26 = vld [vmem:[%s2687_s3 + $0x28] sm:$0xff] (!%p268_p2)  ;;  %vm509_vm2 = vcmask (!%p268_p2), 31744   ;;  %v955_v37 = vld [vmem:[%s2687_s3 + $0x30] sm:$0xff] (!%p268_p2)  ;;  %vm907_vm3 = vcmask (!%p268_p2), 261120  }
   0x8   : > { %1657 = vmatprep.mubr.msk.f32.mxu0 (!%p268_p2), %vm1806_vm1, %v1805_v1  ;;  %1720 = vmatprep.mubr.msk.f32.mxu1 (!%p268_p2), %vm1806_vm1, %v1805_v1  ;;  %v1892_v6 = vld [vmem:[%s2686_s2] ss:$0 sm:$0xff] (!%p268_p2)  ;;  %v956_v42 = vld [vmem:[%s2687_s3 + $0x38] sm:$0xff] (!%p268_p2)  ;;  %v958_v53 = vld [vmem:[%s2687_s3 + $0x48] sm:$0xff] (!%p268_p2)  ;;  %vm1323_vm4 = vcmask (!%p268_p2), 253952  }
   0x9   : > { %1795 = vset.pattern.permute.xlu0 (!%p268_p2), %v1807_v4  ;;  %1796 = vset.pattern.permute.xlu1 (!%p268_p2), %v1807_v4  ;;  %v953_v25 = vld [vmem:[%s2687_s3 + $0x20] sm:$0xff] (!%p268_p2)  ;;  %v959_v59 = vld [vmem:[%s2687_s3 + $0x50] sm:$0xff] (!%p268_p2)  ;;  %v960_v0 = vld [vmem:[%s2687_s3 + $0x58] sm:$0xff] (!%p268_p2) }
   0xa   : > { %992 = vperm.xlu0 (!%p268_p2), %1795, %v949_v2   ;;  %1002 = vperm.xlu1 (!%p268_p2), %1796, %v951_v3   ;;  %v957_v48 = vld [vmem:[%s2687_s3 + $0x40] sm:$0xff] (!%p268_p2) }
   0xd   : > { %s2694_s28 = smov (!%p307_p3, %s1559_s28), 1 }
   0xe   : > { %s1782_s13 = smul.u32 376, %s2694_s28  ;;  %997 = vperm.xlu0 %1795, %v950_v7   ;;  %1007 = vperm.xlu1 %1796, %v952_v8   ;;  %v961_v8 = vld [vmem:[%s2687_s3 + $0x60] sm:$0xff]  ;;  %s319_s9 = scalar_lea.vmem %s2691_s7, %s2694_s28 }
   0xf   : > { %s1783_s21 = smul.u32 328, %s2694_s28  ;;  %s322_s12 = scalar_lea.vmem %s2692_s8, %s2694_s28 }
  0x10   : > { %s1887_s18 = scalar_lea.vmem %s2684_s0, %s1782_s13 }
  0x11   : > { %v323_v9 = vld [vmem:[%s1887_s18 + $0x18] sm:$0xff]  ;;  %v344_v10 = vld [vmem:[%s1887_s18 + $0xc0] sm:$0xff]  ;;  %v345_v15 = vld [vmem:[%s1887_s18 + $0xc8] sm:$0xff]  ;;  %s2311_s26 = scalar_lea.vmem %s2690_s6, %s1783_s21 }
  0x12   : > { %v324_v11 = vld [vmem:[%s1887_s18 + $0x20] sm:$0xff]  ;;  %v371_v12 = vmul.f32 %v1882_v5, %v323_v9  ;;  %v392_v13 = vmul.f32 %v1882_v5, %v344_v10  ;;  %v325_v16 = vld [vmem:[%s1887_s18 + $0x28] sm:$0xff]  ;;  %v346_v17 = vld [vmem:[%s1887_s18 + $0xd0] sm:$0xff]  ;;  %v393_v18 = vmul.f32 %v1882_v5, %v345_v15  ;;  %1012 = vperm.xlu0 %1795, %v953_v25   ;;  %1017 = vperm.xlu1 %1796, %v954_v26  }
  0x13   : > { %v372_v14 = vmul.f32 %v1882_v5, %v324_v11  ;;  %v373_v19 = vmul.f32 %v1882_v5, %v325_v16  ;;  %v394_v23 = vmul.f32 %v1882_v5, %v346_v17  ;;  %v326_v24 = vld [vmem:[%s1887_s18 + $0x30] sm:$0xff]  ;;  %v347_v28 = vld [vmem:[%s1887_s18 + $0xd8] sm:$0xff]  ;;  %v348_v39 = vld [vmem:[%s1887_s18 + $0xe0] sm:$0xff] }
  0x14   : > { %v419_v20 = vadd.f32 %v1892_v6, %v371_v12  ;;  %v440_v21 = vadd.f32 %v1892_v6, %v392_v13  ;;  %v441_v27 = vadd.f32 %v1892_v6, %v393_v18  ;;  %v374_v32 = vmul.f32 %v1882_v5, %v326_v24  ;;  %v327_v38 = vld [vmem:[%s1887_s18 + $0x38] sm:$0xff]  ;;  %v328_v47 = vld [vmem:[%s1887_s18 + $0x40] sm:$0xff]  ;;  %v349_v49 = vld [vmem:[%s1887_s18 + $0xe8] sm:$0xff] }
  0x15   : > { %v420_v22 = vadd.f32 %v1892_v6, %v372_v14  ;;  %v421_v31 = vadd.f32 %v1892_v6, %v373_v19  ;;  %v442_v35 = vadd.f32 %v1892_v6, %v394_v23  ;;  %v395_v36 = vmul.f32 %v1882_v5, %v347_v28  ;;  %v329_v52 = vld [vmem:[%s1887_s18 + $0x48] sm:$0xff]  ;;  %v350_v58 = vld [vmem:[%s1887_s18 + $0xf0] sm:$0xff]  ;;  %v351_v63 = vld [vmem:[%s1887_s18 + $0xf8] sm:$0xff] }
  0x16   : > { %v460_v29 = vmax.f32 %v419_v20, 0.0  ;;  %v481_v30 = vmax.f32 %v440_v21, 0.0  ;;  %v482_v34 = vmax.f32 %v441_v27, 0.0  ;;  %v422_v41 = vadd.f32 %v1892_v6, %v374_v32  ;;  %1022 = vperm.xlu0 %1795, %v955_v37   ;;  %1027 = vperm.xlu1 %1796, %v956_v42   ;;  %v330_v61 = vld [vmem:[%s1887_s18 + $0x50] sm:$0xff]  ;;  %v962_v13 = vld [vmem:[%s2687_s3 + $0x68] sm:$0xff]  ;;  %v331_v14 = vld [vmem:[%s1887_s18 + $0x58] sm:$0xff] }
  0x17   : > { %v461_v33 = vmax.f32 %v420_v22, 0.0  ;;  %v462_v40 = vmax.f32 %v421_v31, 0.0  ;;  %v483_v43 = vmax.f32 %v442_v35, 0.0  ;;  %v443_v44 = vadd.f32 %v1892_v6, %v395_v36  ;;  %v963_v12 = vld [vmem:[%s2687_s3 + $0x70] sm:$0xff]  ;;  %v339_v15 = vld [vmem:[%s1887_s18 + $0x98] sm:$0xff]  ;;  %v360_v16 = vld [vmem:[%s1887_s18 + $0x140] sm:$0xff] }
  0x18   : > { %1658 = vmatmul.mubr.msk.f32.vlgmr.msra.gmra.mrb[0].mxu0 %vm509_vm2, %v460_v29  ;;  %1721 = vmatmul.mubr.msk.f32.vlgmr.msra.gmra.mrb[0].mxu1 %vm509_vm2, %v481_v30  ;;  %v375_v45 = vmul.f32 %v1882_v5, %v327_v38  ;;  %v396_v46 = vmul.f32 %v1882_v5, %v348_v39  ;;  %v463_v50 = vmax.f32 %v422_v41, 0.0  ;;  %v376_v51 = vmul.f32 %v1882_v5, %v328_v47  ;;  %v352_v20 = vld [vmem:[%s1887_s18 + $0x100] sm:$0xff]  ;;  %v361_v22 = vld [vmem:[%s1887_s18 + $0x148] sm:$0xff]  ;;  %v362_v29 = vld [vmem:[%s1887_s18 + $0x150] sm:$0xff] }
  0x19   : > { %1660 = vmatprep.mubr.msk.f32.mxu0 %vm1806_vm1, %v1805_v1  ;;  %1723 = vmatprep.mubr.msk.f32.mxu1 %vm1806_vm1, %v1805_v1  ;;  %v484_v54 = vmax.f32 %v443_v44, 0.0  ;;  %v397_v57 = vmul.f32 %v1882_v5, %v349_v49  ;;  %v377_v60 = vmul.f32 %v1882_v5, %v329_v52  ;;  %v398_v62 = vmul.f32 %v1882_v5, %v350_v58  ;;  %v340_v21 = vld [vmem:[%s1887_s18 + $0xa0] sm:$0xff]  ;;  %v341_v24 = vld [vmem:[%s1887_s18 + $0xa8] sm:$0xff]  ;;  %v342_v35 = vld [vmem:[%s1887_s18 + $0xb0] sm:$0xff] }
  0x1a   : > { %1032 = vperm.xlu0 %1795, %v957_v48   ;;  %v423_v55 = vadd.f32 %v1892_v6, %v375_v45  ;;  %v444_v56 = vadd.f32 %v1892_v6, %v396_v46  ;;  %1037 = vperm.xlu1 %1796, %v958_v53   ;;  %v424_v4 = vadd.f32 %v1892_v6, %v376_v51  ;;  %v332_v32 = vld [vmem:[%s1887_s18 + $0x60] sm:$0xff]  ;;  %v964_v36 = vld [vmem:[%s2687_s3 + $0x78] sm:$0xff]  ;;  %v353_v38 = vld [vmem:[%s1887_s18 + $0x108] sm:$0xff] }
  0x1b   : > { %v445_v7 = vadd.f32 %v1892_v6, %v397_v57  ;;  %v378_v9 = vmul.f32 %v1882_v5, %v330_v61  ;;  %v425_v10 = vadd.f32 %v1892_v6, %v377_v60  ;;  %v399_v11 = vmul.f32 %v1882_v5, %v351_v63  ;;  %v965_v42 = vld [vmem:[%s2687_s3 + $0x80] sm:$0xff]  ;;  %v343_v47 = vld [vmem:[%s1887_s18 + $0xb8] sm:$0xff]  ;;  %v354_v60 = vld [vmem:[%s1887_s18 + $0x110] sm:$0xff] }
  0x1c   : > { %1661 = vmatmul.mubr.msk.f32.gmra.mrb[2].mxu0 %vm509_vm2, %v461_v33  ;;  %1724 = vmatmul.mubr.msk.f32.gmra.mrb[2].mxu1 %vm509_vm2, %v482_v34  ;;  %v464_v2 = vmax.f32 %v423_v55, 0.0  ;;  %v485_v3 = vmax.f32 %v444_v56, 0.0  ;;  %v465_v17 = vmax.f32 %v424_v4, 0.0  ;;  %v446_v19 = vadd.f32 %v1892_v6, %v398_v62  ;;  %v966_v56 = vld [vmem:[%s2687_s3 + $0x88] sm:$0xff]  ;;  %v967_v62 = vld [vmem:[%s2687_s3 + $0x90] sm:$0xff] }
  0x1d   : > { %1663 = vmatprep.mubr.msk.f32.mxu0 %vm1806_vm1, %v1805_v1  ;;  %1726 = vmatprep.mubr.msk.f32.mxu1 %vm1806_vm1, %v1805_v1  ;;  %v486_v18 = vmax.f32 %v445_v7, 0.0  ;;  %v426_v23 = vadd.f32 %v1892_v6, %v378_v9  ;;  %v466_v25 = vmax.f32 %v425_v10, 0.0  ;;  %v447_v26 = vadd.f32 %v1892_v6, %v399_v11  ;;  %v968_v7 = vld [vmem:[%s2687_s3 + $0x98] sm:$0xff] }
  0x1e   : > { %1042 = vperm.xlu0 %1795, %v959_v59   ;;  %1047 = vperm.xlu1 %1796, %v960_v0   ;;  %v387_v27 = vmul.f32 %v1882_v5, %v339_v15  ;;  %v408_v28 = vmul.f32 %v1882_v5, %v360_v16  ;;  %v379_v30 = vmul.f32 %v1882_v5, %v331_v14  ;;  %v487_v37 = vmax.f32 %v446_v19, 0.0  ;;  %v333_v59 = vld [vmem:[%s1887_s18 + $0x68] sm:$0xff]  ;;  %v355_v14 = vld [vmem:[%s1887_s18 + $0x118] sm:$0xff] }
  0x1f   : > { %v400_v31 = vmul.f32 %v1882_v5, %v352_v20  ;;  %v388_v33 = vmul.f32 %v1882_v5, %v340_v21  ;;  %v409_v34 = vmul.f32 %v1882_v5, %v361_v22  ;;  %v389_v41 = vmul.f32 %v1882_v5, %v341_v24  ;;  %v971_v22 = vld [vmem:[%s2687_s3 + $0xb0] sm:$0xff]  ;;  %v356_v24 = vld [vmem:[%s1887_s18 + $0x120] sm:$0xff] }
  0x20   : > { %1664 = vmatmul.mubr.msk.f32.gmra.mrb[4].mxu0 %vm509_vm2, %v462_v40  ;;  %1727 = vmatmul.mubr.msk.f32.gmra.mrb[4].mxu1 %vm509_vm2, %v483_v43  ;;  %v2034_v39 = vadd.f32 %v1892_v6, %v387_v27  ;;  %v2037_v40 = vadd.f32 %v1892_v6, %v408_v28  ;;  %v363_v43 = vld [vmem:[%s1887_s18 + $0x158] sm:$0xff]  ;;  %v410_v46 = vmul.f32 %v1882_v5, %v362_v29  ;;  %v467_v48 = vmax.f32 %v426_v23, 0.0 }
  0x21   : > { %1666 = vmatprep.mubr.msk.f32.mxu0 %vm1806_vm1, %v1805_v1  ;;  %1729 = vmatprep.mubr.msk.f32.mxu1 %vm1806_vm1, %v1805_v1  ;;  %v2049_v44 = vadd.f32 %v1892_v6, %v388_v33  ;;  %v2052_v45 = vadd.f32 %v1892_v6, %v409_v34  ;;  %v380_v49 = vmul.f32 %v1882_v5, %v332_v32  ;;  %v488_v57 = vmax.f32 %v447_v26, 0.0  ;;  %v335_v23 = vld [vmem:[%s1887_s18 + $0x78] sm:$0xff]  ;;  %v336_v32 = vld [vmem:[%s1887_s18 + $0x80] sm:$0xff]  ;;  %v357_v33 = vld [vmem:[%s1887_s18 + $0x128] sm:$0xff] }
  0x22   : > { %1052 = vperm.xlu0 %1795, %v961_v8   ;;  %1057 = vperm.xlu1 %1796, %v962_v13   ;;  %v390_v51 = vmul.f32 %v1882_v5, %v342_v35  ;;  %v427_v52 = vadd.f32 %v1892_v6, %v379_v30  ;;  %v401_v53 = vmul.f32 %v1882_v5, %v353_v38  ;;  %v969_v13 = vld [vmem:[%s2687_s3 + $0xa0] sm:$0xff]  ;;  %v972_v27 = vld [vmem:[%s2687_s3 + $0xb8] sm:$0xff] }
  0x23   : > { %v411_v55 = vmul.f32 %v1882_v5, %v363_v43  ;;  %v448_v58 = vadd.f32 %v1892_v6, %v400_v31  ;;  %v391_v63 = vmul.f32 %v1882_v5, %v343_v47  ;;  %v402_v4 = vmul.f32 %v1882_v5, %v354_v60  ;;  %v973_v34 = vld [vmem:[%s2687_s3 + $0xc0] sm:$0xff]  ;;  %v975_v47 = vld [vmem:[%s2687_s3 + $0xd0] sm:$0xff]  ;;  %v359_v60 = vld [vmem:[%s1887_s18 + $0x138] sm:$0xff] }
  0x24   : > { %1667 = vmatmul.mubr.msk.f32.gmra.mrb[6].mxu0 %vm509_vm2, %v463_v50  ;;  %1730 = vmatmul.mubr.msk.f32.gmra.mrb[6].mxu1 %vm509_vm2, %v484_v54  ;;  %v2058_v50 = vadd.f32 %v1892_v6, %v389_v41  ;;  %v2064_v54 = vadd.f32 %v1892_v6, %v410_v46  ;;  %v2076_v61 = vadd.f32 %v1892_v6, %v390_v51  ;;  %v468_v8 = vmax.f32 %v427_v52, 0.0  ;;  %v337_v46 = vld [vmem:[%s1887_s18 + $0x88] sm:$0xff]  ;;  %v976_v52 = vld [vmem:[%s2687_s3 + $0xd8] sm:$0xff] }
  0x25   : > { %1669 = vmatprep.mubr.msk.f32.mxu0 %vm1806_vm1, %v1805_v1  ;;  %1732 = vmatprep.mubr.msk.f32.mxu1 %vm1806_vm1, %v1805_v1  ;;  %v2087_v0 = vadd.f32 %v1892_v6, %v411_v55  ;;  %v489_v9 = vmax.f32 %v448_v58, 0.0  ;;  %v428_v10 = vadd.f32 %v1892_v6, %v380_v49  ;;  %v449_v11 = vadd.f32 %v1892_v6, %v401_v53  ;;  %v338_v58 = vld [vmem:[%s1887_s18 + $0x90] sm:$0xff] }
  0x26   : > { %1062 = vperm.xlu0 %1795, %v963_v12   ;;  %1067 = vperm.xlu1 %1796, %v964_v36   ;;  %v334_v12 = vld [vmem:[%s1887_s18 + $0x70] sm:$0xff]  ;;  %v450_v20 = vadd.f32 %v1892_v6, %v402_v4  ;;  %v403_v21 = vmul.f32 %v1882_v5, %v355_v14  ;;  %v383_v30 = vmul.f32 %v1882_v5, %v335_v23  ;;  %v986_v23 = vld [vmem:[%s2687_s3 + $0x128] sm:$0xff] }
  0x27   : > { %v382_v16 = vmul.f32 %v1882_v5, %v334_v12  ;;  %v490_v19 = vmax.f32 %v449_v11, 0.0  ;;  %v404_v31 = vmul.f32 %v1882_v5, %v356_v24  ;;  %v384_v35 = vmul.f32 %v1882_v5, %v336_v32  ;;  %v980_v11 = vld [vmem:[%s2687_s3 + $0xf8] sm:$0xff]  ;;  %v987_v24 = vld [vmem:[%s2687_s3 + $0x130] sm:$0xff] }
  0x28   : > { %1670 = vmatmul.mubr.msk.f32.gmra.mrb[8].mxu0 %vm509_vm2, %v464_v2  ;;  %1733 = vmatmul.mubr.msk.f32.gmra.mrb[8].mxu1 %vm509_vm2, %v485_v3  ;;  %v2090_v2 = vadd.f32 %v1892_v6, %v391_v63  ;;  %v381_v3 = vmul.f32 %v1882_v5, %v333_v59  ;;  %v491_v28 = vmax.f32 %v450_v20, 0.0  ;;  %v451_v29 = vadd.f32 %v1892_v6, %v403_v21  ;;  %v977_v59 = vld [vmem:[%s2687_s3 + $0xe0] sm:$0xff] }
  0x29   : > { %1672 = vmatprep.mubr.msk.f32.mxu0 %vm1806_vm1, %v1805_v1  ;;  %1735 = vmatprep.mubr.msk.f32.mxu1 %vm1806_vm1, %v1805_v1  ;;  %v430_v26 = vadd.f32 %v1892_v6, %v382_v16  ;;  %v405_v36 = vmul.f32 %v1882_v5, %v357_v33  ;;  %v452_v43 = vadd.f32 %v1892_v6, %v404_v31  ;;  %v982_v16 = vld [vmem:[%s2687_s3 + $0x108] sm:$0xff]  ;;  %v476_v20 = vmax.f32 %v2034_v39, 0.0 }
  0x2a   : > { %1072 = vperm.xlu0 %1795, %v965_v42   ;;  %1077 = vperm.xlu1 %1796, %v966_v56   ;;  %v429_v15 = vadd.f32 %v1892_v6, %v381_v3  ;;  %v492_v41 = vmax.f32 %v451_v29, 0.0  ;;  %v431_v42 = vadd.f32 %v1892_v6, %v383_v30  ;;  %v432_v49 = vadd.f32 %v1892_v6, %v384_v35  ;;  %v978_v3 = vld [vmem:[%s2687_s3 + $0xe8] sm:$0xff] }
  0x2b   : > { %v471_v38 = vmax.f32 %v430_v26, 0.0  ;;  %v385_v51 = vmul.f32 %v1882_v5, %v337_v46  ;;  %v493_v55 = vmax.f32 %v452_v43, 0.0  ;;  %v453_v56 = vadd.f32 %v1892_v6, %v405_v36  ;;  %v989_v26 = vld [vmem:[%s2687_s3 + $0x140] sm:$0xff] }
  0x2c   : > { %1673 = vmatmul.mubr.msk.f32.gmra.mrb[10].mxu0 %vm509_vm2, %v465_v17  ;;  %1736 = vmatmul.mubr.msk.f32.gmra.mrb[10].mxu1 %vm509_vm2, %v486_v18  ;;  %v970_v17 = vld [vmem:[%s2687_s3 + $0xa8] sm:$0xff]  ;;  %v469_v18 = vmax.f32 %v428_v10, 0.0  ;;  %v472_v53 = vmax.f32 %v431_v42, 0.0  ;;  %v386_v63 = vmul.f32 %v1882_v5, %v338_v58  ;;  %v473_v4 = vmax.f32 %v432_v49, 0.0  ;;  %v979_v10 = vld [vmem:[%s2687_s3 + $0xf0] sm:$0xff] }
  0x2d   : > { %1675 = vmatprep.mubr.msk.f32.mxu0 %vm1806_vm1, %v1805_v1  ;;  %1738 = vmatprep.mubr.msk.f32.mxu1 %vm1806_vm1, %v1805_v1  ;;  %v497_v21 = vmax.f32 %v2037_v40, 0.0  ;;  %v477_v39 = vmax.f32 %v2049_v44, 0.0  ;;  %v498_v40 = vmax.f32 %v2052_v45, 0.0  ;;  %v478_v44 = vmax.f32 %v2058_v50, 0.0 }
  0x2e   : > { %1082 = vperm.xlu0 %1795, %v967_v62   ;;  %1087 = vperm.xlu1 %1796, %v968_v7   ;;  %v433_v62 = vadd.f32 %v1892_v6, %v385_v51  ;;  %v494_v7 = vmax.f32 %v453_v56, 0.0  ;;  %v499_v45 = vmax.f32 %v2064_v54, 0.0  ;;  %v479_v50 = vmax.f32 %v2076_v61, 0.0 }
  0x2f   : > { %v500_v54 = vmax.f32 %v2087_v0, 0.0 }
  0x30   : > { %1676 = vmatmul.mubr.msk.f32.gmra.mrb[12].mxu0 %vm509_vm2, %v466_v25  ;;  %1739 = vmatmul.mubr.msk.f32.gmra.mrb[12].mxu1 %vm509_vm2, %v487_v37  ;;  %v470_v25 = vmax.f32 %v429_v15, 0.0  ;;  %v974_v37 = vld [vmem:[%s2687_s3 + $0xc8] sm:$0xff]  ;;  %v981_v15 = vld [vmem:[%s2687_s3 + $0x100] sm:$0xff] }
  0x31   : > { %1678 = vmatprep.mubr.msk.f32.mxu0 %vm1806_vm1, %v1805_v1  ;;  %1741 = vmatprep.mubr.msk.f32.mxu1 %vm1806_vm1, %v1805_v1 }
  0x32   : > { %1092 = vperm.xlu0 %1795, %v969_v13   ;;  %1097 = vperm.xlu1 %1796, %v970_v17   ;;  %v434_v13 = vadd.f32 %v1892_v6, %v386_v63 }
  0x34   : > { %1679 = vmatmul.mubr.msk.f32.gmra.mrb[14].mxu0 %vm509_vm2, %v467_v48  ;;  %1742 = vmatmul.mubr.msk.f32.gmra.mrb[14].mxu1 %vm509_vm2, %v488_v57  ;;  %v358_v48 = vld [vmem:[%s1887_s18 + $0x130] sm:$0xff] }
  0x35   : > { %1681 = vmatprep.mubr.msk.f32.mxu0 %vm1806_vm1, %v1805_v1  ;;  %1744 = vmatprep.mubr.msk.f32.mxu1 %vm1806_vm1, %v1805_v1  ;;  %v406_v57 = vmul.f32 %v1882_v5, %v358_v48 }
  0x36   : > { %1102 = vperm.xlu0 %1795, %v971_v22   ;;  %1107 = vperm.xlu1 %1796, %v972_v27   ;;  %v985_v22 = vld [vmem:[%s2687_s3 + $0x120] sm:$0xff]  ;;  %v480_v27 = vmax.f32 %v2090_v2, 0.0 }
  0x38   : > { %1682 = vmatmul.mubr.msk.f32.gmra.mrb[16].mxu0 %vm509_vm2, %v468_v8  ;;  %1745 = vmatmul.mubr.msk.f32.gmra.mrb[16].mxu1 %vm509_vm2, %v489_v9  ;;  %v454_v8 = vadd.f32 %v1892_v6, %v406_v57  ;;  %v407_v9 = vmul.f32 %v1882_v5, %v359_v60  ;;  %v474_v5 = vmax.f32 %v433_v62, 0.0 }
  0x39   : > { %1684 = vmatprep.mubr.msk.f32.mxu0 %vm1806_vm1, %v1805_v1  ;;  %1747 = vmatprep.mubr.msk.f32.mxu1 %vm1806_vm1, %v1805_v1 }
  0x3a   : > { %1112 = vperm.xlu0 %1795, %v973_v34   ;;  %1117 = vperm.xlu1 %1796, %v974_v37   ;;  %v495_v12 = vmax.f32 %v454_v8, 0.0  ;;  %v455_v14 = vadd.f32 %v1892_v6, %v407_v9  ;;  %v475_v6 = vmax.f32 %v434_v13, 0.0 }
  0x3c   : > { %1685 = vmatmul.mubr.msk.f32.gmra.mrb[18].mxu0 %vm509_vm2, %v469_v18  ;;  %1748 = vmatmul.mubr.msk.f32.gmra.mrb[18].mxu1 %vm509_vm2, %v490_v19  ;;  %v496_v17 = vmax.f32 %v455_v14, 0.0  ;;  %v983_v18 = vld [vmem:[%s2687_s3 + $0x110] sm:$0xff]  ;;  %v984_v19 = vld [vmem:[%s2687_s3 + $0x118] sm:$0xff] }
  0x3d   : > { %1687 = vmatprep.mubr.msk.f32.mxu0 %vm1806_vm1, %v1805_v1  ;;  %1750 = vmatprep.mubr.msk.f32.mxu1 %vm1806_vm1, %v1805_v1 }
  0x3e   : > { %1122 = vperm.xlu0 %1795, %v975_v47   ;;  %1127 = vperm.xlu1 %1796, %v976_v52  }
  0x40   : > { %1688 = vmatmul.mubr.msk.f32.gmra.mrb[20].mxu0 %vm509_vm2, %v470_v25  ;;  %1751 = vmatmul.mubr.msk.f32.gmra.mrb[20].mxu1 %vm509_vm2, %v491_v28  ;;  %v988_v25 = vld [vmem:[%s2687_s3 + $0x138] sm:$0xff] }
  0x41   : > { %1690 = vmatprep.mubr.msk.f32.mxu0 %vm1806_vm1, %v1805_v1  ;;  %1753 = vmatprep.mubr.msk.f32.mxu1 %vm1806_vm1, %v1805_v1 }
  0x42   : > { %1132 = vperm.xlu0 %1795, %v977_v59   ;;  %1137 = vperm.xlu1 %1796, %v978_v3  }
  0x44   : > { %1691 = vmatmul.mubr.msk.f32.gmra.mrb[22].mxu0 %vm509_vm2, %v471_v38  ;;  %1754 = vmatmul.mubr.msk.f32.gmra.mrb[22].mxu1 %vm509_vm2, %v492_v41  ;;  %v2306_v38 = vld [vmem:[%s2689_s5] ss:$0 sm:$0xff] }
  0x45   : > { %1693 = vmatprep.mubr.msk.f32.mxu0 %vm1806_vm1, %v1805_v1  ;;  %1756 = vmatprep.mubr.msk.f32.mxu1 %vm1806_vm1, %v1805_v1 }
  0x46   : > { %1142 = vperm.xlu0 %1795, %v979_v10   ;;  %1147 = vperm.xlu1 %1796, %v980_v11  }
  0x48   : > { %1694 = vmatmul.mubr.msk.f32.gmra.mrb[24].mxu0 %vm509_vm2, %v472_v53  ;;  %1757 = vmatmul.mubr.msk.f32.gmra.mrb[24].mxu1 %vm509_vm2, %v493_v55 }
  0x49   : > { %1696 = vmatprep.mubr.msk.f32.mxu0 %vm1806_vm1, %v1805_v1  ;;  %1759 = vmatprep.mubr.msk.f32.mxu1 %vm1806_vm1, %v1805_v1 }
  0x4a   : > { %1152 = vperm.xlu0 %1795, %v981_v15   ;;  %1157 = vperm.xlu1 %1796, %v982_v16  }
  0x4c   : > { %1697 = vmatmul.mubr.msk.f32.gmra.mrb[26].mxu0 %vm509_vm2, %v473_v4  ;;  %1760 = vmatmul.mubr.msk.f32.gmra.mrb[26].mxu1 %vm509_vm2, %v494_v7 }
  0x4d   : > { %1699 = vmatprep.mubr.msk.f32.mxu0 %vm1806_vm1, %v1805_v1  ;;  %1762 = vmatprep.mubr.msk.f32.mxu1 %vm1806_vm1, %v1805_v1 }
  0x4e   : > { %1162 = vperm.xlu0 %1795, %v983_v18   ;;  %1167 = vperm.xlu1 %1796, %v984_v19  }
  0x50   : > { %1700 = vmatmul.mubr.msk.f32.gmra.mrb[28].mxu0 %vm509_vm2, %v474_v5  ;;  %1763 = vmatmul.mubr.msk.f32.gmra.mrb[28].mxu1 %vm509_vm2, %v495_v12 }
  0x51   : > { %1702 = vmatprep.mubr.msk.f32.mxu0 %vm1806_vm1, %v1805_v1  ;;  %1765 = vmatprep.mubr.msk.f32.mxu1 %vm1806_vm1, %v1805_v1 }
  0x52   : > { %1172 = vperm.xlu0 %1795, %v985_v22   ;;  %1177 = vperm.xlu1 %1796, %v986_v23  }
  0x54   : > { %1703 = vmatmul.mubr.msk.f32.gmra.mrb[30].mxu0 %vm509_vm2, %v475_v6  ;;  %1766 = vmatmul.mubr.msk.f32.gmra.mrb[30].mxu1 %vm509_vm2, %v496_v17 }
  0x55   : > { %1705 = vmatprep.mubr.msk.f32.mxu0 %vm1806_vm1, %v1805_v1  ;;  %1768 = vmatprep.mubr.msk.f32.mxu1 %vm1806_vm1, %v1805_v1 }
  0x56   : > { %1182 = vperm.xlu0 %1795, %v987_v24   ;;  %1187 = vperm.xlu1 %1796, %v988_v25  }
  0x58   : > { %1706 = vmatmul.mubr.msk.f32.gmra.mrb[32].mxu0 %vm509_vm2, %v476_v20  ;;  %1769 = vmatmul.mubr.msk.f32.gmra.mrb[32].mxu1 %vm509_vm2, %v497_v21 }
  0x59   : > { %1708 = vmatprep.mubr.msk.f32.mxu0 %vm1806_vm1, %v1805_v1  ;;  %1771 = vmatprep.mubr.msk.f32.mxu1 %vm1806_vm1, %v1805_v1 }
  0x5a   : > { %1192 = vperm.xlu0 %1795, %v989_v26  }
  0x5c   : > { %1709 = vmatmul.mubr.msk.f32.gmra.mrb[34].mxu0 %vm509_vm2, %v477_v39  ;;  %1772 = vmatmul.mubr.msk.f32.gmra.mrb[34].mxu1 %vm509_vm2, %v498_v40 }
  0x5d   : > { %1711 = vmatprep.mubr.msk.f32.mxu0 %vm1806_vm1, %v1805_v1  ;;  %1774 = vmatprep.mubr.msk.f32.mxu1 %vm1806_vm1, %v1805_v1 }
  0x60   : > { %1712 = vmatmul.mubr.msk.f32.gmra.mrb[36].mxu0 %vm509_vm2, %v478_v44  ;;  %1775 = vmatmul.mubr.msk.f32.gmra.mrb[36].mxu1 %vm509_vm2, %v499_v45 }
  0x61   : > { %1714 = vmatprep.mubr.msk.f32.mxu0 %vm1806_vm1, %v1805_v1  ;;  %1777 = vmatprep.mubr.msk.f32.mxu1 %vm1806_vm1, %v1805_v1 }
  0x64   : > { %1715 = vmatmul.mubr.msk.f32.gmra.mrb[38].mxu0 %vm509_vm2, %v479_v50  ;;  %1778 = vmatmul.mubr.msk.f32.gmra.mrb[38].mxu1 %vm509_vm2, %v500_v54 }
  0x65   : > { %1717 = vmatprep.mubr.msk.f32.mxu0 %vm1806_vm1, %v1805_v1 }
  0x68   : > { %1718 = vmatmul.mubr.msk.f32.gmra.mrb[40].mxu0 %vm509_vm2, %v480_v27 }
  0x89   : > { %v1003_v61 = vpop.permute.xlu1 %1002  ;;  %v993_v32 = vpop.permute.xlu0 %992 }
  0x8d   : > { %v2280_v0 = vpop.permute.xlu1 %1007  ;;  %v998_v2 = vpop.permute.xlu0 %997 }
  0x91   : > { %v2282_v28 = vpop.permute.xlu1 %1017  ;;  %v2294_v1 = vpop.permute.xlu0 %1012 }
  0x95   : > { %v2284_v29 = vpop.permute.xlu1 %1027  ;;  %v2299_v36 = vpop.permute.xlu0 %1022 }
  0x99   : > { %v2286_v30 = vpop.permute.xlu1 %1037  ;;  %v2317_v49 = vpop.permute.xlu0 %1032 }
  0x9d   : > { %v2288_v31 = vpop.permute.xlu1 %1047  ;;  %v2341_v13 = vpop.permute.xlu0 %1042 }
  0xa1   : > { %v2290_v33 = vpop.permute.xlu1 %1057 }
  0xa5   : > { %v2292_v34 = vpop.permute.xlu1 %1067 }
  0xa9   : > { %v2296_v35 = vpop.permute.xlu1 %1077 }
  0xad   : > { %v2301_v37 = vpop.permute.xlu1 %1087 }
  0xb1   : > { %v2321_v52 = vpop.permute.xlu1 %1097 }
  0xb5   : > { %v2347_v6 = vpop.permute.xlu1 %1107 }
  0xeb   : > { %v703_v41 = vpop.f32.mrb[0].mxu0  ;;  %v808_v42 = vpop.f32.mrb[0].mxu1 }
  0xec   : > { %v704_v43 = vadd.f32 %v2306_v38, %v703_v41  ;;  %v1659_v46 = vpop.f32.mrb[1].mxu0  ;;  %v2315_v47 = vadd.f32 %v2306_v38, %v808_v42  ;;  %v1722_v48 = vpop.f32.mrb[1].mxu1 }
  0xed   : > { %v2372_v46 = vpop.permute.xlu1 %1117 }
  0xee   : > { %908 = vst.msk [vmem:[%s2311_s26] sm:$0xff] %vm907_vm3, %v704_v43  ;;  %v1195_v51 = vmul.f32 %v993_v32, %v704_v43  ;;  %929 = vst.msk [vmem:[%s2311_s26 + $0xa8] sm:$0xff] %vm907_vm3, %v2315_v47 }
  0xef   : > { %v708_v53 = vpop.f32.mrb[2].mxu0  ;;  %v813_v55 = vpop.f32.mrb[2].mxu1 }
  0xf0   : > { %v709_v56 = vadd.f32 %v2306_v38, %v708_v53  ;;  %v1662_v57 = vpop.f32.mrb[3].mxu0  ;;  %v1725_v58 = vpop.f32.mrb[3].mxu1  ;;  %v2328_v59 = vadd.f32 %v2306_v38, %v813_v55  ;;  %v1325_v60 = vmul.f32 %v1195_v51, %v704_v43  ;;  %v1236_v63 = vsel %vm907_vm3, %v1195_v51, 0.0 }
  0xf1   : > { %v2369_v43 = vpop.permute.xlu0 %1052 }
  0xf2   : > { %909 = vst.msk [vmem:[%s2311_s26 + $0x8] sm:$0xff] %vm907_vm3, %v709_v56  ;;  %v1196_v62 = vmul.f32 %v998_v2, %v709_v56  ;;  %930 = vst.msk [vmem:[%s2311_s26 + $0xb0] sm:$0xff] %vm907_vm3, %v2328_v59  ;;  %v1366_v14 = vsel %vm907_vm3, %v1325_v60, 0.0 }
  0xf3   : > { %v713_v3 = vpop.f32.mrb[4].mxu0  ;;  %v818_v4 = vpop.f32.mrb[4].mxu1 }
  0xf4   : > { %v1237_v7 = vsel %vm907_vm3, %v1196_v62, 0.0  ;;  %v1326_v8 = vmul.f32 %v1196_v62, %v709_v56  ;;  %v714_v9 = vadd.f32 %v2306_v38, %v713_v3  ;;  %v1665_v10 = vpop.f32.mrb[5].mxu0  ;;  %v2339_v11 = vadd.f32 %v2306_v38, %v818_v4  ;;  %v1728_v5 = vpop.f32.mrb[5].mxu1 }
  0xf5   : > { %v1238_v12 = vadd.f32 %v1237_v7, %v1236_v63 }
  0xf6   : > { %v1367_v15 = vsel %vm907_vm3, %v1326_v8, 0.0  ;;  %910 = vst.msk [vmem:[%s2311_s26 + $0x10] sm:$0xff] %vm907_vm3, %v714_v9  ;;  %v1197_v16 = vmul.f32 %v1003_v61, %v714_v9  ;;  %931 = vst.msk [vmem:[%s2311_s26 + $0xb8] sm:$0xff] %vm907_vm3, %v2339_v11 }
  0xf7   : > { %v1368_v17 = vadd.f32 %v1367_v15, %v1366_v14  ;;  %v718_v18 = vpop.f32.mrb[6].mxu0  ;;  %v823_v19 = vpop.f32.mrb[6].mxu1 }
  0xf8   : > { %v1239_v20 = vsel %vm907_vm3, %v1197_v16, 0.0  ;;  %v1327_v21 = vmul.f32 %v1197_v16, %v714_v9  ;;  %v719_v22 = vadd.f32 %v2306_v38, %v718_v18  ;;  %v1668_v23 = vpop.f32.mrb[7].mxu0  ;;  %v1731_v39 = vpop.f32.mrb[7].mxu1  ;;  %v2355_v24 = vadd.f32 %v2306_v38, %v823_v19 }
  0xf9   : > { %v1240_v40 = vadd.f32 %v1239_v20, %v1238_v12  ;;  %v2397_v18 = vpop.permute.xlu0 %1062 }
  0xfa   : > { %v1369_v25 = vsel %vm907_vm3, %v1327_v21, 0.0  ;;  %911 = vst.msk [vmem:[%s2311_s26 + $0x18] sm:$0xff] %vm907_vm3, %v719_v22  ;;  %v1198_v44 = vmul.f32 %v2280_v0, %v719_v22  ;;  %932 = vst.msk [vmem:[%s2311_s26 + $0xc0] sm:$0xff] %vm907_vm3, %v2355_v24 }
  0xfb   : > { %v1370_v45 = vadd.f32 %v1369_v25, %v1368_v17  ;;  %v723_v26 = vpop.f32.mrb[8].mxu0  ;;  %v828_v50 = vpop.f32.mrb[8].mxu1 }
  0xfc   : > { %v1241_v54 = vsel %vm907_vm3, %v1198_v44, 0.0  ;;  %v1328_v27 = vmul.f32 %v1198_v44, %v719_v22  ;;  %v724_v61 = vadd.f32 %v2306_v38, %v723_v26  ;;  %v1671_v32 = vpop.f32.mrb[9].mxu0  ;;  %v2367_v2 = vadd.f32 %v2306_v38, %v828_v50  ;;  %v1734_v41 = vpop.f32.mrb[9].mxu1 }
  0xfd   : > { %v1242_v42 = vadd.f32 %v1241_v54, %v1240_v40 }
  0xfe   : > { %v1371_v0 = vsel %vm907_vm3, %v1328_v27, 0.0  ;;  %912 = vst.msk [vmem:[%s2311_s26 + $0x20] sm:$0xff] %vm907_vm3, %v724_v61  ;;  %v1199_v48 = vmul.f32 %v2294_v1, %v724_v61  ;;  %933 = vst.msk [vmem:[%s2311_s26 + $0xc8] sm:$0xff] %vm907_vm3, %v2367_v2 }
  0xff   : > { %v1372_v51 = vadd.f32 %v1371_v0, %v1370_v45  ;;  %v728_v53 = vpop.f32.mrb[10].mxu0  ;;  %v833_v55 = vpop.f32.mrb[10].mxu1 }
 0x100   : > { %v1243_v56 = vsel %vm907_vm3, %v1199_v48, 0.0  ;;  %v1329_v57 = vmul.f32 %v1199_v48, %v724_v61  ;;  %v729_v58 = vadd.f32 %v2306_v38, %v728_v53  ;;  %v1674_v60 = vpop.f32.mrb[11].mxu0  ;;  %v1737_v62 = vpop.f32.mrb[11].mxu1  ;;  %v2383_v3 = vadd.f32 %v2306_v38, %v833_v55 }
 0x101   : > { %v1244_v63 = vadd.f32 %v1243_v56, %v1242_v42  ;;  %v2425_v56 = vpop.permute.xlu0 %1072 }
 0x102   : > { %v1373_v1 = vsel %vm907_vm3, %v1329_v57, 0.0  ;;  %913 = vst.msk [vmem:[%s2311_s26 + $0x28] sm:$0xff] %vm907_vm3, %v729_v58  ;;  %v1200_v4 = vmul.f32 %v2282_v28, %v729_v58  ;;  %934 = vst.msk [vmem:[%s2311_s26 + $0xd0] sm:$0xff] %vm907_vm3, %v2383_v3  ;;  %v2399_v28 = vpop.permute.xlu1 %1127 }
 0x103   : > { %v1374_v7 = vadd.f32 %v1373_v1, %v1372_v51  ;;  %v733_v8 = vpop.f32.mrb[12].mxu0  ;;  %v838_v9 = vpop.f32.mrb[12].mxu1 }
 0x104   : > { %v1245_v10 = vsel %vm907_vm3, %v1200_v4, 0.0  ;;  %v1330_v5 = vmul.f32 %v1200_v4, %v729_v58  ;;  %v734_v12 = vadd.f32 %v2306_v38, %v733_v8  ;;  %v1677_v14 = vpop.f32.mrb[13].mxu0  ;;  %v2395_v15 = vadd.f32 %v2306_v38, %v838_v9  ;;  %v1740_v16 = vpop.f32.mrb[13].mxu1 }
 0x105   : > { %v1246_v17 = vadd.f32 %v1245_v10, %v1244_v63 }
 0x106   : > { %v1375_v19 = vsel %vm907_vm3, %v1330_v5, 0.0  ;;  %914 = vst.msk [vmem:[%s2311_s26 + $0x30] sm:$0xff] %vm907_vm3, %v734_v12  ;;  %v1201_v20 = vmul.f32 %v2299_v36, %v734_v12  ;;  %935 = vst.msk [vmem:[%s2311_s26 + $0xd8] sm:$0xff] %vm907_vm3, %v2395_v15 }
 0x107   : > { %v1376_v21 = vadd.f32 %v1375_v19, %v1374_v7  ;;  %v738_v22 = vpop.f32.mrb[14].mxu0  ;;  %v843_v23 = vpop.f32.mrb[14].mxu1 }
 0x108   : > { %v1247_v39 = vsel %vm907_vm3, %v1201_v20, 0.0  ;;  %v1331_v40 = vmul.f32 %v1201_v20, %v734_v12  ;;  %v739_v25 = vadd.f32 %v2306_v38, %v738_v22  ;;  %v1680_v44 = vpop.f32.mrb[15].mxu0  ;;  %v1743_v45 = vpop.f32.mrb[15].mxu1  ;;  %v2411_v50 = vadd.f32 %v2306_v38, %v843_v23 }
 0x109   : > { %v1248_v26 = vadd.f32 %v1247_v39, %v1246_v17  ;;  %v2451_v44 = vpop.permute.xlu0 %1082 }
 0x10a   : > { %v1377_v36 = vsel %vm907_vm3, %v1331_v40, 0.0  ;;  %915 = vst.msk [vmem:[%s2311_s26 + $0x38] sm:$0xff] %vm907_vm3, %v739_v25  ;;  %v1202_v54 = vmul.f32 %v2284_v29, %v739_v25  ;;  %936 = vst.msk [vmem:[%s2311_s26 + $0xe0] sm:$0xff] %vm907_vm3, %v2411_v50  ;;  %v2427_v29 = vpop.permute.xlu1 %1137 }
 0x10b   : > { %v1378_v27 = vadd.f32 %v1377_v36, %v1376_v21  ;;  %v743_v61 = vpop.f32.mrb[16].mxu0  ;;  %v848_v32 = vpop.f32.mrb[16].mxu1 }
 0x10c   : > { %v1249_v41 = vsel %vm907_vm3, %v1202_v54, 0.0  ;;  %v1332_v42 = vmul.f32 %v1202_v54, %v739_v25  ;;  %v744_v0 = vadd.f32 %v2306_v38, %v743_v61  ;;  %v1683_v48 = vpop.f32.mrb[17].mxu0  ;;  %v2423_v51 = vadd.f32 %v2306_v38, %v848_v32  ;;  %v1746_v53 = vpop.f32.mrb[17].mxu1 }
 0x10d   : > { %v1250_v55 = vadd.f32 %v1249_v41, %v1248_v26 }
 0x10e   : > { %v1379_v57 = vsel %vm907_vm3, %v1332_v42, 0.0  ;;  %916 = vst.msk [vmem:[%s2311_s26 + $0x40] sm:$0xff] %vm907_vm3, %v744_v0  ;;  %v1203_v58 = vmul.f32 %v2317_v49, %v744_v0  ;;  %937 = vst.msk [vmem:[%s2311_s26 + $0xe8] sm:$0xff] %vm907_vm3, %v2423_v51  ;;  %v1148_v40 = vpop.permute.xlu1 %1147 }
 0x10f   : > { %v1380_v60 = vadd.f32 %v1379_v57, %v1378_v27  ;;  %v748_v62 = vpop.f32.mrb[18].mxu0  ;;  %v853_v63 = vpop.f32.mrb[18].mxu1 }
 0x110   : > { %v1251_v1 = vsel %vm907_vm3, %v1203_v58, 0.0  ;;  %v1333_v4 = vmul.f32 %v1203_v58, %v744_v0  ;;  %v749_v7 = vadd.f32 %v2306_v38, %v748_v62  ;;  %v1686_v8 = vpop.f32.mrb[19].mxu0  ;;  %v1749_v9 = vpop.f32.mrb[19].mxu1  ;;  %v2439_v5 = vadd.f32 %v2306_v38, %v853_v63 }
 0x111   : > { %v1252_v10 = vadd.f32 %v1251_v1, %v1250_v55 }
 0x112   : > { %v1381_v49 = vsel %vm907_vm3, %v1333_v4, 0.0  ;;  %917 = vst.msk [vmem:[%s2311_s26 + $0x48] sm:$0xff] %vm907_vm3, %v749_v7  ;;  %v1204_v12 = vmul.f32 %v2286_v30, %v749_v7  ;;  %938 = vst.msk [vmem:[%s2311_s26 + $0xf0] sm:$0xff] %vm907_vm3, %v2439_v5 }
 0x113   : > { %v1382_v14 = vadd.f32 %v1381_v49, %v1380_v60  ;;  %v753_v16 = vpop.f32.mrb[20].mxu0  ;;  %v858_v17 = vpop.f32.mrb[20].mxu1 }
 0x114   : > { %v1253_v19 = vsel %vm907_vm3, %v1204_v12, 0.0  ;;  %v1334_v20 = vmul.f32 %v1204_v12, %v749_v7  ;;  %v754_v21 = vadd.f32 %v2306_v38, %v753_v16  ;;  %v1689_v22 = vpop.f32.mrb[21].mxu0  ;;  %v859_v23 = vadd.f32 %v2306_v38, %v858_v17  ;;  %v1752_v39 = vpop.f32.mrb[21].mxu1 }
 0x115   : > { %v1254_v25 = vadd.f32 %v1253_v19, %v1252_v10  ;;  %v2481_v10 = vpop.permute.xlu0 %1092 }
 0x116   : > { %v1383_v30 = vsel %vm907_vm3, %v1334_v20, 0.0  ;;  %918 = vst.msk [vmem:[%s2311_s26 + $0x50] sm:$0xff] %vm907_vm3, %v754_v21  ;;  %v1205_v45 = vmul.f32 %v2341_v13, %v754_v21  ;;  %939 = vst.msk [vmem:[%s2311_s26 + $0xf8] sm:$0xff] %vm907_vm3, %v859_v23  ;;  %v2459_v26 = vmul.f32 %v1148_v40, %v859_v23 }
 0x117   : > { %v1384_v36 = vadd.f32 %v1383_v30, %v1382_v14  ;;  %v758_v54 = vpop.f32.mrb[22].mxu0  ;;  %v863_v27 = vpop.f32.mrb[22].mxu1 }
 0x118   : > { %v1255_v61 = vsel %vm907_vm3, %v1205_v45, 0.0  ;;  %v1335_v32 = vmul.f32 %v1205_v45, %v754_v21  ;;  %v2463_v41 = vmul.f32 %v2459_v26, %v859_v23  ;;  %v1692_v42 = vpop.f32.mrb[23].mxu0  ;;  %v1755_v0 = vpop.f32.mrb[23].mxu1  ;;  %v759_v13 = vadd.f32 %v2306_v38, %v758_v54 }
 0x119   : > { %v1256_v48 = vadd.f32 %v1255_v61, %v1254_v25  ;;  %v2467_v53 = vadd.f32 %v2306_v38, %v863_v27 }
 0x11a   : > { %v1385_v55 = vsel %vm907_vm3, %v1335_v32, 0.0  ;;  %919 = vst.msk [vmem:[%s2311_s26 + $0x58] sm:$0xff] %vm907_vm3, %v759_v13  ;;  %v1206_v58 = vmul.f32 %v2288_v31, %v759_v13 }
 0x11b   : > { %v1386_v57 = vadd.f32 %v1385_v55, %v1384_v36  ;;  %940 = vst.msk [vmem:[%s2311_s26 + $0x100] sm:$0xff] %vm907_vm3, %v2467_v53  ;;  %v763_v60 = vpop.f32.mrb[24].mxu0  ;;  %v868_v62 = vpop.f32.mrb[24].mxu1 }
 0x11c   : > { %v764_v63 = vadd.f32 %v2306_v38, %v763_v60  ;;  %v2478_v1 = vadd.f32 %v2306_v38, %v868_v62  ;;  %v1695_v4 = vpop.f32.mrb[25].mxu0  ;;  %v1758_v7 = vpop.f32.mrb[25].mxu1  ;;  %v1257_v8 = vsel %vm907_vm3, %v1206_v58, 0.0  ;;  %v1336_v9 = vmul.f32 %v1206_v58, %v759_v13 }
 0x11d   : > { %v1258_v49 = vadd.f32 %v1257_v8, %v1256_v48  ;;  %v2507_v48 = vpop.permute.xlu0 %1102 }
 0x11e   : > { %920 = vst.msk [vmem:[%s2311_s26 + $0x60] sm:$0xff] %vm907_vm3, %v764_v63  ;;  %v1207_v31 = vmul.f32 %v2369_v43, %v764_v63  ;;  %941 = vst.msk [vmem:[%s2311_s26 + $0x108] sm:$0xff] %vm907_vm3, %v2478_v1  ;;  %v1387_v12 = vsel %vm907_vm3, %v1336_v9, 0.0 }
 0x11f   : > { %v768_v14 = vpop.f32.mrb[26].mxu0  ;;  %v873_v16 = vpop.f32.mrb[26].mxu1  ;;  %v1388_v17 = vadd.f32 %v1387_v12, %v1386_v57 }
 0x120   : > { %v1259_v19 = vsel %vm907_vm3, %v1207_v31, 0.0  ;;  %v1337_v20 = vmul.f32 %v1207_v31, %v764_v63  ;;  %v1698_v21 = vpop.f32.mrb[27].mxu0  ;;  %v1761_v22 = vpop.f32.mrb[27].mxu1  ;;  %v769_v39 = vadd.f32 %v2306_v38, %v768_v14  ;;  %v2493_v40 = vadd.f32 %v2306_v38, %v873_v16 }
 0x121   : > { %v1260_v23 = vadd.f32 %v1259_v19, %v1258_v49 }
 0x122   : > { %v1389_v43 = vsel %vm907_vm3, %v1337_v20, 0.0  ;;  %921 = vst.msk [vmem:[%s2311_s26 + $0x68] sm:$0xff] %vm907_vm3, %v769_v39  ;;  %v1208_v30 = vmul.f32 %v2290_v33, %v769_v39  ;;  %942 = vst.msk [vmem:[%s2311_s26 + $0x110] sm:$0xff] %vm907_vm3, %v2493_v40 }
 0x123   : > { %v1390_v25 = vadd.f32 %v1389_v43, %v1388_v17  ;;  %v773_v45 = vpop.f32.mrb[28].mxu0  ;;  %v878_v36 = vpop.f32.mrb[28].mxu1 }
 0x124   : > { %v774_v54 = vadd.f32 %v2306_v38, %v773_v45  ;;  %v2504_v27 = vadd.f32 %v2306_v38, %v878_v36  ;;  %v1701_v61 = vpop.f32.mrb[29].mxu0  ;;  %v1764_v32 = vpop.f32.mrb[29].mxu1  ;;  %v1261_v42 = vsel %vm907_vm3, %v1208_v30, 0.0  ;;  %v1338_v0 = vmul.f32 %v1208_v30, %v769_v39 }
 0x125   : > { %v1262_v13 = vadd.f32 %v1261_v42, %v1260_v23  ;;  %v2533_v39 = vpop.permute.xlu0 %1112 }
 0x126   : > { %922 = vst.msk [vmem:[%s2311_s26 + $0x70] sm:$0xff] %vm907_vm3, %v774_v54  ;;  %v1209_v33 = vmul.f32 %v2397_v18, %v774_v54  ;;  %943 = vst.msk [vmem:[%s2311_s26 + $0x118] sm:$0xff] %vm907_vm3, %v2504_v27  ;;  %v1391_v55 = vsel %vm907_vm3, %v1338_v0, 0.0 }
 0x127   : > { %v778_v57 = vpop.f32.mrb[30].mxu0  ;;  %v883_v58 = vpop.f32.mrb[30].mxu1  ;;  %v1392_v60 = vadd.f32 %v1391_v55, %v1390_v25 }
 0x128   : > { %v1263_v62 = vsel %vm907_vm3, %v1209_v33, 0.0  ;;  %v1339_v63 = vmul.f32 %v1209_v33, %v774_v54  ;;  %v1704_v4 = vpop.f32.mrb[31].mxu0  ;;  %v1767_v7 = vpop.f32.mrb[31].mxu1  ;;  %v779_v9 = vadd.f32 %v2306_v38, %v778_v57  ;;  %v2519_v49 = vadd.f32 %v2306_v38, %v883_v58 }
 0x129   : > { %v1264_v8 = vadd.f32 %v1263_v62, %v1262_v13 }
 0x12a   : > { %v1393_v18 = vsel %vm907_vm3, %v1339_v63, 0.0  ;;  %923 = vst.msk [vmem:[%s2311_s26 + $0x78] sm:$0xff] %vm907_vm3, %v779_v9  ;;  %v1210_v12 = vmul.f32 %v2292_v34, %v779_v9  ;;  %944 = vst.msk [vmem:[%s2311_s26 + $0x120] sm:$0xff] %vm907_vm3, %v2519_v49 }
 0x12b   : > { %v1394_v31 = vadd.f32 %v1393_v18, %v1392_v60  ;;  %v783_v14 = vpop.f32.mrb[32].mxu0  ;;  %v888_v16 = vpop.f32.mrb[32].mxu1 }
 0x12c   : > { %v784_v17 = vadd.f32 %v2306_v38, %v783_v14  ;;  %v2530_v19 = vadd.f32 %v2306_v38, %v888_v16  ;;  %v1707_v20 = vpop.f32.mrb[33].mxu0  ;;  %v1770_v21 = vpop.f32.mrb[33].mxu1  ;;  %v1265_v22 = vsel %vm907_vm3, %v1210_v12, 0.0  ;;  %v1340_v23 = vmul.f32 %v1210_v12, %v779_v9 }
 0x12d   : > { %v1266_v43 = vadd.f32 %v1265_v22, %v1264_v8  ;;  %v1123_v18 = vpop.permute.xlu0 %1122 }
 0x12e   : > { %924 = vst.msk [vmem:[%s2311_s26 + $0x80] sm:$0xff] %vm907_vm3, %v784_v17  ;;  %v1211_v34 = vmul.f32 %v2425_v56, %v784_v17  ;;  %945 = vst.msk [vmem:[%s2311_s26 + $0x128] sm:$0xff] %vm907_vm3, %v2530_v19  ;;  %v1395_v25 = vsel %vm907_vm3, %v1340_v23, 0.0 }
 0x12f   : > { %v788_v30 = vpop.f32.mrb[34].mxu0  ;;  %v893_v45 = vpop.f32.mrb[34].mxu1  ;;  %v1396_v36 = vadd.f32 %v1395_v25, %v1394_v31 }
 0x130   : > { %v1267_v54 = vsel %vm907_vm3, %v1211_v34, 0.0  ;;  %v1341_v61 = vmul.f32 %v1211_v34, %v784_v17  ;;  %v1710_v32 = vpop.f32.mrb[35].mxu0  ;;  %v1773_v42 = vpop.f32.mrb[35].mxu1  ;;  %v789_v13 = vadd.f32 %v2306_v38, %v788_v30  ;;  %v2545_v33 = vadd.f32 %v2306_v38, %v893_v45 }
 0x131   : > { %v1268_v0 = vadd.f32 %v1267_v54, %v1266_v43  ;;  %v1216_v30 = vmul.f32 %v2321_v52, %v2315_v47  ;;  %v1133_v42 = vpop.permute.xlu0 %1132 }
 0x132   : > { %v1397_v56 = vsel %vm907_vm3, %v1341_v61, 0.0  ;;  %925 = vst.msk [vmem:[%s2311_s26 + $0x88] sm:$0xff] %vm907_vm3, %v789_v13  ;;  %v1212_v57 = vmul.f32 %v2296_v35, %v789_v13  ;;  %946 = vst.msk [vmem:[%s2311_s26 + $0x130] sm:$0xff] %vm907_vm3, %v2545_v33 }
 0x133   : > { %v1398_v55 = vadd.f32 %v1397_v56, %v1396_v36  ;;  %v793_v58 = vpop.f32.mrb[36].mxu0  ;;  %v898_v60 = vpop.f32.mrb[36].mxu1  ;;  %v1217_v56 = vmul.f32 %v2507_v48, %v2328_v59 }
 0x134   : > { %v794_v62 = vadd.f32 %v2306_v38, %v793_v58  ;;  %v2556_v63 = vadd.f32 %v2306_v38, %v898_v60  ;;  %v1713_v4 = vpop.f32.mrb[37].mxu0  ;;  %v1776_v7 = vpop.f32.mrb[37].mxu1  ;;  %v1269_v8 = vsel %vm907_vm3, %v1212_v57, 0.0  ;;  %v1342_v9 = vmul.f32 %v1212_v57, %v789_v13 }
 0x135   : > { %v1270_v31 = vadd.f32 %v1269_v8, %v1268_v0  ;;  %v1277_v7 = vsel %vm907_vm3, %v1216_v30, 0.0  ;;  %v1347_v48 = vmul.f32 %v1217_v56, %v2328_v59  ;;  %v1219_v8 = vmul.f32 %v2533_v39, %v2355_v24 }
 0x136   : > { %926 = vst.msk [vmem:[%s2311_s26 + $0x90] sm:$0xff] %vm907_vm3, %v794_v62  ;;  %v1213_v35 = vmul.f32 %v2451_v44, %v794_v62  ;;  %947 = vst.msk [vmem:[%s2311_s26 + $0x138] sm:$0xff] %vm907_vm3, %v2556_v63  ;;  %v1399_v12 = vsel %vm907_vm3, %v1342_v9, 0.0 }
 0x137   : > { %v798_v14 = vpop.f32.mrb[38].mxu0  ;;  %v903_v16 = vpop.f32.mrb[38].mxu1  ;;  %v1400_v17 = vadd.f32 %v1399_v12, %v1398_v55  ;;  %v1409_v59 = vsel %vm907_vm3, %v1347_v48, 0.0 }
 0x138   : > { %v1271_v20 = vsel %vm907_vm3, %v1213_v35, 0.0  ;;  %v1343_v21 = vmul.f32 %v1213_v35, %v794_v62  ;;  %v1716_v22 = vpop.f32.mrb[39].mxu0  ;;  %v1779_v23 = vpop.f32.mrb[39].mxu1  ;;  %v799_v34 = vadd.f32 %v2306_v38, %v798_v14  ;;  %v2569_v44 = vadd.f32 %v2306_v38, %v903_v16 }
 0x139   : > { %v1272_v43 = vadd.f32 %v1271_v20, %v1270_v31  ;;  %v1220_v14 = vmul.f32 %v2372_v46, %v2367_v2  ;;  %v1349_v20 = vmul.f32 %v1219_v8, %v2355_v24  ;;  %v1222_v46 = vmul.f32 %v2399_v28, %v2395_v15 }
 0x13a   : > { %v1401_v25 = vsel %vm907_vm3, %v1343_v21, 0.0  ;;  %927 = vst.msk [vmem:[%s2311_s26 + $0x98] sm:$0xff] %vm907_vm3, %v799_v34  ;;  %v1214_v36 = vmul.f32 %v2301_v37, %v799_v34  ;;  %948 = vst.msk [vmem:[%s2311_s26 + $0x140] sm:$0xff] %vm907_vm3, %v2569_v44  ;;  %v1346_v37 = vmul.f32 %v1216_v30, %v2315_v47  ;;  %v1143_v47 = vpop.permute.xlu0 %1142  ;;  %v1221_v21 = vmul.f32 %v1123_v18, %v2383_v3 }
 0x13b   : > { %v1402_v45 = vadd.f32 %v1401_v25, %v1400_v17  ;;  %v803_v54 = vpop.f32.mrb[40].mxu0  ;;  %v1285_v24 = vsel %vm907_vm3, %v1220_v14, 0.0  ;;  %v1224_v28 = vmul.f32 %v2427_v29, %v2423_v51 }
 0x13c   : > { %v804_v61 = vadd.f32 %v2306_v38, %v803_v54  ;;  %v1719_v32 = vpop.f32.mrb[41].mxu0  ;;  %v1273_v0 = vsel %vm907_vm3, %v1214_v36, 0.0  ;;  %v1344_v13 = vmul.f32 %v1214_v36, %v799_v34  ;;  %v1218_v38 = vmul.f32 %v2347_v6, %v2339_v11 }
 0x13d   : > { %v1274_v52 = vadd.f32 %v1273_v0, %v1272_v43  ;;  %v1407_v35 = vsel %vm907_vm3, %v1346_v37, 0.0  ;;  %v1279_v6 = vsel %vm907_vm3, %v1217_v56, 0.0  ;;  %v1283_v34 = vsel %vm907_vm3, %v1219_v8, 0.0  ;;  %v1158_v56 = vpop.permute.xlu1 %1157 }
 0x13e   : > { %928 = vst.msk [vmem:[%s2311_s26 + $0xa0] sm:$0xff] %vm907_vm3, %v804_v61  ;;  %v1215_v55 = vmul.f32 %v2481_v10, %v804_v61  ;;  %v1403_v57 = vsel %vm907_vm3, %v1344_v13, 0.0  ;;  %v1348_v12 = vmul.f32 %v1218_v38, %v2339_v11  ;;  %v1281_v39 = vsel %vm907_vm3, %v1218_v38, 0.0  ;;  %v1153_v25 = vpop.permute.xlu0 %1152 }
 0x13f   : > { %v1404_v58 = vadd.f32 %v1403_v57, %v1402_v45  ;;  %v1350_v11 = vmul.f32 %v1220_v14, %v2367_v2  ;;  %v1413_v36 = vsel %vm907_vm3, %v1349_v20, 0.0  ;;  %v1351_v18 = vmul.f32 %v1221_v21, %v2383_v3 }
 0x140   : > { %v1275_v60 = vsel %vm907_vm3, %v1215_v55, 0.0  ;;  %v1345_v62 = vmul.f32 %v1215_v55, %v804_v61  ;;  %v1411_v43 = vsel %vm907_vm3, %v1348_v12, 0.0  ;;  %v1223_v54 = vmul.f32 %v1133_v42, %v2411_v50 }
 0x141   : > { %v1276_v4 = vadd.f32 %v1275_v60, %v1274_v52  ;;  %v1415_v0 = vsel %vm907_vm3, %v1350_v11, 0.0  ;;  %v1287_v2 = vsel %vm907_vm3, %v1221_v21, 0.0  ;;  %v1352_v13 = vmul.f32 %v1222_v46, %v2395_v15 }
 0x142   : > { %v1405_v10 = vsel %vm907_vm3, %v1345_v62, 0.0  ;;  %v1417_v37 = vsel %vm907_vm3, %v1351_v18, 0.0  ;;  %v1289_v3 = vsel %vm907_vm3, %v1222_v46, 0.0  ;;  %v1353_v42 = vmul.f32 %v1223_v54, %v2411_v50  ;;  %v1163_v38 = vpop.permute.xlu0 %1162 }
 0x143   : > { %v1278_v9 = vadd.f32 %v1277_v7, %v1276_v4  ;;  %v1406_v31 = vadd.f32 %v1405_v10, %v1404_v58  ;;  %v1225_v57 = vmul.f32 %v1143_v47, %v2439_v5  ;;  %v1419_v62 = vsel %vm907_vm3, %v1352_v13, 0.0  ;;  %v1168_v47 = vpop.permute.xlu1 %1167 }
 0x144   : > { %v1291_v15 = vsel %vm907_vm3, %v1223_v54, 0.0  ;;  %v1354_v29 = vmul.f32 %v1224_v28, %v2423_v51  ;;  %v1421_v48 = vsel %vm907_vm3, %v1353_v42, 0.0  ;;  %v1293_v8 = vsel %vm907_vm3, %v1224_v28, 0.0 }
 0x145   : > { %v1280_v16 = vadd.f32 %v1279_v6, %v1278_v9  ;;  %v1408_v17 = vadd.f32 %v1407_v35, %v1406_v31  ;;  %v1355_v10 = vmul.f32 %v1225_v57, %v2439_v5  ;;  %v1227_v50 = vmul.f32 %v1153_v25, %v2467_v53 }
 0x146   : > { %v1423_v35 = vsel %vm907_vm3, %v1354_v29, 0.0  ;;  %v1295_v6 = vsel %vm907_vm3, %v1225_v57, 0.0  ;;  %v1228_v12 = vmul.f32 %v1158_v56, %v2478_v1  ;;  %v1173_v51 = vpop.permute.xlu0 %1172 }
 0x147   : > { %v1282_v22 = vadd.f32 %v1281_v39, %v1280_v16  ;;  %v1410_v23 = vadd.f32 %v1409_v59, %v1408_v17  ;;  %v1425_v17 = vsel %vm907_vm3, %v1355_v10, 0.0  ;;  %v1297_v59 = vsel %vm907_vm3, %v2459_v26, 0.0  ;;  %v1178_v11 = vpop.permute.xlu1 %1177 }
 0x148   : > { %v1357_v5 = vmul.f32 %v1227_v50, %v2467_v53  ;;  %v1229_v39 = vmul.f32 %v1163_v38, %v2493_v40  ;;  %v1301_v53 = vsel %vm907_vm3, %v1228_v12, 0.0 }
 0x149   : > { %v1284_v30 = vadd.f32 %v1283_v34, %v1282_v22  ;;  %v1412_v45 = vadd.f32 %v1411_v43, %v1410_v23  ;;  %v1427_v22 = vsel %vm907_vm3, %v2463_v41, 0.0  ;;  %v1299_v23 = vsel %vm907_vm3, %v1227_v50, 0.0 }
 0x14a   : > { %v1358_v43 = vmul.f32 %v1228_v12, %v2478_v1  ;;  %v1230_v34 = vmul.f32 %v1168_v47, %v2504_v27  ;;  %v1429_v26 = vsel %vm907_vm3, %v1357_v5, 0.0  ;;  %v1303_v1 = vsel %vm907_vm3, %v1229_v39, 0.0 }
 0x14b   : > { %v1286_v61 = vadd.f32 %v1285_v24, %v1284_v30  ;;  %v1414_v32 = vadd.f32 %v1413_v36, %v1412_v45  ;;  %v1359_v30 = vmul.f32 %v1229_v39, %v2493_v40  ;;  %v1231_v45 = vmul.f32 %v1173_v51, %v2519_v49  ;;  %v1183_v36 = vpop.permute.xlu0 %1182  ;;  %v1188_v56 = vpop.permute.xlu1 %1187 }
 0x14c   : > { %v1431_v18 = vsel %vm907_vm3, %v1358_v43, 0.0  ;;  %v1360_v54 = vmul.f32 %v1230_v34, %v2504_v27  ;;  %v1305_v13 = vsel %vm907_vm3, %v1230_v34, 0.0  ;;  %v1233_v28 = vmul.f32 %v1183_v36, %v2545_v33 }
 0x14d   : > { %v1288_v52 = vadd.f32 %v1287_v2, %v1286_v61  ;;  %v1416_v55 = vadd.f32 %v1415_v0, %v1414_v32  ;;  %v1232_v61 = vmul.f32 %v1178_v11, %v2530_v19  ;;  %v1433_v2 = vsel %vm907_vm3, %v1359_v30, 0.0 }
 0x14e   : > { %v1361_v40 = vmul.f32 %v1231_v45, %v2519_v49  ;;  %v1234_v42 = vmul.f32 %v1188_v56, %v2556_v63 }
 0x14f   : > { %v1290_v58 = vadd.f32 %v1289_v3, %v1288_v52  ;;  %v1418_v60 = vadd.f32 %v1417_v37, %v1416_v55  ;;  %v1435_v37 = vsel %vm907_vm3, %v1360_v54, 0.0  ;;  %v1307_v3 = vsel %vm907_vm3, %v1231_v45, 0.0  ;;  %v1193_v57 = vpop.permute.xlu0 %1192 }
 0x150   : > { %v1362_v27 = vmul.f32 %v1232_v61, %v2530_v19  ;;  %v1309_v49 = vsel %vm907_vm3, %v1232_v61, 0.0  ;;  %v1364_v19 = vmul.f32 %v1234_v42, %v2556_v63  ;;  %v1313_v47 = vsel %vm907_vm3, %v1234_v42, 0.0 }
 0x151   : > { %v1292_v4 = vadd.f32 %v1291_v15, %v1290_v58  ;;  %v1420_v7 = vadd.f32 %v1419_v62, %v1418_v60  ;;  %v1437_v60 = vsel %vm907_vm3, %v1361_v40, 0.0  ;;  %v1363_v62 = vmul.f32 %v1233_v28, %v2545_v33 }
 0x152   : > { %v1235_v15 = vmul.f32 %v1193_v57, %v2569_v44 }
 0x153   : > { %v1294_v9 = vadd.f32 %v1293_v8, %v1292_v4  ;;  %v1422_v31 = vadd.f32 %v1421_v48, %v1420_v7  ;;  %v1439_v7 = vsel %vm907_vm3, %v1362_v27, 0.0  ;;  %v1311_v48 = vsel %vm907_vm3, %v1233_v28, 0.0 }
 0x154   : > { %v1441_v50 = vsel %vm907_vm3, %v1363_v62, 0.0 }
 0x155   : > { %v1296_v14 = vadd.f32 %v1295_v6, %v1294_v9  ;;  %v1424_v16 = vadd.f32 %v1423_v35, %v1422_v31  ;;  %v1365_v9 = vmul.f32 %v1235_v15, %v2569_v44  ;;  %v1443_v35 = vsel %vm907_vm3, %v1364_v19, 0.0 }
 0x156   : > { %v1315_v6 = vsel %vm907_vm3, %v1235_v15, 0.0 }
 0x157   : > { %v1298_v20 = vadd.f32 %v1297_v59, %v1296_v14  ;;  %v1426_v21 = vadd.f32 %v1425_v17, %v1424_v16  ;;  %v1445_v63 = vsel %vm907_vm3, %v1365_v9, 0.0 }
 0x159   : > { %v1300_v46 = vadd.f32 %v1299_v23, %v1298_v20  ;;  %v1428_v25 = vadd.f32 %v1427_v22, %v1426_v21 }
 0x15b   : > { %v1302_v24 = vadd.f32 %v1301_v53, %v1300_v46  ;;  %v1430_v41 = vadd.f32 %v1429_v26, %v1428_v25 }
 0x15d   : > { %v1304_v32 = vadd.f32 %v1303_v1, %v1302_v24  ;;  %v1432_v0 = vadd.f32 %v1431_v18, %v1430_v41 }
 0x15f   : > { %v1306_v52 = vadd.f32 %v1305_v13, %v1304_v32  ;;  %v1434_v55 = vadd.f32 %v1433_v2, %v1432_v0 }
 0x161   : > { %v1308_v38 = vadd.f32 %v1307_v3, %v1306_v52  ;;  %v1436_v58 = vadd.f32 %v1435_v37, %v1434_v55 }
 0x163   : > { %v1310_v29 = vadd.f32 %v1309_v49, %v1308_v38  ;;  %v1438_v4 = vadd.f32 %v1437_v60, %v1436_v58 }
 0x165   : > { %v1312_v8 = vadd.f32 %v1311_v48, %v1310_v29  ;;  %v1440_v10 = vadd.f32 %v1439_v7, %v1438_v4 }
 0x167   : > { %v1314_v31 = vadd.f32 %v1313_v47, %v1312_v8  ;;  %v1442_v33 = vadd.f32 %v1441_v50, %v1440_v10 }
 0x169   : > { %v1316_v12 = vadd.f32 %v1315_v6, %v1314_v31  ;;  %v1444_v51 = vadd.f32 %v1443_v35, %v1442_v33 }
 0x16b   : > { %v1317_v14 = vrot.slane %v1316_v12, 4  ;;  %v1446_v16 = vadd.f32 %v1445_v63, %v1444_v51 }
 0x16d   : > { %v1318_v17 = vadd.f32 %v1317_v14, %v1316_v12  ;;  %v1447_v59 = vrot.slane %v1446_v16, 4 }
 0x16f   : > { %v1319_v5 = vrot.slane %v1318_v17, 2  ;;  %v1448_v39 = vadd.f32 %v1447_v59, %v1446_v16 }
 0x171   : > { %v1320_v20 = vadd.f32 %v1319_v5, %v1318_v17  ;;  %v1449_v44 = vrot.slane %v1448_v39, 2 }
 0x173   : > { %v1321_v21 = vrot.slane %v1320_v20, 1  ;;  %v1450_v22 = vadd.f32 %v1449_v44, %v1448_v39 }
 0x175   : > { %v1322_v23 = vadd.f32 %v1321_v21, %v1320_v20  ;;  %v1451_v43 = vrot.slane %v1450_v22, 1 }
 0x177   : > { %1324 = vst.msk [vmem:[%s319_s9] sm:$0x1] %vm1323_vm4, %v1322_v23  ;;  %v1452_v34 = vadd.f32 %v1451_v43, %v1450_v22 }
 0x179   : > { %1453 = vst.msk [vmem:[%s322_s12] sm:$0x1] %vm1323_vm4, %v1452_v34 }
 0x17a PF: > { %s19_s27 = sadd.s32 1, %s1803_s27  }
 0x17b   : > { %p16_p4 = scmp.ge.s32.totalorder %s19_s27, 4  }
 0x17d   :  { %18 = sbr.rel (!%p16_p4) target bundleno = 1 (0x1), region = 98 }

// kernel: bridge_up.4
= control target key start
LH: loop header
LB: loop body
LE: loop exit
PB: predicated region body
PF: predicated region fallthrough
CT: control target
= control target key end

     0   :  { %12 = vsyncpa [#allocation3], 0  ;;  %s9948_s0 = inlined_call_operand.vmem [shape: f32[2,376,4], index: 0, kind: input, shape index: {}]   ;;  %s9949_s1 = inlined_call_operand.vmem [shape: f32[9,4,4], index: 1, kind: input, shape index: {}]   ;;  %s9950_s2 = inlined_call_operand.vmem [shape: f32[1,4], index: 2, kind: input, shape index: {}]   ;;  %s9951_s3 = inlined_call_operand.vmem [shape: f32[328,1], index: 3, kind: input, shape index: {}]   ;;  %s9952_s4 = inlined_call_operand.vmem [shape: f32[2,376,4], index: 4, kind: output, shape index: {0}]   ;;  %s9953_s5 = inlined_call_operand.hbm [shape: f32[2,1,4], index: 5, kind: output, shape index: {1}]   ;;  %s9954_s6 = inlined_call_operand.hbm [shape: f32[2,1,4], index: 6, kind: output, shape index: {2}]  }
   0x1   :  { %14 = vsyncpa [#allocation3 + $0x1], 0 }
   0x2   :  { %15 = vsyncpa [#allocation5], 0 }
   0x3   :  { %17 = vsyncpa [#allocation5 + $0x1], 0  ;;  %s7345_s21 = smov 0   ;;  %s7347_s22 = smov 0  }
   0x4   :  { %s7349_s23 = smov 0   ;;  %s7351_s24 = smov 0  }
   0x5 LB: > { %s7366_s25 = sadd.s32 4294967295, %s7303_s24   ;;  %s5256_s26 = sadd.s32 4294967294, %s7303_s24   ;;  %s7303_s24 = sphi %s7351_s24, %s9988_s24   ;;  %s7299_s23 = sphi %s7349_s23, %s9987_s23   ;;  %s7295_s22 = sphi %s7347_s22, %s9986_s22   ;;  %s7291_s21 = sphi %s7345_s21, %s9985_s21  }
   0x6   : > { %s7370_s27 = sadd.s32 1, %s7303_s24   ;;  %s145_s28 = sadd.s32 1, %s7299_s23 }
   0x7   : > { %s142_s29 = ssub.s32 %s7303_s24, %s7370_s27  ;;  %p155_p0 = scmp.ne.s32.totalorder %s7299_s23, %s7295_s22 }
   0x8   : > { %p143_p1 = scmp.eq.s32.totalorder %s142_s29, 0  ;;  %p156_p2 = scmp.eq.s32.totalorder %s7366_s25, 1 }
   0x9   : > { %p161_p3 = scmp.ne.s32.totalorder %s7295_s22, %s7291_s21  ;;  %p162_p4 = scmp.eq.s32.totalorder %s5256_s26, 1 }
   0xa   : > { %s7381_s30 = scalar_select %p143_p1, %s7299_s23, %s145_s28  }
   0xb   : > { %p7383_p5 = por %p156_p2, %p155_p0  ;;  %p7387_p6 = por %p162_p4, %p161_p3 }
   0xc   : > { %p5259_p7 = scmp.ge.s32.totalorder %s7303_s24, 1  ;;  %p223_p8 = scmp.lt.s32.totalorder %s7303_s24, 3 }
   0xe   : > { %p224_p9 = pnand %p5259_p7, %p223_p8 }
  0x10   : > { %227 = sbr.rel (%p224_p9) target bundleno = 1037 (0x40d), region = 36 }
  0x17   : > { %v5262_v0 = vld [vmem:[%s9949_s1 + $0x4] sm:$0xf]  ;;  %vm480_vm0 = vcmask 1043456   ;;  %p261_p10 = scmp.lt.s32.totalorder %s7366_s25, 1  ;;  %v7305_v1 = vmov 0.0   ;;  %vm7306_vm1 = vmmov 0  }
  0x18   : > { %6031 = vmatprep.subr.mxu0 %v7305_v1  ;;  %7156 = vmatprep.subr.mxu1 %v7305_v1  ;;  %vm356_vm2 = vcmask 31744   ;;  %v5347_v2 = vld [vmem:[%s9949_s1 + $0x8] sm:$0xf]  ;;  %v312_v3 = vld [vmem:[%s9949_s1] sm:$0xf]  ;;  %s9862_s28 = sand.u32 1, %s7295_s22  }
  0x19   : > { %6032 = vmatpush3.msk.msra.mxu0 %vm480_vm0, %v5262_v0  ;;  %7157 = vmatpush3.msk.msra.mxu1 %vm480_vm0, %v5262_v0  ;;  %s7402_s11 = scalar_select %p261_p10, %s7366_s25, 1  ;;  %v5390_v46 = vld [vmem:[%s9949_s1 + $0xc] sm:$0xf]  ;;  %v5433_v49 = vld [vmem:[%s9949_s1 + $0x10] sm:$0xf]  ;;  %vm4979_vm3 = vcmask 24576  }
  0x1a   : > { %6033 = vmatprep.mubr.msk.f32.mxu0 %vm7306_vm1, %v7305_v1  ;;  %6096 = vmatprep.mubr.msk.f32.mxu1 %vm7306_vm1, %v7305_v1  ;;  %s5649_s29 = sshll.u32 %s7366_s25, 4  ;;  %s254_s9 = scalar_lea.vmem [#allocation2], %s9862_s28 }
  0x1b   : > { %6281 = vmatprep.subr.mxu0 %v7305_v1  ;;  %s7158_s12 = smul.u32 376, %s7402_s11  ;;  %6156 = vmatprep.subr.mxu1 %v7305_v1  ;;  %s5135_s10 = sshll.u32 %s254_s9, 4  ;;  %s9874_s10 = int_to_ptr.vmem [resolvable:$true] %s5135_s10 }
  0x1c   : > { %s260_s13 = scalar_lea.vmem [#allocation4], %s9862_s28  ;;  %s9872_s18 = scalar_lea.hbm %s9953_s5, %s5649_s29 }
  0x1d   : > { %s7416_s15 = scalar_lea.vmem %s9948_s0, %s7158_s12  ;;  %s9345_s20 = scalar_lea.vmem %s9952_s4, %s7158_s12 }
  0x1e   : > { %v313_v4 = vld [vmem:[%s7416_s15 + $0x6] sm:$0xff]  ;;  %v334_v5 = vld [vmem:[%s7416_s15 + $0xae] sm:$0xff]  ;;  %v335_v7 = vld [vmem:[%s7416_s15 + $0xb6] sm:$0xff]  ;;  %4845 = vst.msk [vmem:[%s9345_s20] sm:$0xff] %vm356_vm2, %v7305_v1  ;;  %s5148_s14 = sshll.u32 %s260_s13, 4  ;;  %s5116_s11 = scalar_lea.sflag [#allocation3], %s9862_s28  ;;  %s9882_s14 = int_to_ptr.vmem [resolvable:$true] %s5148_s14 }
  0x1f   : > { %6034 = vmatmul.mubr.msk.f32.vlgmr.msra.gmra.mrb[0].mxu0 %vm356_vm2, %v313_v4  ;;  %6097 = vmatmul.mubr.msk.f32.vlgmr.msra.gmra.mrb[0].mxu1 %vm356_vm2, %v334_v5  ;;  %v314_v6 = vld [vmem:[%s7416_s15 + $0xe] sm:$0xff]  ;;  %v315_v8 = vld [vmem:[%s7416_s15 + $0x16] sm:$0xff]  ;;  %v336_v9 = vld [vmem:[%s7416_s15 + $0xbe] sm:$0xff]  ;;  %4846 = vst.msk [vmem:[%s9345_s20 + $0x8] sm:$0xff] %vm356_vm2, %v7305_v1  ;;  %s7209_s12 = scalar_lea.vmem %s9874_s10, 16 }
  0x20   : > { %6282 = vmatpush3.msk.msra.mxu0 %vm480_vm0, %v5347_v2  ;;  %6157 = vmatpush3.msk.msra.mxu1 %vm480_vm0, %v312_v3  ;;  %v316_v10 = vld [vmem:[%s7416_s15 + $0x1e] sm:$0xff]  ;;  %v337_v11 = vld [vmem:[%s7416_s15 + $0xc6] sm:$0xff]  ;;  %v338_v13 = vld [vmem:[%s7416_s15 + $0xce] sm:$0xff]  ;;  %4847 = vst.msk [vmem:[%s9345_s20 + $0x10] sm:$0xff] %vm356_vm2, %v7305_v1  ;;  %p7210_p11 = scmp.ne.s32.totalorder %s9874_s10, %s7209_s12 }
  0x21   : > { %6036 = vmatprep.mubr.msk.f32.mxu0 %vm7306_vm1, %v7305_v1  ;;  %6099 = vmatprep.mubr.msk.f32.mxu1 %vm7306_vm1, %v7305_v1  ;;  %v317_v12 = vld [vmem:[%s7416_s15 + $0x26] sm:$0xff]  ;;  %v318_v14 = vld [vmem:[%s7416_s15 + $0x2e] sm:$0xff]  ;;  %v339_v15 = vld [vmem:[%s7416_s15 + $0xd6] sm:$0xff]  ;;  %4889 = vst.msk [vmem:[%s9345_s20 + $0x160] sm:$0xff] %vm356_vm2, %v7305_v1 }
  0x22   : > { %6406 = vmatprep.subr.mxu1 %v7305_v1  ;;  %6531 = vmatprep.subr.mxu0 %v7305_v1  ;;  %v319_v16 = vld [vmem:[%s7416_s15 + $0x36] sm:$0xff]  ;;  %v340_v17 = vld [vmem:[%s7416_s15 + $0xde] sm:$0xff]  ;;  %v341_v19 = vld [vmem:[%s7416_s15 + $0xe6] sm:$0xff]  ;;  %4890 = vst.msk [vmem:[%s9345_s20 + $0x168] sm:$0xff] %vm356_vm2, %v7305_v1  ;;  %p7211_p12 = pnand %p7210_p11, %p7383_p5 }
  0x23   : > { %6037 = vmatmul.mubr.msk.f32.gmra.mrb[2].mxu0 %vm356_vm2, %v314_v6  ;;  %6100 = vmatmul.mubr.msk.f32.gmra.mrb[2].mxu1 %vm356_vm2, %v335_v7  ;;  %v320_v18 = vld [vmem:[%s7416_s15 + $0x3e] sm:$0xff]  ;;  %v321_v20 = vld [vmem:[%s7416_s15 + $0x46] sm:$0xff]  ;;  %v342_v21 = vld [vmem:[%s7416_s15 + $0xee] sm:$0xff]  ;;  %4891 = vst.msk [vmem:[%s9345_s20 + $0x170] sm:$0xff] %vm356_vm2, %v7305_v1 }
  0x24   : > { %6039 = vmatprep.mubr.msk.f32.mxu0 %vm7306_vm1, %v7305_v1  ;;  %6102 = vmatprep.mubr.msk.f32.mxu1 %vm7306_vm1, %v7305_v1  ;;  %v322_v22 = vld [vmem:[%s7416_s15 + $0x4e] sm:$0xff]  ;;  %v343_v23 = vld [vmem:[%s7416_s15 + $0xf6] sm:$0xff]  ;;  %v344_v25 = vld [vmem:[%s7416_s15 + $0xfe] sm:$0xff]  ;;  %p7212_p13 = pneg %p7211_p12 }
  0x25   : > { %v323_v24 = vld [vmem:[%s7416_s15 + $0x56] sm:$0xff]  ;;  %v324_v26 = vld [vmem:[%s7416_s15 + $0x5e] sm:$0xff]  ;;  %v345_v27 = vld [vmem:[%s7416_s15 + $0x106] sm:$0xff] }
  0x26   : > { %v325_v28 = vld [vmem:[%s7416_s15 + $0x66] sm:$0xff]  ;;  %v346_v29 = vld [vmem:[%s7416_s15 + $0x10e] sm:$0xff]  ;;  %v347_v31 = vld [vmem:[%s7416_s15 + $0x116] sm:$0xff] }
  0x27   : > { %6040 = vmatmul.mubr.msk.f32.gmra.mrb[4].mxu0 %vm356_vm2, %v315_v8  ;;  %6103 = vmatmul.mubr.msk.f32.gmra.mrb[4].mxu1 %vm356_vm2, %v336_v9  ;;  %v326_v30 = vld [vmem:[%s7416_s15 + $0x6e] sm:$0xff]  ;;  %v327_v32 = vld [vmem:[%s7416_s15 + $0x76] sm:$0xff]  ;;  %v348_v33 = vld [vmem:[%s7416_s15 + $0x11e] sm:$0xff] }
  0x28   : > { %6042 = vmatprep.mubr.msk.f32.mxu0 %vm7306_vm1, %v7305_v1  ;;  %6105 = vmatprep.mubr.msk.f32.mxu1 %vm7306_vm1, %v7305_v1  ;;  %v328_v34 = vld [vmem:[%s7416_s15 + $0x7e] sm:$0xff]  ;;  %v349_v35 = vld [vmem:[%s7416_s15 + $0x126] sm:$0xff]  ;;  %v350_v37 = vld [vmem:[%s7416_s15 + $0x12e] sm:$0xff] }
  0x29   : > { %v329_v36 = vld [vmem:[%s7416_s15 + $0x86] sm:$0xff]  ;;  %v330_v38 = vld [vmem:[%s7416_s15 + $0x8e] sm:$0xff]  ;;  %v351_v39 = vld [vmem:[%s7416_s15 + $0x136] sm:$0xff] }
  0x2a   : > { %v331_v40 = vld [vmem:[%s7416_s15 + $0x96] sm:$0xff]  ;;  %v352_v41 = vld [vmem:[%s7416_s15 + $0x13e] sm:$0xff]  ;;  %v353_v43 = vld [vmem:[%s7416_s15 + $0x146] sm:$0xff] }
  0x2b   : > { %6043 = vmatmul.mubr.msk.f32.gmra.mrb[6].mxu0 %vm356_vm2, %v316_v10  ;;  %6106 = vmatmul.mubr.msk.f32.gmra.mrb[6].mxu1 %vm356_vm2, %v337_v11  ;;  %v332_v42 = vld [vmem:[%s7416_s15 + $0x9e] sm:$0xff]  ;;  %v333_v44 = vld [vmem:[%s7416_s15 + $0xa6] sm:$0xff]  ;;  %v273_v50 = vld [vmem:[%s7416_s15 + $0x15] sm:$0xff] }
  0x2c   : > { %6045 = vmatprep.mubr.msk.f32.mxu0 %vm7306_vm1, %v7305_v1  ;;  %6108 = vmatprep.mubr.msk.f32.mxu1 %vm7306_vm1, %v7305_v1  ;;  %v271_v45 = vld [vmem:[%s7416_s15 + $0x5] sm:$0xff]  ;;  %v272_v47 = vld [vmem:[%s7416_s15 + $0xd] sm:$0xff]  ;;  %v274_v52 = vld [vmem:[%s7416_s15 + $0x1d] sm:$0xff] }
  0x2d   : > { %v1150_v48 = vld [vmem:[%s7416_s15 + $0x7] sm:$0xff]  ;;  %v1151_v51 = vld [vmem:[%s7416_s15 + $0xf] sm:$0xff]  ;;  %v7624_v53 = vld [vmem:[%s7416_s15 + $0x17] sm:$0xff] }
  0x2e   : > { %v275_v54 = vld [vmem:[%s7416_s15 + $0x25] sm:$0xff]  ;;  %v276_v56 = vld [vmem:[%s7416_s15 + $0x2d] sm:$0xff]  ;;  %v277_v58 = vld [vmem:[%s7416_s15 + $0x35] sm:$0xff] }
  0x2f   : > { %6046 = vmatmul.mubr.msk.f32.gmra.mrb[8].mxu0 %vm356_vm2, %v317_v12  ;;  %6109 = vmatmul.mubr.msk.f32.gmra.mrb[8].mxu1 %vm356_vm2, %v338_v13  ;;  %v7635_v55 = vld [vmem:[%s7416_s15 + $0x1f] sm:$0xff]  ;;  %v7646_v57 = vld [vmem:[%s7416_s15 + $0x27] sm:$0xff]  ;;  %v7657_v59 = vld [vmem:[%s7416_s15 + $0x2f] sm:$0xff] }
  0x30   : > { %6048 = vmatprep.mubr.msk.f32.mxu0 %vm7306_vm1, %v7305_v1  ;;  %6111 = vmatprep.mubr.msk.f32.mxu1 %vm7306_vm1, %v7305_v1  ;;  %v278_v60 = vld [vmem:[%s7416_s15 + $0x3d] sm:$0xff]  ;;  %v279_v62 = vld [vmem:[%s7416_s15 + $0x45] sm:$0xff]  ;;  %v280_v0 = vld [vmem:[%s7416_s15 + $0x4d] sm:$0xff] }
  0x31   : > { %v7668_v61 = vld [vmem:[%s7416_s15 + $0x37] sm:$0xff]  ;;  %v7679_v63 = vld [vmem:[%s7416_s15 + $0x3f] sm:$0xff]  ;;  %v7690_v2 = vld [vmem:[%s7416_s15 + $0x47] sm:$0xff] }
  0x32   : > { %v281_v3 = vld [vmem:[%s7416_s15 + $0x55] sm:$0xff]  ;;  %v282_v5 = vld [vmem:[%s7416_s15 + $0x5d] sm:$0xff]  ;;  %v283_v7 = vld [vmem:[%s7416_s15 + $0x65] sm:$0xff] }
  0x33   : > { %6049 = vmatmul.mubr.msk.f32.gmra.mrb[10].mxu0 %vm356_vm2, %v318_v14  ;;  %6112 = vmatmul.mubr.msk.f32.gmra.mrb[10].mxu1 %vm356_vm2, %v339_v15  ;;  %v7701_v4 = vld [vmem:[%s7416_s15 + $0x4f] sm:$0xff]  ;;  %v7712_v6 = vld [vmem:[%s7416_s15 + $0x57] sm:$0xff]  ;;  %v7723_v8 = vld [vmem:[%s7416_s15 + $0x5f] sm:$0xff] }
  0x34   : > { %6051 = vmatprep.mubr.msk.f32.mxu0 %vm7306_vm1, %v7305_v1  ;;  %6114 = vmatprep.mubr.msk.f32.mxu1 %vm7306_vm1, %v7305_v1  ;;  %v284_v9 = vld [vmem:[%s7416_s15 + $0x6d] sm:$0xff]  ;;  %v285_v11 = vld [vmem:[%s7416_s15 + $0x75] sm:$0xff]  ;;  %v286_v13 = vld [vmem:[%s7416_s15 + $0x7d] sm:$0xff] }
  0x35   : > { %v7734_v10 = vld [vmem:[%s7416_s15 + $0x67] sm:$0xff]  ;;  %v7745_v12 = vld [vmem:[%s7416_s15 + $0x6f] sm:$0xff]  ;;  %v7756_v14 = vld [vmem:[%s7416_s15 + $0x77] sm:$0xff] }
  0x36   : > { %v287_v15 = vld [vmem:[%s7416_s15 + $0x85] sm:$0xff] }
  0x37   : > { %6052 = vmatmul.mubr.msk.f32.gmra.mrb[12].mxu0 %vm356_vm2, %v319_v16  ;;  %6115 = vmatmul.mubr.msk.f32.gmra.mrb[12].mxu1 %vm356_vm2, %v340_v17  ;;  %v7767_v16 = vld [vmem:[%s7416_s15 + $0x7f] sm:$0xff]  ;;  %v288_v17 = vld [vmem:[%s7416_s15 + $0x8d] sm:$0xff] }
  0x38   : > { %6054 = vmatprep.mubr.msk.f32.mxu0 %vm7306_vm1, %v7305_v1  ;;  %6117 = vmatprep.mubr.msk.f32.mxu1 %vm7306_vm1, %v7305_v1 }
  0x3b   : > { %6055 = vmatmul.mubr.msk.f32.gmra.mrb[14].mxu0 %vm356_vm2, %v320_v18  ;;  %6118 = vmatmul.mubr.msk.f32.gmra.mrb[14].mxu1 %vm356_vm2, %v341_v19  ;;  %v7778_v18 = vld [vmem:[%s7416_s15 + $0x87] sm:$0xff]  ;;  %v289_v19 = vld [vmem:[%s7416_s15 + $0x95] sm:$0xff] }
  0x3c   : > { %6057 = vmatprep.mubr.msk.f32.mxu0 %vm7306_vm1, %v7305_v1  ;;  %6120 = vmatprep.mubr.msk.f32.mxu1 %vm7306_vm1, %v7305_v1 }
  0x3f   : > { %6058 = vmatmul.mubr.msk.f32.gmra.mrb[16].mxu0 %vm356_vm2, %v321_v20  ;;  %6121 = vmatmul.mubr.msk.f32.gmra.mrb[16].mxu1 %vm356_vm2, %v342_v21  ;;  %v7789_v20 = vld [vmem:[%s7416_s15 + $0x8f] sm:$0xff]  ;;  %v290_v21 = vld [vmem:[%s7416_s15 + $0x9d] sm:$0xff] }
  0x40   : > { %6060 = vmatprep.mubr.msk.f32.mxu0 %vm7306_vm1, %v7305_v1  ;;  %6123 = vmatprep.mubr.msk.f32.mxu1 %vm7306_vm1, %v7305_v1 }
  0x43   : > { %6061 = vmatmul.mubr.msk.f32.gmra.mrb[18].mxu0 %vm356_vm2, %v322_v22  ;;  %6124 = vmatmul.mubr.msk.f32.gmra.mrb[18].mxu1 %vm356_vm2, %v343_v23  ;;  %v7800_v22 = vld [vmem:[%s7416_s15 + $0x97] sm:$0xff]  ;;  %v291_v23 = vld [vmem:[%s7416_s15 + $0xa5] sm:$0xff] }
  0x44   : > { %6063 = vmatprep.mubr.msk.f32.mxu0 %vm7306_vm1, %v7305_v1  ;;  %6126 = vmatprep.mubr.msk.f32.mxu1 %vm7306_vm1, %v7305_v1 }
  0x47   : > { %6064 = vmatmul.mubr.msk.f32.gmra.mrb[20].mxu0 %vm356_vm2, %v323_v24  ;;  %6127 = vmatmul.mubr.msk.f32.gmra.mrb[20].mxu1 %vm356_vm2, %v344_v25  ;;  %v7811_v24 = vld [vmem:[%s7416_s15 + $0x9f] sm:$0xff]  ;;  %v292_v25 = vld [vmem:[%s7416_s15 + $0xad] sm:$0xff] }
  0x48   : > { %6066 = vmatprep.mubr.msk.f32.mxu0 %vm7306_vm1, %v7305_v1  ;;  %6129 = vmatprep.mubr.msk.f32.mxu1 %vm7306_vm1, %v7305_v1 }
  0x4b   : > { %6067 = vmatmul.mubr.msk.f32.gmra.mrb[22].mxu0 %vm356_vm2, %v324_v26  ;;  %6130 = vmatmul.mubr.msk.f32.gmra.mrb[22].mxu1 %vm356_vm2, %v345_v27  ;;  %v7822_v26 = vld [vmem:[%s7416_s15 + $0xa7] sm:$0xff]  ;;  %v293_v27 = vld [vmem:[%s7416_s15 + $0xb5] sm:$0xff] }
  0x4c   : > { %6069 = vmatprep.mubr.msk.f32.mxu0 %vm7306_vm1, %v7305_v1  ;;  %6132 = vmatprep.mubr.msk.f32.mxu1 %vm7306_vm1, %v7305_v1 }
  0x4f   : > { %6070 = vmatmul.mubr.msk.f32.gmra.mrb[24].mxu0 %vm356_vm2, %v325_v28  ;;  %6133 = vmatmul.mubr.msk.f32.gmra.mrb[24].mxu1 %vm356_vm2, %v346_v29  ;;  %v7833_v28 = vld [vmem:[%s7416_s15 + $0xaf] sm:$0xff]  ;;  %v294_v29 = vld [vmem:[%s7416_s15 + $0xbd] sm:$0xff] }
  0x50   : > { %6072 = vmatprep.mubr.msk.f32.mxu0 %vm7306_vm1, %v7305_v1  ;;  %6135 = vmatprep.mubr.msk.f32.mxu1 %vm7306_vm1, %v7305_v1 }
  0x53   : > { %6073 = vmatmul.mubr.msk.f32.gmra.mrb[26].mxu0 %vm356_vm2, %v326_v30  ;;  %6136 = vmatmul.mubr.msk.f32.gmra.mrb[26].mxu1 %vm356_vm2, %v347_v31  ;;  %v7844_v30 = vld [vmem:[%s7416_s15 + $0xb7] sm:$0xff]  ;;  %v295_v31 = vld [vmem:[%s7416_s15 + $0xc5] sm:$0xff] }
  0x54   : > { %6075 = vmatprep.mubr.msk.f32.mxu0 %vm7306_vm1, %v7305_v1  ;;  %6138 = vmatprep.mubr.msk.f32.mxu1 %vm7306_vm1, %v7305_v1 }
  0x57   : > { %6076 = vmatmul.mubr.msk.f32.gmra.mrb[28].mxu0 %vm356_vm2, %v327_v32  ;;  %6139 = vmatmul.mubr.msk.f32.gmra.mrb[28].mxu1 %vm356_vm2, %v348_v33  ;;  %v7855_v32 = vld [vmem:[%s7416_s15 + $0xbf] sm:$0xff]  ;;  %v296_v33 = vld [vmem:[%s7416_s15 + $0xcd] sm:$0xff] }
  0x58   : > { %6078 = vmatprep.mubr.msk.f32.mxu0 %vm7306_vm1, %v7305_v1  ;;  %6141 = vmatprep.mubr.msk.f32.mxu1 %vm7306_vm1, %v7305_v1 }
  0x5b   : > { %6079 = vmatmul.mubr.msk.f32.gmra.mrb[30].mxu0 %vm356_vm2, %v328_v34  ;;  %6142 = vmatmul.mubr.msk.f32.gmra.mrb[30].mxu1 %vm356_vm2, %v349_v35  ;;  %v7866_v34 = vld [vmem:[%s7416_s15 + $0xc7] sm:$0xff]  ;;  %v297_v35 = vld [vmem:[%s7416_s15 + $0xd5] sm:$0xff] }
  0x5c   : > { %6081 = vmatprep.mubr.msk.f32.mxu0 %vm7306_vm1, %v7305_v1  ;;  %6144 = vmatprep.mubr.msk.f32.mxu1 %vm7306_vm1, %v7305_v1 }
  0x5f   : > { %6082 = vmatmul.mubr.msk.f32.gmra.mrb[32].mxu0 %vm356_vm2, %v329_v36  ;;  %6145 = vmatmul.mubr.msk.f32.gmra.mrb[32].mxu1 %vm356_vm2, %v350_v37  ;;  %v7877_v36 = vld [vmem:[%s7416_s15 + $0xcf] sm:$0xff]  ;;  %v298_v37 = vld [vmem:[%s7416_s15 + $0xdd] sm:$0xff] }
  0x60   : > { %6084 = vmatprep.mubr.msk.f32.mxu0 %vm7306_vm1, %v7305_v1  ;;  %6147 = vmatprep.mubr.msk.f32.mxu1 %vm7306_vm1, %v7305_v1 }
  0x63   : > { %6085 = vmatmul.mubr.msk.f32.gmra.mrb[34].mxu0 %vm356_vm2, %v330_v38  ;;  %6148 = vmatmul.mubr.msk.f32.gmra.mrb[34].mxu1 %vm356_vm2, %v351_v39  ;;  %v7888_v38 = vld [vmem:[%s7416_s15 + $0xd7] sm:$0xff]  ;;  %v299_v39 = vld [vmem:[%s7416_s15 + $0xe5] sm:$0xff] }
  0x64   : > { %6087 = vmatprep.mubr.msk.f32.mxu0 %vm7306_vm1, %v7305_v1  ;;  %6150 = vmatprep.mubr.msk.f32.mxu1 %vm7306_vm1, %v7305_v1 }
  0x67   : > { %6088 = vmatmul.mubr.msk.f32.gmra.mrb[36].mxu0 %vm356_vm2, %v331_v40  ;;  %6151 = vmatmul.mubr.msk.f32.gmra.mrb[36].mxu1 %vm356_vm2, %v352_v41  ;;  %v7899_v40 = vld [vmem:[%s7416_s15 + $0xdf] sm:$0xff]  ;;  %v300_v41 = vld [vmem:[%s7416_s15 + $0xed] sm:$0xff] }
  0x68   : > { %6090 = vmatprep.mubr.msk.f32.mxu0 %vm7306_vm1, %v7305_v1  ;;  %6153 = vmatprep.mubr.msk.f32.mxu1 %vm7306_vm1, %v7305_v1 }
  0x6b   : > { %6091 = vmatmul.mubr.msk.f32.gmra.mrb[38].mxu0 %vm356_vm2, %v332_v42  ;;  %6154 = vmatmul.mubr.msk.f32.gmra.mrb[38].mxu1 %vm356_vm2, %v353_v43  ;;  %v7910_v42 = vld [vmem:[%s7416_s15 + $0xe7] sm:$0xff]  ;;  %v301_v43 = vld [vmem:[%s7416_s15 + $0xf5] sm:$0xff] }
  0x6c   : > { %6093 = vmatprep.mubr.msk.f32.mxu0 %vm7306_vm1, %v7305_v1  ;;  %6158 = vmatprep.mubr.msk.f32.mxu1 %vm7306_vm1, %v7305_v1 }
  0x6f   : > { %6094 = vmatmul.mubr.msk.f32.gmra.mrb[40].mxu0 %vm356_vm2, %v333_v44  ;;  %6159 = vmatmul.mubr.msk.f32.vlgmr.msra.gmra.mrb[40].mxu1 %vm356_vm2, %v271_v45  ;;  %v7921_v44 = vld [vmem:[%s7416_s15 + $0xef] sm:$0xff]  ;;  %v302_v45 = vld [vmem:[%s7416_s15 + $0xfd] sm:$0xff] }
  0x70   : > { %6407 = vmatpush3.msk.msra.mxu1 %vm480_vm0, %v5390_v46  ;;  %6161 = vmatprep.mubr.msk.f32.mxu1 %vm7306_vm1, %v7305_v1  ;;  %v7932_v46 = vld [vmem:[%s7416_s15 + $0xf7] sm:$0xff] }
  0x71   : > { %6283 = vmatprep.mubr.msk.f32.mxu0 %vm7306_vm1, %v7305_v1  ;;  %6656 = vmatprep.subr.mxu1 %v7305_v1 }
  0x73   : > { %6162 = vmatmul.mubr.msk.f32.gmra.mrb[42].mxu1 %vm356_vm2, %v272_v47  ;;  %6284 = vmatmul.mubr.msk.f32.vlgmr.msra.gmra.mrb[42].mxu0 %vm356_vm2, %v1150_v48  ;;  %v303_v47 = vld [vmem:[%s7416_s15 + $0x105] sm:$0xff] }
  0x74   : > { %6532 = vmatpush3.msk.msra.mxu0 %vm480_vm0, %v5433_v49  ;;  %6164 = vmatprep.mubr.msk.f32.mxu1 %vm7306_vm1, %v7305_v1  ;;  %v7943_v48 = vld [vmem:[%s7416_s15 + $0xff] sm:$0xff]  ;;  %v304_v49 = vld [vmem:[%s7416_s15 + $0x10d] sm:$0xff] }
  0x75   : > { %6286 = vmatprep.mubr.msk.f32.mxu0 %vm7306_vm1, %v7305_v1  ;;  %6781 = vmatprep.subr.mxu0 %v7305_v1 }
  0x77   : > { %6165 = vmatmul.mubr.msk.f32.gmra.mrb[44].mxu1 %vm356_vm2, %v273_v50  ;;  %6287 = vmatmul.mubr.msk.f32.gmra.mrb[44].mxu0 %vm356_vm2, %v1151_v51  ;;  %v7954_v50 = vld [vmem:[%s7416_s15 + $0x107] sm:$0xff] }
  0x78   : > { %6167 = vmatprep.mubr.msk.f32.mxu1 %vm7306_vm1, %v7305_v1  ;;  %6289 = vmatprep.mubr.msk.f32.mxu0 %vm7306_vm1, %v7305_v1 }
  0x7b   : > { %6168 = vmatmul.mubr.msk.f32.gmra.mrb[46].mxu1 %vm356_vm2, %v274_v52  ;;  %6290 = vmatmul.mubr.msk.f32.gmra.mrb[46].mxu0 %vm356_vm2, %v7624_v53 }
  0x7c   : > { %6170 = vmatprep.mubr.msk.f32.mxu1 %vm7306_vm1, %v7305_v1  ;;  %6292 = vmatprep.mubr.msk.f32.mxu0 %vm7306_vm1, %v7305_v1 }
  0x7f   : > { %6171 = vmatmul.mubr.msk.f32.gmra.mrb[48].mxu1 %vm356_vm2, %v275_v54  ;;  %6293 = vmatmul.mubr.msk.f32.gmra.mrb[48].mxu0 %vm356_vm2, %v7635_v55 }
  0x80   : > { %6173 = vmatprep.mubr.msk.f32.mxu1 %vm7306_vm1, %v7305_v1  ;;  %6295 = vmatprep.mubr.msk.f32.mxu0 %vm7306_vm1, %v7305_v1 }
  0x83   : > { %6174 = vmatmul.mubr.msk.f32.gmra.mrb[50].mxu1 %vm356_vm2, %v276_v56  ;;  %6296 = vmatmul.mubr.msk.f32.gmra.mrb[50].mxu0 %vm356_vm2, %v7646_v57 }
  0x84   : > { %6176 = vmatprep.mubr.msk.f32.mxu1 %vm7306_vm1, %v7305_v1  ;;  %6298 = vmatprep.mubr.msk.f32.mxu0 %vm7306_vm1, %v7305_v1 }
  0x87   : > { %6177 = vmatmul.mubr.msk.f32.gmra.mrb[52].mxu1 %vm356_vm2, %v277_v58  ;;  %6299 = vmatmul.mubr.msk.f32.gmra.mrb[52].mxu0 %vm356_vm2, %v7657_v59  ;;  %v305_v58 = vld [vmem:[%s7416_s15 + $0x115] sm:$0xff] }
  0x88   : > { %6179 = vmatprep.mubr.msk.f32.mxu1 %vm7306_vm1, %v7305_v1  ;;  %6301 = vmatprep.mubr.msk.f32.mxu0 %vm7306_vm1, %v7305_v1 }
  0x8b   : > { %6180 = vmatmul.mubr.msk.f32.gmra.mrb[54].mxu1 %vm356_vm2, %v278_v60  ;;  %6302 = vmatmul.mubr.msk.f32.gmra.mrb[54].mxu0 %vm356_vm2, %v7668_v61  ;;  %v7969_v60 = vld [vmem:[%s7416_s15 + $0x10f] sm:$0xff] }
  0x8c   : > { %6182 = vmatprep.mubr.msk.f32.mxu1 %vm7306_vm1, %v7305_v1  ;;  %6304 = vmatprep.mubr.msk.f32.mxu0 %vm7306_vm1, %v7305_v1 }
  0x8f   : > { %6183 = vmatmul.mubr.msk.f32.gmra.mrb[56].mxu1 %vm356_vm2, %v279_v62  ;;  %6305 = vmatmul.mubr.msk.f32.gmra.mrb[56].mxu0 %vm356_vm2, %v7679_v63 }
  0x90   : > { %6185 = vmatprep.mubr.msk.f32.mxu1 %vm7306_vm1, %v7305_v1  ;;  %6307 = vmatprep.mubr.msk.f32.mxu0 %vm7306_vm1, %v7305_v1 }
  0x93   : > { %6186 = vmatmul.mubr.msk.f32.gmra.mrb[58].mxu1 %vm356_vm2, %v280_v0  ;;  %6308 = vmatmul.mubr.msk.f32.gmra.mrb[58].mxu0 %vm356_vm2, %v7690_v2 }
  0x94   : > { %6188 = vmatprep.mubr.msk.f32.mxu1 %vm7306_vm1, %v7305_v1  ;;  %6310 = vmatprep.mubr.msk.f32.mxu0 %vm7306_vm1, %v7305_v1 }
  0x97   : > { %6189 = vmatmul.mubr.msk.f32.gmra.mrb[60].mxu1 %vm356_vm2, %v281_v3  ;;  %6311 = vmatmul.mubr.msk.f32.gmra.mrb[60].mxu0 %vm356_vm2, %v7701_v4 }
  0x98   : > { %6191 = vmatprep.mubr.msk.f32.mxu1 %vm7306_vm1, %v7305_v1  ;;  %6313 = vmatprep.mubr.msk.f32.mxu0 %vm7306_vm1, %v7305_v1 }
  0x9b   : > { %6192 = vmatmul.mubr.msk.f32.gmra.mrb[62].mxu1 %vm356_vm2, %v282_v5  ;;  %6314 = vmatmul.mubr.msk.f32.gmra.mrb[62].mxu0 %vm356_vm2, %v7712_v6 }
  0x9c   : > { %6194 = vmatprep.mubr.msk.f32.mxu1 %vm7306_vm1, %v7305_v1  ;;  %6316 = vmatprep.mubr.msk.f32.mxu0 %vm7306_vm1, %v7305_v1 }
  0x9f   : > { %6195 = vmatmul.mubr.msk.f32.gmra.mrb[64].mxu1 %vm356_vm2, %v283_v7  ;;  %6317 = vmatmul.mubr.msk.f32.gmra.mrb[64].mxu0 %vm356_vm2, %v7723_v8  ;;  %v306_v7 = vld [vmem:[%s7416_s15 + $0x11d] sm:$0xff] }
  0xa0   : > { %6197 = vmatprep.mubr.msk.f32.mxu1 %vm7306_vm1, %v7305_v1  ;;  %6319 = vmatprep.mubr.msk.f32.mxu0 %vm7306_vm1, %v7305_v1 }
  0xa3   : > { %6198 = vmatmul.mubr.msk.f32.gmra.mrb[66].mxu1 %vm356_vm2, %v284_v9  ;;  %6320 = vmatmul.mubr.msk.f32.gmra.mrb[66].mxu0 %vm356_vm2, %v7734_v10  ;;  %v7984_v9 = vld [vmem:[%s7416_s15 + $0x117] sm:$0xff] }
  0xa4   : > { %6200 = vmatprep.mubr.msk.f32.mxu1 %vm7306_vm1, %v7305_v1  ;;  %6322 = vmatprep.mubr.msk.f32.mxu0 %vm7306_vm1, %v7305_v1 }
  0xa7   : > { %6201 = vmatmul.mubr.msk.f32.gmra.mrb[68].mxu1 %vm356_vm2, %v285_v11  ;;  %6323 = vmatmul.mubr.msk.f32.gmra.mrb[68].mxu0 %vm356_vm2, %v7745_v12 }
  0xa8   : > { %6203 = vmatprep.mubr.msk.f32.mxu1 %vm7306_vm1, %v7305_v1  ;;  %6325 = vmatprep.mubr.msk.f32.mxu0 %vm7306_vm1, %v7305_v1 }
  0xab   : > { %6204 = vmatmul.mubr.msk.f32.gmra.mrb[70].mxu1 %vm356_vm2, %v286_v13  ;;  %6326 = vmatmul.mubr.msk.f32.gmra.mrb[70].mxu0 %vm356_vm2, %v7756_v14 }
  0xac   : > { %6206 = vmatprep.mubr.msk.f32.mxu1 %vm7306_vm1, %v7305_v1  ;;  %6328 = vmatprep.mubr.msk.f32.mxu0 %vm7306_vm1, %v7305_v1 }
  0xaf   : > { %6207 = vmatmul.mubr.msk.f32.gmra.mrb[72].mxu1 %vm356_vm2, %v287_v15  ;;  %6329 = vmatmul.mubr.msk.f32.gmra.mrb[72].mxu0 %vm356_vm2, %v7767_v16 }
  0xb0   : > { %6209 = vmatprep.mubr.msk.f32.mxu1 %vm7306_vm1, %v7305_v1  ;;  %6331 = vmatprep.mubr.msk.f32.mxu0 %vm7306_vm1, %v7305_v1 }
  0xb3   : > { %6210 = vmatmul.mubr.msk.f32.gmra.mrb[74].mxu1 %vm356_vm2, %v288_v17  ;;  %6332 = vmatmul.mubr.msk.f32.gmra.mrb[74].mxu0 %vm356_vm2, %v7778_v18 }
  0xb4   : > { %6212 = vmatprep.mubr.msk.f32.mxu1 %vm7306_vm1, %v7305_v1  ;;  %6334 = vmatprep.mubr.msk.f32.mxu0 %vm7306_vm1, %v7305_v1 }
  0xb7   : > { %6213 = vmatmul.mubr.msk.f32.gmra.mrb[76].mxu1 %vm356_vm2, %v289_v19  ;;  %6335 = vmatmul.mubr.msk.f32.gmra.mrb[76].mxu0 %vm356_vm2, %v7789_v20  ;;  %v307_v19 = vld [vmem:[%s7416_s15 + $0x125] sm:$0xff] }
  0xb8   : > { %6215 = vmatprep.mubr.msk.f32.mxu1 %vm7306_vm1, %v7305_v1  ;;  %6337 = vmatprep.mubr.msk.f32.mxu0 %vm7306_vm1, %v7305_v1 }
  0xbb   : > { %6216 = vmatmul.mubr.msk.f32.gmra.mrb[78].mxu1 %vm356_vm2, %v290_v21  ;;  %6338 = vmatmul.mubr.msk.f32.gmra.mrb[78].mxu0 %vm356_vm2, %v7800_v22  ;;  %v7999_v21 = vld [vmem:[%s7416_s15 + $0x11f] sm:$0xff] }
  0xbc   : > { %6218 = vmatprep.mubr.msk.f32.mxu1 %vm7306_vm1, %v7305_v1  ;;  %6340 = vmatprep.mubr.msk.f32.mxu0 %vm7306_vm1, %v7305_v1 }
  0xbf   : > { %6219 = vmatmul.mubr.msk.f32.gmra.mrb[80].mxu1 %vm356_vm2, %v291_v23  ;;  %6341 = vmatmul.mubr.msk.f32.gmra.mrb[80].mxu0 %vm356_vm2, %v7811_v24 }
  0xc0   : > { %6221 = vmatprep.mubr.msk.f32.mxu1 %vm7306_vm1, %v7305_v1  ;;  %6343 = vmatprep.mubr.msk.f32.mxu0 %vm7306_vm1, %v7305_v1 }
  0xc3   : > { %6222 = vmatmul.mubr.msk.f32.gmra.mrb[82].mxu1 %vm356_vm2, %v292_v25  ;;  %6344 = vmatmul.mubr.msk.f32.gmra.mrb[82].mxu0 %vm356_vm2, %v7822_v26 }
  0xc4   : > { %6224 = vmatprep.mubr.msk.f32.mxu1 %vm7306_vm1, %v7305_v1  ;;  %6346 = vmatprep.mubr.msk.f32.mxu0 %vm7306_vm1, %v7305_v1 }
  0xc7   : > { %6225 = vmatmul.mubr.msk.f32.gmra.mrb[84].mxu1 %vm356_vm2, %v293_v27  ;;  %6347 = vmatmul.mubr.msk.f32.gmra.mrb[84].mxu0 %vm356_vm2, %v7833_v28 }
  0xc8   : > { %6227 = vmatprep.mubr.msk.f32.mxu1 %vm7306_vm1, %v7305_v1  ;;  %6349 = vmatprep.mubr.msk.f32.mxu0 %vm7306_vm1, %v7305_v1 }
  0xcb   : > { %6228 = vmatmul.mubr.msk.f32.gmra.mrb[86].mxu1 %vm356_vm2, %v294_v29  ;;  %6350 = vmatmul.mubr.msk.f32.gmra.mrb[86].mxu0 %vm356_vm2, %v7844_v30 }
  0xcc   : > { %6230 = vmatprep.mubr.msk.f32.mxu1 %vm7306_vm1, %v7305_v1  ;;  %6352 = vmatprep.mubr.msk.f32.mxu0 %vm7306_vm1, %v7305_v1 }
  0xcf   : > { %6231 = vmatmul.mubr.msk.f32.gmra.mrb[88].mxu1 %vm356_vm2, %v295_v31  ;;  %6353 = vmatmul.mubr.msk.f32.gmra.mrb[88].mxu0 %vm356_vm2, %v7855_v32  ;;  %v308_v31 = vld [vmem:[%s7416_s15 + $0x12d] sm:$0xff] }
  0xd0   : > { %6233 = vmatprep.mubr.msk.f32.mxu1 %vm7306_vm1, %v7305_v1  ;;  %6355 = vmatprep.mubr.msk.f32.mxu0 %vm7306_vm1, %v7305_v1 }
  0xd3   : > { %6234 = vmatmul.mubr.msk.f32.gmra.mrb[90].mxu1 %vm356_vm2, %v296_v33  ;;  %6356 = vmatmul.mubr.msk.f32.gmra.mrb[90].mxu0 %vm356_vm2, %v7866_v34  ;;  %v8014_v33 = vld [vmem:[%s7416_s15 + $0x127] sm:$0xff] }
  0xd4   : > { %6236 = vmatprep.mubr.msk.f32.mxu1 %vm7306_vm1, %v7305_v1  ;;  %6358 = vmatprep.mubr.msk.f32.mxu0 %vm7306_vm1, %v7305_v1 }
  0xd7   : > { %6237 = vmatmul.mubr.msk.f32.gmra.mrb[92].mxu1 %vm356_vm2, %v297_v35  ;;  %6359 = vmatmul.mubr.msk.f32.gmra.mrb[92].mxu0 %vm356_vm2, %v7877_v36 }
  0xd8   : > { %6239 = vmatprep.mubr.msk.f32.mxu1 %vm7306_vm1, %v7305_v1  ;;  %6361 = vmatprep.mubr.msk.f32.mxu0 %vm7306_vm1, %v7305_v1 }
  0xdb   : > { %6240 = vmatmul.mubr.msk.f32.gmra.mrb[94].mxu1 %vm356_vm2, %v298_v37  ;;  %6362 = vmatmul.mubr.msk.f32.gmra.mrb[94].mxu0 %vm356_vm2, %v7888_v38 }
  0xdc   : > { %6242 = vmatprep.mubr.msk.f32.mxu1 %vm7306_vm1, %v7305_v1  ;;  %6364 = vmatprep.mubr.msk.f32.mxu0 %vm7306_vm1, %v7305_v1 }
  0xdf   : > { %6243 = vmatmul.mubr.msk.f32.gmra.mrb[96].mxu1 %vm356_vm2, %v299_v39  ;;  %6365 = vmatmul.mubr.msk.f32.gmra.mrb[96].mxu0 %vm356_vm2, %v7899_v40 }
  0xe0   : > { %6245 = vmatprep.mubr.msk.f32.mxu1 %vm7306_vm1, %v7305_v1  ;;  %6367 = vmatprep.mubr.msk.f32.mxu0 %vm7306_vm1, %v7305_v1 }
  0xe3   : > { %6246 = vmatmul.mubr.msk.f32.gmra.mrb[98].mxu1 %vm356_vm2, %v300_v41  ;;  %6368 = vmatmul.mubr.msk.f32.gmra.mrb[98].mxu0 %vm356_vm2, %v7910_v42 }
  0xe4   : > { %6248 = vmatprep.mubr.msk.f32.mxu1 %vm7306_vm1, %v7305_v1  ;;  %6370 = vmatprep.mubr.msk.f32.mxu0 %vm7306_vm1, %v7305_v1 }
  0xe7   : > { %6249 = vmatmul.mubr.msk.f32.gmra.mrb[100].mxu1 %vm356_vm2, %v301_v43  ;;  %6371 = vmatmul.mubr.msk.f32.gmra.mrb[100].mxu0 %vm356_vm2, %v7921_v44  ;;  %v309_v43 = vld [vmem:[%s7416_s15 + $0x135] sm:$0xff] }
  0xe8   : > { %6251 = vmatprep.mubr.msk.f32.mxu1 %vm7306_vm1, %v7305_v1  ;;  %6373 = vmatprep.mubr.msk.f32.mxu0 %vm7306_vm1, %v7305_v1 }
  0xeb   : > { %6252 = vmatmul.mubr.msk.f32.gmra.mrb[102].mxu1 %vm356_vm2, %v302_v45  ;;  %6374 = vmatmul.mubr.msk.f32.gmra.mrb[102].mxu0 %vm356_vm2, %v7932_v46  ;;  %v8029_v45 = vld [vmem:[%s7416_s15 + $0x12f] sm:$0xff] }
  0xec   : > { %6254 = vmatprep.mubr.msk.f32.mxu1 %vm7306_vm1, %v7305_v1  ;;  %6376 = vmatprep.mubr.msk.f32.mxu0 %vm7306_vm1, %v7305_v1 }
  0xef   : > { %6255 = vmatmul.mubr.msk.f32.gmra.mrb[104].mxu1 %vm356_vm2, %v303_v47  ;;  %6377 = vmatmul.mubr.msk.f32.gmra.mrb[104].mxu0 %vm356_vm2, %v7943_v48 }
  0xf0   : > { %6257 = vmatprep.mubr.msk.f32.mxu1 %vm7306_vm1, %v7305_v1  ;;  %6379 = vmatprep.mubr.msk.f32.mxu0 %vm7306_vm1, %v7305_v1 }
  0xf2   : > { %v7956_v51 = vpop.f32.mrb[0].mxu0  ;;  %v7958_v52 = vpop.f32.mrb[0].mxu1 }
  0xf3   : > { %v6035_v54 = vpop.f32.mrb[1].mxu0  ;;  %6258 = vmatmul.mubr.msk.f32.gmra.mrb[106].mxu1 %vm356_vm2, %v304_v49  ;;  %6380 = vmatmul.mubr.msk.f32.gmra.mrb[106].mxu0 %vm356_vm2, %v7954_v50  ;;  %v6098_v56 = vpop.f32.mrb[1].mxu1 }
  0xf4   : > { %6260 = vmatprep.mubr.msk.f32.mxu1 %vm7306_vm1, %v7305_v1  ;;  %6382 = vmatprep.mubr.msk.f32.mxu0 %vm7306_vm1, %v7305_v1 }
  0xf6   : > { %v7971_v62 = vpop.f32.mrb[2].mxu0  ;;  %v7973_v0 = vpop.f32.mrb[2].mxu1 }
  0xf7   : > { %v6038_v3 = vpop.f32.mrb[3].mxu0  ;;  %6261 = vmatmul.mubr.msk.f32.gmra.mrb[108].mxu1 %vm356_vm2, %v305_v58  ;;  %6383 = vmatmul.mubr.msk.f32.gmra.mrb[108].mxu0 %vm356_vm2, %v7969_v60  ;;  %v6101_v5 = vpop.f32.mrb[3].mxu1  ;;  %v310_v58 = vld [vmem:[%s7416_s15 + $0x13d] sm:$0xff] }
  0xf8   : > { %6263 = vmatprep.mubr.msk.f32.mxu1 %vm7306_vm1, %v7305_v1  ;;  %6385 = vmatprep.mubr.msk.f32.mxu0 %vm7306_vm1, %v7305_v1  ;;  %v8044_v3 = vld [vmem:[%s7416_s15 + $0x137] sm:$0xff] }
  0xfa   : > { %v7986_v11 = vpop.f32.mrb[4].mxu0  ;;  %v7988_v13 = vpop.f32.mrb[4].mxu1 }
  0xfb   : > { %v6041_v15 = vpop.f32.mrb[5].mxu0  ;;  %6264 = vmatmul.mubr.msk.f32.gmra.mrb[110].mxu1 %vm356_vm2, %v306_v7  ;;  %6386 = vmatmul.mubr.msk.f32.gmra.mrb[110].mxu0 %vm356_vm2, %v7984_v9  ;;  %v6104_v17 = vpop.f32.mrb[5].mxu1 }
  0xfc   : > { %6266 = vmatprep.mubr.msk.f32.mxu1 %vm7306_vm1, %v7305_v1  ;;  %6388 = vmatprep.mubr.msk.f32.mxu0 %vm7306_vm1, %v7305_v1 }
  0xfe   : > { %v8001_v23 = vpop.f32.mrb[6].mxu0  ;;  %v8003_v25 = vpop.f32.mrb[6].mxu1 }
  0xff   : > { %v6044_v27 = vpop.f32.mrb[7].mxu0  ;;  %6267 = vmatmul.mubr.msk.f32.gmra.mrb[112].mxu1 %vm356_vm2, %v307_v19  ;;  %6389 = vmatmul.mubr.msk.f32.gmra.mrb[112].mxu0 %vm356_vm2, %v7999_v21  ;;  %v6107_v29 = vpop.f32.mrb[7].mxu1  ;;  %v311_v19 = vld [vmem:[%s7416_s15 + $0x145] sm:$0xff] }
 0x100   : > { %6269 = vmatprep.mubr.msk.f32.mxu1 %vm7306_vm1, %v7305_v1  ;;  %6391 = vmatprep.mubr.msk.f32.mxu0 %vm7306_vm1, %v7305_v1  ;;  %v8059_v27 = vld [vmem:[%s7416_s15 + $0x13f] sm:$0xff] }
 0x102   : > { %v8016_v35 = vpop.f32.mrb[8].mxu0  ;;  %v8018_v37 = vpop.f32.mrb[8].mxu1 }
 0x103   : > { %v6047_v39 = vpop.f32.mrb[9].mxu0  ;;  %6270 = vmatmul.mubr.msk.f32.gmra.mrb[114].mxu1 %vm356_vm2, %v308_v31  ;;  %6392 = vmatmul.mubr.msk.f32.gmra.mrb[114].mxu0 %vm356_vm2, %v8014_v33  ;;  %v6110_v41 = vpop.f32.mrb[9].mxu1 }
 0x104   : > { %6272 = vmatprep.mubr.msk.f32.mxu1 %vm7306_vm1, %v7305_v1  ;;  %6394 = vmatprep.mubr.msk.f32.mxu0 %vm7306_vm1, %v7305_v1 }
 0x106   : > { %v8031_v47 = vpop.f32.mrb[10].mxu0  ;;  %v8033_v49 = vpop.f32.mrb[10].mxu1 }
 0x107   : > { %v6050_v54 = vpop.f32.mrb[11].mxu0  ;;  %6273 = vmatmul.mubr.msk.f32.gmra.mrb[116].mxu1 %vm356_vm2, %v309_v43  ;;  %6395 = vmatmul.mubr.msk.f32.gmra.mrb[116].mxu0 %vm356_vm2, %v8029_v45  ;;  %v6113_v56 = vpop.f32.mrb[11].mxu1  ;;  %v8073_v43 = vld [vmem:[%s7416_s15 + $0x147] sm:$0xff] }
 0x108   : > { %6275 = vmatprep.mubr.msk.f32.mxu1 %vm7306_vm1, %v7305_v1  ;;  %6397 = vmatprep.mubr.msk.f32.mxu0 %vm7306_vm1, %v7305_v1  ;;  %v5476_v54 = vld [vmem:[%s9949_s1 + $0x14] sm:$0xf] }
 0x10a   : > { %v8046_v5 = vpop.f32.mrb[12].mxu0  ;;  %v8048_v7 = vpop.f32.mrb[12].mxu1 }
 0x10b   : > { %9957 = vst [vmem:[#allocation8_spill] sm:$0xff] %v8048_v7  ;;  %v6053_v15 = vpop.f32.mrb[13].mxu0  ;;  %6276 = vmatmul.mubr.msk.f32.gmra.mrb[118].mxu1 %vm356_vm2, %v310_v58  ;;  %6398 = vmatmul.mubr.msk.f32.gmra.mrb[118].mxu0 %vm356_vm2, %v8044_v3  ;;  %v6116_v17 = vpop.f32.mrb[13].mxu1 }
 0x10c   : > { %6278 = vmatprep.mubr.msk.f32.mxu1 %vm7306_vm1, %v7305_v1  ;;  %6400 = vmatprep.mubr.msk.f32.mxu0 %vm7306_vm1, %v7305_v1 }
 0x10e   : > { %v8061_v29 = vpop.f32.mrb[14].mxu0  ;;  %v8063_v31 = vpop.f32.mrb[14].mxu1 }
 0x10f   : > { %9958 = vst [vmem:[#allocation9_spill] sm:$0xff] %v8063_v31  ;;  %v6056_v39 = vpop.f32.mrb[15].mxu0  ;;  %6279 = vmatmul.mubr.msk.f32.gmra.mrb[120].mxu1 %vm356_vm2, %v311_v19  ;;  %6401 = vmatmul.mubr.msk.f32.gmra.mrb[120].mxu0 %vm356_vm2, %v8059_v27  ;;  %v6119_v41 = vpop.f32.mrb[15].mxu1  ;;  %v2110_v19 = vld [vmem:[%s7416_s15 + $0x18] sm:$0xff] }
 0x110   : > { %6403 = vmatprep.mubr.msk.f32.mxu0 %vm7306_vm1, %v7305_v1  ;;  %6408 = vmatprep.mubr.msk.f32.mxu1 %vm7306_vm1, %v7305_v1  ;;  %v5519_v39 = vld [vmem:[%s9949_s1 + $0x18] sm:$0xf] }
 0x112   : > { %v8078_v56 = vpop.f32.mrb[16].mxu0  ;;  %v8080_v58 = vpop.f32.mrb[16].mxu1 }
 0x113   : > { %9959 = vst [vmem:[#allocation10_spill] sm:$0xff] %v8080_v58  ;;  %v6059_v15 = vpop.f32.mrb[17].mxu0  ;;  %6404 = vmatmul.mubr.msk.f32.gmra.mrb[122].mxu0 %vm356_vm2, %v8073_v43  ;;  %6409 = vmatmul.mubr.msk.f32.vlgmr.msra.gmra.mrb[122].mxu1 %vm356_vm2, %v7624_v53  ;;  %v6122_v17 = vpop.f32.mrb[17].mxu1 }
 0x114   : > { %6657 = vmatpush3.msk.msra.mxu1 %vm480_vm0, %v5476_v54  ;;  %6411 = vmatprep.mubr.msk.f32.mxu1 %vm7306_vm1, %v7305_v1  ;;  %v2111_v17 = vld [vmem:[%s7416_s15 + $0x20] sm:$0xff] }
 0x115   : > { %6533 = vmatprep.mubr.msk.f32.mxu0 %vm7306_vm1, %v7305_v1  ;;  %6906 = vmatprep.subr.mxu1 %v7305_v1 }
 0x116   : > { %v8096_v41 = vpop.f32.mrb[18].mxu0  ;;  %v8098_v53 = vpop.f32.mrb[18].mxu1 }
 0x117   : > { %9960 = vst [vmem:[#allocation11_spill] sm:$0xff] %v8098_v53  ;;  %v6062_v15 = vpop.f32.mrb[19].mxu0  ;;  %6412 = vmatmul.mubr.msk.f32.gmra.mrb[124].mxu1 %vm356_vm2, %v7635_v55  ;;  %6534 = vmatmul.mubr.msk.f32.vlgmr.msra.gmra.mrb[124].mxu0 %vm356_vm2, %v2110_v19  ;;  %v6125_v54 = vpop.f32.mrb[19].mxu1 }
 0x118   : > { %6782 = vmatpush3.msk.msra.mxu0 %vm480_vm0, %v5519_v39  ;;  %6414 = vmatprep.mubr.msk.f32.mxu1 %vm7306_vm1, %v7305_v1  ;;  %v2112_v39 = vld [vmem:[%s7416_s15 + $0x28] sm:$0xff] }
 0x119   : > { %6536 = vmatprep.mubr.msk.f32.mxu0 %vm7306_vm1, %v7305_v1  ;;  %7031 = vmatprep.subr.mxu0 %v7305_v1 }
 0x11a   : > { %v8110_v53 = vpop.f32.mrb[20].mxu0  ;;  %v8112_v15 = vpop.f32.mrb[20].mxu1 }
 0x11b   : > { %9961 = vst [vmem:[#allocation12_spill] sm:$0xff] %v8112_v15  ;;  %v6065_v55 = vpop.f32.mrb[21].mxu0  ;;  %6415 = vmatmul.mubr.msk.f32.gmra.mrb[126].mxu1 %vm356_vm2, %v7646_v57  ;;  %6537 = vmatmul.mubr.msk.f32.gmra.mrb[126].mxu0 %vm356_vm2, %v2111_v17  ;;  %v6128_v19 = vpop.f32.mrb[21].mxu1  ;;  %v2113_v17 = vld [vmem:[%s7416_s15 + $0x30] sm:$0xff] }
 0x11c   : > { %6417 = vmatprep.mubr.msk.f32.mxu1 %vm7306_vm1, %v7305_v1  ;;  %6539 = vmatprep.mubr.msk.f32.mxu0 %vm7306_vm1, %v7305_v1 }
 0x11e   : > { %v8122_v54 = vpop.f32.mrb[22].mxu0  ;;  %v8124_v58 = vpop.f32.mrb[22].mxu1 }
 0x11f   : > { %9962 = vst [vmem:[#allocation13_spill] sm:$0xff] %v8124_v58  ;;  %v6068_v15 = vpop.f32.mrb[23].mxu0  ;;  %6418 = vmatmul.mubr.msk.f32.gmra.mrb[128].mxu1 %vm356_vm2, %v7657_v59  ;;  %6540 = vmatmul.mubr.msk.f32.gmra.mrb[128].mxu0 %vm356_vm2, %v2112_v39  ;;  %v6131_v57 = vpop.f32.mrb[23].mxu1 }
 0x120   : > { %6420 = vmatprep.mubr.msk.f32.mxu1 %vm7306_vm1, %v7305_v1  ;;  %6542 = vmatprep.mubr.msk.f32.mxu0 %vm7306_vm1, %v7305_v1  ;;  %v2114_v15 = vld [vmem:[%s7416_s15 + $0x38] sm:$0xff] }
 0x122   : > { %v8134_v55 = vpop.f32.mrb[24].mxu0  ;;  %v8136_v19 = vpop.f32.mrb[24].mxu1 }
 0x123   : > { %9963 = vst [vmem:[#allocation14_spill] sm:$0xff] %v8136_v19  ;;  %v6071_v58 = vpop.f32.mrb[25].mxu0  ;;  %6421 = vmatmul.mubr.msk.f32.gmra.mrb[130].mxu1 %vm356_vm2, %v7668_v61  ;;  %6543 = vmatmul.mubr.msk.f32.gmra.mrb[130].mxu0 %vm356_vm2, %v2113_v17  ;;  %v6134_v59 = vpop.f32.mrb[25].mxu1 }
 0x124   : > { %6423 = vmatprep.mubr.msk.f32.mxu1 %vm7306_vm1, %v7305_v1  ;;  %6545 = vmatprep.mubr.msk.f32.mxu0 %vm7306_vm1, %v7305_v1  ;;  %v2115_v58 = vld [vmem:[%s7416_s15 + $0x40] sm:$0xff] }
 0x126   : > { %v8146_v39 = vpop.f32.mrb[26].mxu0  ;;  %v8148_v57 = vpop.f32.mrb[26].mxu1 }
 0x127   : > { %9964 = vst [vmem:[#allocation15_spill] sm:$0xff] %v8148_v57  ;;  %v6074_v19 = vpop.f32.mrb[27].mxu0  ;;  %6424 = vmatmul.mubr.msk.f32.gmra.mrb[132].mxu1 %vm356_vm2, %v7679_v63  ;;  %6546 = vmatmul.mubr.msk.f32.gmra.mrb[132].mxu0 %vm356_vm2, %v2114_v15  ;;  %v6137_v61 = vpop.f32.mrb[27].mxu1 }
 0x128   : > { %6426 = vmatprep.mubr.msk.f32.mxu1 %vm7306_vm1, %v7305_v1  ;;  %6548 = vmatprep.mubr.msk.f32.mxu0 %vm7306_vm1, %v7305_v1  ;;  %v2116_v19 = vld [vmem:[%s7416_s15 + $0x48] sm:$0xff] }
 0x12a   : > { %v8158_v17 = vpop.f32.mrb[28].mxu0  ;;  %v8160_v59 = vpop.f32.mrb[28].mxu1 }
 0x12b   : > { %9965 = vst [vmem:[#allocation16_spill] sm:$0xff] %v8160_v59  ;;  %v6077_v57 = vpop.f32.mrb[29].mxu0  ;;  %6427 = vmatmul.mubr.msk.f32.gmra.mrb[134].mxu1 %vm356_vm2, %v7690_v2  ;;  %6549 = vmatmul.mubr.msk.f32.gmra.mrb[134].mxu0 %vm356_vm2, %v2115_v58  ;;  %v6140_v63 = vpop.f32.mrb[29].mxu1 }
 0x12c   : > { %6429 = vmatprep.mubr.msk.f32.mxu1 %vm7306_vm1, %v7305_v1  ;;  %6551 = vmatprep.mubr.msk.f32.mxu0 %vm7306_vm1, %v7305_v1  ;;  %v2117_v57 = vld [vmem:[%s7416_s15 + $0x50] sm:$0xff] }
 0x12e   : > { %v8170_v15 = vpop.f32.mrb[30].mxu0  ;;  %v8172_v61 = vpop.f32.mrb[30].mxu1 }
 0x12f   : > { %9966 = vst [vmem:[#allocation17_spill] sm:$0xff] %v8172_v61  ;;  %v6080_v59 = vpop.f32.mrb[31].mxu0  ;;  %6430 = vmatmul.mubr.msk.f32.gmra.mrb[136].mxu1 %vm356_vm2, %v7701_v4  ;;  %6552 = vmatmul.mubr.msk.f32.gmra.mrb[136].mxu0 %vm356_vm2, %v2116_v19  ;;  %v6143_v2 = vpop.f32.mrb[31].mxu1 }
 0x130   : > { %6432 = vmatprep.mubr.msk.f32.mxu1 %vm7306_vm1, %v7305_v1  ;;  %6554 = vmatprep.mubr.msk.f32.mxu0 %vm7306_vm1, %v7305_v1  ;;  %v2118_v59 = vld [vmem:[%s7416_s15 + $0x58] sm:$0xff] }
 0x132   : > { %v8182_v58 = vpop.f32.mrb[32].mxu0  ;;  %v8184_v63 = vpop.f32.mrb[32].mxu1 }
 0x133   : > { %9967 = vst [vmem:[#allocation18_spill] sm:$0xff] %v8184_v63  ;;  %v6083_v61 = vpop.f32.mrb[33].mxu0  ;;  %6433 = vmatmul.mubr.msk.f32.gmra.mrb[138].mxu1 %vm356_vm2, %v7712_v6  ;;  %6555 = vmatmul.mubr.msk.f32.gmra.mrb[138].mxu0 %vm356_vm2, %v2117_v57  ;;  %v6146_v4 = vpop.f32.mrb[33].mxu1 }
 0x134   : > { %6435 = vmatprep.mubr.msk.f32.mxu1 %vm7306_vm1, %v7305_v1  ;;  %6557 = vmatprep.mubr.msk.f32.mxu0 %vm7306_vm1, %v7305_v1  ;;  %v2119_v61 = vld [vmem:[%s7416_s15 + $0x60] sm:$0xff] }
 0x136   : > { %v8194_v19 = vpop.f32.mrb[34].mxu0  ;;  %v8196_v2 = vpop.f32.mrb[34].mxu1 }
 0x137   : > { %9968 = vst [vmem:[#allocation19_spill] sm:$0xff] %v8196_v2  ;;  %v6086_v63 = vpop.f32.mrb[35].mxu0  ;;  %6436 = vmatmul.mubr.msk.f32.gmra.mrb[140].mxu1 %vm356_vm2, %v7723_v8  ;;  %6558 = vmatmul.mubr.msk.f32.gmra.mrb[140].mxu0 %vm356_vm2, %v2118_v59  ;;  %v6149_v6 = vpop.f32.mrb[35].mxu1 }
 0x138   : > { %6438 = vmatprep.mubr.msk.f32.mxu1 %vm7306_vm1, %v7305_v1  ;;  %6560 = vmatprep.mubr.msk.f32.mxu0 %vm7306_vm1, %v7305_v1  ;;  %v2120_v63 = vld [vmem:[%s7416_s15 + $0x68] sm:$0xff] }
 0x13a   : > { %v8206_v57 = vpop.f32.mrb[36].mxu0  ;;  %v8208_v4 = vpop.f32.mrb[36].mxu1 }
 0x13b   : > { %9969 = vst [vmem:[#allocation20_spill] sm:$0xff] %v8208_v4  ;;  %v6089_v2 = vpop.f32.mrb[37].mxu0  ;;  %6439 = vmatmul.mubr.msk.f32.gmra.mrb[142].mxu1 %vm356_vm2, %v7734_v10  ;;  %6561 = vmatmul.mubr.msk.f32.gmra.mrb[142].mxu0 %vm356_vm2, %v2119_v61  ;;  %v6152_v8 = vpop.f32.mrb[37].mxu1 }
 0x13c   : > { %6441 = vmatprep.mubr.msk.f32.mxu1 %vm7306_vm1, %v7305_v1  ;;  %6563 = vmatprep.mubr.msk.f32.mxu0 %vm7306_vm1, %v7305_v1  ;;  %v2121_v2 = vld [vmem:[%s7416_s15 + $0x70] sm:$0xff] }
 0x13e   : > { %v8218_v59 = vpop.f32.mrb[38].mxu0  ;;  %v8220_v6 = vpop.f32.mrb[38].mxu1 }
 0x13f   : > { %9970 = vst [vmem:[#allocation21_spill] sm:$0xff] %v8220_v6  ;;  %v6092_v4 = vpop.f32.mrb[39].mxu0  ;;  %6442 = vmatmul.mubr.msk.f32.gmra.mrb[144].mxu1 %vm356_vm2, %v7745_v12  ;;  %6564 = vmatmul.mubr.msk.f32.gmra.mrb[144].mxu0 %vm356_vm2, %v2120_v63  ;;  %v6155_v10 = vpop.f32.mrb[39].mxu1  ;;  %v2122_v63 = vld [vmem:[%s7416_s15 + $0x78] sm:$0xff] }
 0x140   : > { %6444 = vmatprep.mubr.msk.f32.mxu1 %vm7306_vm1, %v7305_v1  ;;  %6566 = vmatprep.mubr.msk.f32.mxu0 %vm7306_vm1, %v7305_v1 }
 0x142   : > { %v8230_v61 = vpop.f32.mrb[40].mxu0  ;;  %v946_v8 = vpop.f32.mrb[40].mxu1 }
 0x143   : > { %v947_v6 = vadd.f32 %v946_v8, %v7956_v51  ;;  %v6095_v4 = vpop.f32.mrb[41].mxu0  ;;  %6445 = vmatmul.mubr.msk.f32.gmra.mrb[146].mxu1 %vm356_vm2, %v7756_v14  ;;  %6567 = vmatmul.mubr.msk.f32.gmra.mrb[146].mxu0 %vm356_vm2, %v2121_v2  ;;  %v6160_v12 = vpop.f32.mrb[41].mxu1  ;;  %v2123_v8 = vld [vmem:[%s7416_s15 + $0x80] sm:$0xff] }
 0x144   : > { %6447 = vmatprep.mubr.msk.f32.mxu1 %vm7306_vm1, %v7305_v1  ;;  %6569 = vmatprep.mubr.msk.f32.mxu0 %vm7306_vm1, %v7305_v1 }
 0x146   : > { %v951_v10 = vpop.f32.mrb[42].mxu1  ;;  %v1385_v31 = vpop.f32.mrb[42].mxu0 }
 0x147   : > { %v952_v7 = vadd.f32 %v951_v10, %v7971_v62  ;;  %v6285_v51 = vpop.f32.mrb[43].mxu0  ;;  %6448 = vmatmul.mubr.msk.f32.gmra.mrb[148].mxu1 %vm356_vm2, %v7767_v16  ;;  %6570 = vmatmul.mubr.msk.f32.gmra.mrb[148].mxu0 %vm356_vm2, %v2122_v63  ;;  %v6163_v14 = vpop.f32.mrb[43].mxu1  ;;  %v8245_v2 = vadd.f32 %v1385_v31, %v947_v6  ;;  %v2124_v6 = vld [vmem:[%s7416_s15 + $0x88] sm:$0xff] }
 0x148   : > { %6450 = vmatprep.mubr.msk.f32.mxu1 %vm7306_vm1, %v7305_v1  ;;  %6572 = vmatprep.mubr.msk.f32.mxu0 %vm7306_vm1, %v7305_v1 }
 0x14a   : > { %v956_v4 = vpop.f32.mrb[44].mxu1  ;;  %v1390_v12 = vpop.f32.mrb[44].mxu0 }
 0x14b   : > { %v957_v62 = vadd.f32 %v956_v4, %v7986_v11  ;;  %v6288_v10 = vpop.f32.mrb[45].mxu0  ;;  %6451 = vmatmul.mubr.msk.f32.gmra.mrb[150].mxu1 %vm356_vm2, %v7778_v18  ;;  %6573 = vmatmul.mubr.msk.f32.gmra.mrb[150].mxu0 %vm356_vm2, %v2123_v8  ;;  %v6166_v16 = vpop.f32.mrb[45].mxu1  ;;  %v8256_v31 = vadd.f32 %v1390_v12, %v952_v7  ;;  %v2125_v8 = vld [vmem:[%s7416_s15 + $0x90] sm:$0xff] }
 0x14c   : > { %6453 = vmatprep.mubr.msk.f32.mxu1 %vm7306_vm1, %v7305_v1  ;;  %6575 = vmatprep.mubr.msk.f32.mxu0 %vm7306_vm1, %v7305_v1  ;;  %v2126_v16 = vld [vmem:[%s7416_s15 + $0x98] sm:$0xff] }
 0x14e   : > { %v961_v63 = vpop.f32.mrb[46].mxu1  ;;  %v1395_v51 = vpop.f32.mrb[46].mxu0 }
 0x14f   : > { %v962_v11 = vadd.f32 %v961_v63, %v8001_v23  ;;  %v6291_v14 = vpop.f32.mrb[47].mxu0  ;;  %6454 = vmatmul.mubr.msk.f32.gmra.mrb[152].mxu1 %vm356_vm2, %v7789_v20  ;;  %6576 = vmatmul.mubr.msk.f32.gmra.mrb[152].mxu0 %vm356_vm2, %v2124_v6  ;;  %v6169_v18 = vpop.f32.mrb[47].mxu1  ;;  %v8267_v7 = vadd.f32 %v1395_v51, %v957_v62 }
 0x150   : > { %6456 = vmatprep.mubr.msk.f32.mxu1 %vm7306_vm1, %v7305_v1  ;;  %6578 = vmatprep.mubr.msk.f32.mxu0 %vm7306_vm1, %v7305_v1  ;;  %v2127_v14 = vld [vmem:[%s7416_s15 + $0xa0] sm:$0xff] }
 0x152   : > { %v966_v4 = vpop.f32.mrb[48].mxu1  ;;  %v1400_v12 = vpop.f32.mrb[48].mxu0 }
 0x153   : > { %v967_v23 = vadd.f32 %v966_v4, %v8016_v35  ;;  %v6294_v10 = vpop.f32.mrb[49].mxu0  ;;  %6457 = vmatmul.mubr.msk.f32.gmra.mrb[154].mxu1 %vm356_vm2, %v7800_v22  ;;  %6579 = vmatmul.mubr.msk.f32.gmra.mrb[154].mxu0 %vm356_vm2, %v2125_v8  ;;  %v6172_v20 = vpop.f32.mrb[49].mxu1  ;;  %v8278_v62 = vadd.f32 %v1400_v12, %v962_v11 }
 0x154   : > { %6459 = vmatprep.mubr.msk.f32.mxu1 %vm7306_vm1, %v7305_v1  ;;  %6581 = vmatprep.mubr.msk.f32.mxu0 %vm7306_vm1, %v7305_v1 }
 0x156   : > { %v971_v6 = vpop.f32.mrb[50].mxu1  ;;  %v1405_v63 = vpop.f32.mrb[50].mxu0 }
 0x157   : > { %v972_v35 = vadd.f32 %v971_v6, %v8031_v47  ;;  %v6297_v51 = vpop.f32.mrb[51].mxu0  ;;  %6460 = vmatmul.mubr.msk.f32.gmra.mrb[156].mxu1 %vm356_vm2, %v7811_v24  ;;  %6582 = vmatmul.mubr.msk.f32.gmra.mrb[156].mxu0 %vm356_vm2, %v2126_v16  ;;  %v6175_v22 = vpop.f32.mrb[51].mxu1  ;;  %v8289_v11 = vadd.f32 %v1405_v63, %v967_v23  ;;  %v2128_v23 = vld [vmem:[%s7416_s15 + $0xa8] sm:$0xff]  ;;  %v2129_v63 = vld [vmem:[%s7416_s15 + $0xb0] sm:$0xff] }
 0x158   : > { %6462 = vmatprep.mubr.msk.f32.mxu1 %vm7306_vm1, %v7305_v1  ;;  %6584 = vmatprep.mubr.msk.f32.mxu0 %vm7306_vm1, %v7305_v1 }
 0x15a   : > { %v976_v18 = vpop.f32.mrb[52].mxu1  ;;  %v1410_v8 = vpop.f32.mrb[52].mxu0 }
 0x15b   : > { %v977_v47 = vadd.f32 %v976_v18, %v8046_v5  ;;  %v6300_v4 = vpop.f32.mrb[53].mxu0  ;;  %6463 = vmatmul.mubr.msk.f32.gmra.mrb[158].mxu1 %vm356_vm2, %v7822_v26  ;;  %6585 = vmatmul.mubr.msk.f32.gmra.mrb[158].mxu0 %vm356_vm2, %v2127_v14  ;;  %v6178_v24 = vpop.f32.mrb[53].mxu1  ;;  %v8300_v12 = vadd.f32 %v1410_v8, %v972_v35  ;;  %v2130_v18 = vld [vmem:[%s7416_s15 + $0xb8] sm:$0xff] }
 0x15c   : > { %6465 = vmatprep.mubr.msk.f32.mxu1 %vm7306_vm1, %v7305_v1  ;;  %6587 = vmatprep.mubr.msk.f32.mxu0 %vm7306_vm1, %v7305_v1 }
 0x15e   : > { %v981_v10 = vpop.f32.mrb[54].mxu1  ;;  %v1415_v20 = vpop.f32.mrb[54].mxu0 }
 0x15f   : > { %v982_v5 = vadd.f32 %v981_v10, %v8061_v29  ;;  %v6303_v16 = vpop.f32.mrb[55].mxu0  ;;  %6466 = vmatmul.mubr.msk.f32.gmra.mrb[160].mxu1 %vm356_vm2, %v7833_v28  ;;  %6588 = vmatmul.mubr.msk.f32.gmra.mrb[160].mxu0 %vm356_vm2, %v2128_v23  ;;  %v6181_v26 = vpop.f32.mrb[55].mxu1  ;;  %v8311_v6 = vadd.f32 %v1415_v20, %v977_v47  ;;  %v2131_v23 = vld [vmem:[%s7416_s15 + $0xc0] sm:$0xff] }
 0x160   : > { %6468 = vmatprep.mubr.msk.f32.mxu1 %vm7306_vm1, %v7305_v1  ;;  %6590 = vmatprep.mubr.msk.f32.mxu0 %vm7306_vm1, %v7305_v1  ;;  %v2132_v26 = vld [vmem:[%s7416_s15 + $0xc8] sm:$0xff] }
 0x162   : > { %v986_v35 = vpop.f32.mrb[56].mxu1  ;;  %v1420_v51 = vpop.f32.mrb[56].mxu0 }
 0x163   : > { %v987_v29 = vadd.f32 %v986_v35, %v8078_v56  ;;  %v6306_v22 = vpop.f32.mrb[57].mxu0  ;;  %6469 = vmatmul.mubr.msk.f32.gmra.mrb[162].mxu1 %vm356_vm2, %v7844_v30  ;;  %6591 = vmatmul.mubr.msk.f32.gmra.mrb[162].mxu0 %vm356_vm2, %v2129_v63  ;;  %v6184_v28 = vpop.f32.mrb[57].mxu1  ;;  %v8322_v14 = vadd.f32 %v1420_v51, %v982_v5 }
 0x164   : > { %6471 = vmatprep.mubr.msk.f32.mxu1 %vm7306_vm1, %v7305_v1  ;;  %6593 = vmatprep.mubr.msk.f32.mxu0 %vm7306_vm1, %v7305_v1  ;;  %v2133_v22 = vld [vmem:[%s7416_s15 + $0xd0] sm:$0xff] }
 0x166   : > { %v991_v8 = vpop.f32.mrb[58].mxu1  ;;  %v1425_v47 = vpop.f32.mrb[58].mxu0 }
 0x167   : > { %v992_v56 = vadd.f32 %v991_v8, %v8096_v41  ;;  %v6309_v4 = vpop.f32.mrb[59].mxu0  ;;  %6472 = vmatmul.mubr.msk.f32.gmra.mrb[164].mxu1 %vm356_vm2, %v7855_v32  ;;  %6594 = vmatmul.mubr.msk.f32.gmra.mrb[164].mxu0 %vm356_vm2, %v2130_v18  ;;  %v6187_v30 = vpop.f32.mrb[59].mxu1  ;;  %v8333_v24 = vadd.f32 %v1425_v47, %v987_v29 }
 0x168   : > { %6474 = vmatprep.mubr.msk.f32.mxu1 %vm7306_vm1, %v7305_v1  ;;  %6596 = vmatprep.mubr.msk.f32.mxu0 %vm7306_vm1, %v7305_v1 }
 0x16a   : > { %v996_v10 = vpop.f32.mrb[60].mxu1  ;;  %v1430_v20 = vpop.f32.mrb[60].mxu0 }
 0x16b   : > { %v997_v41 = vadd.f32 %v996_v10, %v8110_v53  ;;  %v6312_v5 = vpop.f32.mrb[61].mxu0  ;;  %6475 = vmatmul.mubr.msk.f32.gmra.mrb[166].mxu1 %vm356_vm2, %v7866_v34  ;;  %6597 = vmatmul.mubr.msk.f32.gmra.mrb[166].mxu0 %vm356_vm2, %v2131_v23  ;;  %v6190_v32 = vpop.f32.mrb[61].mxu1  ;;  %v8344_v16 = vadd.f32 %v1430_v20, %v992_v56  ;;  %v2134_v56 = vld [vmem:[%s7416_s15 + $0xd8] sm:$0xff]  ;;  %v2135_v20 = vld [vmem:[%s7416_s15 + $0xe0] sm:$0xff] }
 0x16c   : > { %6477 = vmatprep.mubr.msk.f32.mxu1 %vm7306_vm1, %v7305_v1  ;;  %6599 = vmatprep.mubr.msk.f32.mxu0 %vm7306_vm1, %v7305_v1 }
 0x16e   : > { %v1001_v63 = vpop.f32.mrb[62].mxu1  ;;  %v1435_v35 = vpop.f32.mrb[62].mxu0 }
 0x16f   : > { %v1002_v53 = vadd.f32 %v1001_v63, %v8122_v54  ;;  %v6315_v51 = vpop.f32.mrb[63].mxu0  ;;  %6478 = vmatmul.mubr.msk.f32.gmra.mrb[168].mxu1 %vm356_vm2, %v7877_v36  ;;  %6600 = vmatmul.mubr.msk.f32.gmra.mrb[168].mxu0 %vm356_vm2, %v2132_v26  ;;  %v6193_v34 = vpop.f32.mrb[63].mxu1  ;;  %v8355_v29 = vadd.f32 %v1435_v35, %v997_v41  ;;  %v2136_v63 = vld [vmem:[%s7416_s15 + $0xe8] sm:$0xff] }
 0x170   : > { %6480 = vmatprep.mubr.msk.f32.mxu1 %vm7306_vm1, %v7305_v1  ;;  %6602 = vmatprep.mubr.msk.f32.mxu0 %vm7306_vm1, %v7305_v1 }
 0x172   : > { %v1006_v28 = vpop.f32.mrb[64].mxu1  ;;  %v1440_v18 = vpop.f32.mrb[64].mxu0 }
 0x173   : > { %v1007_v54 = vadd.f32 %v1006_v28, %v8134_v55  ;;  %v6318_v8 = vpop.f32.mrb[65].mxu0  ;;  %6481 = vmatmul.mubr.msk.f32.gmra.mrb[170].mxu1 %vm356_vm2, %v7888_v38  ;;  %6603 = vmatmul.mubr.msk.f32.gmra.mrb[170].mxu0 %vm356_vm2, %v2133_v22  ;;  %v6196_v36 = vpop.f32.mrb[65].mxu1  ;;  %v8366_v47 = vadd.f32 %v1440_v18, %v1002_v53  ;;  %v2137_v22 = vld [vmem:[%s7416_s15 + $0xf0] sm:$0xff] }
 0x174   : > { %6483 = vmatprep.mubr.msk.f32.mxu1 %vm7306_vm1, %v7305_v1  ;;  %6605 = vmatprep.mubr.msk.f32.mxu0 %vm7306_vm1, %v7305_v1  ;;  %v2138_v36 = vld [vmem:[%s7416_s15 + $0xf8] sm:$0xff] }
 0x176   : > { %v1011_v4 = vpop.f32.mrb[66].mxu1  ;;  %v1445_v30 = vpop.f32.mrb[66].mxu0 }
 0x177   : > { %v1012_v55 = vadd.f32 %v1011_v4, %v8146_v39  ;;  %v6321_v23 = vpop.f32.mrb[67].mxu0  ;;  %6484 = vmatmul.mubr.msk.f32.gmra.mrb[172].mxu1 %vm356_vm2, %v7899_v40  ;;  %6606 = vmatmul.mubr.msk.f32.gmra.mrb[172].mxu0 %vm356_vm2, %v2134_v56  ;;  %v6199_v38 = vpop.f32.mrb[67].mxu1  ;;  %v8377_v10 = vadd.f32 %v1445_v30, %v1007_v54 }
 0x178   : > { %6486 = vmatprep.mubr.msk.f32.mxu1 %vm7306_vm1, %v7305_v1  ;;  %6608 = vmatprep.mubr.msk.f32.mxu0 %vm7306_vm1, %v7305_v1  ;;  %v2139_v23 = vld [vmem:[%s7416_s15 + $0x100] sm:$0xff] }
 0x17a   : > { %v1016_v41 = vpop.f32.mrb[68].mxu1  ;;  %v1450_v5 = vpop.f32.mrb[68].mxu0 }
 0x17b   : > { %v1017_v39 = vadd.f32 %v1016_v41, %v8158_v17  ;;  %v6324_v32 = vpop.f32.mrb[69].mxu0  ;;  %6487 = vmatmul.mubr.msk.f32.gmra.mrb[174].mxu1 %vm356_vm2, %v7910_v42  ;;  %6609 = vmatmul.mubr.msk.f32.gmra.mrb[174].mxu0 %vm356_vm2, %v2135_v20  ;;  %v6202_v40 = vpop.f32.mrb[69].mxu1  ;;  %v8388_v26 = vadd.f32 %v1450_v5, %v1012_v55 }
 0x17c   : > { %6489 = vmatprep.mubr.msk.f32.mxu1 %vm7306_vm1, %v7305_v1  ;;  %6611 = vmatprep.mubr.msk.f32.mxu0 %vm7306_vm1, %v7305_v1 }
 0x17e   : > { %v1021_v35 = vpop.f32.mrb[70].mxu1  ;;  %v1455_v53 = vpop.f32.mrb[70].mxu0 }
 0x17f   : > { %v1022_v17 = vadd.f32 %v1021_v35, %v8170_v15  ;;  %v6327_v51 = vpop.f32.mrb[71].mxu0  ;;  %6490 = vmatmul.mubr.msk.f32.gmra.mrb[176].mxu1 %vm356_vm2, %v7921_v44  ;;  %6612 = vmatmul.mubr.msk.f32.gmra.mrb[176].mxu0 %vm356_vm2, %v2136_v63  ;;  %v6205_v42 = vpop.f32.mrb[71].mxu1  ;;  %v8399_v34 = vadd.f32 %v1455_v53, %v1017_v39  ;;  %v2140_v39 = vld [vmem:[%s7416_s15 + $0x108] sm:$0xff]  ;;  %v2141_v53 = vld [vmem:[%s7416_s15 + $0x110] sm:$0xff] }
 0x180   : > { %6492 = vmatprep.mubr.msk.f32.mxu1 %vm7306_vm1, %v7305_v1  ;;  %6614 = vmatprep.mubr.msk.f32.mxu0 %vm7306_vm1, %v7305_v1 }
 0x182   : > { %v1026_v28 = vpop.f32.mrb[72].mxu1  ;;  %v1460_v18 = vpop.f32.mrb[72].mxu0 }
 0x183   : > { %v1027_v15 = vadd.f32 %v1026_v28, %v8182_v58  ;;  %v6330_v54 = vpop.f32.mrb[73].mxu0  ;;  %6493 = vmatmul.mubr.msk.f32.gmra.mrb[178].mxu1 %vm356_vm2, %v7932_v46  ;;  %6615 = vmatmul.mubr.msk.f32.gmra.mrb[178].mxu0 %vm356_vm2, %v2137_v22  ;;  %v6208_v44 = vpop.f32.mrb[73].mxu1  ;;  %v8410_v8 = vadd.f32 %v1460_v18, %v1022_v17  ;;  %v2142_v28 = vld [vmem:[%s7416_s15 + $0x118] sm:$0xff] }
 0x184   : > { %6495 = vmatprep.mubr.msk.f32.mxu1 %vm7306_vm1, %v7305_v1  ;;  %6617 = vmatprep.mubr.msk.f32.mxu0 %vm7306_vm1, %v7305_v1 }
 0x186   : > { %v1031_v56 = vpop.f32.mrb[74].mxu1  ;;  %v1465_v4 = vpop.f32.mrb[74].mxu0 }
 0x187   : > { %v1032_v58 = vadd.f32 %v1031_v56, %v8194_v19  ;;  %v6333_v30 = vpop.f32.mrb[75].mxu0  ;;  %6496 = vmatmul.mubr.msk.f32.gmra.mrb[180].mxu1 %vm356_vm2, %v7943_v48  ;;  %6618 = vmatmul.mubr.msk.f32.gmra.mrb[180].mxu0 %vm356_vm2, %v2138_v36  ;;  %v6211_v46 = vpop.f32.mrb[75].mxu1  ;;  %v8421_v55 = vadd.f32 %v1465_v4, %v1027_v15  ;;  %v2143_v36 = vld [vmem:[%s7416_s15 + $0x120] sm:$0xff] }
 0x188   : > { %6498 = vmatprep.mubr.msk.f32.mxu1 %vm7306_vm1, %v7305_v1  ;;  %6620 = vmatprep.mubr.msk.f32.mxu0 %vm7306_vm1, %v7305_v1  ;;  %v2144_v46 = vld [vmem:[%s7416_s15 + $0x128] sm:$0xff] }
 0x18a   : > { %v1036_v38 = vpop.f32.mrb[76].mxu1  ;;  %v1470_v20 = vpop.f32.mrb[76].mxu0 }
 0x18b   : > { %v1037_v19 = vadd.f32 %v1036_v38, %v8206_v57  ;;  %v6336_v41 = vpop.f32.mrb[77].mxu0  ;;  %6499 = vmatmul.mubr.msk.f32.gmra.mrb[182].mxu1 %vm356_vm2, %v7954_v50  ;;  %6621 = vmatmul.mubr.msk.f32.gmra.mrb[182].mxu0 %vm356_vm2, %v2139_v23  ;;  %v6214_v48 = vpop.f32.mrb[77].mxu1  ;;  %v8432_v5 = vadd.f32 %v1470_v20, %v1032_v58 }
 0x18c   : > { %6501 = vmatprep.mubr.msk.f32.mxu1 %vm7306_vm1, %v7305_v1  ;;  %6623 = vmatprep.mubr.msk.f32.mxu0 %vm7306_vm1, %v7305_v1  ;;  %v2145_v41 = vld [vmem:[%s7416_s15 + $0x130] sm:$0xff] }
 0x18e   : > { %v1041_v32 = vpop.f32.mrb[78].mxu1  ;;  %v1475_v40 = vpop.f32.mrb[78].mxu0 }
 0x18f   : > { %v1042_v57 = vadd.f32 %v1041_v32, %v8218_v59  ;;  %v6339_v63 = vpop.f32.mrb[79].mxu0  ;;  %6502 = vmatmul.mubr.msk.f32.gmra.mrb[184].mxu1 %vm356_vm2, %v7969_v60  ;;  %6624 = vmatmul.mubr.msk.f32.gmra.mrb[184].mxu0 %vm356_vm2, %v2140_v39  ;;  %v6217_v50 = vpop.f32.mrb[79].mxu1  ;;  %v8443_v35 = vadd.f32 %v1475_v40, %v1037_v19 }
 0x190   : > { %6504 = vmatprep.mubr.msk.f32.mxu1 %vm7306_vm1, %v7305_v1  ;;  %6626 = vmatprep.mubr.msk.f32.mxu0 %vm7306_vm1, %v7305_v1 }
 0x192   : > { %v1046_v17 = vpop.f32.mrb[80].mxu1  ;;  %v1480_v51 = vpop.f32.mrb[80].mxu0 }
 0x193   : > { %v1047_v59 = vadd.f32 %v1046_v17, %v8230_v61  ;;  %v6342_v42 = vpop.f32.mrb[81].mxu0  ;;  %6505 = vmatmul.mubr.msk.f32.gmra.mrb[186].mxu1 %vm356_vm2, %v7984_v9  ;;  %6627 = vmatmul.mubr.msk.f32.gmra.mrb[186].mxu0 %vm356_vm2, %v2141_v53  ;;  %v6220_v60 = vpop.f32.mrb[81].mxu1  ;;  %v8454_v22 = vadd.f32 %v1480_v51, %v1042_v57  ;;  %v2146_v57 = vld [vmem:[%s7416_s15 + $0x138] sm:$0xff]  ;;  %v2147_v51 = vld [vmem:[%s7416_s15 + $0x140] sm:$0xff] }
 0x194   : > { %6507 = vmatprep.mubr.msk.f32.mxu1 %vm7306_vm1, %v7305_v1  ;;  %6629 = vmatprep.mubr.msk.f32.mxu0 %vm7306_vm1, %v7305_v1 }
 0x196   : > { %v1051_v18 = vpop.f32.mrb[82].mxu1  ;;  %v1485_v15 = vpop.f32.mrb[82].mxu0 }
 0x197   : > { %v1052_v61 = vadd.f32 %v1051_v18, %v7958_v52  ;;  %v6345_v54 = vpop.f32.mrb[83].mxu0  ;;  %6508 = vmatmul.mubr.msk.f32.gmra.mrb[188].mxu1 %vm356_vm2, %v7999_v21  ;;  %6630 = vmatmul.mubr.msk.f32.gmra.mrb[188].mxu0 %vm356_vm2, %v2142_v28  ;;  %v6223_v9 = vpop.f32.mrb[83].mxu1  ;;  %v8465_v44 = vadd.f32 %v1485_v15, %v1047_v59  ;;  %v1669_v18 = vld [vmem:[%s7416_s15 + $0x14f] sm:$0xff] }
 0x198   : > { %6510 = vmatprep.mubr.msk.f32.mxu1 %vm7306_vm1, %v7305_v1  ;;  %6632 = vmatprep.mubr.msk.f32.mxu0 %vm7306_vm1, %v7305_v1  ;;  %v2148_v15 = vld [vmem:[%s7416_s15 + $0x148] sm:$0xff] }
 0x199   : > { %v9971_v54 = vld [vmem:[#allocation8_spill] sm:$0xff] }
 0x19a   : > { %v1056_v56 = vpop.f32.mrb[84].mxu1  ;;  %v1490_v4 = vpop.f32.mrb[84].mxu0 }
 0x19b   : > { %v1057_v52 = vadd.f32 %v1056_v56, %v7973_v0  ;;  %v6348_v58 = vpop.f32.mrb[85].mxu0  ;;  %6511 = vmatmul.mubr.msk.f32.gmra.mrb[190].mxu1 %vm356_vm2, %v8014_v33  ;;  %6633 = vmatmul.mubr.msk.f32.gmra.mrb[190].mxu0 %vm356_vm2, %v2143_v36  ;;  %v6226_v21 = vpop.f32.mrb[85].mxu1  ;;  %v8476_v30 = vadd.f32 %v1490_v4, %v1052_v61  ;;  %v1670_v4 = vld [vmem:[%s7416_s15 + $0x157] sm:$0xff] }
 0x19c   : > { %6513 = vmatprep.mubr.msk.f32.mxu1 %vm7306_vm1, %v7305_v1  ;;  %6635 = vmatprep.mubr.msk.f32.mxu0 %vm7306_vm1, %v7305_v1 }
 0x19e   : > { %v1061_v23 = vpop.f32.mrb[86].mxu1  ;;  %v1495_v38 = vpop.f32.mrb[86].mxu0 }
 0x19f   : > { %v1062_v0 = vadd.f32 %v1061_v23, %v7988_v13  ;;  %v6351_v20 = vpop.f32.mrb[87].mxu0  ;;  %6514 = vmatmul.mubr.msk.f32.gmra.mrb[192].mxu1 %vm356_vm2, %v8029_v45  ;;  %6636 = vmatmul.mubr.msk.f32.gmra.mrb[192].mxu0 %vm356_vm2, %v2144_v46  ;;  %v6229_v33 = vpop.f32.mrb[87].mxu1  ;;  %v8487_v19 = vadd.f32 %v1495_v38, %v1057_v52  ;;  %v2149_v52 = vld [vmem:[%s7416_s15 + $0x150] sm:$0xff] }
 0x1a0   : > { %6516 = vmatprep.mubr.msk.f32.mxu1 %vm7306_vm1, %v7305_v1  ;;  %6638 = vmatprep.mubr.msk.f32.mxu0 %vm7306_vm1, %v7305_v1  ;;  %v9972_v46 = vld [vmem:[#allocation9_spill] sm:$0xff]  ;;  %v2150_v33 = vld [vmem:[%s7416_s15 + $0x158] sm:$0xff] }
 0x1a2   : > { %v1066_v48 = vpop.f32.mrb[88].mxu1  ;;  %v1500_v39 = vpop.f32.mrb[88].mxu0 }
 0x1a3   : > { %v1067_v13 = vadd.f32 %v1066_v48, %v8003_v25  ;;  %v6354_v32 = vpop.f32.mrb[89].mxu0  ;;  %6517 = vmatmul.mubr.msk.f32.gmra.mrb[194].mxu1 %vm356_vm2, %v8044_v3  ;;  %6639 = vmatmul.mubr.msk.f32.gmra.mrb[194].mxu0 %vm356_vm2, %v2145_v41  ;;  %v6232_v45 = vpop.f32.mrb[89].mxu1  ;;  %v8498_v40 = vadd.f32 %v1500_v39, %v1062_v0  ;;  %v2590_v41 = vld [vmem:[%s7416_s15 + $0x19] sm:$0xff] }
 0x1a4   : > { %6519 = vmatprep.mubr.msk.f32.mxu1 %vm7306_vm1, %v7305_v1  ;;  %6641 = vmatprep.mubr.msk.f32.mxu0 %vm7306_vm1, %v7305_v1  ;;  %v5562_v48 = vld [vmem:[%s9949_s1 + $0x1c] sm:$0xf]  ;;  %v9973_v32 = vld [vmem:[#allocation10_spill] sm:$0xff] }
 0x1a6   : > { %v1071_v63 = vpop.f32.mrb[90].mxu1  ;;  %v1505_v50 = vpop.f32.mrb[90].mxu0 }
 0x1a7   : > { %v1072_v25 = vadd.f32 %v1071_v63, %v8018_v37  ;;  %v6357_v53 = vpop.f32.mrb[91].mxu0  ;;  %6520 = vmatmul.mubr.msk.f32.gmra.mrb[196].mxu1 %vm356_vm2, %v8059_v27  ;;  %6642 = vmatmul.mubr.msk.f32.gmra.mrb[196].mxu0 %vm356_vm2, %v2146_v57  ;;  %v6235_v3 = vpop.f32.mrb[91].mxu1  ;;  %v8509_v17 = vadd.f32 %v1505_v50, %v1067_v13 }
 0x1a8   : > { %6522 = vmatprep.mubr.msk.f32.mxu1 %vm7306_vm1, %v7305_v1  ;;  %6644 = vmatprep.mubr.msk.f32.mxu0 %vm7306_vm1, %v7305_v1  ;;  %v3070_v53 = vld [vmem:[%s7416_s15 + $0x29] sm:$0xff]  ;;  %v5605_v3 = vld [vmem:[%s9949_s1 + $0x20] sm:$0xf] }
 0x1aa   : > { %v1076_v59 = vpop.f32.mrb[92].mxu1  ;;  %v1510_v37 = vpop.f32.mrb[92].mxu0 }
 0x1ab   : > { %v1077_v42 = vadd.f32 %v1076_v59, %v8033_v49  ;;  %v6360_v60 = vpop.f32.mrb[93].mxu0  ;;  %6523 = vmatmul.mubr.msk.f32.gmra.mrb[198].mxu1 %vm356_vm2, %v8073_v43  ;;  %6645 = vmatmul.mubr.msk.f32.gmra.mrb[198].mxu0 %vm356_vm2, %v2147_v51  ;;  %v6238_v27 = vpop.f32.mrb[93].mxu1  ;;  %v8520_v28 = vadd.f32 %v1510_v37, %v1072_v25  ;;  %v2591_v25 = vld [vmem:[%s7416_s15 + $0x21] sm:$0xff] }
 0x1ac   : > { %6525 = vmatprep.mubr.msk.f32.mxu1 %vm7306_vm1, %v7305_v1  ;;  %6647 = vmatprep.mubr.msk.f32.mxu0 %vm7306_vm1, %v7305_v1  ;;  %v9974_v37 = vld [vmem:[#allocation11_spill] sm:$0xff] }
 0x1ae   : > { %v1081_v49 = vpop.f32.mrb[94].mxu1  ;;  %v1515_v61 = vpop.f32.mrb[94].mxu0 }
 0x1af   : > { %v1082_v9 = vadd.f32 %v1081_v49, %v9971_v54  ;;  %v6363_v43 = vpop.f32.mrb[95].mxu0  ;;  %6526 = vmatmul.mubr.msk.f32.gmra.mrb[200].mxu1 %vm356_vm2, %v1669_v18  ;;  %6648 = vmatmul.mubr.msk.f32.gmra.mrb[200].mxu0 %vm356_vm2, %v2148_v15  ;;  %v6241_v36 = vpop.f32.mrb[95].mxu1  ;;  %v8531_v56 = vadd.f32 %v1515_v61, %v1077_v42  ;;  %v3071_v15 = vld [vmem:[%s7416_s15 + $0x31] sm:$0xff]  ;;  %v9975_v54 = vld [vmem:[#allocation12_spill] sm:$0xff] }
 0x1b0   : > { %6528 = vmatprep.mubr.msk.f32.mxu1 %vm7306_vm1, %v7305_v1  ;;  %6650 = vmatprep.mubr.msk.f32.mxu0 %vm7306_vm1, %v7305_v1 }
 0x1b2   : > { %v1086_v58 = vpop.f32.mrb[96].mxu1  ;;  %v1520_v21 = vpop.f32.mrb[96].mxu0 }
 0x1b3   : > { %v1087_v23 = vadd.f32 %v1086_v58, %v9972_v46  ;;  %v6366_v38 = vpop.f32.mrb[97].mxu0  ;;  %6529 = vmatmul.mubr.msk.f32.gmra.mrb[202].mxu1 %vm356_vm2, %v1670_v4  ;;  %6651 = vmatmul.mubr.msk.f32.gmra.mrb[202].mxu0 %vm356_vm2, %v2149_v52  ;;  %v6244_v0 = vpop.f32.mrb[97].mxu1  ;;  %v8542_v20 = vadd.f32 %v1520_v21, %v1082_v9  ;;  %v3072_v52 = vld [vmem:[%s7416_s15 + $0x39] sm:$0xff]  ;;  %v9976_v46 = vld [vmem:[#allocation13_spill] sm:$0xff] }
 0x1b4   : > { %6653 = vmatprep.mubr.msk.f32.mxu0 %vm7306_vm1, %v7305_v1  ;;  %6658 = vmatprep.mubr.msk.f32.mxu1 %vm7306_vm1, %v7305_v1 }
 0x1b6   : > { %v1091_v39 = vpop.f32.mrb[98].mxu1  ;;  %v1525_v13 = vpop.f32.mrb[98].mxu0 }
 0x1b7   : > { %v1092_v45 = vadd.f32 %v1091_v39, %v9973_v32  ;;  %v6369_v57 = vpop.f32.mrb[99].mxu0  ;;  %6654 = vmatmul.mubr.msk.f32.gmra.mrb[204].mxu0 %vm356_vm2, %v2150_v33  ;;  %6659 = vmatmul.mubr.msk.f32.vlgmr.msra.gmra.mrb[204].mxu1 %vm356_vm2, %v2590_v41  ;;  %v6247_v63 = vpop.f32.mrb[99].mxu1  ;;  %v8556_v50 = vadd.f32 %v1525_v13, %v1087_v23  ;;  %v3073_v41 = vld [vmem:[%s7416_s15 + $0x41] sm:$0xff]  ;;  %v9977_v13 = vld [vmem:[#allocation14_spill] sm:$0xff] }
 0x1b8   : > { %6907 = vmatpush3.msk.msra.mxu1 %vm480_vm0, %v5562_v48  ;;  %6661 = vmatprep.mubr.msk.f32.mxu1 %vm7306_vm1, %v7305_v1 }
 0x1b9   : > { %6783 = vmatprep.mubr.msk.f32.mxu0 %vm7306_vm1, %v7305_v1 }
 0x1ba   : > { %v1096_v51 = vpop.f32.mrb[100].mxu1  ;;  %v1530_v59 = vpop.f32.mrb[100].mxu0 }
 0x1bb   : > { %v1097_v42 = vadd.f32 %v1096_v51, %v9974_v37  ;;  %v6372_v60 = vpop.f32.mrb[101].mxu0  ;;  %6662 = vmatmul.mubr.msk.f32.gmra.mrb[206].mxu1 %vm356_vm2, %v2591_v25  ;;  %6784 = vmatmul.mubr.msk.f32.vlgmr.msra.gmra.mrb[206].mxu0 %vm356_vm2, %v3070_v53  ;;  %v6250_v27 = vpop.f32.mrb[101].mxu1  ;;  %v8571_v18 = vadd.f32 %v1530_v59, %v1092_v45  ;;  %v3074_v25 = vld [vmem:[%s7416_s15 + $0x49] sm:$0xff]  ;;  %v9978_v51 = vld [vmem:[#allocation15_spill] sm:$0xff] }
 0x1bc   : > { %7032 = vmatpush3.msk.msra.mxu0 %vm480_vm0, %v5605_v3  ;;  %6664 = vmatprep.mubr.msk.f32.mxu1 %vm7306_vm1, %v7305_v1  ;;  %v3075_v27 = vld [vmem:[%s7416_s15 + $0x51] sm:$0xff] }
 0x1bd   : > { %6786 = vmatprep.mubr.msk.f32.mxu0 %vm7306_vm1, %v7305_v1 }
 0x1be   : > { %v1101_v49 = vpop.f32.mrb[102].mxu1  ;;  %v1535_v61 = vpop.f32.mrb[102].mxu0 }
 0x1bf   : > { %v1102_v9 = vadd.f32 %v1101_v49, %v9975_v54  ;;  %v6375_v43 = vpop.f32.mrb[103].mxu0  ;;  %6665 = vmatmul.mubr.msk.f32.gmra.mrb[208].mxu1 %vm356_vm2, %v3070_v53  ;;  %6787 = vmatmul.mubr.msk.f32.gmra.mrb[208].mxu0 %vm356_vm2, %v3071_v15  ;;  %v6253_v36 = vpop.f32.mrb[103].mxu1  ;;  %v8582_v4 = vadd.f32 %v1535_v61, %v1097_v42  ;;  %v9979_v61 = vld [vmem:[#allocation16_spill] sm:$0xff] }
 0x1c0   : > { %6667 = vmatprep.mubr.msk.f32.mxu1 %vm7306_vm1, %v7305_v1  ;;  %6789 = vmatprep.mubr.msk.f32.mxu0 %vm7306_vm1, %v7305_v1 }
 0x1c2   : > { %v1106_v58 = vpop.f32.mrb[104].mxu1  ;;  %v1540_v21 = vpop.f32.mrb[104].mxu0 }
 0x1c3   : > { %v1107_v23 = vadd.f32 %v1106_v58, %v9976_v46  ;;  %v6378_v38 = vpop.f32.mrb[105].mxu0  ;;  %6668 = vmatmul.mubr.msk.f32.gmra.mrb[210].mxu1 %vm356_vm2, %v3071_v15  ;;  %6790 = vmatmul.mubr.msk.f32.gmra.mrb[210].mxu0 %vm356_vm2, %v3072_v52  ;;  %v6256_v0 = vpop.f32.mrb[105].mxu1  ;;  %v8592_v33 = vadd.f32 %v1540_v21, %v1102_v9  ;;  %v9980_v46 = vld [vmem:[#allocation17_spill] sm:$0xff] }
 0x1c4   : > { %6670 = vmatprep.mubr.msk.f32.mxu1 %vm7306_vm1, %v7305_v1  ;;  %6792 = vmatprep.mubr.msk.f32.mxu0 %vm7306_vm1, %v7305_v1 }
 0x1c6   : > { %v1111_v48 = vpop.f32.mrb[106].mxu1  ;;  %v1545_v39 = vpop.f32.mrb[106].mxu0 }
 0x1c7   : > { %v1112_v32 = vadd.f32 %v1111_v48, %v9977_v13  ;;  %v6381_v45 = vpop.f32.mrb[107].mxu0  ;;  %6671 = vmatmul.mubr.msk.f32.gmra.mrb[212].mxu1 %vm356_vm2, %v3072_v52  ;;  %6793 = vmatmul.mubr.msk.f32.gmra.mrb[212].mxu0 %vm356_vm2, %v3073_v41  ;;  %v6259_v57 = vpop.f32.mrb[107].mxu1  ;;  %v8602_v63 = vadd.f32 %v1545_v39, %v1107_v23  ;;  %v3076_v52 = vld [vmem:[%s7416_s15 + $0x59] sm:$0xff]  ;;  %v3077_v48 = vld [vmem:[%s7416_s15 + $0x61] sm:$0xff] }
 0x1c8   : > { %6673 = vmatprep.mubr.msk.f32.mxu1 %vm7306_vm1, %v7305_v1  ;;  %6795 = vmatprep.mubr.msk.f32.mxu0 %vm7306_vm1, %v7305_v1 }
 0x1ca   : > { %v1116_v53 = vpop.f32.mrb[108].mxu1  ;;  %v1550_v3 = vpop.f32.mrb[108].mxu0 }
 0x1cb   : > { %v1117_v59 = vadd.f32 %v1116_v53, %v9978_v51  ;;  %v6384_v37 = vpop.f32.mrb[109].mxu0  ;;  %6674 = vmatmul.mubr.msk.f32.gmra.mrb[214].mxu1 %vm356_vm2, %v3073_v41  ;;  %6796 = vmatmul.mubr.msk.f32.gmra.mrb[214].mxu0 %vm356_vm2, %v3074_v25  ;;  %v6262_v42 = vpop.f32.mrb[109].mxu1  ;;  %v8612_v60 = vadd.f32 %v1550_v3, %v1112_v32  ;;  %v9981_v32 = vld [vmem:[#allocation18_spill] sm:$0xff]  ;;  %v3078_v3 = vld [vmem:[%s7416_s15 + $0x69] sm:$0xff] }
 0x1cc   : > { %6676 = vmatprep.mubr.msk.f32.mxu1 %vm7306_vm1, %v7305_v1  ;;  %6798 = vmatprep.mubr.msk.f32.mxu0 %vm7306_vm1, %v7305_v1  ;;  %v9982_v37 = vld [vmem:[#allocation19_spill] sm:$0xff] }
 0x1ce   : > { %v1121_v15 = vpop.f32.mrb[110].mxu1  ;;  %v1555_v49 = vpop.f32.mrb[110].mxu0 }
 0x1cf   : > { %v1122_v54 = vadd.f32 %v1121_v15, %v9979_v61  ;;  %v6387_v9 = vpop.f32.mrb[111].mxu0  ;;  %6677 = vmatmul.mubr.msk.f32.gmra.mrb[216].mxu1 %vm356_vm2, %v3074_v25  ;;  %6799 = vmatmul.mubr.msk.f32.gmra.mrb[216].mxu0 %vm356_vm2, %v3075_v27  ;;  %v6265_v43 = vpop.f32.mrb[111].mxu1  ;;  %v8622_v36 = vadd.f32 %v1555_v49, %v1117_v59  ;;  %v3079_v61 = vld [vmem:[%s7416_s15 + $0x71] sm:$0xff] }
 0x1d0   : > { %6679 = vmatprep.mubr.msk.f32.mxu1 %vm7306_vm1, %v7305_v1  ;;  %6801 = vmatprep.mubr.msk.f32.mxu0 %vm7306_vm1, %v7305_v1  ;;  %v9983_v43 = vld [vmem:[#allocation20_spill] sm:$0xff] }
 0x1d2   : > { %v1126_v58 = vpop.f32.mrb[112].mxu1  ;;  %v1560_v21 = vpop.f32.mrb[112].mxu0 }
 0x1d3   : > { %v1127_v23 = vadd.f32 %v1126_v58, %v9980_v46  ;;  %v6390_v38 = vpop.f32.mrb[113].mxu0  ;;  %6680 = vmatmul.mubr.msk.f32.gmra.mrb[218].mxu1 %vm356_vm2, %v3075_v27  ;;  %6802 = vmatmul.mubr.msk.f32.gmra.mrb[218].mxu0 %vm356_vm2, %v3076_v52  ;;  %v6268_v0 = vpop.f32.mrb[113].mxu1  ;;  %v8632_v41 = vadd.f32 %v1560_v21, %v1122_v54 }
 0x1d4   : > { %6682 = vmatprep.mubr.msk.f32.mxu1 %vm7306_vm1, %v7305_v1  ;;  %6804 = vmatprep.mubr.msk.f32.mxu0 %vm7306_vm1, %v7305_v1 }
 0x1d6   : > { %v1131_v39 = vpop.f32.mrb[114].mxu1  ;;  %v1565_v13 = vpop.f32.mrb[114].mxu0 }
 0x1d7   : > { %v1132_v45 = vadd.f32 %v1131_v39, %v9981_v32  ;;  %v8640_v57 = vadd.f32 %v1565_v13, %v1127_v23  ;;  %v6393_v25 = vpop.f32.mrb[115].mxu0  ;;  %6683 = vmatmul.mubr.msk.f32.gmra.mrb[220].mxu1 %vm356_vm2, %v3076_v52  ;;  %6805 = vmatmul.mubr.msk.f32.gmra.mrb[220].mxu0 %vm356_vm2, %v3077_v48  ;;  %v6271_v53 = vpop.f32.mrb[115].mxu1  ;;  %v3080_v23 = vld [vmem:[%s7416_s15 + $0x79] sm:$0xff] }
 0x1d8   : > { %6685 = vmatprep.mubr.msk.f32.mxu1 %vm7306_vm1, %v7305_v1  ;;  %6807 = vmatprep.mubr.msk.f32.mxu0 %vm7306_vm1, %v7305_v1  ;;  %v3081_v25 = vld [vmem:[%s7416_s15 + $0x81] sm:$0xff] }
 0x1da   : > { %v1136_v51 = vpop.f32.mrb[116].mxu1  ;;  %v1570_v59 = vpop.f32.mrb[116].mxu0 }
 0x1db   : > { %v1137_v42 = vadd.f32 %v1136_v51, %v9982_v37  ;;  %v8650_v27 = vadd.f32 %v1570_v59, %v1132_v45  ;;  %v6396_v15 = vpop.f32.mrb[117].mxu0  ;;  %6686 = vmatmul.mubr.msk.f32.gmra.mrb[222].mxu1 %vm356_vm2, %v3077_v48  ;;  %6808 = vmatmul.mubr.msk.f32.gmra.mrb[222].mxu0 %vm356_vm2, %v3078_v3  ;;  %v6274_v49 = vpop.f32.mrb[117].mxu1  ;;  %v9984_v48 = vld [vmem:[#allocation21_spill] sm:$0xff] }
 0x1dc   : > { %6688 = vmatprep.mubr.msk.f32.mxu1 %vm7306_vm1, %v7305_v1  ;;  %6810 = vmatprep.mubr.msk.f32.mxu0 %vm7306_vm1, %v7305_v1  ;;  %v3082_v15 = vld [vmem:[%s7416_s15 + $0x89] sm:$0xff] }
 0x1de   : > { %v1141_v54 = vpop.f32.mrb[118].mxu1  ;;  %v1575_v9 = vpop.f32.mrb[118].mxu0 }
 0x1df   : > { %v1142_v52 = vadd.f32 %v1141_v54, %v9983_v43  ;;  %v8660_v58 = vadd.f32 %v1575_v9, %v1137_v42  ;;  %v6399_v21 = vpop.f32.mrb[119].mxu0  ;;  %6689 = vmatmul.mubr.msk.f32.gmra.mrb[224].mxu1 %vm356_vm2, %v3078_v3  ;;  %6811 = vmatmul.mubr.msk.f32.gmra.mrb[224].mxu0 %vm356_vm2, %v3079_v61  ;;  %v6277_v46 = vpop.f32.mrb[119].mxu1 }
 0x1e0   : > { %6691 = vmatprep.mubr.msk.f32.mxu1 %vm7306_vm1, %v7305_v1  ;;  %6813 = vmatprep.mubr.msk.f32.mxu0 %vm7306_vm1, %v7305_v1 }
 0x1e2   : > { %v1146_v38 = vpop.f32.mrb[120].mxu1  ;;  %v1580_v0 = vpop.f32.mrb[120].mxu0 }
 0x1e3   : > { %v1147_v39 = vadd.f32 %v1146_v38, %v9984_v48  ;;  %v8670_v13 = vadd.f32 %v1580_v0, %v1142_v52  ;;  %v6402_v32 = vpop.f32.mrb[121].mxu0  ;;  %6692 = vmatmul.mubr.msk.f32.gmra.mrb[226].mxu1 %vm356_vm2, %v3079_v61  ;;  %6814 = vmatmul.mubr.msk.f32.gmra.mrb[226].mxu0 %vm356_vm2, %v3080_v23  ;;  %v6280_v45 = vpop.f32.mrb[121].mxu1  ;;  %v3083_v52 = vld [vmem:[%s7416_s15 + $0x91] sm:$0xff]  ;;  %v3084_v48 = vld [vmem:[%s7416_s15 + $0x99] sm:$0xff] }
 0x1e4   : > { %6694 = vmatprep.mubr.msk.f32.mxu1 %vm7306_vm1, %v7305_v1  ;;  %6816 = vmatprep.mubr.msk.f32.mxu0 %vm7306_vm1, %v7305_v1 }
 0x1e6   : > { %v1585_v53 = vpop.f32.mrb[122].mxu0  ;;  %v1865_v3 = vpop.f32.mrb[122].mxu1 }
 0x1e7   : > { %v8679_v51 = vadd.f32 %v1585_v53, %v1147_v39  ;;  %v2069_v59 = vadd.f32 %v1865_v3, %v8245_v2  ;;  %v6405_v37 = vpop.f32.mrb[123].mxu0  ;;  %6695 = vmatmul.mubr.msk.f32.gmra.mrb[228].mxu1 %vm356_vm2, %v3080_v23  ;;  %6817 = vmatmul.mubr.msk.f32.gmra.mrb[228].mxu0 %vm356_vm2, %v3081_v25  ;;  %v6410_v42 = vpop.f32.mrb[123].mxu1  ;;  %v3085_v3 = vld [vmem:[%s7416_s15 + $0xa1] sm:$0xff] }
 0x1e8   : > { %6697 = vmatprep.mubr.msk.f32.mxu1 %vm7306_vm1, %v7305_v1  ;;  %6819 = vmatprep.mubr.msk.f32.mxu0 %vm7306_vm1, %v7305_v1 }
 0x1ea   : > { %v1870_v49 = vpop.f32.mrb[124].mxu1  ;;  %v2345_v61 = vpop.f32.mrb[124].mxu0 }
 0x1eb   : > { %v2070_v54 = vadd.f32 %v1870_v49, %v8256_v31  ;;  %v8690_v9 = vadd.f32 %v2345_v61, %v2069_v59  ;;  %v6535_v2 = vpop.f32.mrb[125].mxu0  ;;  %6698 = vmatmul.mubr.msk.f32.gmra.mrb[230].mxu1 %vm356_vm2, %v3081_v25  ;;  %6820 = vmatmul.mubr.msk.f32.gmra.mrb[230].mxu0 %vm356_vm2, %v3082_v15  ;;  %v6413_v43 = vpop.f32.mrb[125].mxu1  ;;  %v3086_v61 = vld [vmem:[%s7416_s15 + $0xa9] sm:$0xff] }
 0x1ec   : > { %6700 = vmatprep.mubr.msk.f32.mxu1 %vm7306_vm1, %v7305_v1  ;;  %6822 = vmatprep.mubr.msk.f32.mxu0 %vm7306_vm1, %v7305_v1 }
 0x1ee   : > { %v1875_v21 = vpop.f32.mrb[126].mxu1  ;;  %v2350_v46 = vpop.f32.mrb[126].mxu0 }
 0x1ef   : > { %v2071_v31 = vadd.f32 %v1875_v21, %v8267_v7  ;;  %v8700_v23 = vadd.f32 %v2350_v46, %v2070_v54  ;;  %v6538_v38 = vpop.f32.mrb[127].mxu0  ;;  %6701 = vmatmul.mubr.msk.f32.gmra.mrb[232].mxu1 %vm356_vm2, %v3082_v15  ;;  %6823 = vmatmul.mubr.msk.f32.gmra.mrb[232].mxu0 %vm356_vm2, %v3083_v52  ;;  %v6416_v0 = vpop.f32.mrb[127].mxu1  ;;  %v3087_v46 = vld [vmem:[%s7416_s15 + $0xb1] sm:$0xff] }
 0x1f0   : > { %6703 = vmatprep.mubr.msk.f32.mxu1 %vm7306_vm1, %v7305_v1  ;;  %6825 = vmatprep.mubr.msk.f32.mxu0 %vm7306_vm1, %v7305_v1 }
 0x1f2   : > { %v1880_v39 = vpop.f32.mrb[128].mxu1  ;;  %v2355_v32 = vpop.f32.mrb[128].mxu0 }
 0x1f3   : > { %v2072_v7 = vadd.f32 %v1880_v39, %v8278_v62  ;;  %v8710_v45 = vadd.f32 %v2355_v32, %v2071_v31  ;;  %v6541_v25 = vpop.f32.mrb[129].mxu0  ;;  %6704 = vmatmul.mubr.msk.f32.gmra.mrb[234].mxu1 %vm356_vm2, %v3083_v52  ;;  %6826 = vmatmul.mubr.msk.f32.gmra.mrb[234].mxu0 %vm356_vm2, %v3084_v48  ;;  %v6419_v53 = vpop.f32.mrb[129].mxu1  ;;  %v3088_v32 = vld [vmem:[%s7416_s15 + $0xb9] sm:$0xff] }
 0x1f4   : > { %6706 = vmatprep.mubr.msk.f32.mxu1 %vm7306_vm1, %v7305_v1  ;;  %6828 = vmatprep.mubr.msk.f32.mxu0 %vm7306_vm1, %v7305_v1 }
 0x1f6   : > { %v1885_v59 = vpop.f32.mrb[130].mxu1  ;;  %v2360_v37 = vpop.f32.mrb[130].mxu0 }
 0x1f7   : > { %v2073_v62 = vadd.f32 %v1885_v59, %v8289_v11  ;;  %v8720_v42 = vadd.f32 %v2360_v37, %v2072_v7  ;;  %v6544_v15 = vpop.f32.mrb[131].mxu0  ;;  %6707 = vmatmul.mubr.msk.f32.gmra.mrb[236].mxu1 %vm356_vm2, %v3084_v48  ;;  %6829 = vmatmul.mubr.msk.f32.gmra.mrb[236].mxu0 %vm356_vm2, %v3085_v3  ;;  %v6422_v49 = vpop.f32.mrb[131].mxu1  ;;  %v3089_v37 = vld [vmem:[%s7416_s15 + $0xc1] sm:$0xff] }
 0x1f8   : > { %6709 = vmatprep.mubr.msk.f32.mxu1 %vm7306_vm1, %v7305_v1  ;;  %6831 = vmatprep.mubr.msk.f32.mxu0 %vm7306_vm1, %v7305_v1 }
 0x1fa   : > { %v1890_v54 = vpop.f32.mrb[132].mxu1  ;;  %v2365_v2 = vpop.f32.mrb[132].mxu0 }
 0x1fb   : > { %v2074_v11 = vadd.f32 %v1890_v54, %v8300_v12  ;;  %v8730_v43 = vadd.f32 %v2365_v2, %v2073_v62  ;;  %v6547_v52 = vpop.f32.mrb[133].mxu0  ;;  %6710 = vmatmul.mubr.msk.f32.gmra.mrb[238].mxu1 %vm356_vm2, %v3085_v3  ;;  %6832 = vmatmul.mubr.msk.f32.gmra.mrb[238].mxu0 %vm356_vm2, %v3086_v61  ;;  %v6425_v21 = vpop.f32.mrb[133].mxu1  ;;  %v3090_v2 = vld [vmem:[%s7416_s15 + $0xc9] sm:$0xff] }
 0x1fc   : > { %6712 = vmatprep.mubr.msk.f32.mxu1 %vm7306_vm1, %v7305_v1  ;;  %6834 = vmatprep.mubr.msk.f32.mxu0 %vm7306_vm1, %v7305_v1 }
 0x1fe   : > { %v1895_v31 = vpop.f32.mrb[134].mxu1  ;;  %v2370_v38 = vpop.f32.mrb[134].mxu0 }
 0x1ff   : > { %v2075_v12 = vadd.f32 %v1895_v31, %v8311_v6  ;;  %v8740_v0 = vadd.f32 %v2370_v38, %v2074_v11  ;;  %v6550_v48 = vpop.f32.mrb[135].mxu0  ;;  %6713 = vmatmul.mubr.msk.f32.gmra.mrb[240].mxu1 %vm356_vm2, %v3086_v61  ;;  %6835 = vmatmul.mubr.msk.f32.gmra.mrb[240].mxu0 %vm356_vm2, %v3087_v46  ;;  %v6428_v39 = vpop.f32.mrb[135].mxu1  ;;  %v3091_v38 = vld [vmem:[%s7416_s15 + $0xd1] sm:$0xff] }
 0x200   : > { %6715 = vmatprep.mubr.msk.f32.mxu1 %vm7306_vm1, %v7305_v1  ;;  %6837 = vmatprep.mubr.msk.f32.mxu0 %vm7306_vm1, %v7305_v1 }
 0x202   : > { %v1900_v7 = vpop.f32.mrb[136].mxu1  ;;  %v2375_v25 = vpop.f32.mrb[136].mxu0 }
 0x203   : > { %v2076_v6 = vadd.f32 %v1900_v7, %v8322_v14  ;;  %v8750_v53 = vadd.f32 %v2375_v25, %v2075_v12  ;;  %v6553_v3 = vpop.f32.mrb[137].mxu0  ;;  %6716 = vmatmul.mubr.msk.f32.gmra.mrb[242].mxu1 %vm356_vm2, %v3087_v46  ;;  %6838 = vmatmul.mubr.msk.f32.gmra.mrb[242].mxu0 %vm356_vm2, %v3088_v32  ;;  %v6431_v59 = vpop.f32.mrb[137].mxu1  ;;  %v3092_v25 = vld [vmem:[%s7416_s15 + $0xd9] sm:$0xff] }
 0x204   : > { %6718 = vmatprep.mubr.msk.f32.mxu1 %vm7306_vm1, %v7305_v1  ;;  %6840 = vmatprep.mubr.msk.f32.mxu0 %vm7306_vm1, %v7305_v1 }
 0x206   : > { %v1905_v62 = vpop.f32.mrb[138].mxu1  ;;  %v2380_v15 = vpop.f32.mrb[138].mxu0 }
 0x207   : > { %v2077_v14 = vadd.f32 %v1905_v62, %v8333_v24  ;;  %v8760_v49 = vadd.f32 %v2380_v15, %v2076_v6  ;;  %v6556_v61 = vpop.f32.mrb[139].mxu0  ;;  %6719 = vmatmul.mubr.msk.f32.gmra.mrb[244].mxu1 %vm356_vm2, %v3088_v32  ;;  %6841 = vmatmul.mubr.msk.f32.gmra.mrb[244].mxu0 %vm356_vm2, %v3089_v37  ;;  %v6434_v54 = vpop.f32.mrb[139].mxu1  ;;  %v3093_v15 = vld [vmem:[%s7416_s15 + $0xe1] sm:$0xff] }
 0x208   : > { %6721 = vmatprep.mubr.msk.f32.mxu1 %vm7306_vm1, %v7305_v1  ;;  %6843 = vmatprep.mubr.msk.f32.mxu0 %vm7306_vm1, %v7305_v1 }
 0x20a   : > { %v1910_v11 = vpop.f32.mrb[140].mxu1  ;;  %v2385_v52 = vpop.f32.mrb[140].mxu0 }
 0x20b   : > { %v2078_v24 = vadd.f32 %v1910_v11, %v8344_v16  ;;  %v8770_v21 = vadd.f32 %v2385_v52, %v2077_v14  ;;  %v6559_v46 = vpop.f32.mrb[141].mxu0  ;;  %6722 = vmatmul.mubr.msk.f32.gmra.mrb[246].mxu1 %vm356_vm2, %v3089_v37  ;;  %6844 = vmatmul.mubr.msk.f32.gmra.mrb[246].mxu0 %vm356_vm2, %v3090_v2  ;;  %v6437_v31 = vpop.f32.mrb[141].mxu1  ;;  %v3094_v52 = vld [vmem:[%s7416_s15 + $0xe9] sm:$0xff] }
 0x20c   : > { %6724 = vmatprep.mubr.msk.f32.mxu1 %vm7306_vm1, %v7305_v1  ;;  %6846 = vmatprep.mubr.msk.f32.mxu0 %vm7306_vm1, %v7305_v1 }
 0x20e   : > { %v1915_v12 = vpop.f32.mrb[142].mxu1  ;;  %v2390_v48 = vpop.f32.mrb[142].mxu0 }
 0x20f   : > { %v2079_v16 = vadd.f32 %v1915_v12, %v8355_v29  ;;  %v8780_v39 = vadd.f32 %v2390_v48, %v2078_v24  ;;  %v6562_v32 = vpop.f32.mrb[143].mxu0  ;;  %6725 = vmatmul.mubr.msk.f32.gmra.mrb[248].mxu1 %vm356_vm2, %v3090_v2  ;;  %6847 = vmatmul.mubr.msk.f32.gmra.mrb[248].mxu0 %vm356_vm2, %v3091_v38  ;;  %v6440_v7 = vpop.f32.mrb[143].mxu1  ;;  %v3095_v48 = vld [vmem:[%s7416_s15 + $0xf1] sm:$0xff] }
 0x210   : > { %6727 = vmatprep.mubr.msk.f32.mxu1 %vm7306_vm1, %v7305_v1  ;;  %6849 = vmatprep.mubr.msk.f32.mxu0 %vm7306_vm1, %v7305_v1 }
 0x212   : > { %v1920_v6 = vpop.f32.mrb[144].mxu1  ;;  %v2395_v3 = vpop.f32.mrb[144].mxu0 }
 0x213   : > { %v2080_v29 = vadd.f32 %v1920_v6, %v8366_v47  ;;  %v8790_v59 = vadd.f32 %v2395_v3, %v2079_v16  ;;  %v6565_v37 = vpop.f32.mrb[145].mxu0  ;;  %6728 = vmatmul.mubr.msk.f32.gmra.mrb[250].mxu1 %vm356_vm2, %v3091_v38  ;;  %6850 = vmatmul.mubr.msk.f32.gmra.mrb[250].mxu0 %vm356_vm2, %v3092_v25  ;;  %v6443_v62 = vpop.f32.mrb[145].mxu1  ;;  %v3096_v3 = vld [vmem:[%s7416_s15 + $0xf9] sm:$0xff] }
 0x214   : > { %6730 = vmatprep.mubr.msk.f32.mxu1 %vm7306_vm1, %v7305_v1  ;;  %6852 = vmatprep.mubr.msk.f32.mxu0 %vm7306_vm1, %v7305_v1 }
 0x216   : > { %v1925_v14 = vpop.f32.mrb[146].mxu1  ;;  %v2400_v61 = vpop.f32.mrb[146].mxu0 }
 0x217   : > { %v2081_v47 = vadd.f32 %v1925_v14, %v8377_v10  ;;  %v8800_v54 = vadd.f32 %v2400_v61, %v2080_v29  ;;  %v6568_v2 = vpop.f32.mrb[147].mxu0  ;;  %6731 = vmatmul.mubr.msk.f32.gmra.mrb[252].mxu1 %vm356_vm2, %v3092_v25  ;;  %6853 = vmatmul.mubr.msk.f32.gmra.mrb[252].mxu0 %vm356_vm2, %v3093_v15  ;;  %v6446_v11 = vpop.f32.mrb[147].mxu1  ;;  %v3097_v61 = vld [vmem:[%s7416_s15 + $0x101] sm:$0xff] }
 0x218   : > { %6733 = vmatprep.mubr.msk.f32.mxu1 %vm7306_vm1, %v7305_v1  ;;  %6855 = vmatprep.mubr.msk.f32.mxu0 %vm7306_vm1, %v7305_v1 }
 0x21a   : > { %v1930_v24 = vpop.f32.mrb[148].mxu1  ;;  %v2405_v46 = vpop.f32.mrb[148].mxu0 }
 0x21b   : > { %v2082_v10 = vadd.f32 %v1930_v24, %v8388_v26  ;;  %v8810_v31 = vadd.f32 %v2405_v46, %v2081_v47  ;;  %v6571_v38 = vpop.f32.mrb[149].mxu0  ;;  %6734 = vmatmul.mubr.msk.f32.gmra.mrb[254].mxu1 %vm356_vm2, %v3093_v15  ;;  %6856 = vmatmul.mubr.msk.f32.gmra.mrb[254].mxu0 %vm356_vm2, %v3094_v52  ;;  %v6449_v12 = vpop.f32.mrb[149].mxu1  ;;  %v3098_v46 = vld [vmem:[%s7416_s15 + $0x109] sm:$0xff] }
 0x21c   : > { %6736 = vmatprep.mubr.msk.f32.mxu1 %vm7306_vm1, %v7305_v1  ;;  %6858 = vmatprep.mubr.msk.f32.mxu0 %vm7306_vm1, %v7305_v1 }
 0x21e   : > { %v1935_v16 = vpop.f32.mrb[150].mxu1  ;;  %v2410_v32 = vpop.f32.mrb[150].mxu0 }
 0x21f   : > { %v2083_v26 = vadd.f32 %v1935_v16, %v8399_v34  ;;  %v8820_v7 = vadd.f32 %v2410_v32, %v2082_v10  ;;  %v6574_v25 = vpop.f32.mrb[151].mxu0  ;;  %6737 = vmatmul.mubr.msk.f32.gmra.mrb[0].mxu1 %vm356_vm2, %v3094_v52  ;;  %6859 = vmatmul.mubr.msk.f32.gmra.mrb[0].mxu0 %vm356_vm2, %v3095_v48  ;;  %v6452_v6 = vpop.f32.mrb[151].mxu1  ;;  %v3099_v32 = vld [vmem:[%s7416_s15 + $0x111] sm:$0xff] }
 0x220   : > { %6739 = vmatprep.mubr.msk.f32.mxu1 %vm7306_vm1, %v7305_v1  ;;  %6861 = vmatprep.mubr.msk.f32.mxu0 %vm7306_vm1, %v7305_v1 }
 0x222   : > { %v1940_v29 = vpop.f32.mrb[152].mxu1  ;;  %v2415_v37 = vpop.f32.mrb[152].mxu0 }
 0x223   : > { %v2084_v34 = vadd.f32 %v1940_v29, %v8410_v8  ;;  %v8830_v62 = vadd.f32 %v2415_v37, %v2083_v26  ;;  %v6577_v15 = vpop.f32.mrb[153].mxu0  ;;  %6740 = vmatmul.mubr.msk.f32.gmra.mrb[2].mxu1 %vm356_vm2, %v3095_v48  ;;  %6862 = vmatmul.mubr.msk.f32.gmra.mrb[2].mxu0 %vm356_vm2, %v3096_v3  ;;  %v6455_v14 = vpop.f32.mrb[153].mxu1  ;;  %v3100_v37 = vld [vmem:[%s7416_s15 + $0x119] sm:$0xff] }
 0x224   : > { %6742 = vmatprep.mubr.msk.f32.mxu1 %vm7306_vm1, %v7305_v1  ;;  %6864 = vmatprep.mubr.msk.f32.mxu0 %vm7306_vm1, %v7305_v1 }
 0x226   : > { %v1945_v47 = vpop.f32.mrb[154].mxu1  ;;  %v2420_v2 = vpop.f32.mrb[154].mxu0 }
 0x227   : > { %v2085_v8 = vadd.f32 %v1945_v47, %v8421_v55  ;;  %v8840_v11 = vadd.f32 %v2420_v2, %v2084_v34  ;;  %v6580_v52 = vpop.f32.mrb[155].mxu0  ;;  %6743 = vmatmul.mubr.msk.f32.gmra.mrb[4].mxu1 %vm356_vm2, %v3096_v3  ;;  %6865 = vmatmul.mubr.msk.f32.gmra.mrb[4].mxu0 %vm356_vm2, %v3097_v61  ;;  %v6458_v24 = vpop.f32.mrb[155].mxu1  ;;  %v4558_v2 = vld [vmem:[%s9951_s3] sm:$0xff] }
 0x228   : > { %6745 = vmatprep.mubr.msk.f32.mxu1 %vm7306_vm1, %v7305_v1  ;;  %6867 = vmatprep.mubr.msk.f32.mxu0 %vm7306_vm1, %v7305_v1 }
 0x22a   : > { %v1950_v10 = vpop.f32.mrb[156].mxu1  ;;  %v2425_v38 = vpop.f32.mrb[156].mxu0 }
 0x22b   : > { %v2086_v55 = vadd.f32 %v1950_v10, %v8432_v5  ;;  %v8850_v12 = vadd.f32 %v2425_v38, %v2085_v8  ;;  %v6583_v48 = vpop.f32.mrb[157].mxu0  ;;  %6746 = vmatmul.mubr.msk.f32.gmra.mrb[6].mxu1 %vm356_vm2, %v3097_v61  ;;  %6868 = vmatmul.mubr.msk.f32.gmra.mrb[6].mxu0 %vm356_vm2, %v3098_v46  ;;  %v6461_v16 = vpop.f32.mrb[157].mxu1  ;;  %v3101_v8 = vld [vmem:[%s7416_s15 + $0x121] sm:$0xff] }
 0x22c   : > { %6748 = vmatprep.mubr.msk.f32.mxu1 %vm7306_vm1, %v7305_v1  ;;  %6870 = vmatprep.mubr.msk.f32.mxu0 %vm7306_vm1, %v7305_v1  ;;  %v4559_v48 = vld [vmem:[%s9951_s3 + $0x8] sm:$0xff] }
 0x22e   : > { %v1955_v26 = vpop.f32.mrb[158].mxu1  ;;  %v2430_v25 = vpop.f32.mrb[158].mxu0 }
 0x22f   : > { %v2087_v5 = vadd.f32 %v1955_v26, %v8443_v35  ;;  %v8860_v6 = vadd.f32 %v2430_v25, %v2086_v55  ;;  %v6586_v3 = vpop.f32.mrb[159].mxu0  ;;  %6749 = vmatmul.mubr.msk.f32.gmra.mrb[8].mxu1 %vm356_vm2, %v3098_v46  ;;  %6871 = vmatmul.mubr.msk.f32.gmra.mrb[8].mxu0 %vm356_vm2, %v3099_v32  ;;  %v6464_v29 = vpop.f32.mrb[159].mxu1 }
 0x230   : > { %6751 = vmatprep.mubr.msk.f32.mxu1 %vm7306_vm1, %v7305_v1  ;;  %6873 = vmatprep.mubr.msk.f32.mxu0 %vm7306_vm1, %v7305_v1  ;;  %v4560_v29 = vld [vmem:[%s9951_s3 + $0x10] sm:$0xff] }
 0x232   : > { %v1960_v34 = vpop.f32.mrb[160].mxu1  ;;  %v2435_v15 = vpop.f32.mrb[160].mxu0 }
 0x233   : > { %v2088_v35 = vadd.f32 %v1960_v34, %v8454_v22  ;;  %v8870_v14 = vadd.f32 %v2435_v15, %v2087_v5  ;;  %v6589_v61 = vpop.f32.mrb[161].mxu0  ;;  %6752 = vmatmul.mubr.msk.f32.gmra.mrb[10].mxu1 %vm356_vm2, %v3099_v32  ;;  %6874 = vmatmul.mubr.msk.f32.gmra.mrb[10].mxu0 %vm356_vm2, %v3100_v37  ;;  %v6467_v47 = vpop.f32.mrb[161].mxu1  ;;  %v7307_v22 = vmov 0  }
 0x234   : > { %6754 = vmatprep.mubr.msk.f32.mxu1 %vm7306_vm1, %v7305_v1  ;;  %6876 = vmatprep.mubr.msk.f32.mxu0 %vm7306_vm1, %v7305_v1 }
 0x235   : > { %7206 = vset.pattern.permute.xlu0 %v7307_v22  ;;  %7207 = vset.pattern.permute.xlu1 %v7307_v22  ;;  %v4564_v22 = vld [vmem:[%s9951_s3 + $0x30] sm:$0xff] }
 0x236   : > { %v1965_v52 = vpop.f32.mrb[162].mxu1  ;;  %v2440_v24 = vpop.f32.mrb[162].mxu0  ;;  %4601 = vperm.xlu0 %7206, %v4558_v2   ;;  %4611 = vperm.xlu1 %7207, %v4560_v29  }
 0x237   : > { %v2089_v46 = vadd.f32 %v1965_v52, %v8465_v44  ;;  %v8883_v10 = vadd.f32 %v2440_v24, %v2088_v35  ;;  %v6592_v38 = vpop.f32.mrb[163].mxu0  ;;  %6755 = vmatmul.mubr.msk.f32.gmra.mrb[12].mxu1 %vm356_vm2, %v3100_v37  ;;  %6877 = vmatmul.mubr.msk.f32.gmra.mrb[12].mxu0 %vm356_vm2, %v3101_v8  ;;  %v6470_v55 = vpop.f32.mrb[163].mxu1  ;;  %v3102_v44 = vld [vmem:[%s7416_s15 + $0x129] sm:$0xff]  ;;  %v4562_v37 = vld [vmem:[%s9951_s3 + $0x20] sm:$0xff] }
 0x238   : > { %6757 = vmatprep.mubr.msk.f32.mxu1 %vm7306_vm1, %v7305_v1  ;;  %6879 = vmatprep.mubr.msk.f32.mxu0 %vm7306_vm1, %v7305_v1 }
 0x23a   : > { %v1970_v16 = vpop.f32.mrb[164].mxu1  ;;  %v2445_v32 = vpop.f32.mrb[164].mxu0  ;;  %4606 = vperm.xlu0 %7206, %v4559_v48  }
 0x23b   : > { %v2090_v26 = vadd.f32 %v1970_v16, %v8476_v30  ;;  %v8896_v25 = vadd.f32 %v2445_v32, %v2089_v46  ;;  %v6595_v5 = vpop.f32.mrb[165].mxu0  ;;  %6758 = vmatmul.mubr.msk.f32.gmra.mrb[14].mxu1 %vm356_vm2, %v3101_v8  ;;  %6880 = vmatmul.mubr.msk.f32.gmra.mrb[14].mxu0 %vm356_vm2, %v3102_v44  ;;  %v6473_v3 = vpop.f32.mrb[165].mxu1  ;;  %v3103_v30 = vld [vmem:[%s7416_s15 + $0x131] sm:$0xff]  ;;  %v4566_v16 = vld [vmem:[%s9951_s3 + $0x40] sm:$0xff] }
 0x23c   : > { %6760 = vmatprep.mubr.msk.f32.mxu1 %vm7306_vm1, %v7305_v1  ;;  %6882 = vmatprep.mubr.msk.f32.mxu0 %vm7306_vm1, %v7305_v1  ;;  %v4561_v8 = vld [vmem:[%s9951_s3 + $0x18] sm:$0xff] }
 0x23d   : > { %4616 = vperm.xlu1 %7207, %v4561_v8  }
 0x23e   : > { %v1975_v34 = vpop.f32.mrb[166].mxu1  ;;  %v2450_v15 = vpop.f32.mrb[166].mxu0  ;;  %4621 = vperm.xlu0 %7206, %v4562_v37  }
 0x23f   : > { %v2091_v35 = vadd.f32 %v1975_v34, %v8487_v19  ;;  %v8912_v61 = vadd.f32 %v2450_v15, %v2090_v26  ;;  %v6598_v47 = vpop.f32.mrb[167].mxu0  ;;  %6761 = vmatmul.mubr.msk.f32.gmra.mrb[16].mxu1 %vm356_vm2, %v3102_v44  ;;  %6883 = vmatmul.mubr.msk.f32.gmra.mrb[16].mxu0 %vm356_vm2, %v3103_v30  ;;  %v6476_v2 = vpop.f32.mrb[167].mxu1  ;;  %v3104_v19 = vld [vmem:[%s7416_s15 + $0x139] sm:$0xff]  ;;  %v4563_v44 = vld [vmem:[%s9951_s3 + $0x28] sm:$0xff]  ;;  %v4568_v34 = vld [vmem:[%s9951_s3 + $0x50] sm:$0xff] }
 0x240   : > { %6763 = vmatprep.mubr.msk.f32.mxu1 %vm7306_vm1, %v7305_v1  ;;  %6885 = vmatprep.mubr.msk.f32.mxu0 %vm7306_vm1, %v7305_v1 }
 0x241   : > { %4626 = vperm.xlu1 %7207, %v4563_v44  }
 0x242   : > { %v1980_v52 = vpop.f32.mrb[168].mxu1  ;;  %v2455_v24 = vpop.f32.mrb[168].mxu0  ;;  %4631 = vperm.xlu0 %7206, %v4564_v22  }
 0x243   : > { %v2092_v46 = vadd.f32 %v1980_v52, %v8498_v40  ;;  %v8928_v38 = vadd.f32 %v2455_v24, %v2091_v35  ;;  %v6601_v55 = vpop.f32.mrb[169].mxu0  ;;  %6764 = vmatmul.mubr.msk.f32.gmra.mrb[18].mxu1 %vm356_vm2, %v3103_v30  ;;  %6886 = vmatmul.mubr.msk.f32.gmra.mrb[18].mxu0 %vm356_vm2, %v3104_v19  ;;  %v6479_v48 = vpop.f32.mrb[169].mxu1  ;;  %v3105_v40 = vld [vmem:[%s7416_s15 + $0x141] sm:$0xff]  ;;  %v4565_v30 = vld [vmem:[%s9951_s3 + $0x38] sm:$0xff] }
 0x244   : > { %6766 = vmatprep.mubr.msk.f32.mxu1 %vm7306_vm1, %v7305_v1  ;;  %6888 = vmatprep.mubr.msk.f32.mxu0 %vm7306_vm1, %v7305_v1  ;;  %v4570_v52 = vld [vmem:[%s9951_s3 + $0x60] sm:$0xff] }
 0x245   : > { %4636 = vperm.xlu1 %7207, %v4565_v30  }
 0x246   : > { %v1985_v32 = vpop.f32.mrb[170].mxu1  ;;  %v2460_v26 = vpop.f32.mrb[170].mxu0  ;;  %4641 = vperm.xlu0 %7206, %v4566_v16  }
 0x247   : > { %v2093_v5 = vadd.f32 %v1985_v32, %v8509_v17  ;;  %v8944_v3 = vadd.f32 %v2460_v26, %v2092_v46  ;;  %v6604_v29 = vpop.f32.mrb[171].mxu0  ;;  %6767 = vmatmul.mubr.msk.f32.gmra.mrb[20].mxu1 %vm356_vm2, %v3104_v19  ;;  %6889 = vmatmul.mubr.msk.f32.gmra.mrb[20].mxu0 %vm356_vm2, %v3105_v40  ;;  %v6482_v37 = vpop.f32.mrb[171].mxu1  ;;  %v3106_v17 = vld [vmem:[%s7416_s15 + $0x149] sm:$0xff] }
 0x248   : > { %6769 = vmatprep.mubr.msk.f32.mxu1 %vm7306_vm1, %v7305_v1  ;;  %6891 = vmatprep.mubr.msk.f32.mxu0 %vm7306_vm1, %v7305_v1  ;;  %v4567_v19 = vld [vmem:[%s9951_s3 + $0x48] sm:$0xff]  ;;  %v4572_v32 = vld [vmem:[%s9951_s3 + $0x70] sm:$0xff] }
 0x249   : > { %4646 = vperm.xlu1 %7207, %v4567_v19  }
 0x24a   : > { %v1990_v15 = vpop.f32.mrb[172].mxu1  ;;  %v2465_v35 = vpop.f32.mrb[172].mxu0  ;;  %4651 = vperm.xlu0 %7206, %v4568_v34  }
 0x24b   : > { %v2094_v47 = vadd.f32 %v1990_v15, %v8520_v28  ;;  %v8960_v2 = vadd.f32 %v2465_v35, %v2093_v5  ;;  %v6607_v8 = vpop.f32.mrb[173].mxu0  ;;  %6770 = vmatmul.mubr.msk.f32.gmra.mrb[22].mxu1 %vm356_vm2, %v3105_v40  ;;  %6892 = vmatmul.mubr.msk.f32.gmra.mrb[22].mxu0 %vm356_vm2, %v3106_v17  ;;  %v6485_v22 = vpop.f32.mrb[173].mxu1  ;;  %v3107_v28 = vld [vmem:[%s7416_s15 + $0x151] sm:$0xff]  ;;  %v4574_v15 = vld [vmem:[%s9951_s3 + $0x80] sm:$0xff] }
 0x24c   : > { %6772 = vmatprep.mubr.msk.f32.mxu1 %vm7306_vm1, %v7305_v1  ;;  %6894 = vmatprep.mubr.msk.f32.mxu0 %vm7306_vm1, %v7305_v1  ;;  %v4569_v40 = vld [vmem:[%s9951_s3 + $0x58] sm:$0xff] }
 0x24d   : > { %4656 = vperm.xlu1 %7207, %v4569_v40  }
 0x24e   : > { %v1995_v24 = vpop.f32.mrb[174].mxu1  ;;  %v2470_v46 = vpop.f32.mrb[174].mxu0  ;;  %4661 = vperm.xlu0 %7206, %v4570_v52  }
 0x24f   : > { %v2095_v55 = vadd.f32 %v1995_v24, %v8531_v56  ;;  %v8976_v48 = vadd.f32 %v2470_v46, %v2094_v47  ;;  %v6610_v44 = vpop.f32.mrb[175].mxu0  ;;  %6773 = vmatmul.mubr.msk.f32.gmra.mrb[24].mxu1 %vm356_vm2, %v3106_v17  ;;  %6895 = vmatmul.mubr.msk.f32.gmra.mrb[24].mxu0 %vm356_vm2, %v3107_v28  ;;  %v6488_v16 = vpop.f32.mrb[175].mxu1  ;;  %v3108_v56 = vld [vmem:[%s7416_s15 + $0x159] sm:$0xff]  ;;  %v4571_v17 = vld [vmem:[%s9951_s3 + $0x68] sm:$0xff]  ;;  %v4576_v24 = vld [vmem:[%s9951_s3 + $0x90] sm:$0xff] }
 0x250   : > { %6775 = vmatprep.mubr.msk.f32.mxu1 %vm7306_vm1, %v7305_v1  ;;  %6897 = vmatprep.mubr.msk.f32.mxu0 %vm7306_vm1, %v7305_v1  ;;  %v3550_v46 = vld [vmem:[%s7416_s15 + $0x2a] sm:$0xff] }
 0x251   : > { %4666 = vperm.xlu1 %7207, %v4571_v17  }
 0x252   : > { %v2000_v26 = vpop.f32.mrb[176].mxu1  ;;  %v2475_v5 = vpop.f32.mrb[176].mxu0  ;;  %4671 = vperm.xlu0 %7206, %v4572_v32  }
 0x253   : > { %v2096_v29 = vadd.f32 %v2000_v26, %v8542_v20  ;;  %v8992_v37 = vadd.f32 %v2475_v5, %v2095_v55  ;;  %v6613_v30 = vpop.f32.mrb[177].mxu0  ;;  %6776 = vmatmul.mubr.msk.f32.gmra.mrb[26].mxu1 %vm356_vm2, %v3107_v28  ;;  %6898 = vmatmul.mubr.msk.f32.gmra.mrb[26].mxu0 %vm356_vm2, %v3108_v56  ;;  %v6491_v34 = vpop.f32.mrb[177].mxu1  ;;  %v3109_v20 = vld [vmem:[%s7416_s15 + $0x161] sm:$0xff]  ;;  %v4573_v28 = vld [vmem:[%s9951_s3 + $0x78] sm:$0xff] }
 0x254   : > { %6778 = vmatprep.mubr.msk.f32.mxu1 %vm7306_vm1, %v7305_v1  ;;  %6900 = vmatprep.mubr.msk.f32.mxu0 %vm7306_vm1, %v7305_v1  ;;  %v4575_v26 = vld [vmem:[%s9951_s3 + $0x88] sm:$0xff]  ;;  %v4578_v5 = vld [vmem:[%s9951_s3 + $0xa0] sm:$0xff] }
 0x255   : > { %4676 = vperm.xlu1 %7207, %v4573_v28  }
 0x256   : > { %v2005_v35 = vpop.f32.mrb[178].mxu1  ;;  %v2480_v47 = vpop.f32.mrb[178].mxu0  ;;  %4681 = vperm.xlu0 %7206, %v4574_v15  }
 0x257   : > { %v2097_v8 = vadd.f32 %v2005_v35, %v8556_v50  ;;  %v9008_v22 = vadd.f32 %v2480_v47, %v2096_v29  ;;  %v6616_v19 = vpop.f32.mrb[179].mxu0  ;;  %6779 = vmatmul.mubr.msk.f32.gmra.mrb[28].mxu1 %vm356_vm2, %v3108_v56  ;;  %6901 = vmatmul.mubr.msk.f32.gmra.mrb[28].mxu0 %vm356_vm2, %v3109_v20  ;;  %v6494_v52 = vpop.f32.mrb[179].mxu1  ;;  %v3110_v50 = vld [vmem:[%s7416_s15 + $0x169] sm:$0xff]  ;;  %v4577_v47 = vld [vmem:[%s9951_s3 + $0x98] sm:$0xff] }
 0x258   : > { %6903 = vmatprep.mubr.msk.f32.mxu0 %vm7306_vm1, %v7305_v1  ;;  %6908 = vmatprep.mubr.msk.f32.mxu1 %vm7306_vm1, %v7305_v1  ;;  %v4030_v29 = vld [vmem:[%s7416_s15 + $0x2b] sm:$0xff]  ;;  %v4031_v19 = vld [vmem:[%s7416_s15 + $0x33] sm:$0xff] }
 0x259   : > { %4686 = vperm.xlu1 %7207, %v4575_v26  }
 0x25a   : > { %v2010_v55 = vpop.f32.mrb[180].mxu1  ;;  %v2485_v44 = vpop.f32.mrb[180].mxu0  ;;  %4691 = vperm.xlu0 %7206, %v4576_v24  }
 0x25b   : > { %v2098_v16 = vadd.f32 %v2010_v55, %v8571_v18  ;;  %v9025_v40 = vadd.f32 %v2485_v44, %v2097_v8  ;;  %v6619_v32 = vpop.f32.mrb[181].mxu0  ;;  %6904 = vmatmul.mubr.msk.f32.gmra.mrb[30].mxu0 %vm356_vm2, %v3110_v50  ;;  %6909 = vmatmul.mubr.msk.f32.vlgmr.msra.gmra.mrb[30].mxu1 %vm356_vm2, %v3550_v46  ;;  %v6497_v56 = vpop.f32.mrb[181].mxu1  ;;  %v3551_v18 = vld [vmem:[%s7416_s15 + $0x32] sm:$0xff]  ;;  %v4579_v44 = vld [vmem:[%s9951_s3 + $0xa8] sm:$0xff] }
 0x25c   : > { %6911 = vmatprep.mubr.msk.f32.mxu1 %vm7306_vm1, %v7305_v1  ;;  %7033 = vmatprep.mubr.msk.f32.mxu0 %vm7306_vm1, %v7305_v1  ;;  %v4580_v8 = vld [vmem:[%s9951_s3 + $0xb0] sm:$0xff]  ;;  %v4032_v32 = vld [vmem:[%s7416_s15 + $0x3b] sm:$0xff] }
 0x25d   : > { %4696 = vperm.xlu1 %7207, %v4577_v47  }
 0x25e   : > { %v2015_v30 = vpop.f32.mrb[182].mxu1  ;;  %v2490_v34 = vpop.f32.mrb[182].mxu0  ;;  %4701 = vperm.xlu0 %7206, %v4578_v5  }
 0x25f   : > { %v2099_v17 = vadd.f32 %v2015_v30, %v8582_v4  ;;  %v9042_v15 = vadd.f32 %v2490_v34, %v2098_v16  ;;  %v6622_v20 = vpop.f32.mrb[183].mxu0  ;;  %6912 = vmatmul.mubr.msk.f32.gmra.mrb[32].mxu1 %vm356_vm2, %v3551_v18  ;;  %7034 = vmatmul.mubr.msk.f32.vlgmr.msra.gmra.mrb[32].mxu0 %vm356_vm2, %v4030_v29  ;;  %v6500_v35 = vpop.f32.mrb[183].mxu1  ;;  %v3552_v4 = vld [vmem:[%s7416_s15 + $0x3a] sm:$0xff] }
 0x260   : > { %6914 = vmatprep.mubr.msk.f32.mxu1 %vm7306_vm1, %v7305_v1  ;;  %7036 = vmatprep.mubr.msk.f32.mxu0 %vm7306_vm1, %v7305_v1  ;;  %v4582_v16 = vld [vmem:[%s9951_s3 + $0xc0] sm:$0xff]  ;;  %v4581_v34 = vld [vmem:[%s9951_s3 + $0xb8] sm:$0xff] }
 0x261   : > { %4706 = vperm.xlu1 %7207, %v4579_v44   ;;  %v4033_v20 = vld [vmem:[%s7416_s15 + $0x43] sm:$0xff] }
 0x262   : > { %v2020_v52 = vpop.f32.mrb[184].mxu1  ;;  %v2495_v28 = vpop.f32.mrb[184].mxu0  ;;  %4711 = vperm.xlu0 %7206, %v4580_v8  }
 0x263   : > { %v2100_v24 = vadd.f32 %v2020_v52, %v8592_v33  ;;  %v9059_v50 = vadd.f32 %v2495_v28, %v2099_v17  ;;  %v6625_v46 = vpop.f32.mrb[185].mxu0  ;;  %6915 = vmatmul.mubr.msk.f32.gmra.mrb[34].mxu1 %vm356_vm2, %v3552_v4  ;;  %7037 = vmatmul.mubr.msk.f32.gmra.mrb[34].mxu0 %vm356_vm2, %v4031_v19  ;;  %v6503_v55 = vpop.f32.mrb[185].mxu1  ;;  %v3553_v33 = vld [vmem:[%s7416_s15 + $0x42] sm:$0xff]  ;;  %v4584_v17 = vld [vmem:[%s9951_s3 + $0xd0] sm:$0xff] }
 0x264   : > { %6917 = vmatprep.mubr.msk.f32.mxu1 %vm7306_vm1, %v7305_v1  ;;  %7039 = vmatprep.mubr.msk.f32.mxu0 %vm7306_vm1, %v7305_v1  ;;  %v4583_v28 = vld [vmem:[%s9951_s3 + $0xc8] sm:$0xff] }
 0x265   : > { %4716 = vperm.xlu1 %7207, %v4581_v34   ;;  %v4034_v46 = vld [vmem:[%s7416_s15 + $0x4b] sm:$0xff] }
 0x266   : > { %v2025_v56 = vpop.f32.mrb[186].mxu1  ;;  %v2500_v26 = vpop.f32.mrb[186].mxu0  ;;  %4721 = vperm.xlu0 %7206, %v4582_v16  }
 0x267   : > { %v2101_v5 = vadd.f32 %v2025_v56, %v8602_v63  ;;  %v9076_v18 = vadd.f32 %v2500_v26, %v2100_v24  ;;  %v6628_v29 = vpop.f32.mrb[187].mxu0  ;;  %6918 = vmatmul.mubr.msk.f32.gmra.mrb[36].mxu1 %vm356_vm2, %v3553_v33  ;;  %7040 = vmatmul.mubr.msk.f32.gmra.mrb[36].mxu0 %vm356_vm2, %v4032_v32  ;;  %v6506_v30 = vpop.f32.mrb[187].mxu1  ;;  %v3554_v63 = vld [vmem:[%s7416_s15 + $0x4a] sm:$0xff]  ;;  %v4586_v24 = vld [vmem:[%s9951_s3 + $0xe0] sm:$0xff]  ;;  %v4585_v26 = vld [vmem:[%s9951_s3 + $0xd8] sm:$0xff] }
 0x268   : > { %6920 = vmatprep.mubr.msk.f32.mxu1 %vm7306_vm1, %v7305_v1  ;;  %7042 = vmatprep.mubr.msk.f32.mxu0 %vm7306_vm1, %v7305_v1  ;;  %v4035_v29 = vld [vmem:[%s7416_s15 + $0x53] sm:$0xff] }
 0x269   : > { %4726 = vperm.xlu1 %7207, %v4583_v28  }
 0x26a   : > { %v2030_v35 = vpop.f32.mrb[188].mxu1  ;;  %v2505_v47 = vpop.f32.mrb[188].mxu0  ;;  %4731 = vperm.xlu0 %7206, %v4584_v17  }
 0x26b   : > { %v2102_v8 = vadd.f32 %v2030_v35, %v8612_v60  ;;  %v9093_v4 = vadd.f32 %v2505_v47, %v2101_v5  ;;  %v6631_v19 = vpop.f32.mrb[189].mxu0  ;;  %6921 = vmatmul.mubr.msk.f32.gmra.mrb[38].mxu1 %vm356_vm2, %v3554_v63  ;;  %7043 = vmatmul.mubr.msk.f32.gmra.mrb[38].mxu0 %vm356_vm2, %v4033_v20  ;;  %v6509_v52 = vpop.f32.mrb[189].mxu1  ;;  %v3555_v60 = vld [vmem:[%s7416_s15 + $0x52] sm:$0xff]  ;;  %v4587_v47 = vld [vmem:[%s9951_s3 + $0xe8] sm:$0xff] }
 0x26c   : > { %6923 = vmatprep.mubr.msk.f32.mxu1 %vm7306_vm1, %v7305_v1  ;;  %7045 = vmatprep.mubr.msk.f32.mxu0 %vm7306_vm1, %v7305_v1  ;;  %v4588_v5 = vld [vmem:[%s9951_s3 + $0xf0] sm:$0xff]  ;;  %v4036_v19 = vld [vmem:[%s7416_s15 + $0x5b] sm:$0xff] }
 0x26d   : > { %4736 = vperm.xlu1 %7207, %v4585_v26  }
 0x26e   : > { %v2035_v55 = vpop.f32.mrb[190].mxu1  ;;  %v2510_v44 = vpop.f32.mrb[190].mxu0  ;;  %4741 = vperm.xlu0 %7206, %v4586_v24  }
 0x26f   : > { %v2103_v16 = vadd.f32 %v2035_v55, %v8622_v36  ;;  %v9110_v33 = vadd.f32 %v2510_v44, %v2102_v8  ;;  %v6634_v32 = vpop.f32.mrb[191].mxu0  ;;  %6924 = vmatmul.mubr.msk.f32.gmra.mrb[40].mxu1 %vm356_vm2, %v3555_v60  ;;  %7046 = vmatmul.mubr.msk.f32.gmra.mrb[40].mxu0 %vm356_vm2, %v4034_v46  ;;  %v6512_v56 = vpop.f32.mrb[191].mxu1  ;;  %v3556_v36 = vld [vmem:[%s7416_s15 + $0x5a] sm:$0xff] }
 0x270   : > { %6926 = vmatprep.mubr.msk.f32.mxu1 %vm7306_vm1, %v7305_v1  ;;  %7048 = vmatprep.mubr.msk.f32.mxu0 %vm7306_vm1, %v7305_v1  ;;  %v4590_v8 = vld [vmem:[%s9951_s3 + $0x100] sm:$0xff]  ;;  %v4589_v44 = vld [vmem:[%s9951_s3 + $0xf8] sm:$0xff] }
 0x271   : > { %4746 = vperm.xlu1 %7207, %v4587_v47   ;;  %v4037_v32 = vld [vmem:[%s7416_s15 + $0x63] sm:$0xff] }
 0x272   : > { %v2040_v30 = vpop.f32.mrb[192].mxu1  ;;  %v2515_v34 = vpop.f32.mrb[192].mxu0  ;;  %4751 = vperm.xlu0 %7206, %v4588_v5  }
 0x273   : > { %v2104_v17 = vadd.f32 %v2040_v30, %v8632_v41  ;;  %v9127_v63 = vadd.f32 %v2515_v34, %v2103_v16  ;;  %v6637_v20 = vpop.f32.mrb[193].mxu0  ;;  %6927 = vmatmul.mubr.msk.f32.gmra.mrb[42].mxu1 %vm356_vm2, %v3556_v36  ;;  %7049 = vmatmul.mubr.msk.f32.gmra.mrb[42].mxu0 %vm356_vm2, %v4035_v29  ;;  %v6515_v35 = vpop.f32.mrb[193].mxu1  ;;  %v3557_v41 = vld [vmem:[%s7416_s15 + $0x62] sm:$0xff]  ;;  %v4592_v16 = vld [vmem:[%s9951_s3 + $0x110] sm:$0xff] }
 0x274   : > { %6929 = vmatprep.mubr.msk.f32.mxu1 %vm7306_vm1, %v7305_v1  ;;  %7051 = vmatprep.mubr.msk.f32.mxu0 %vm7306_vm1, %v7305_v1  ;;  %v4591_v34 = vld [vmem:[%s9951_s3 + $0x108] sm:$0xff] }
 0x275   : > { %4756 = vperm.xlu1 %7207, %v4589_v44   ;;  %v4038_v20 = vld [vmem:[%s7416_s15 + $0x6b] sm:$0xff] }
 0x276   : > { %v2045_v52 = vpop.f32.mrb[194].mxu1  ;;  %v2520_v28 = vpop.f32.mrb[194].mxu0  ;;  %4761 = vperm.xlu0 %7206, %v4590_v8  }
 0x277   : > { %v2105_v24 = vadd.f32 %v2045_v52, %v8640_v57  ;;  %v9144_v60 = vadd.f32 %v2520_v28, %v2104_v17  ;;  %v6640_v46 = vpop.f32.mrb[195].mxu0  ;;  %6930 = vmatmul.mubr.msk.f32.gmra.mrb[44].mxu1 %vm356_vm2, %v3557_v41  ;;  %7052 = vmatmul.mubr.msk.f32.gmra.mrb[44].mxu0 %vm356_vm2, %v4036_v19  ;;  %v6518_v55 = vpop.f32.mrb[195].mxu1  ;;  %v3558_v57 = vld [vmem:[%s7416_s15 + $0x6a] sm:$0xff]  ;;  %v4594_v17 = vld [vmem:[%s9951_s3 + $0x120] sm:$0xff]  ;;  %v4593_v28 = vld [vmem:[%s9951_s3 + $0x118] sm:$0xff] }
 0x278   : > { %6932 = vmatprep.mubr.msk.f32.mxu1 %vm7306_vm1, %v7305_v1  ;;  %7054 = vmatprep.mubr.msk.f32.mxu0 %vm7306_vm1, %v7305_v1  ;;  %v4039_v46 = vld [vmem:[%s7416_s15 + $0x73] sm:$0xff] }
 0x279   : > { %4766 = vperm.xlu1 %7207, %v4591_v34  }
 0x27a   : > { %v2050_v56 = vpop.f32.mrb[196].mxu1  ;;  %v2525_v26 = vpop.f32.mrb[196].mxu0  ;;  %4771 = vperm.xlu0 %7206, %v4592_v16  }
 0x27b   : > { %v2106_v5 = vadd.f32 %v2050_v56, %v8650_v27  ;;  %v9161_v36 = vadd.f32 %v2525_v26, %v2105_v24  ;;  %v6643_v29 = vpop.f32.mrb[197].mxu0  ;;  %6933 = vmatmul.mubr.msk.f32.gmra.mrb[46].mxu1 %vm356_vm2, %v3558_v57  ;;  %7055 = vmatmul.mubr.msk.f32.gmra.mrb[46].mxu0 %vm356_vm2, %v4037_v32  ;;  %v6521_v30 = vpop.f32.mrb[197].mxu1  ;;  %v3559_v27 = vld [vmem:[%s7416_s15 + $0x72] sm:$0xff]  ;;  %v4595_v26 = vld [vmem:[%s9951_s3 + $0x128] sm:$0xff] }
 0x27c   : > { %6935 = vmatprep.mubr.msk.f32.mxu1 %vm7306_vm1, %v7305_v1  ;;  %7057 = vmatprep.mubr.msk.f32.mxu0 %vm7306_vm1, %v7305_v1  ;;  %v4596_v24 = vld [vmem:[%s9951_s3 + $0x130] sm:$0xff]  ;;  %v4040_v29 = vld [vmem:[%s7416_s15 + $0x7b] sm:$0xff] }
 0x27d   : > { %4776 = vperm.xlu1 %7207, %v4593_v28  }
 0x27e   : > { %v2055_v35 = vpop.f32.mrb[198].mxu1  ;;  %v2530_v47 = vpop.f32.mrb[198].mxu0  ;;  %4781 = vperm.xlu0 %7206, %v4594_v17  }
 0x27f   : > { %v2107_v8 = vadd.f32 %v2055_v35, %v8660_v58  ;;  %v9178_v41 = vadd.f32 %v2530_v47, %v2106_v5  ;;  %v6646_v19 = vpop.f32.mrb[199].mxu0  ;;  %6936 = vmatmul.mubr.msk.f32.gmra.mrb[48].mxu1 %vm356_vm2, %v3559_v27  ;;  %7058 = vmatmul.mubr.msk.f32.gmra.mrb[48].mxu0 %vm356_vm2, %v4038_v20  ;;  %v6524_v52 = vpop.f32.mrb[199].mxu1  ;;  %v3560_v58 = vld [vmem:[%s7416_s15 + $0x7a] sm:$0xff] }
 0x280   : > { %6938 = vmatprep.mubr.msk.f32.mxu1 %vm7306_vm1, %v7305_v1  ;;  %7060 = vmatprep.mubr.msk.f32.mxu0 %vm7306_vm1, %v7305_v1  ;;  %v4598_v5 = vld [vmem:[%s9951_s3 + $0x140] sm:$0xff]  ;;  %v4597_v47 = vld [vmem:[%s9951_s3 + $0x138] sm:$0xff] }
 0x281   : > { %4786 = vperm.xlu1 %7207, %v4595_v26  }
 0x282   : > { %v2060_v55 = vpop.f32.mrb[200].mxu1  ;;  %v2535_v44 = vpop.f32.mrb[200].mxu0  ;;  %4791 = vperm.xlu0 %7206, %v4596_v24  }
 0x283   : > { %v2108_v16 = vadd.f32 %v2060_v55, %v8670_v13  ;;  %v9195_v57 = vadd.f32 %v2535_v44, %v2107_v8  ;;  %v6649_v32 = vpop.f32.mrb[201].mxu0  ;;  %6939 = vmatmul.mubr.msk.f32.gmra.mrb[50].mxu1 %vm356_vm2, %v3560_v58  ;;  %7061 = vmatmul.mubr.msk.f32.gmra.mrb[50].mxu0 %vm356_vm2, %v4039_v46  ;;  %v6527_v56 = vpop.f32.mrb[201].mxu1  ;;  %v3561_v13 = vld [vmem:[%s7416_s15 + $0x82] sm:$0xff]  ;;  %v3563_v55 = vld [vmem:[%s7416_s15 + $0x92] sm:$0xff] }
 0x284   : > { %6941 = vmatprep.mubr.msk.f32.mxu1 %vm7306_vm1, %v7305_v1  ;;  %7063 = vmatprep.mubr.msk.f32.mxu0 %vm7306_vm1, %v7305_v1  ;;  %v4041_v8 = vld [vmem:[%s7416_s15 + $0x83] sm:$0xff]  ;;  %v4042_v44 = vld [vmem:[%s7416_s15 + $0x8b] sm:$0xff] }
 0x285   : > { %4796 = vperm.xlu1 %7207, %v4597_v47   ;;  %v3565_v47 = vld [vmem:[%s7416_s15 + $0xa2] sm:$0xff] }
 0x286   : > { %v2065_v30 = vpop.f32.mrb[202].mxu1  ;;  %v2540_v34 = vpop.f32.mrb[202].mxu0  ;;  %4801 = vperm.xlu0 %7206, %v4598_v5  }
 0x287   : > { %v2109_v17 = vadd.f32 %v2065_v30, %v8679_v51  ;;  %v9212_v27 = vadd.f32 %v2540_v34, %v2108_v16  ;;  %v6652_v20 = vpop.f32.mrb[203].mxu0  ;;  %6942 = vmatmul.mubr.msk.f32.gmra.mrb[52].mxu1 %vm356_vm2, %v3561_v13  ;;  %7064 = vmatmul.mubr.msk.f32.gmra.mrb[52].mxu0 %vm356_vm2, %v4040_v29  ;;  %v6530_v35 = vpop.f32.mrb[203].mxu1  ;;  %v3562_v51 = vld [vmem:[%s7416_s15 + $0x8a] sm:$0xff]  ;;  %v3564_v13 = vld [vmem:[%s7416_s15 + $0x9a] sm:$0xff] }
 0x288   : > { %6944 = vmatprep.mubr.msk.f32.mxu1 %vm7306_vm1, %v7305_v1  ;;  %7066 = vmatprep.mubr.msk.f32.mxu0 %vm7306_vm1, %v7305_v1  ;;  %v4043_v29 = vld [vmem:[%s7416_s15 + $0x93] sm:$0xff] }
 0x28a   : > { %v2545_v19 = vpop.f32.mrb[204].mxu0  ;;  %v2825_v52 = vpop.f32.mrb[204].mxu1 }
 0x28b   : > { %v9225_v28 = vadd.f32 %v2545_v19, %v2109_v17  ;;  %v3029_v24 = vadd.f32 %v2825_v52, %v8690_v9  ;;  %v6655_v58 = vpop.f32.mrb[205].mxu0  ;;  %6945 = vmatmul.mubr.msk.f32.gmra.mrb[54].mxu1 %vm356_vm2, %v3562_v51  ;;  %7067 = vmatmul.mubr.msk.f32.gmra.mrb[54].mxu0 %vm356_vm2, %v4041_v8  ;;  %v6660_v46 = vpop.f32.mrb[205].mxu1  ;;  %v4044_v51 = vld [vmem:[%s7416_s15 + $0x9b] sm:$0xff] }
 0x28c   : > { %6947 = vmatprep.mubr.msk.f32.mxu1 %vm7306_vm1, %v7305_v1  ;;  %7069 = vmatprep.mubr.msk.f32.mxu0 %vm7306_vm1, %v7305_v1  ;;  %v3566_v46 = vld [vmem:[%s7416_s15 + $0xaa] sm:$0xff] }
 0x28e   : > { %v2830_v16 = vpop.f32.mrb[206].mxu1  ;;  %v3305_v32 = vpop.f32.mrb[206].mxu0 }
 0x28f   : > { %v3030_v9 = vadd.f32 %v2830_v16, %v8700_v23  ;;  %v9237_v56 = vadd.f32 %v3305_v32, %v3029_v24  ;;  %v6785_v26 = vpop.f32.mrb[207].mxu0  ;;  %6948 = vmatmul.mubr.msk.f32.gmra.mrb[56].mxu1 %vm356_vm2, %v3563_v55  ;;  %7070 = vmatmul.mubr.msk.f32.gmra.mrb[56].mxu0 %vm356_vm2, %v4042_v44  ;;  %v6663_v5 = vpop.f32.mrb[207].mxu1  ;;  %v4045_v55 = vld [vmem:[%s7416_s15 + $0xa3] sm:$0xff] }
 0x290   : > { %6950 = vmatprep.mubr.msk.f32.mxu1 %vm7306_vm1, %v7305_v1  ;;  %7072 = vmatprep.mubr.msk.f32.mxu0 %vm7306_vm1, %v7305_v1  ;;  %v3567_v5 = vld [vmem:[%s7416_s15 + $0xb2] sm:$0xff] }
 0x292   : > { %v2835_v30 = vpop.f32.mrb[208].mxu1  ;;  %v3310_v23 = vpop.f32.mrb[208].mxu0 }
 0x293   : > { %v3031_v34 = vadd.f32 %v2835_v30, %v8710_v45  ;;  %v9248_v17 = vadd.f32 %v3310_v23, %v3030_v9  ;;  %v6788_v20 = vpop.f32.mrb[209].mxu0  ;;  %6951 = vmatmul.mubr.msk.f32.gmra.mrb[58].mxu1 %vm356_vm2, %v3564_v13  ;;  %7073 = vmatmul.mubr.msk.f32.gmra.mrb[58].mxu0 %vm356_vm2, %v4043_v29  ;;  %v6666_v35 = vpop.f32.mrb[209].mxu1  ;;  %v4046_v13 = vld [vmem:[%s7416_s15 + $0xab] sm:$0xff] }
 0x294   : > { %6953 = vmatprep.mubr.msk.f32.mxu1 %vm7306_vm1, %v7305_v1  ;;  %7075 = vmatprep.mubr.msk.f32.mxu0 %vm7306_vm1, %v7305_v1  ;;  %v3568_v35 = vld [vmem:[%s7416_s15 + $0xba] sm:$0xff] }
 0x296   : > { %v2840_v8 = vpop.f32.mrb[210].mxu1  ;;  %v3315_v45 = vpop.f32.mrb[210].mxu0 }
 0x297   : > { %v3032_v19 = vadd.f32 %v2840_v8, %v8720_v42  ;;  %v9259_v52 = vadd.f32 %v3315_v45, %v3031_v34  ;;  %v6791_v24 = vpop.f32.mrb[211].mxu0  ;;  %6954 = vmatmul.mubr.msk.f32.gmra.mrb[60].mxu1 %vm356_vm2, %v3565_v47  ;;  %7076 = vmatmul.mubr.msk.f32.gmra.mrb[60].mxu0 %vm356_vm2, %v4044_v51  ;;  %v6669_v58 = vpop.f32.mrb[211].mxu1  ;;  %v4047_v47 = vld [vmem:[%s7416_s15 + $0xb3] sm:$0xff] }
 0x298   : > { %6956 = vmatprep.mubr.msk.f32.mxu1 %vm7306_vm1, %v7305_v1  ;;  %7078 = vmatprep.mubr.msk.f32.mxu0 %vm7306_vm1, %v7305_v1  ;;  %v3569_v58 = vld [vmem:[%s7416_s15 + $0xc2] sm:$0xff] }
 0x29a   : > { %v2845_v44 = vpop.f32.mrb[212].mxu1  ;;  %v3320_v42 = vpop.f32.mrb[212].mxu0 }
 0x29b   : > { %v3033_v16 = vadd.f32 %v2845_v44, %v8730_v43  ;;  %v9270_v32 = vadd.f32 %v3320_v42, %v3032_v19  ;;  %v6794_v9 = vpop.f32.mrb[213].mxu0  ;;  %6957 = vmatmul.mubr.msk.f32.gmra.mrb[62].mxu1 %vm356_vm2, %v3566_v46  ;;  %7079 = vmatmul.mubr.msk.f32.gmra.mrb[62].mxu0 %vm356_vm2, %v4045_v55  ;;  %v6672_v26 = vpop.f32.mrb[213].mxu1  ;;  %v4048_v46 = vld [vmem:[%s7416_s15 + $0xbb] sm:$0xff] }
 0x29c   : > { %6959 = vmatprep.mubr.msk.f32.mxu1 %vm7306_vm1, %v7305_v1  ;;  %7081 = vmatprep.mubr.msk.f32.mxu0 %vm7306_vm1, %v7305_v1  ;;  %v3570_v26 = vld [vmem:[%s7416_s15 + $0xca] sm:$0xff] }
 0x29e   : > { %v2850_v29 = vpop.f32.mrb[214].mxu1  ;;  %v3325_v43 = vpop.f32.mrb[214].mxu0 }
 0x29f   : > { %v3034_v30 = vadd.f32 %v2850_v29, %v8740_v0  ;;  %v9281_v23 = vadd.f32 %v3325_v43, %v3033_v16  ;;  %v6797_v34 = vpop.f32.mrb[215].mxu0  ;;  %6960 = vmatmul.mubr.msk.f32.gmra.mrb[64].mxu1 %vm356_vm2, %v3567_v5  ;;  %7082 = vmatmul.mubr.msk.f32.gmra.mrb[64].mxu0 %vm356_vm2, %v4046_v13  ;;  %v6675_v20 = vpop.f32.mrb[215].mxu1  ;;  %v4049_v5 = vld [vmem:[%s7416_s15 + $0xc3] sm:$0xff] }
 0x2a0   : > { %6962 = vmatprep.mubr.msk.f32.mxu1 %vm7306_vm1, %v7305_v1  ;;  %7084 = vmatprep.mubr.msk.f32.mxu0 %vm7306_vm1, %v7305_v1  ;;  %v3571_v20 = vld [vmem:[%s7416_s15 + $0xd2] sm:$0xff] }
 0x2a2   : > { %v2855_v51 = vpop.f32.mrb[216].mxu1  ;;  %v3330_v0 = vpop.f32.mrb[216].mxu0 }
 0x2a3   : > { %v3035_v8 = vadd.f32 %v2855_v51, %v8750_v53  ;;  %v9292_v45 = vadd.f32 %v3330_v0, %v3034_v30  ;;  %v6800_v19 = vpop.f32.mrb[217].mxu0  ;;  %6963 = vmatmul.mubr.msk.f32.gmra.mrb[66].mxu1 %vm356_vm2, %v3568_v35  ;;  %7085 = vmatmul.mubr.msk.f32.gmra.mrb[66].mxu0 %vm356_vm2, %v4047_v47  ;;  %v6678_v24 = vpop.f32.mrb[217].mxu1  ;;  %v4050_v35 = vld [vmem:[%s7416_s15 + $0xcb] sm:$0xff] }
 0x2a4   : > { %6965 = vmatprep.mubr.msk.f32.mxu1 %vm7306_vm1, %v7305_v1  ;;  %7087 = vmatprep.mubr.msk.f32.mxu0 %vm7306_vm1, %v7305_v1  ;;  %v3572_v24 = vld [vmem:[%s7416_s15 + $0xda] sm:$0xff] }
 0x2a6   : > { %v2860_v55 = vpop.f32.mrb[218].mxu1  ;;  %v3335_v53 = vpop.f32.mrb[218].mxu0 }
 0x2a7   : > { %v3036_v44 = vadd.f32 %v2860_v55, %v8760_v49  ;;  %v9303_v42 = vadd.f32 %v3335_v53, %v3035_v8  ;;  %v6803_v16 = vpop.f32.mrb[219].mxu0  ;;  %6966 = vmatmul.mubr.msk.f32.gmra.mrb[68].mxu1 %vm356_vm2, %v3569_v58  ;;  %7088 = vmatmul.mubr.msk.f32.gmra.mrb[68].mxu0 %vm356_vm2, %v4048_v46  ;;  %v6681_v9 = vpop.f32.mrb[219].mxu1  ;;  %v4051_v58 = vld [vmem:[%s7416_s15 + $0xd3] sm:$0xff] }
 0x2a8   : > { %6968 = vmatprep.mubr.msk.f32.mxu1 %vm7306_vm1, %v7305_v1  ;;  %7090 = vmatprep.mubr.msk.f32.mxu0 %vm7306_vm1, %v7305_v1  ;;  %v4052_v9 = vld [vmem:[%s7416_s15 + $0xdb] sm:$0xff] }
 0x2aa   : > { %v2865_v13 = vpop.f32.mrb[220].mxu1  ;;  %v3340_v49 = vpop.f32.mrb[220].mxu0 }
 0x2ab   : > { %v3037_v29 = vadd.f32 %v2865_v13, %v8770_v21  ;;  %v9314_v43 = vadd.f32 %v3340_v49, %v3036_v44  ;;  %v6806_v30 = vpop.f32.mrb[221].mxu0  ;;  %6969 = vmatmul.mubr.msk.f32.gmra.mrb[70].mxu1 %vm356_vm2, %v3570_v26  ;;  %7091 = vmatmul.mubr.msk.f32.gmra.mrb[70].mxu0 %vm356_vm2, %v4049_v5  ;;  %v6684_v34 = vpop.f32.mrb[221].mxu1 }
 0x2ac   : > { %6971 = vmatprep.mubr.msk.f32.mxu1 %vm7306_vm1, %v7305_v1  ;;  %7093 = vmatprep.mubr.msk.f32.mxu0 %vm7306_vm1, %v7305_v1  ;;  %v3574_v34 = vld [vmem:[%s7416_s15 + $0xea] sm:$0xff] }
 0x2ae   : > { %v2870_v47 = vpop.f32.mrb[222].mxu1  ;;  %v3345_v21 = vpop.f32.mrb[222].mxu0 }
 0x2af   : > { %v3038_v51 = vadd.f32 %v2870_v47, %v8780_v39  ;;  %v9325_v0 = vadd.f32 %v3345_v21, %v3037_v29  ;;  %v6809_v8 = vpop.f32.mrb[223].mxu0  ;;  %6972 = vmatmul.mubr.msk.f32.gmra.mrb[72].mxu1 %vm356_vm2, %v3571_v20  ;;  %7094 = vmatmul.mubr.msk.f32.gmra.mrb[72].mxu0 %vm356_vm2, %v4050_v35  ;;  %v6687_v19 = vpop.f32.mrb[223].mxu1  ;;  %v4053_v20 = vld [vmem:[%s7416_s15 + $0xe3] sm:$0xff] }
 0x2b0   : > { %6974 = vmatprep.mubr.msk.f32.mxu1 %vm7306_vm1, %v7305_v1  ;;  %7096 = vmatprep.mubr.msk.f32.mxu0 %vm7306_vm1, %v7305_v1  ;;  %v3575_v19 = vld [vmem:[%s7416_s15 + $0xf2] sm:$0xff] }
 0x2b2   : > { %v2875_v39 = vpop.f32.mrb[224].mxu1  ;;  %v3350_v46 = vpop.f32.mrb[224].mxu0 }
 0x2b3   : > { %v3039_v55 = vadd.f32 %v2875_v39, %v8790_v59  ;;  %v9336_v53 = vadd.f32 %v3350_v46, %v3038_v51  ;;  %v6812_v44 = vpop.f32.mrb[225].mxu0  ;;  %6975 = vmatmul.mubr.msk.f32.gmra.mrb[74].mxu1 %vm356_vm2, %v3572_v24  ;;  %7097 = vmatmul.mubr.msk.f32.gmra.mrb[74].mxu0 %vm356_vm2, %v4051_v58  ;;  %v6690_v16 = vpop.f32.mrb[225].mxu1  ;;  %v3573_v59 = vld [vmem:[%s7416_s15 + $0xe2] sm:$0xff]  ;;  %v4054_v24 = vld [vmem:[%s7416_s15 + $0xeb] sm:$0xff] }
 0x2b4   : > { %6977 = vmatprep.mubr.msk.f32.mxu1 %vm7306_vm1, %v7305_v1  ;;  %7099 = vmatprep.mubr.msk.f32.mxu0 %vm7306_vm1, %v7305_v1  ;;  %v3576_v16 = vld [vmem:[%s7416_s15 + $0xfa] sm:$0xff] }
 0x2b6   : > { %v2880_v26 = vpop.f32.mrb[226].mxu1  ;;  %v3355_v5 = vpop.f32.mrb[226].mxu0 }
 0x2b7   : > { %v3040_v13 = vadd.f32 %v2880_v26, %v8800_v54  ;;  %v9372_v49 = vadd.f32 %v3355_v5, %v3039_v55  ;;  %v6815_v29 = vpop.f32.mrb[227].mxu0  ;;  %6978 = vmatmul.mubr.msk.f32.gmra.mrb[76].mxu1 %vm356_vm2, %v3573_v59  ;;  %7100 = vmatmul.mubr.msk.f32.gmra.mrb[76].mxu0 %vm356_vm2, %v4052_v9  ;;  %v6693_v30 = vpop.f32.mrb[227].mxu1  ;;  %v4055_v59 = vld [vmem:[%s7416_s15 + $0xf3] sm:$0xff] }
 0x2b8   : > { %6980 = vmatprep.mubr.msk.f32.mxu1 %vm7306_vm1, %v7305_v1  ;;  %7102 = vmatprep.mubr.msk.f32.mxu0 %vm7306_vm1, %v7305_v1  ;;  %v3577_v30 = vld [vmem:[%s7416_s15 + $0x102] sm:$0xff] }
 0x2ba   : > { %v2885_v35 = vpop.f32.mrb[228].mxu1  ;;  %v3360_v54 = vpop.f32.mrb[228].mxu0 }
 0x2bb   : > { %v3041_v47 = vadd.f32 %v2885_v35, %v8810_v31  ;;  %v9383_v21 = vadd.f32 %v3360_v54, %v3040_v13  ;;  %v6818_v51 = vpop.f32.mrb[229].mxu0  ;;  %6981 = vmatmul.mubr.msk.f32.gmra.mrb[78].mxu1 %vm356_vm2, %v3574_v34  ;;  %7103 = vmatmul.mubr.msk.f32.gmra.mrb[78].mxu0 %vm356_vm2, %v4053_v20  ;;  %v6696_v8 = vpop.f32.mrb[229].mxu1  ;;  %v4056_v34 = vld [vmem:[%s7416_s15 + $0xfb] sm:$0xff] }
 0x2bc   : > { %6983 = vmatprep.mubr.msk.f32.mxu1 %vm7306_vm1, %v7305_v1  ;;  %7105 = vmatprep.mubr.msk.f32.mxu0 %vm7306_vm1, %v7305_v1  ;;  %v3578_v8 = vld [vmem:[%s7416_s15 + $0x10a] sm:$0xff] }
 0x2be   : > { %v2890_v58 = vpop.f32.mrb[230].mxu1  ;;  %v3365_v31 = vpop.f32.mrb[230].mxu0 }
 0x2bf   : > { %v3042_v39 = vadd.f32 %v2890_v58, %v8820_v7  ;;  %v9394_v46 = vadd.f32 %v3365_v31, %v3041_v47  ;;  %v6821_v55 = vpop.f32.mrb[231].mxu0  ;;  %6984 = vmatmul.mubr.msk.f32.gmra.mrb[80].mxu1 %vm356_vm2, %v3575_v19  ;;  %7106 = vmatmul.mubr.msk.f32.gmra.mrb[80].mxu0 %vm356_vm2, %v4054_v24  ;;  %v6699_v44 = vpop.f32.mrb[231].mxu1  ;;  %v4057_v19 = vld [vmem:[%s7416_s15 + $0x103] sm:$0xff] }
 0x2c0   : > { %6986 = vmatprep.mubr.msk.f32.mxu1 %vm7306_vm1, %v7305_v1  ;;  %7108 = vmatprep.mubr.msk.f32.mxu0 %vm7306_vm1, %v7305_v1  ;;  %v3579_v44 = vld [vmem:[%s7416_s15 + $0x112] sm:$0xff] }
 0x2c2   : > { %v2895_v9 = vpop.f32.mrb[232].mxu1  ;;  %v3370_v7 = vpop.f32.mrb[232].mxu0 }
 0x2c3   : > { %v3043_v26 = vadd.f32 %v2895_v9, %v8830_v62  ;;  %v9405_v5 = vadd.f32 %v3370_v7, %v3042_v39  ;;  %v6824_v13 = vpop.f32.mrb[233].mxu0  ;;  %6987 = vmatmul.mubr.msk.f32.gmra.mrb[82].mxu1 %vm356_vm2, %v3576_v16  ;;  %7109 = vmatmul.mubr.msk.f32.gmra.mrb[82].mxu0 %vm356_vm2, %v4055_v59  ;;  %v6702_v29 = vpop.f32.mrb[233].mxu1  ;;  %v4058_v16 = vld [vmem:[%s7416_s15 + $0x10b] sm:$0xff] }
 0x2c4   : > { %6989 = vmatprep.mubr.msk.f32.mxu1 %vm7306_vm1, %v7305_v1  ;;  %7111 = vmatprep.mubr.msk.f32.mxu0 %vm7306_vm1, %v7305_v1  ;;  %v3580_v29 = vld [vmem:[%s7416_s15 + $0x11a] sm:$0xff] }
 0x2c6   : > { %v2900_v20 = vpop.f32.mrb[234].mxu1  ;;  %v3375_v62 = vpop.f32.mrb[234].mxu0 }
 0x2c7   : > { %v3044_v35 = vadd.f32 %v2900_v20, %v8840_v11  ;;  %v9416_v54 = vadd.f32 %v3375_v62, %v3043_v26  ;;  %v6827_v47 = vpop.f32.mrb[235].mxu0  ;;  %6990 = vmatmul.mubr.msk.f32.gmra.mrb[84].mxu1 %vm356_vm2, %v3577_v30  ;;  %7112 = vmatmul.mubr.msk.f32.gmra.mrb[84].mxu0 %vm356_vm2, %v4056_v34  ;;  %v6705_v51 = vpop.f32.mrb[235].mxu1  ;;  %v4059_v30 = vld [vmem:[%s7416_s15 + $0x113] sm:$0xff] }
 0x2c8   : > { %6992 = vmatprep.mubr.msk.f32.mxu1 %vm7306_vm1, %v7305_v1  ;;  %7114 = vmatprep.mubr.msk.f32.mxu0 %vm7306_vm1, %v7305_v1  ;;  %v3581_v51 = vld [vmem:[%s7416_s15 + $0x122] sm:$0xff] }
 0x2ca   : > { %v2905_v24 = vpop.f32.mrb[236].mxu1  ;;  %v3380_v11 = vpop.f32.mrb[236].mxu0 }
 0x2cb   : > { %v3045_v58 = vadd.f32 %v2905_v24, %v8850_v12  ;;  %v9427_v31 = vadd.f32 %v3380_v11, %v3044_v35  ;;  %v6830_v39 = vpop.f32.mrb[237].mxu0  ;;  %6993 = vmatmul.mubr.msk.f32.gmra.mrb[86].mxu1 %vm356_vm2, %v3578_v8  ;;  %7115 = vmatmul.mubr.msk.f32.gmra.mrb[86].mxu0 %vm356_vm2, %v4057_v19  ;;  %v6708_v55 = vpop.f32.mrb[237].mxu1  ;;  %v4060_v8 = vld [vmem:[%s7416_s15 + $0x11b] sm:$0xff] }
 0x2cc   : > { %6995 = vmatprep.mubr.msk.f32.mxu1 %vm7306_vm1, %v7305_v1  ;;  %7117 = vmatprep.mubr.msk.f32.mxu0 %vm7306_vm1, %v7305_v1  ;;  %v3582_v55 = vld [vmem:[%s7416_s15 + $0x12a] sm:$0xff] }
 0x2ce   : > { %v2910_v59 = vpop.f32.mrb[238].mxu1  ;;  %v3385_v12 = vpop.f32.mrb[238].mxu0 }
 0x2cf   : > { %v3046_v9 = vadd.f32 %v2910_v59, %v8860_v6  ;;  %v9438_v7 = vadd.f32 %v3385_v12, %v3045_v58  ;;  %v6833_v26 = vpop.f32.mrb[239].mxu0  ;;  %6996 = vmatmul.mubr.msk.f32.gmra.mrb[88].mxu1 %vm356_vm2, %v3579_v44  ;;  %7118 = vmatmul.mubr.msk.f32.gmra.mrb[88].mxu0 %vm356_vm2, %v4058_v16  ;;  %v6711_v13 = vpop.f32.mrb[239].mxu1  ;;  %v4061_v44 = vld [vmem:[%s7416_s15 + $0x123] sm:$0xff] }
 0x2d0   : > { %6998 = vmatprep.mubr.msk.f32.mxu1 %vm7306_vm1, %v7305_v1  ;;  %7120 = vmatprep.mubr.msk.f32.mxu0 %vm7306_vm1, %v7305_v1  ;;  %v3583_v13 = vld [vmem:[%s7416_s15 + $0x132] sm:$0xff] }
 0x2d2   : > { %v2915_v34 = vpop.f32.mrb[240].mxu1  ;;  %v3390_v6 = vpop.f32.mrb[240].mxu0 }
 0x2d3   : > { %v3047_v20 = vadd.f32 %v2915_v34, %v8870_v14  ;;  %v9449_v62 = vadd.f32 %v3390_v6, %v3046_v9  ;;  %v6836_v35 = vpop.f32.mrb[241].mxu0  ;;  %6999 = vmatmul.mubr.msk.f32.gmra.mrb[90].mxu1 %vm356_vm2, %v3580_v29  ;;  %7121 = vmatmul.mubr.msk.f32.gmra.mrb[90].mxu0 %vm356_vm2, %v4059_v30  ;;  %v6714_v47 = vpop.f32.mrb[241].mxu1  ;;  %v4062_v29 = vld [vmem:[%s7416_s15 + $0x12b] sm:$0xff] }
 0x2d4   : > { %7001 = vmatprep.mubr.msk.f32.mxu1 %vm7306_vm1, %v7305_v1  ;;  %7123 = vmatprep.mubr.msk.f32.mxu0 %vm7306_vm1, %v7305_v1  ;;  %v3584_v47 = vld [vmem:[%s7416_s15 + $0x13a] sm:$0xff] }
 0x2d6   : > { %v2920_v19 = vpop.f32.mrb[242].mxu1  ;;  %v3395_v14 = vpop.f32.mrb[242].mxu0 }
 0x2d7   : > { %v3048_v24 = vadd.f32 %v2920_v19, %v8883_v10  ;;  %v9460_v11 = vadd.f32 %v3395_v14, %v3047_v20  ;;  %v6839_v58 = vpop.f32.mrb[243].mxu0  ;;  %7002 = vmatmul.mubr.msk.f32.gmra.mrb[92].mxu1 %vm356_vm2, %v3581_v51  ;;  %7124 = vmatmul.mubr.msk.f32.gmra.mrb[92].mxu0 %vm356_vm2, %v4060_v8  ;;  %v6717_v39 = vpop.f32.mrb[243].mxu1  ;;  %v4063_v51 = vld [vmem:[%s7416_s15 + $0x133] sm:$0xff] }
 0x2d8   : > { %7004 = vmatprep.mubr.msk.f32.mxu1 %vm7306_vm1, %v7305_v1  ;;  %7126 = vmatprep.mubr.msk.f32.mxu0 %vm7306_vm1, %v7305_v1  ;;  %v3585_v39 = vld [vmem:[%s7416_s15 + $0x142] sm:$0xff] }
 0x2da   : > { %v2925_v16 = vpop.f32.mrb[244].mxu1  ;;  %v3400_v10 = vpop.f32.mrb[244].mxu0 }
 0x2db   : > { %v3049_v59 = vadd.f32 %v2925_v16, %v8896_v25  ;;  %v9471_v12 = vadd.f32 %v3400_v10, %v3048_v24  ;;  %v6842_v9 = vpop.f32.mrb[245].mxu0  ;;  %7005 = vmatmul.mubr.msk.f32.gmra.mrb[94].mxu1 %vm356_vm2, %v3582_v55  ;;  %7127 = vmatmul.mubr.msk.f32.gmra.mrb[94].mxu0 %vm356_vm2, %v4061_v44  ;;  %v6720_v26 = vpop.f32.mrb[245].mxu1  ;;  %v4064_v55 = vld [vmem:[%s7416_s15 + $0x13b] sm:$0xff] }
 0x2dc   : > { %7007 = vmatprep.mubr.msk.f32.mxu1 %vm7306_vm1, %v7305_v1  ;;  %7129 = vmatprep.mubr.msk.f32.mxu0 %vm7306_vm1, %v7305_v1  ;;  %v3586_v26 = vld [vmem:[%s7416_s15 + $0x14a] sm:$0xff] }
 0x2de   : > { %v2930_v30 = vpop.f32.mrb[246].mxu1  ;;  %v3405_v25 = vpop.f32.mrb[246].mxu0 }
 0x2df   : > { %v3050_v34 = vadd.f32 %v2930_v30, %v8912_v61  ;;  %v9482_v6 = vadd.f32 %v3405_v25, %v3049_v59  ;;  %v6845_v20 = vpop.f32.mrb[247].mxu0  ;;  %7008 = vmatmul.mubr.msk.f32.gmra.mrb[96].mxu1 %vm356_vm2, %v3583_v13  ;;  %7130 = vmatmul.mubr.msk.f32.gmra.mrb[96].mxu0 %vm356_vm2, %v4062_v29  ;;  %v6723_v35 = vpop.f32.mrb[247].mxu1  ;;  %v4065_v13 = vld [vmem:[%s7416_s15 + $0x143] sm:$0xff] }
 0x2e0   : > { %7010 = vmatprep.mubr.msk.f32.mxu1 %vm7306_vm1, %v7305_v1  ;;  %7132 = vmatprep.mubr.msk.f32.mxu0 %vm7306_vm1, %v7305_v1  ;;  %v3587_v35 = vld [vmem:[%s7416_s15 + $0x152] sm:$0xff] }
 0x2e2   : > { %v2935_v8 = vpop.f32.mrb[248].mxu1  ;;  %v3410_v61 = vpop.f32.mrb[248].mxu0 }
 0x2e3   : > { %v3051_v19 = vadd.f32 %v2935_v8, %v8928_v38  ;;  %v9493_v14 = vadd.f32 %v3410_v61, %v3050_v34  ;;  %v6848_v24 = vpop.f32.mrb[249].mxu0  ;;  %7011 = vmatmul.mubr.msk.f32.gmra.mrb[98].mxu1 %vm356_vm2, %v3584_v47  ;;  %7133 = vmatmul.mubr.msk.f32.gmra.mrb[98].mxu0 %vm356_vm2, %v4063_v51  ;;  %v6726_v58 = vpop.f32.mrb[249].mxu1  ;;  %v4066_v47 = vld [vmem:[%s7416_s15 + $0x14b] sm:$0xff] }
 0x2e4   : > { %7013 = vmatprep.mubr.msk.f32.mxu1 %vm7306_vm1, %v7305_v1  ;;  %7135 = vmatprep.mubr.msk.f32.mxu0 %vm7306_vm1, %v7305_v1  ;;  %v3588_v58 = vld [vmem:[%s7416_s15 + $0x15a] sm:$0xff] }
 0x2e6   : > { %v2940_v44 = vpop.f32.mrb[250].mxu1  ;;  %v3415_v38 = vpop.f32.mrb[250].mxu0 }
 0x2e7   : > { %v3052_v16 = vadd.f32 %v2940_v44, %v8944_v3  ;;  %v9504_v10 = vadd.f32 %v3415_v38, %v3051_v19  ;;  %v6851_v59 = vpop.f32.mrb[251].mxu0  ;;  %7014 = vmatmul.mubr.msk.f32.gmra.mrb[100].mxu1 %vm356_vm2, %v3585_v39  ;;  %7136 = vmatmul.mubr.msk.f32.gmra.mrb[100].mxu0 %vm356_vm2, %v4064_v55  ;;  %v6729_v9 = vpop.f32.mrb[251].mxu1  ;;  %v4067_v39 = vld [vmem:[%s7416_s15 + $0x153] sm:$0xff] }
 0x2e8   : > { %7016 = vmatprep.mubr.msk.f32.mxu1 %vm7306_vm1, %v7305_v1  ;;  %7138 = vmatprep.mubr.msk.f32.mxu0 %vm7306_vm1, %v7305_v1  ;;  %v3589_v9 = vld [vmem:[%s7416_s15 + $0x162] sm:$0xff] }
 0x2ea   : > { %v2945_v29 = vpop.f32.mrb[252].mxu1  ;;  %v3420_v3 = vpop.f32.mrb[252].mxu0 }
 0x2eb   : > { %v3053_v30 = vadd.f32 %v2945_v29, %v8960_v2  ;;  %v9515_v25 = vadd.f32 %v3420_v3, %v3052_v16  ;;  %v6854_v34 = vpop.f32.mrb[253].mxu0  ;;  %7017 = vmatmul.mubr.msk.f32.gmra.mrb[102].mxu1 %vm356_vm2, %v3586_v26  ;;  %7139 = vmatmul.mubr.msk.f32.gmra.mrb[102].mxu0 %vm356_vm2, %v4065_v13  ;;  %v6732_v20 = vpop.f32.mrb[253].mxu1  ;;  %v4068_v26 = vld [vmem:[%s7416_s15 + $0x15b] sm:$0xff] }
 0x2ec   : > { %7019 = vmatprep.mubr.msk.f32.mxu1 %vm7306_vm1, %v7305_v1  ;;  %7141 = vmatprep.mubr.msk.f32.mxu0 %vm7306_vm1, %v7305_v1  ;;  %v3590_v20 = vld [vmem:[%s7416_s15 + $0x16a] sm:$0xff] }
 0x2ee   : > { %v2950_v51 = vpop.f32.mrb[254].mxu1  ;;  %v3425_v2 = vpop.f32.mrb[254].mxu0 }
 0x2ef   : > { %v3054_v8 = vadd.f32 %v2950_v51, %v8976_v48  ;;  %v9526_v61 = vadd.f32 %v3425_v2, %v3053_v30  ;;  %v6857_v19 = vpop.f32.mrb[255].mxu0  ;;  %7020 = vmatmul.mubr.msk.f32.gmra.mrb[104].mxu1 %vm356_vm2, %v3587_v35  ;;  %7142 = vmatmul.mubr.msk.f32.gmra.mrb[104].mxu0 %vm356_vm2, %v4066_v47  ;;  %v6735_v24 = vpop.f32.mrb[255].mxu1  ;;  %v4069_v35 = vld [vmem:[%s7416_s15 + $0x163] sm:$0xff] }
 0x2f0   : > { %7022 = vmatprep.mubr.msk.f32.mxu1 %vm7306_vm1, %v7305_v1  ;;  %7144 = vmatprep.mubr.msk.f32.mxu0 %vm7306_vm1, %v7305_v1  ;;  %v4070_v24 = vld [vmem:[%s7416_s15 + $0x16b] sm:$0xff]  ;;  %s7308_s15 = smov [#allocation2]  }
 0x2f1   : > { %s7213_s26 = sshll.u32 %s7308_s15, 4  ;;  %s7214_s26 = int_to_ptr.vmem [resolvable:$false] %s7213_s26 }
 0x2f2   : > { %v2955_v55 = vpop.f32.mrb[0].mxu1  ;;  %v3430_v48 = vpop.f32.mrb[0].mxu0  ;;  %s7215_s16 = scalar_lea.vmem %s7214_s26, 32  ;;  %p7216_p0 = scmp.lt.s32.totalorder %s9874_s10, %s7214_s26 }
 0x2f3   : > { %v3055_v44 = vadd.f32 %v2955_v55, %v8992_v37  ;;  %v9537_v38 = vadd.f32 %v3430_v48, %v3054_v8  ;;  %v6860_v16 = vpop.f32.mrb[1].mxu0  ;;  %7023 = vmatmul.mubr.msk.f32.gmra.mrb[106].mxu1 %vm356_vm2, %v3588_v58  ;;  %7145 = vmatmul.mubr.msk.f32.gmra.mrb[106].mxu0 %vm356_vm2, %v4067_v39  ;;  %v6738_v59 = vpop.f32.mrb[1].mxu1  ;;  %p7217_p1 = scmp.lt.s32.totalorder %s7215_s16, %s7209_s12 }
 0x2f4   : > { %7025 = vmatprep.mubr.msk.f32.mxu1 %vm7306_vm1, %v7305_v1  ;;  %7147 = vmatprep.mubr.msk.f32.mxu0 %vm7306_vm1, %v7305_v1 }
 0x2f5   : > { %p7218_p2 = por %p7217_p1, %p7216_p0 }
 0x2f6   : > { %v2960_v13 = vpop.f32.mrb[2].mxu1  ;;  %v3435_v37 = vpop.f32.mrb[2].mxu0 }
 0x2f7   : > { %v3056_v29 = vadd.f32 %v2960_v13, %v9008_v22  ;;  %v9548_v3 = vadd.f32 %v3435_v37, %v3055_v44  ;;  %v6863_v30 = vpop.f32.mrb[3].mxu0  ;;  %7026 = vmatmul.mubr.msk.f32.gmra.mrb[108].mxu1 %vm356_vm2, %v3589_v9  ;;  %7148 = vmatmul.mubr.msk.f32.gmra.mrb[108].mxu0 %vm356_vm2, %v4068_v26  ;;  %v6741_v34 = vpop.f32.mrb[3].mxu1  ;;  %p7219_p3 = pnand %p7218_p2, %p7212_p13 }
 0x2f8   : > { %7028 = vmatprep.mubr.msk.f32.mxu1 %vm7306_vm1, %v7305_v1  ;;  %7150 = vmatprep.mubr.msk.f32.mxu0 %vm7306_vm1, %v7305_v1 }
 0x2fa   : > { %v2965_v47 = vpop.f32.mrb[4].mxu1  ;;  %v3440_v51 = vpop.f32.mrb[4].mxu0 }
 0x2fb   : > { %v3057_v22 = vadd.f32 %v2965_v47, %v9025_v40  ;;  %v9559_v2 = vadd.f32 %v3440_v51, %v3056_v29  ;;  %v6866_v8 = vpop.f32.mrb[5].mxu0  ;;  %7029 = vmatmul.mubr.msk.f32.gmra.mrb[110].mxu1 %vm356_vm2, %v3590_v20  ;;  %7151 = vmatmul.mubr.msk.f32.gmra.mrb[110].mxu0 %vm356_vm2, %v4069_v35  ;;  %v6744_v19 = vpop.f32.mrb[5].mxu1 }
 0x2fc   : > { %7153 = vmatprep.mubr.msk.f32.mxu0 %vm7306_vm1, %v7305_v1 }
 0x2fe   : > { %v2970_v58 = vpop.f32.mrb[6].mxu1  ;;  %v3445_v39 = vpop.f32.mrb[6].mxu0 }
 0x2ff   : > { %v3058_v55 = vadd.f32 %v2970_v58, %v9042_v15  ;;  %v9567_v48 = vadd.f32 %v3445_v39, %v3057_v22  ;;  %v6869_v44 = vpop.f32.mrb[7].mxu0  ;;  %7154 = vmatmul.mubr.msk.f32.gmra.mrb[112].mxu0 %vm356_vm2, %v4070_v24  ;;  %v6747_v40 = vpop.f32.mrb[7].mxu1 }
 0x302   : > { %v2975_v16 = vpop.f32.mrb[8].mxu1  ;;  %v3450_v59 = vpop.f32.mrb[8].mxu0 }
 0x303   : > { %v3059_v9 = vadd.f32 %v2975_v16, %v9059_v50  ;;  %v9571_v26 = vadd.f32 %v3450_v59, %v3058_v55  ;;  %v6872_v13 = vpop.f32.mrb[9].mxu0  ;;  %v6750_v37 = vpop.f32.mrb[9].mxu1 }
 0x306   : > { %v2980_v1 = vpop.f32.mrb[10].mxu1  ;;  %v3455_v29 = vpop.f32.mrb[10].mxu0 }
 0x307   : > { %v3060_v30 = vadd.f32 %v2980_v1, %v9076_v18  ;;  %v9574_v34 = vadd.f32 %v3455_v29, %v3059_v9  ;;  %v6875_v15 = vpop.f32.mrb[11].mxu0  ;;  %v6753_v20 = vpop.f32.mrb[11].mxu1 }
 0x30a   : > { %v2985_v35 = vpop.f32.mrb[12].mxu1  ;;  %v3460_v47 = vpop.f32.mrb[12].mxu0 }
 0x30b   : > { %v3061_v51 = vadd.f32 %v2985_v35, %v9093_v4  ;;  %v9577_v22 = vadd.f32 %v3460_v47, %v3060_v30  ;;  %v6878_v8 = vpop.f32.mrb[13].mxu0  ;;  %v6756_v50 = vpop.f32.mrb[13].mxu1 }
 0x30e   : > { %v2990_v19 = vpop.f32.mrb[14].mxu1  ;;  %v3465_v24 = vpop.f32.mrb[14].mxu0 }
 0x30f   : > { %v3062_v58 = vadd.f32 %v2990_v19, %v9110_v33  ;;  %v9580_v39 = vadd.f32 %v3465_v24, %v3061_v51  ;;  %v6881_v55 = vpop.f32.mrb[15].mxu0  ;;  %v6759_v18 = vpop.f32.mrb[15].mxu1 }
 0x312   : > { %v2995_v44 = vpop.f32.mrb[16].mxu1  ;;  %v3470_v40 = vpop.f32.mrb[16].mxu0 }
 0x313   : > { %v3063_v16 = vadd.f32 %v2995_v44, %v9127_v63  ;;  %v9583_v59 = vadd.f32 %v3470_v40, %v3062_v58  ;;  %v6884_v9 = vpop.f32.mrb[17].mxu0  ;;  %v6762_v4 = vpop.f32.mrb[17].mxu1 }
 0x316   : > { %v3000_v13 = vpop.f32.mrb[18].mxu1  ;;  %v3475_v37 = vpop.f32.mrb[18].mxu0 }
 0x317   : > { %v3064_v1 = vadd.f32 %v3000_v13, %v9144_v60  ;;  %v9586_v29 = vadd.f32 %v3475_v37, %v3063_v16  ;;  %v6887_v30 = vpop.f32.mrb[19].mxu0  ;;  %v6765_v33 = vpop.f32.mrb[19].mxu1 }
 0x31a   : > { %v3005_v15 = vpop.f32.mrb[20].mxu1  ;;  %v3480_v20 = vpop.f32.mrb[20].mxu0 }
 0x31b   : > { %v3065_v35 = vadd.f32 %v3005_v15, %v9161_v36  ;;  %v9589_v47 = vadd.f32 %v3480_v20, %v3064_v1  ;;  %v6890_v51 = vpop.f32.mrb[21].mxu0  ;;  %v6768_v63 = vpop.f32.mrb[21].mxu1 }
 0x31e   : > { %v3010_v8 = vpop.f32.mrb[22].mxu1  ;;  %v3485_v50 = vpop.f32.mrb[22].mxu0 }
 0x31f   : > { %v3066_v19 = vadd.f32 %v3010_v8, %v9178_v41  ;;  %v9592_v24 = vadd.f32 %v3485_v50, %v3065_v35  ;;  %v6893_v58 = vpop.f32.mrb[23].mxu0  ;;  %v6771_v60 = vpop.f32.mrb[23].mxu1 }
 0x320   : > { %v4602_v58 = vpop.permute.xlu0 %4601 }
 0x322   : > { %v3015_v55 = vpop.f32.mrb[24].mxu1  ;;  %v3490_v18 = vpop.f32.mrb[24].mxu0 }
 0x323   : > { %v3067_v44 = vadd.f32 %v3015_v55, %v9195_v57  ;;  %v9595_v40 = vadd.f32 %v3490_v18, %v3066_v19  ;;  %v6896_v16 = vpop.f32.mrb[25].mxu0  ;;  %v6774_v36 = vpop.f32.mrb[25].mxu1 }
 0x326   : > { %v3020_v9 = vpop.f32.mrb[26].mxu1  ;;  %v3495_v4 = vpop.f32.mrb[26].mxu0 }
 0x327   : > { %v3068_v13 = vadd.f32 %v3020_v9, %v9212_v27  ;;  %v9598_v37 = vadd.f32 %v3495_v4, %v3067_v44  ;;  %v6899_v1 = vpop.f32.mrb[27].mxu0  ;;  %v6777_v41 = vpop.f32.mrb[27].mxu1 }
 0x32a   : > { %v3025_v30 = vpop.f32.mrb[28].mxu1  ;;  %v3500_v33 = vpop.f32.mrb[28].mxu0 }
 0x32b   : > { %v3069_v15 = vadd.f32 %v3025_v30, %v9225_v28  ;;  %v9601_v20 = vadd.f32 %v3500_v33, %v3068_v13  ;;  %v6902_v35 = vpop.f32.mrb[29].mxu0  ;;  %v6780_v57 = vpop.f32.mrb[29].mxu1  ;;  %v9609_v28 = vld [vmem:[%s9950_s2] ss:$0 sm:$0xff] }
 0x32e   : > { %v3505_v51 = vpop.f32.mrb[30].mxu0  ;;  %v3785_v63 = vpop.f32.mrb[30].mxu1 }
 0x32f   : > { %v9603_v8 = vadd.f32 %v3505_v51, %v3069_v15  ;;  %v3989_v50 = vadd.f32 %v3785_v63, %v9237_v56  ;;  %v6905_v19 = vpop.f32.mrb[31].mxu0  ;;  %v6910_v27 = vpop.f32.mrb[31].mxu1 }
 0x330   : > { %v4607_v15 = vpop.permute.xlu0 %4606 }
 0x332   : > { %v3790_v60 = vpop.f32.mrb[32].mxu1  ;;  %v4265_v55 = vpop.f32.mrb[32].mxu0 }
 0x333   : > { %v3990_v18 = vadd.f32 %v3790_v60, %v9248_v17  ;;  %v4469_v44 = vadd.f32 %v4265_v55, %v3989_v50  ;;  %v7035_v16 = vpop.f32.mrb[33].mxu0  ;;  %v6913_v36 = vpop.f32.mrb[33].mxu1 }
 0x334   : > { %v4612_v17 = vpop.permute.xlu1 %4611 }
 0x335   : > { %v4517_v9 = vadd.f32 %v9609_v28, %v4469_v44 }
 0x336   : > { %v3795_v4 = vpop.f32.mrb[34].mxu1  ;;  %v4270_v56 = vpop.f32.mrb[34].mxu0 }
 0x337   : > { %v4804_v13 = vmul.f32 %v4602_v58, %v4517_v9  ;;  %v3991_v1 = vadd.f32 %v3795_v4, %v9259_v52  ;;  %v4470_v41 = vadd.f32 %v4270_v56, %v3990_v18  ;;  %v7038_v30 = vpop.f32.mrb[35].mxu0  ;;  %v6916_v33 = vpop.f32.mrb[35].mxu1 }
 0x339   : > { %4848 = vst.msk [vmem:[%s9345_s20 + $0x18] sm:$0xff] %vm356_vm2, %v4804_v13  ;;  %v4518_v35 = vadd.f32 %v9609_v28, %v4470_v41  ;;  %v4981_v57 = vmul.f32 %v4804_v13, %v4804_v13  ;;  %v4892_v52 = vsel %vm356_vm2, %v4804_v13, 0.0 }
 0x33a   : > { %v3800_v51 = vpop.f32.mrb[36].mxu1  ;;  %v4275_v63 = vpop.f32.mrb[36].mxu0 }
 0x33b   : > { %v4805_v50 = vmul.f32 %v4607_v15, %v4518_v35  ;;  %v3992_v19 = vadd.f32 %v3800_v51, %v9270_v32  ;;  %v4471_v27 = vadd.f32 %v4275_v63, %v3991_v1  ;;  %v7041_v58 = vpop.f32.mrb[37].mxu0  ;;  %v6919_v60 = vpop.f32.mrb[37].mxu1  ;;  %v5022_v16 = vsel %vm356_vm2, %v4981_v57, 0.0 }
 0x33c   : > { %v4617_v51 = vpop.permute.xlu1 %4616 }
 0x33d   : > { %4849 = vst.msk [vmem:[%s9345_s20 + $0x20] sm:$0xff] %vm356_vm2, %v4805_v50  ;;  %v4893_v55 = vsel %vm356_vm2, %v4805_v50, 0.0  ;;  %v4982_v18 = vmul.f32 %v4805_v50, %v4805_v50  ;;  %v4519_v44 = vadd.f32 %v9609_v28, %v4471_v27 }
 0x33e   : > { %v4894_v36 = vadd.f32 %v4893_v55, %v4892_v52  ;;  %v3805_v9 = vpop.f32.mrb[38].mxu1  ;;  %v4280_v4 = vpop.f32.mrb[38].mxu0 }
 0x33f   : > { %v5023_v32 = vsel %vm356_vm2, %v4982_v18, 0.0  ;;  %v4806_v56 = vmul.f32 %v4612_v17, %v4519_v44  ;;  %v3993_v1 = vadd.f32 %v3805_v9, %v9281_v23  ;;  %v4472_v41 = vadd.f32 %v4280_v4, %v3992_v19  ;;  %v7044_v13 = vpop.f32.mrb[39].mxu0  ;;  %v6922_v30 = vpop.f32.mrb[39].mxu1 }
 0x340   : > { %v5024_v33 = vadd.f32 %v5023_v32, %v5022_v16  ;;  %v4622_v18 = vpop.permute.xlu0 %4621 }
 0x341   : > { %4850 = vst.msk [vmem:[%s9345_s20 + $0x28] sm:$0xff] %vm356_vm2, %v4806_v56  ;;  %v4895_v15 = vsel %vm356_vm2, %v4806_v56, 0.0  ;;  %v4983_v35 = vmul.f32 %v4806_v56, %v4806_v56  ;;  %v4520_v57 = vadd.f32 %v9609_v28, %v4472_v41 }
 0x342   : > { %v4896_v63 = vadd.f32 %v4895_v15, %v4894_v36  ;;  %v3810_v50 = vpop.f32.mrb[40].mxu1  ;;  %v4285_v27 = vpop.f32.mrb[40].mxu0 }
 0x343   : > { %v5025_v17 = vsel %vm356_vm2, %v4983_v35, 0.0  ;;  %v4807_v58 = vmul.f32 %v4617_v51, %v4520_v57  ;;  %v3994_v23 = vadd.f32 %v3810_v50, %v9292_v45  ;;  %v4473_v19 = vadd.f32 %v4285_v27, %v3993_v1  ;;  %v7047_v60 = vpop.f32.mrb[41].mxu0  ;;  %v6925_v52 = vpop.f32.mrb[41].mxu1 }
 0x344   : > { %v5026_v55 = vadd.f32 %v5025_v17, %v5024_v33  ;;  %v4627_v51 = vpop.permute.xlu1 %4626 }
 0x345   : > { %4851 = vst.msk [vmem:[%s9345_s20 + $0x30] sm:$0xff] %vm356_vm2, %v4807_v58  ;;  %v4897_v44 = vsel %vm356_vm2, %v4807_v58, 0.0  ;;  %v4984_v16 = vmul.f32 %v4807_v58, %v4807_v58  ;;  %v4521_v36 = vadd.f32 %v9609_v28, %v4473_v19 }
 0x346   : > { %v4898_v9 = vadd.f32 %v4897_v44, %v4896_v63  ;;  %v3815_v4 = vpop.f32.mrb[42].mxu1  ;;  %v4290_v32 = vpop.f32.mrb[42].mxu0 }
 0x347   : > { %v5027_v56 = vsel %vm356_vm2, %v4984_v16, 0.0  ;;  %v4808_v41 = vmul.f32 %v4622_v18, %v4521_v36  ;;  %v3995_v45 = vadd.f32 %v3815_v4, %v9303_v42  ;;  %v4474_v1 = vadd.f32 %v4290_v32, %v3994_v23  ;;  %v7050_v13 = vpop.f32.mrb[43].mxu0  ;;  %v6928_v30 = vpop.f32.mrb[43].mxu1 }
 0x348   : > { %v5028_v33 = vadd.f32 %v5027_v56, %v5026_v55  ;;  %v4632_v55 = vpop.permute.xlu0 %4631  ;;  %v4637_v30 = vpop.permute.xlu1 %4636 }
 0x349   : > { %4852 = vst.msk [vmem:[%s9345_s20 + $0x38] sm:$0xff] %vm356_vm2, %v4808_v41  ;;  %v4899_v15 = vsel %vm356_vm2, %v4808_v41, 0.0  ;;  %v4985_v35 = vmul.f32 %v4808_v41, %v4808_v41  ;;  %v4522_v57 = vadd.f32 %v9609_v28, %v4474_v1 }
 0x34a   : > { %v4900_v63 = vadd.f32 %v4899_v15, %v4898_v9  ;;  %v3820_v50 = vpop.f32.mrb[44].mxu1  ;;  %v4295_v27 = vpop.f32.mrb[44].mxu0 }
 0x34b   : > { %v5029_v17 = vsel %vm356_vm2, %v4985_v35, 0.0  ;;  %v4809_v58 = vmul.f32 %v4627_v51, %v4522_v57  ;;  %v3996_v42 = vadd.f32 %v3820_v50, %v9314_v43  ;;  %v4475_v23 = vadd.f32 %v4295_v27, %v3995_v45  ;;  %v7053_v19 = vpop.f32.mrb[45].mxu0  ;;  %v6931_v60 = vpop.f32.mrb[45].mxu1 }
 0x34c   : > { %v5030_v52 = vadd.f32 %v5029_v17, %v5028_v33  ;;  %v4642_v19 = vpop.permute.xlu0 %4641 }
 0x34d   : > { %4853 = vst.msk [vmem:[%s9345_s20 + $0x40] sm:$0xff] %vm356_vm2, %v4809_v58  ;;  %v4901_v18 = vsel %vm356_vm2, %v4809_v58, 0.0  ;;  %v4986_v44 = vmul.f32 %v4809_v58, %v4809_v58  ;;  %v4523_v16 = vadd.f32 %v9609_v28, %v4475_v23 }
 0x34e   : > { %v4902_v36 = vadd.f32 %v4901_v18, %v4900_v63  ;;  %v3825_v9 = vpop.f32.mrb[46].mxu1  ;;  %v4300_v4 = vpop.f32.mrb[46].mxu0 }
 0x34f   : > { %v5031_v32 = vsel %vm356_vm2, %v4986_v44, 0.0  ;;  %v4810_v56 = vmul.f32 %v4632_v55, %v4523_v16  ;;  %v3997_v43 = vadd.f32 %v3825_v9, %v9325_v0  ;;  %v4476_v41 = vadd.f32 %v4300_v4, %v3996_v42  ;;  %v7056_v45 = vpop.f32.mrb[47].mxu0  ;;  %v6934_v1 = vpop.f32.mrb[47].mxu1 }
 0x350   : > { %v5032_v13 = vadd.f32 %v5031_v32, %v5030_v52 }
 0x351   : > { %4854 = vst.msk [vmem:[%s9345_s20 + $0x48] sm:$0xff] %vm356_vm2, %v4810_v56  ;;  %v4903_v33 = vsel %vm356_vm2, %v4810_v56, 0.0  ;;  %v4987_v15 = vmul.f32 %v4810_v56, %v4810_v56  ;;  %v4524_v35 = vadd.f32 %v9609_v28, %v4476_v41  ;;  %v4647_v41 = vpop.permute.xlu1 %4646 }
 0x352   : > { %v4904_v51 = vadd.f32 %v4903_v33, %v4902_v36  ;;  %v3830_v57 = vpop.f32.mrb[48].mxu1  ;;  %v4305_v63 = vpop.f32.mrb[48].mxu0 }
 0x353   : > { %v5033_v50 = vsel %vm356_vm2, %v4987_v15, 0.0  ;;  %v4811_v27 = vmul.f32 %v4637_v30, %v4524_v35  ;;  %v3998_v0 = vadd.f32 %v3830_v57, %v9336_v53  ;;  %v4477_v17 = vadd.f32 %v4305_v63, %v3997_v43  ;;  %v7059_v58 = vpop.f32.mrb[49].mxu0  ;;  %v6937_v42 = vpop.f32.mrb[49].mxu1 }
 0x354   : > { %v5034_v23 = vadd.f32 %v5033_v50, %v5032_v13 }
 0x355   : > { %4855 = vst.msk [vmem:[%s9345_s20 + $0x50] sm:$0xff] %vm356_vm2, %v4811_v27  ;;  %v4905_v60 = vsel %vm356_vm2, %v4811_v27, 0.0  ;;  %v4988_v52 = vmul.f32 %v4811_v27, %v4811_v27  ;;  %v4525_v55 = vadd.f32 %v9609_v28, %v4477_v17 }
 0x356   : > { %v4906_v18 = vadd.f32 %v4905_v60, %v4904_v51  ;;  %v3835_v44 = vpop.f32.mrb[50].mxu1  ;;  %v4310_v16 = vpop.f32.mrb[50].mxu0 }
 0x357   : > { %v5035_v36 = vsel %vm356_vm2, %v4988_v52, 0.0  ;;  %v4812_v9 = vmul.f32 %v4642_v19, %v4525_v55  ;;  %v3999_v53 = vadd.f32 %v3835_v44, %v9372_v49  ;;  %v4478_v4 = vadd.f32 %v4310_v16, %v3998_v0  ;;  %v7062_v32 = vpop.f32.mrb[51].mxu0  ;;  %v6940_v56 = vpop.f32.mrb[51].mxu1 }
 0x358   : > { %v5036_v43 = vadd.f32 %v5035_v36, %v5034_v23  ;;  %v4652_v0 = vpop.permute.xlu0 %4651 }
 0x359   : > { %4856 = vst.msk [vmem:[%s9345_s20 + $0x58] sm:$0xff] %vm356_vm2, %v4812_v9  ;;  %v4907_v45 = vsel %vm356_vm2, %v4812_v9, 0.0  ;;  %v4989_v1 = vmul.f32 %v4812_v9, %v4812_v9  ;;  %v4526_v13 = vadd.f32 %v9609_v28, %v4478_v4  ;;  %v4657_v9 = vpop.permute.xlu1 %4656 }
 0x35a   : > { %v4908_v30 = vadd.f32 %v4907_v45, %v4906_v18  ;;  %v3840_v33 = vpop.f32.mrb[52].mxu1  ;;  %v4315_v15 = vpop.f32.mrb[52].mxu0 }
 0x35b   : > { %v5037_v35 = vsel %vm356_vm2, %v4989_v1, 0.0  ;;  %v4813_v51 = vmul.f32 %v4647_v41, %v4526_v13  ;;  %v4000_v49 = vadd.f32 %v3840_v33, %v9383_v21  ;;  %v4479_v57 = vadd.f32 %v4315_v15, %v3999_v53  ;;  %v7065_v63 = vpop.f32.mrb[53].mxu0  ;;  %v6943_v50 = vpop.f32.mrb[53].mxu1 }
 0x35c   : > { %v5038_v27 = vadd.f32 %v5037_v35, %v5036_v43  ;;  %v4662_v35 = vpop.permute.xlu0 %4661 }
 0x35d   : > { %4857 = vst.msk [vmem:[%s9345_s20 + $0x60] sm:$0xff] %vm356_vm2, %v4813_v51  ;;  %v4909_v17 = vsel %vm356_vm2, %v4813_v51, 0.0  ;;  %v4990_v58 = vmul.f32 %v4813_v51, %v4813_v51  ;;  %v4527_v42 = vadd.f32 %v9609_v28, %v4479_v57 }
 0x35e   : > { %v4910_v23 = vadd.f32 %v4909_v17, %v4908_v30  ;;  %v3845_v19 = vpop.f32.mrb[54].mxu1  ;;  %v4320_v60 = vpop.f32.mrb[54].mxu0 }
 0x35f   : > { %v5039_v52 = vsel %vm356_vm2, %v4990_v58, 0.0  ;;  %v4814_v55 = vmul.f32 %v4652_v0, %v4527_v42  ;;  %v4001_v21 = vadd.f32 %v3845_v19, %v9394_v46  ;;  %v4480_v18 = vadd.f32 %v4320_v60, %v4000_v49  ;;  %v7068_v44 = vpop.f32.mrb[55].mxu0  ;;  %v6946_v16 = vpop.f32.mrb[55].mxu1 }
 0x360   : > { %v5040_v36 = vadd.f32 %v5039_v52, %v5038_v27  ;;  %v4667_v60 = vpop.permute.xlu1 %4666 }
 0x361   : > { %4858 = vst.msk [vmem:[%s9345_s20 + $0x68] sm:$0xff] %vm356_vm2, %v4814_v55  ;;  %v4911_v53 = vsel %vm356_vm2, %v4814_v55, 0.0  ;;  %v4991_v4 = vmul.f32 %v4814_v55, %v4814_v55  ;;  %v4528_v32 = vadd.f32 %v9609_v28, %v4480_v18 }
 0x362   : > { %v4912_v56 = vadd.f32 %v4911_v53, %v4910_v23  ;;  %v3850_v43 = vpop.f32.mrb[56].mxu1  ;;  %v4325_v41 = vpop.f32.mrb[56].mxu0 }
 0x363   : > { %v5041_v45 = vsel %vm356_vm2, %v4991_v4, 0.0  ;;  %v4815_v1 = vmul.f32 %v4657_v9, %v4528_v32  ;;  %v4002_v46 = vadd.f32 %v3850_v43, %v9405_v5  ;;  %v4481_v13 = vadd.f32 %v4325_v41, %v4001_v21  ;;  %v7071_v30 = vpop.f32.mrb[57].mxu0  ;;  %v6949_v33 = vpop.f32.mrb[57].mxu1 }
 0x364   : > { %v5042_v15 = vadd.f32 %v5041_v45, %v5040_v36  ;;  %v4672_v43 = vpop.permute.xlu0 %4671 }
 0x365   : > { %4859 = vst.msk [vmem:[%s9345_s20 + $0x70] sm:$0xff] %vm356_vm2, %v4815_v1  ;;  %v4913_v51 = vsel %vm356_vm2, %v4815_v1, 0.0  ;;  %v4992_v49 = vmul.f32 %v4815_v1, %v4815_v1  ;;  %v4529_v57 = vadd.f32 %v9609_v28, %v4481_v13 }
 0x366   : > { %v4914_v63 = vadd.f32 %v4913_v51, %v4912_v56  ;;  %v3855_v50 = vpop.f32.mrb[58].mxu1  ;;  %v4330_v27 = vpop.f32.mrb[58].mxu0 }
 0x367   : > { %v5043_v0 = vsel %vm356_vm2, %v4992_v49, 0.0  ;;  %v4816_v17 = vmul.f32 %v4662_v35, %v4529_v57  ;;  %v4003_v5 = vadd.f32 %v3855_v50, %v9416_v54  ;;  %v4482_v58 = vadd.f32 %v4330_v27, %v4002_v46  ;;  %v7074_v42 = vpop.f32.mrb[59].mxu0  ;;  %v6952_v23 = vpop.f32.mrb[59].mxu1 }
 0x368   : > { %v5044_v19 = vadd.f32 %v5043_v0, %v5042_v15 }
 0x369   : > { %4860 = vst.msk [vmem:[%s9345_s20 + $0x78] sm:$0xff] %vm356_vm2, %v4816_v17  ;;  %v4915_v52 = vsel %vm356_vm2, %v4816_v17, 0.0  ;;  %v4993_v55 = vmul.f32 %v4816_v17, %v4816_v17  ;;  %v4530_v21 = vadd.f32 %v9609_v28, %v4482_v58 }
 0x36a   : > { %v4916_v18 = vadd.f32 %v4915_v52, %v4914_v63  ;;  %v3860_v44 = vpop.f32.mrb[60].mxu1  ;;  %v4335_v16 = vpop.f32.mrb[60].mxu0 }
 0x36b   : > { %v5045_v36 = vsel %vm356_vm2, %v4993_v55, 0.0  ;;  %v4817_v9 = vmul.f32 %v4667_v60, %v4530_v21  ;;  %v4004_v54 = vadd.f32 %v3860_v44, %v9427_v31  ;;  %v4483_v53 = vadd.f32 %v4335_v16, %v4003_v5  ;;  %v7077_v4 = vpop.f32.mrb[61].mxu0  ;;  %v6955_v32 = vpop.f32.mrb[61].mxu1 }
 0x36c   : > { %v5046_v56 = vadd.f32 %v5045_v36, %v5044_v19  ;;  %v4677_v63 = vpop.permute.xlu1 %4676  ;;  %v4682_v21 = vpop.permute.xlu0 %4681 }
 0x36d   : > { %4861 = vst.msk [vmem:[%s9345_s20 + $0x80] sm:$0xff] %vm356_vm2, %v4817_v9  ;;  %v4917_v41 = vsel %vm356_vm2, %v4817_v9, 0.0  ;;  %v4994_v45 = vmul.f32 %v4817_v9, %v4817_v9  ;;  %v4531_v1 = vadd.f32 %v9609_v28, %v4483_v53 }
 0x36e   : > { %v4918_v46 = vadd.f32 %v4917_v41, %v4916_v18  ;;  %v3865_v13 = vpop.f32.mrb[62].mxu1  ;;  %v4340_v30 = vpop.f32.mrb[62].mxu0 }
 0x36f   : > { %v5047_v33 = vsel %vm356_vm2, %v4994_v45, 0.0  ;;  %v4818_v15 = vmul.f32 %v4672_v43, %v4531_v1  ;;  %v4005_v31 = vadd.f32 %v3865_v13, %v9438_v7  ;;  %v4484_v35 = vadd.f32 %v4340_v30, %v4004_v54  ;;  %v7080_v51 = vpop.f32.mrb[63].mxu0  ;;  %v6958_v49 = vpop.f32.mrb[63].mxu1 }
 0x370   : > { %v5048_v57 = vadd.f32 %v5047_v33, %v5046_v56  ;;  %v4687_v45 = vpop.permute.xlu1 %4686 }
 0x371   : > { %4862 = vst.msk [vmem:[%s9345_s20 + $0x88] sm:$0xff] %vm356_vm2, %v4818_v15  ;;  %v4919_v50 = vsel %vm356_vm2, %v4818_v15, 0.0  ;;  %v4995_v27 = vmul.f32 %v4818_v15, %v4818_v15  ;;  %v4532_v0 = vadd.f32 %v9609_v28, %v4484_v35 }
 0x372   : > { %v4920_v17 = vadd.f32 %v4919_v50, %v4918_v46  ;;  %v3870_v5 = vpop.f32.mrb[64].mxu1  ;;  %v4345_v58 = vpop.f32.mrb[64].mxu0 }
 0x373   : > { %v5049_v42 = vsel %vm356_vm2, %v4995_v27, 0.0  ;;  %v4819_v23 = vmul.f32 %v4677_v63, %v4532_v0  ;;  %v4006_v7 = vadd.f32 %v3870_v5, %v9449_v62  ;;  %v4485_v19 = vadd.f32 %v4345_v58, %v4005_v31  ;;  %v7083_v60 = vpop.f32.mrb[65].mxu0  ;;  %v6961_v52 = vpop.f32.mrb[65].mxu1 }
 0x374   : > { %v5050_v55 = vadd.f32 %v5049_v42, %v5048_v57  ;;  %v4692_v50 = vpop.permute.xlu0 %4691 }
 0x375   : > { %4863 = vst.msk [vmem:[%s9345_s20 + $0x90] sm:$0xff] %vm356_vm2, %v4819_v23  ;;  %v4921_v18 = vsel %vm356_vm2, %v4819_v23, 0.0  ;;  %v4996_v44 = vmul.f32 %v4819_v23, %v4819_v23  ;;  %v4533_v16 = vadd.f32 %v9609_v28, %v4485_v19 }
 0x376   : > { %v4922_v36 = vadd.f32 %v4921_v18, %v4920_v17  ;;  %v3875_v9 = vpop.f32.mrb[66].mxu1  ;;  %v4350_v54 = vpop.f32.mrb[66].mxu0 }
 0x377   : > { %v5051_v53 = vsel %vm356_vm2, %v4996_v44, 0.0  ;;  %v4820_v4 = vmul.f32 %v4682_v21, %v4533_v16  ;;  %v4007_v62 = vadd.f32 %v3875_v9, %v9460_v11  ;;  %v4486_v32 = vadd.f32 %v4350_v54, %v4006_v7  ;;  %v7086_v56 = vpop.f32.mrb[67].mxu0  ;;  %v6964_v43 = vpop.f32.mrb[67].mxu1 }
 0x378   : > { %v5052_v41 = vadd.f32 %v5051_v53, %v5050_v55  ;;  %v4697_v21 = vpop.permute.xlu1 %4696 }
 0x379   : > { %4864 = vst.msk [vmem:[%s9345_s20 + $0x98] sm:$0xff] %vm356_vm2, %v4820_v4  ;;  %v4923_v1 = vsel %vm356_vm2, %v4820_v4, 0.0  ;;  %v4997_v46 = vmul.f32 %v4820_v4, %v4820_v4  ;;  %v4534_v13 = vadd.f32 %v9609_v28, %v4486_v32 }
 0x37a   : > { %v4924_v30 = vadd.f32 %v4923_v1, %v4922_v36  ;;  %v3880_v33 = vpop.f32.mrb[68].mxu1  ;;  %v4355_v15 = vpop.f32.mrb[68].mxu0 }
 0x37b   : > { %v5053_v31 = vsel %vm356_vm2, %v4997_v46, 0.0  ;;  %v4821_v35 = vmul.f32 %v4687_v45, %v4534_v13  ;;  %v4008_v11 = vadd.f32 %v3880_v33, %v9471_v12  ;;  %v4487_v51 = vadd.f32 %v4355_v15, %v4007_v62  ;;  %v7089_v49 = vpop.f32.mrb[69].mxu0  ;;  %v6967_v57 = vpop.f32.mrb[69].mxu1 }
 0x37c   : > { %v5054_v63 = vadd.f32 %v5053_v31, %v5052_v41  ;;  %v4702_v41 = vpop.permute.xlu0 %4701  ;;  %v4707_v57 = vpop.permute.xlu1 %4706 }
 0x37d   : > { %4865 = vst.msk [vmem:[%s9345_s20 + $0xa0] sm:$0xff] %vm356_vm2, %v4821_v35  ;;  %v4925_v27 = vsel %vm356_vm2, %v4821_v35, 0.0  ;;  %v4998_v0 = vmul.f32 %v4821_v35, %v4821_v35  ;;  %v4535_v17 = vadd.f32 %v9609_v28, %v4487_v51 }
 0x37e   : > { %v4926_v5 = vadd.f32 %v4925_v27, %v4924_v30  ;;  %v3885_v58 = vpop.f32.mrb[70].mxu1  ;;  %v4360_v42 = vpop.f32.mrb[70].mxu0 }
 0x37f   : > { %v5055_v23 = vsel %vm356_vm2, %v4998_v0, 0.0  ;;  %v4822_v7 = vmul.f32 %v4692_v50, %v4535_v17  ;;  %v4009_v12 = vadd.f32 %v3885_v58, %v9482_v6  ;;  %v4488_v19 = vadd.f32 %v4360_v42, %v4008_v11  ;;  %v7092_v60 = vpop.f32.mrb[71].mxu0  ;;  %v6970_v52 = vpop.f32.mrb[71].mxu1 }
 0x380   : > { %v5056_v55 = vadd.f32 %v5055_v23, %v5054_v63  ;;  %v4712_v60 = vpop.permute.xlu0 %4711 }
 0x381   : > { %4866 = vst.msk [vmem:[%s9345_s20 + $0xa8] sm:$0xff] %vm356_vm2, %v4822_v7  ;;  %v4927_v18 = vsel %vm356_vm2, %v4822_v7, 0.0  ;;  %v4999_v44 = vmul.f32 %v4822_v7, %v4822_v7  ;;  %v4536_v16 = vadd.f32 %v9609_v28, %v4488_v19 }
 0x382   : > { %v4928_v36 = vadd.f32 %v4927_v18, %v4926_v5  ;;  %v3890_v9 = vpop.f32.mrb[72].mxu1  ;;  %v4365_v54 = vpop.f32.mrb[72].mxu0 }
 0x383   : > { %v5057_v53 = vsel %vm356_vm2, %v4999_v44, 0.0  ;;  %v4823_v4 = vmul.f32 %v4697_v21, %v4536_v16  ;;  %v4010_v6 = vadd.f32 %v3890_v9, %v9493_v14  ;;  %v4489_v62 = vadd.f32 %v4365_v54, %v4009_v12  ;;  %v7095_v32 = vpop.f32.mrb[73].mxu0  ;;  %v6973_v56 = vpop.f32.mrb[73].mxu1 }
 0x384   : > { %v5058_v43 = vadd.f32 %v5057_v53, %v5056_v55 }
 0x385   : > { %4867 = vst.msk [vmem:[%s9345_s20 + $0xb0] sm:$0xff] %vm356_vm2, %v4823_v4  ;;  %v4929_v45 = vsel %vm356_vm2, %v4823_v4, 0.0  ;;  %v5000_v1 = vmul.f32 %v4823_v4, %v4823_v4  ;;  %v4537_v46 = vadd.f32 %v9609_v28, %v4489_v62  ;;  %v4717_v62 = vpop.permute.xlu1 %4716 }
 0x386   : > { %v4930_v13 = vadd.f32 %v4929_v45, %v4928_v36  ;;  %v3895_v30 = vpop.f32.mrb[74].mxu1  ;;  %v4370_v33 = vpop.f32.mrb[74].mxu0 }
 0x387   : > { %v5059_v15 = vsel %vm356_vm2, %v5000_v1, 0.0  ;;  %v4824_v31 = vmul.f32 %v4702_v41, %v4537_v46  ;;  %v4011_v14 = vadd.f32 %v3895_v30, %v9504_v10  ;;  %v4490_v35 = vadd.f32 %v4370_v33, %v4010_v6  ;;  %v7098_v11 = vpop.f32.mrb[75].mxu0  ;;  %v6976_v51 = vpop.f32.mrb[75].mxu1 }
 0x388   : > { %v5060_v49 = vadd.f32 %v5059_v15, %v5058_v43 }
 0x389   : > { %4868 = vst.msk [vmem:[%s9345_s20 + $0xb8] sm:$0xff] %vm356_vm2, %v4824_v31  ;;  %v4931_v63 = vsel %vm356_vm2, %v4824_v31, 0.0  ;;  %v5001_v50 = vmul.f32 %v4824_v31, %v4824_v31  ;;  %v4538_v27 = vadd.f32 %v9609_v28, %v4490_v35 }
 0x38a   : > { %v4932_v0 = vadd.f32 %v4931_v63, %v4930_v13  ;;  %v3900_v17 = vpop.f32.mrb[76].mxu1  ;;  %v4375_v5 = vpop.f32.mrb[76].mxu0 }
 0x38b   : > { %v5061_v58 = vsel %vm356_vm2, %v5001_v50, 0.0  ;;  %v4825_v42 = vmul.f32 %v4707_v57, %v4538_v27  ;;  %v4012_v10 = vadd.f32 %v3900_v17, %v9515_v25  ;;  %v4491_v23 = vadd.f32 %v4375_v5, %v4011_v14  ;;  %v7101_v7 = vpop.f32.mrb[77].mxu0  ;;  %v6979_v12 = vpop.f32.mrb[77].mxu1 }
 0x38c   : > { %v5062_v19 = vadd.f32 %v5061_v58, %v5060_v49  ;;  %v4722_v14 = vpop.permute.xlu0 %4721 }
 0x38d   : > { %4869 = vst.msk [vmem:[%s9345_s20 + $0xc0] sm:$0xff] %vm356_vm2, %v4825_v42  ;;  %v4933_v52 = vsel %vm356_vm2, %v4825_v42, 0.0  ;;  %v5002_v55 = vmul.f32 %v4825_v42, %v4825_v42  ;;  %v4539_v21 = vadd.f32 %v9609_v28, %v4491_v23  ;;  %v4727_v42 = vpop.permute.xlu1 %4726 }
 0x38e   : > { %v4934_v18 = vadd.f32 %v4933_v52, %v4932_v0  ;;  %v3905_v44 = vpop.f32.mrb[78].mxu1  ;;  %v4380_v16 = vpop.f32.mrb[78].mxu0 }
 0x38f   : > { %v5063_v36 = vsel %vm356_vm2, %v5002_v55, 0.0  ;;  %v4826_v9 = vmul.f32 %v4712_v60, %v4539_v21  ;;  %v4013_v25 = vadd.f32 %v3905_v44, %v9526_v61  ;;  %v4492_v54 = vadd.f32 %v4380_v16, %v4012_v10  ;;  %v7104_v53 = vpop.f32.mrb[79].mxu0  ;;  %v6982_v4 = vpop.f32.mrb[79].mxu1 }
 0x390   : > { %v5064_v6 = vadd.f32 %v5063_v36, %v5062_v19  ;;  %v4732_v36 = vpop.permute.xlu0 %4731 }
 0x391   : > { %4870 = vst.msk [vmem:[%s9345_s20 + $0xc8] sm:$0xff] %vm356_vm2, %v4826_v9  ;;  %v4935_v32 = vsel %vm356_vm2, %v4826_v9, 0.0  ;;  %v5003_v56 = vmul.f32 %v4826_v9, %v4826_v9  ;;  %v4540_v43 = vadd.f32 %v9609_v28, %v4492_v54 }
 0x392   : > { %v4936_v41 = vadd.f32 %v4935_v32, %v4934_v18  ;;  %v3910_v45 = vpop.f32.mrb[80].mxu1  ;;  %v4385_v1 = vpop.f32.mrb[80].mxu0 }
 0x393   : > { %v5065_v46 = vsel %vm356_vm2, %v5003_v56, 0.0  ;;  %v4827_v13 = vmul.f32 %v4717_v62, %v4540_v43  ;;  %v4014_v61 = vadd.f32 %v3910_v45, %v9537_v38  ;;  %v4493_v30 = vadd.f32 %v4385_v1, %v4013_v25  ;;  %v7107_v33 = vpop.f32.mrb[81].mxu0  ;;  %v6985_v15 = vpop.f32.mrb[81].mxu1 }
 0x394   : > { %v5066_v31 = vadd.f32 %v5065_v46, %v5064_v6  ;;  %v4737_v1 = vpop.permute.xlu1 %4736 }
 0x395   : > { %4871 = vst.msk [vmem:[%s9345_s20 + $0xd0] sm:$0xff] %vm356_vm2, %v4827_v13  ;;  %v4937_v35 = vsel %vm356_vm2, %v4827_v13, 0.0  ;;  %v5004_v11 = vmul.f32 %v4827_v13, %v4827_v13  ;;  %v4541_v51 = vadd.f32 %v9609_v28, %v4493_v30 }
 0x396   : > { %v4938_v49 = vadd.f32 %v4937_v35, %v4936_v41  ;;  %v3915_v57 = vpop.f32.mrb[82].mxu1  ;;  %v4390_v63 = vpop.f32.mrb[82].mxu0 }
 0x397   : > { %v5067_v50 = vsel %vm356_vm2, %v5004_v11, 0.0  ;;  %v4828_v27 = vmul.f32 %v4722_v14, %v4541_v51  ;;  %v4015_v38 = vadd.f32 %v3915_v57, %v9548_v3  ;;  %v4494_v0 = vadd.f32 %v4390_v63, %v4014_v61  ;;  %v7110_v17 = vpop.f32.mrb[83].mxu0  ;;  %v6988_v5 = vpop.f32.mrb[83].mxu1 }
 0x398   : > { %v5068_v58 = vadd.f32 %v5067_v50, %v5066_v31  ;;  %v4742_v57 = vpop.permute.xlu0 %4741 }
 0x399   : > { %4872 = vst.msk [vmem:[%s9345_s20 + $0xd8] sm:$0xff] %vm356_vm2, %v4828_v27  ;;  %v4939_v10 = vsel %vm356_vm2, %v4828_v27, 0.0  ;;  %v5005_v23 = vmul.f32 %v4828_v27, %v4828_v27  ;;  %v4542_v7 = vadd.f32 %v9609_v28, %v4494_v0 }
 0x39a   : > { %v4940_v12 = vadd.f32 %v4939_v10, %v4938_v49  ;;  %v3920_v19 = vpop.f32.mrb[84].mxu1  ;;  %v4395_v60 = vpop.f32.mrb[84].mxu0 }
 0x39b   : > { %v5069_v52 = vsel %vm356_vm2, %v5005_v23, 0.0  ;;  %v4829_v55 = vmul.f32 %v4727_v42, %v4542_v7  ;;  %v4016_v3 = vadd.f32 %v3920_v19, %v9559_v2  ;;  %v4495_v21 = vadd.f32 %v4395_v60, %v4015_v38  ;;  %v7113_v18 = vpop.f32.mrb[85].mxu0  ;;  %v6991_v44 = vpop.f32.mrb[85].mxu1 }
 0x39c   : > { %v5070_v16 = vadd.f32 %v5069_v52, %v5068_v58 }
 0x39d   : > { %4873 = vst.msk [vmem:[%s9345_s20 + $0xe0] sm:$0xff] %vm356_vm2, %v4829_v55  ;;  %v4941_v9 = vsel %vm356_vm2, %v4829_v55, 0.0  ;;  %v5006_v25 = vmul.f32 %v4829_v55, %v4829_v55  ;;  %v4543_v54 = vadd.f32 %v9609_v28, %v4495_v21 }
 0x39e   : > { %v4942_v53 = vadd.f32 %v4941_v9, %v4940_v12  ;;  %v3925_v4 = vpop.f32.mrb[86].mxu1  ;;  %v4400_v6 = vpop.f32.mrb[86].mxu0 }
 0x39f   : > { %v5071_v62 = vsel %vm356_vm2, %v5006_v25, 0.0  ;;  %v4830_v32 = vmul.f32 %v4732_v36, %v4543_v54  ;;  %v4017_v2 = vadd.f32 %v3925_v4, %v9567_v48  ;;  %v4496_v56 = vadd.f32 %v4400_v6, %v4016_v3  ;;  %v7116_v43 = vpop.f32.mrb[87].mxu0  ;;  %v6994_v41 = vpop.f32.mrb[87].mxu1 }
 0x3a0   : > { %v5072_v45 = vadd.f32 %v5071_v62, %v5070_v16  ;;  %v4747_v12 = vpop.permute.xlu1 %4746  ;;  %v4752_v54 = vpop.permute.xlu0 %4751 }
 0x3a1   : > { %4874 = vst.msk [vmem:[%s9345_s20 + $0xe8] sm:$0xff] %vm356_vm2, %v4830_v32  ;;  %v4943_v46 = vsel %vm356_vm2, %v4830_v32, 0.0  ;;  %v5007_v13 = vmul.f32 %v4830_v32, %v4830_v32  ;;  %v4544_v61 = vadd.f32 %v9609_v28, %v4496_v56 }
 0x3a2   : > { %v4944_v30 = vadd.f32 %v4943_v46, %v4942_v53  ;;  %v3930_v33 = vpop.f32.mrb[88].mxu1  ;;  %v4405_v15 = vpop.f32.mrb[88].mxu0 }
 0x3a3   : > { %v5073_v31 = vsel %vm356_vm2, %v5007_v13, 0.0  ;;  %v4831_v14 = vmul.f32 %v4737_v1, %v4544_v61  ;;  %v4018_v48 = vadd.f32 %v3930_v33, %v9571_v26  ;;  %v4497_v35 = vadd.f32 %v4405_v15, %v4017_v2  ;;  %v7119_v11 = vpop.f32.mrb[89].mxu0  ;;  %v6997_v51 = vpop.f32.mrb[89].mxu1 }
 0x3a4   : > { %v5074_v49 = vadd.f32 %v5073_v31, %v5072_v45  ;;  %v4757_v13 = vpop.permute.xlu1 %4756 }
 0x3a5   : > { %4875 = vst.msk [vmem:[%s9345_s20 + $0xf0] sm:$0xff] %vm356_vm2, %v4831_v14  ;;  %v4945_v63 = vsel %vm356_vm2, %v4831_v14, 0.0  ;;  %v5008_v50 = vmul.f32 %v4831_v14, %v4831_v14  ;;  %v4545_v27 = vadd.f32 %v9609_v28, %v4497_v35 }
 0x3a6   : > { %v4946_v38 = vadd.f32 %v4945_v63, %v4944_v30  ;;  %v3935_v0 = vpop.f32.mrb[90].mxu1  ;;  %v4410_v17 = vpop.f32.mrb[90].mxu0 }
 0x3a7   : > { %v5075_v5 = vsel %vm356_vm2, %v5008_v50, 0.0  ;;  %v4832_v58 = vmul.f32 %v4742_v57, %v4545_v27  ;;  %v4019_v26 = vadd.f32 %v3935_v0, %v9574_v34  ;;  %v4498_v42 = vadd.f32 %v4410_v17, %v4018_v48  ;;  %v7122_v10 = vpop.f32.mrb[91].mxu0  ;;  %v7000_v23 = vpop.f32.mrb[91].mxu1 }
 0x3a8   : > { %v5076_v7 = vadd.f32 %v5075_v5, %v5074_v49  ;;  %v4762_v63 = vpop.permute.xlu0 %4761 }
 0x3a9   : > { %4876 = vst.msk [vmem:[%s9345_s20 + $0xf8] sm:$0xff] %vm356_vm2, %v4832_v58  ;;  %v4947_v19 = vsel %vm356_vm2, %v4832_v58, 0.0  ;;  %v5009_v60 = vmul.f32 %v4832_v58, %v4832_v58  ;;  %v4546_v52 = vadd.f32 %v9609_v28, %v4498_v42 }
 0x3aa   : > { %v4948_v55 = vadd.f32 %v4947_v19, %v4946_v38  ;;  %v3940_v3 = vpop.f32.mrb[92].mxu1  ;;  %v4415_v21 = vpop.f32.mrb[92].mxu0 }
 0x3ab   : > { %v5077_v18 = vsel %vm356_vm2, %v5009_v60, 0.0  ;;  %v4833_v44 = vmul.f32 %v4747_v12, %v4546_v52  ;;  %v4020_v34 = vadd.f32 %v3940_v3, %v9577_v22  ;;  %v4499_v16 = vadd.f32 %v4415_v21, %v4019_v26  ;;  %v7125_v36 = vpop.f32.mrb[93].mxu0  ;;  %v7003_v9 = vpop.f32.mrb[93].mxu1 }
 0x3ac   : > { %v5078_v25 = vadd.f32 %v5077_v18, %v5076_v7  ;;  %v4767_v12 = vpop.permute.xlu1 %4766 }
 0x3ad   : > { %4877 = vst.msk [vmem:[%s9345_s20 + $0x100] sm:$0xff] %vm356_vm2, %v4833_v44  ;;  %v4949_v53 = vsel %vm356_vm2, %v4833_v44, 0.0  ;;  %v5010_v4 = vmul.f32 %v4833_v44, %v4833_v44  ;;  %v4547_v6 = vadd.f32 %v9609_v28, %v4499_v16 }
 0x3ae   : > { %v4950_v62 = vadd.f32 %v4949_v53, %v4948_v55  ;;  %v3945_v32 = vpop.f32.mrb[94].mxu1  ;;  %v4420_v2 = vpop.f32.mrb[94].mxu0 }
 0x3af   : > { %v5079_v56 = vsel %vm356_vm2, %v5010_v4, 0.0  ;;  %v4834_v43 = vmul.f32 %v4752_v54, %v4547_v6  ;;  %v4021_v22 = vadd.f32 %v3945_v32, %v9580_v39  ;;  %v4500_v41 = vadd.f32 %v4420_v2, %v4020_v34  ;;  %v7128_v45 = vpop.f32.mrb[95].mxu0  ;;  %v7006_v1 = vpop.f32.mrb[95].mxu1 }
 0x3b0   : > { %v5080_v46 = vadd.f32 %v5079_v56, %v5078_v25  ;;  %v4772_v25 = vpop.permute.xlu0 %4771  ;;  %v4777_v1 = vpop.permute.xlu1 %4776 }
 0x3b1   : > { %4878 = vst.msk [vmem:[%s9345_s20 + $0x108] sm:$0xff] %vm356_vm2, %v4834_v43  ;;  %v4951_v61 = vsel %vm356_vm2, %v4834_v43, 0.0  ;;  %v5011_v30 = vmul.f32 %v4834_v43, %v4834_v43  ;;  %v4548_v33 = vadd.f32 %v9609_v28, %v4500_v41 }
 0x3b2   : > { %v4952_v15 = vadd.f32 %v4951_v61, %v4950_v62  ;;  %v3950_v31 = vpop.f32.mrb[96].mxu1  ;;  %v4425_v14 = vpop.f32.mrb[96].mxu0 }
 0x3b3   : > { %v5081_v48 = vsel %vm356_vm2, %v5011_v30, 0.0  ;;  %v4835_v35 = vmul.f32 %v4757_v13, %v4548_v33  ;;  %v4022_v39 = vadd.f32 %v3950_v31, %v9583_v59  ;;  %v4501_v11 = vadd.f32 %v4425_v14, %v4021_v22  ;;  %v7131_v51 = vpop.f32.mrb[97].mxu0  ;;  %v7009_v49 = vpop.f32.mrb[97].mxu1 }
 0x3b4   : > { %v5082_v57 = vadd.f32 %v5081_v48, %v5080_v46  ;;  %v4782_v51 = vpop.permute.xlu0 %4781 }
 0x3b5   : > { %4879 = vst.msk [vmem:[%s9345_s20 + $0x110] sm:$0xff] %vm356_vm2, %v4835_v35  ;;  %v4953_v50 = vsel %vm356_vm2, %v4835_v35, 0.0  ;;  %v5012_v27 = vmul.f32 %v4835_v35, %v4835_v35  ;;  %v4549_v38 = vadd.f32 %v9609_v28, %v4501_v11 }
 0x3b6   : > { %v4954_v0 = vadd.f32 %v4953_v50, %v4952_v15  ;;  %v3955_v17 = vpop.f32.mrb[98].mxu1  ;;  %v4430_v5 = vpop.f32.mrb[98].mxu0 }
 0x3b7   : > { %v5083_v58 = vsel %vm356_vm2, %v5012_v27, 0.0  ;;  %v4836_v26 = vmul.f32 %v4762_v63, %v4549_v38  ;;  %v4023_v59 = vadd.f32 %v3955_v17, %v9586_v29  ;;  %v4502_v42 = vadd.f32 %v4430_v5, %v4022_v39  ;;  %v7134_v10 = vpop.f32.mrb[99].mxu0  ;;  %v7012_v23 = vpop.f32.mrb[99].mxu1 }
 0x3b8   : > { %v5084_v7 = vadd.f32 %v5083_v58, %v5082_v57 }
 0x3b9   : > { %4880 = vst.msk [vmem:[%s9345_s20 + $0x118] sm:$0xff] %vm356_vm2, %v4836_v26  ;;  %v4955_v19 = vsel %vm356_vm2, %v4836_v26, 0.0  ;;  %v5013_v60 = vmul.f32 %v4836_v26, %v4836_v26  ;;  %v4550_v52 = vadd.f32 %v9609_v28, %v4502_v42  ;;  %v4787_v42 = vpop.permute.xlu1 %4786 }
 0x3ba   : > { %v4956_v55 = vadd.f32 %v4955_v19, %v4954_v0  ;;  %v3960_v3 = vpop.f32.mrb[100].mxu1  ;;  %v4435_v21 = vpop.f32.mrb[100].mxu0 }
 0x3bb   : > { %v5085_v18 = vsel %vm356_vm2, %v5013_v60, 0.0  ;;  %v4837_v44 = vmul.f32 %v4767_v12, %v4550_v52  ;;  %v4024_v29 = vadd.f32 %v3960_v3, %v9589_v47  ;;  %v4503_v34 = vadd.f32 %v4435_v21, %v4023_v59  ;;  %v7137_v16 = vpop.f32.mrb[101].mxu0  ;;  %v7015_v36 = vpop.f32.mrb[101].mxu1 }
 0x3bc   : > { %v5086_v9 = vadd.f32 %v5085_v18, %v5084_v7 }
 0x3bd   : > { %4881 = vst.msk [vmem:[%s9345_s20 + $0x120] sm:$0xff] %vm356_vm2, %v4837_v44  ;;  %v4957_v54 = vsel %vm356_vm2, %v4837_v44, 0.0  ;;  %v5014_v53 = vmul.f32 %v4837_v44, %v4837_v44  ;;  %v4551_v4 = vadd.f32 %v9609_v28, %v4503_v34  ;;  %v9824_v28 = vld [vmem:[%s9950_s2] ss:$0 sm:$0xff] }
 0x3be   : > { %v4958_v6 = vadd.f32 %v4957_v54, %v4956_v55  ;;  %v3965_v62 = vpop.f32.mrb[102].mxu1  ;;  %v4440_v32 = vpop.f32.mrb[102].mxu0 }
 0x3bf   : > { %v5087_v2 = vsel %vm356_vm2, %v5014_v53, 0.0  ;;  %v4838_v56 = vmul.f32 %v4772_v25, %v4551_v4  ;;  %v4025_v47 = vadd.f32 %v3965_v62, %v9592_v24  ;;  %v4504_v43 = vadd.f32 %v4440_v32, %v4024_v29  ;;  %v7140_v22 = vpop.f32.mrb[103].mxu0  ;;  %v7018_v41 = vpop.f32.mrb[103].mxu1 }
 0x3c0   : > { %v5088_v45 = vadd.f32 %v5087_v2, %v5086_v9  ;;  %v4792_v29 = vpop.permute.xlu0 %4791  ;;  %v4797_v22 = vpop.permute.xlu1 %4796 }
 0x3c1   : > { %4882 = vst.msk [vmem:[%s9345_s20 + $0x128] sm:$0xff] %vm356_vm2, %v4838_v56  ;;  %v4959_v46 = vsel %vm356_vm2, %v4838_v56, 0.0  ;;  %v5015_v13 = vmul.f32 %v4838_v56, %v4838_v56  ;;  %v4552_v61 = vadd.f32 %v9824_v28, %v4504_v43 }
 0x3c2   : > { %v4960_v30 = vadd.f32 %v4959_v46, %v4958_v6  ;;  %v3970_v24 = vpop.f32.mrb[104].mxu1  ;;  %v4445_v33 = vpop.f32.mrb[104].mxu0 }
 0x3c3   : > { %v5089_v15 = vsel %vm356_vm2, %v5015_v13, 0.0  ;;  %v4839_v31 = vmul.f32 %v4777_v1, %v4552_v61  ;;  %v4026_v14 = vadd.f32 %v3970_v24, %v9595_v40  ;;  %v4505_v48 = vadd.f32 %v4445_v33, %v4025_v47  ;;  %v7143_v35 = vpop.f32.mrb[105].mxu0  ;;  %v7021_v39 = vpop.f32.mrb[105].mxu1 }
 0x3c4   : > { %v5090_v11 = vadd.f32 %v5089_v15, %v5088_v45  ;;  %v4802_v15 = vpop.permute.xlu0 %4801 }
 0x3c5   : > { %4883 = vst.msk [vmem:[%s9345_s20 + $0x130] sm:$0xff] %vm356_vm2, %v4839_v31  ;;  %v4961_v49 = vsel %vm356_vm2, %v4839_v31, 0.0  ;;  %v5016_v57 = vmul.f32 %v4839_v31, %v4839_v31  ;;  %v4553_v63 = vadd.f32 %v9824_v28, %v4505_v48 }
 0x3c6   : > { %v4962_v50 = vadd.f32 %v4961_v49, %v4960_v30  ;;  %v3975_v27 = vpop.f32.mrb[106].mxu1  ;;  %v4450_v38 = vpop.f32.mrb[106].mxu0 }
 0x3c7   : > { %v5091_v0 = vsel %vm356_vm2, %v5016_v57, 0.0  ;;  %v4840_v17 = vmul.f32 %v4782_v51, %v4553_v63  ;;  %v4027_v40 = vadd.f32 %v3975_v27, %v9598_v37  ;;  %v4506_v5 = vadd.f32 %v4450_v38, %v4026_v14  ;;  %v7146_v58 = vpop.f32.mrb[107].mxu0  ;;  %v7024_v26 = vpop.f32.mrb[107].mxu1 }
 0x3c8   : > { %v5092_v59 = vadd.f32 %v5091_v0, %v5090_v11 }
 0x3c9   : > { %4884 = vst.msk [vmem:[%s9345_s20 + $0x138] sm:$0xff] %vm356_vm2, %v4840_v17  ;;  %v4963_v10 = vsel %vm356_vm2, %v4840_v17, 0.0  ;;  %v5017_v23 = vmul.f32 %v4840_v17, %v4840_v17  ;;  %v4554_v7 = vadd.f32 %v9824_v28, %v4506_v5 }
 0x3ca   : > { %v4964_v12 = vadd.f32 %v4963_v10, %v4962_v50  ;;  %v3980_v19 = vpop.f32.mrb[108].mxu1  ;;  %v4455_v60 = vpop.f32.mrb[108].mxu0 }
 0x3cb   : > { %v5093_v52 = vsel %vm356_vm2, %v5017_v23, 0.0  ;;  %v4841_v55 = vmul.f32 %v4787_v42, %v4554_v7  ;;  %v4028_v37 = vadd.f32 %v3980_v19, %v9601_v20  ;;  %v4507_v3 = vadd.f32 %v4455_v60, %v4027_v40  ;;  %v7149_v21 = vpop.f32.mrb[109].mxu0  ;;  %v7027_v18 = vpop.f32.mrb[109].mxu1 }
 0x3cc   : > { %v5094_v44 = vadd.f32 %v5093_v52, %v5092_v59 }
 0x3cd   : > { %4885 = vst.msk [vmem:[%s9345_s20 + $0x140] sm:$0xff] %vm356_vm2, %v4841_v55  ;;  %v4965_v34 = vsel %vm356_vm2, %v4841_v55, 0.0  ;;  %v5018_v16 = vmul.f32 %v4841_v55, %v4841_v55  ;;  %v4555_v36 = vadd.f32 %v9824_v28, %v4507_v3 }
 0x3ce   : > { %v4966_v9 = vadd.f32 %v4965_v34, %v4964_v12  ;;  %v3985_v25 = vpop.f32.mrb[110].mxu1  ;;  %v4460_v54 = vpop.f32.mrb[110].mxu0 }
 0x3cf   : > { %v5095_v53 = vsel %vm356_vm2, %v5018_v16, 0.0  ;;  %v4842_v4 = vmul.f32 %v4792_v29, %v4555_v36  ;;  %v4029_v20 = vadd.f32 %v3985_v25, %v9603_v8  ;;  %v4508_v6 = vadd.f32 %v4460_v54, %v4028_v37  ;;  %v7152_v62 = vpop.f32.mrb[111].mxu0  ;;  %v7030_v32 = vpop.f32.mrb[111].mxu1 }
 0x3d0   : > { %v5096_v2 = vadd.f32 %v5095_v53, %v5094_v44 }
 0x3d1   : > { %4886 = vst.msk [vmem:[%s9345_s20 + $0x148] sm:$0xff] %vm356_vm2, %v4842_v4  ;;  %v4967_v56 = vsel %vm356_vm2, %v4842_v4, 0.0  ;;  %v5019_v47 = vmul.f32 %v4842_v4, %v4842_v4  ;;  %v4556_v43 = vadd.f32 %v9824_v28, %v4508_v6 }
 0x3d2   : > { %v4968_v41 = vadd.f32 %v4967_v56, %v4966_v9  ;;  %v4465_v45 = vpop.f32.mrb[112].mxu0 }
 0x3d3   : > { %v5097_v1 = vsel %vm356_vm2, %v5019_v47, 0.0  ;;  %v4843_v46 = vmul.f32 %v4797_v22, %v4556_v43  ;;  %v4509_v8 = vadd.f32 %v4465_v45, %v4029_v20  ;;  %v7155_v13 = vpop.f32.mrb[113].mxu0 }
 0x3d4   : > { %v5098_v61 = vadd.f32 %v5097_v1, %v5096_v2 }
 0x3d5   : > { %4887 = vst.msk [vmem:[%s9345_s20 + $0x150] sm:$0xff] %vm356_vm2, %v4843_v46  ;;  %v4969_v30 = vsel %vm356_vm2, %v4843_v46, 0.0  ;;  %v5020_v24 = vmul.f32 %v4843_v46, %v4843_v46  ;;  %v4557_v33 = vadd.f32 %v9824_v28, %v4509_v8 }
 0x3d6   : > { %v4970_v31 = vadd.f32 %v4969_v30, %v4968_v41 }
 0x3d7   : > { %v5099_v14 = vsel %vm356_vm2, %v5020_v24, 0.0  ;;  %v4844_v48 = vmul.f32 %v4802_v15, %v4557_v33 }
 0x3d8   : > { %v5100_v35 = vadd.f32 %v5099_v14, %v5098_v61 }
 0x3d9   : > { %4888 = vst.msk [vmem:[%s9345_s20 + $0x158] sm:$0xff] %vm356_vm2, %v4844_v48  ;;  %v4971_v39 = vsel %vm356_vm2, %v4844_v48, 0.0  ;;  %v5021_v11 = vmul.f32 %v4844_v48, %v4844_v48  ;;  %s9880_s20 = scalar_lea.hbm %s9954_s6, %s5649_s29 }
 0x3da   : > { %v4972_v51 = vadd.f32 %v4971_v39, %v4970_v31 }
 0x3db   : > { %v5101_v49 = vsel %vm356_vm2, %v5021_v11, 0.0 }
 0x3dc   : > { %v4973_v57 = vrot.slane %v4972_v51, 4  ;;  %v5102_v63 = vadd.f32 %v5101_v49, %v5100_v35 }
 0x3de   : > { %v4974_v28 = vadd.f32 %v4973_v57, %v4972_v51  ;;  %v5103_v50 = vrot.slane %v5102_v63, 4 }
 0x3e0   : > { %v4975_v27 = vrot.slane %v4974_v28, 2  ;;  %v5104_v38 = vadd.f32 %v5103_v50, %v5102_v63 }
 0x3e2   : > { %v4976_v0 = vadd.f32 %v4975_v27, %v4974_v28  ;;  %v5105_v17 = vrot.slane %v5104_v38, 2 }
 0x3e4   : > { %v4977_v40 = vrot.slane %v4976_v0, 1  ;;  %v5106_v5 = vadd.f32 %v5105_v17, %v5104_v38 }
 0x3e6   : > { %v4978_v58 = vadd.f32 %v4977_v40, %v4976_v0  ;;  %v5107_v26 = vrot.slane %v5106_v5, 1 }
 0x3e8   : > { %4980 = vst.msk [vmem:[%s254_s9] sm:$0x1] %vm4979_vm3, %v4978_v58  ;;  %v5108_v59 = vadd.f32 %v5107_v26, %v5106_v5 }
 0x3e9   : > { %7222 = shalt.err (!%p7219_p3)
}
 0x3ea   : > { %s7223_s29 = scalar_lea.hbm %s9872_s18, 16  ;;  %s7227_s25 = scalar_lea.hbm %s9953_s5, 32 }
 0x3eb   : > { %p7224_p4 = scmp.ne.s32.totalorder %s9872_s18, %s7223_s29  ;;  %p7228_p9 = scmp.lt.u32.totalorder %s9872_s18, %s9953_s5 }
 0x3ec   : > { %p7229_p10 = scmp.lt.u32.totalorder %s7227_s25, %s7223_s29  ;;  %p7231_p12 = scmp.lt.u32.totalorder %s7223_s29, %s9872_s18 }
 0x3ed   : > { %p7225_p7 = pnand %p7224_p4, %p7383_p5 }
 0x3ee   : > { %p7230_p11 = por %p7229_p10, %p7228_p9 }
 0x3ef   : > { %p7226_p8 = pneg %p7225_p7 }
 0x3f0   : > { %p7232_p13 = por %p7231_p12, %p7230_p11 }
 0x3f2   : > { %p7233_p0 = pnand %p7232_p13, %p7226_p8 }
 0x3f4   : > { %7236 = shalt.err (!%p7233_p0)
}
 0x3f5   : > { %7159 = dma.vmem_to_hbm [thread:$0]  (%p7383_p5), %s9874_s10, 16, %s9872_s18, %s5116_s11   ;;  %5109 = vst.msk [vmem:[%s260_s13] sm:$0x1] %vm4979_vm3, %v5108_v59 }
 0x3f6   : > { %s5120_s12 = scalar_lea.sflag [#allocation5], %s9862_s28  ;;  %s7237_s26 = scalar_lea.vmem %s9882_s14, 16 }
 0x3f7   : > { %p7238_p1 = scmp.ne.s32.totalorder %s9882_s14, %s7237_s26  ;;  %s7309_s16 = smov [#allocation4]  }
 0x3f8   : > { %s7241_s29 = sshll.u32 %s7309_s16, 4  ;;  %s7242_s29 = int_to_ptr.vmem [resolvable:$false] %s7241_s29 }
 0x3f9   : > { %p7239_p2 = pnand %p7238_p1, %p7383_p5  ;;  %s7243_s9 = scalar_lea.vmem %s7242_s29, 32 }
 0x3fa   : > { %p7244_p4 = scmp.lt.s32.totalorder %s9882_s14, %s7242_s29  ;;  %p7245_p7 = scmp.lt.s32.totalorder %s7243_s9, %s7237_s26 }
 0x3fb   : > { %p7240_p3 = pneg %p7239_p2 }
 0x3fc   : > { %p7246_p8 = por %p7245_p7, %p7244_p4 }
 0x3fe   : > { %p7247_p9 = pnand %p7246_p8, %p7240_p3 }
 0x400   : > { %7250 = shalt.err (!%p7247_p9)
}
 0x401   : > { %s7251_s28 = scalar_lea.hbm %s9880_s20, 16  ;;  %s7255_s18 = scalar_lea.hbm %s9954_s6, 32 }
 0x402   : > { %p7252_p10 = scmp.ne.s32.totalorder %s9880_s20, %s7251_s28  ;;  %p7256_p13 = scmp.lt.u32.totalorder %s9880_s20, %s9954_s6 }
 0x403   : > { %p7257_p0 = scmp.lt.u32.totalorder %s7255_s18, %s7251_s28  ;;  %p7259_p2 = scmp.lt.u32.totalorder %s7251_s28, %s9880_s20 }
 0x404   : > { %p7253_p11 = pnand %p7252_p10, %p7383_p5 }
 0x405   : > { %p7258_p1 = por %p7257_p0, %p7256_p13 }
 0x406   : > { %p7254_p12 = pneg %p7253_p11 }
 0x407   : > { %p7260_p3 = por %p7259_p2, %p7258_p1 }
 0x409   : > { %p7261_p4 = pnand %p7260_p3, %p7254_p12 }
 0x40b   : > { %7264 = shalt.err (!%p7261_p4)
}
 0x40c   : > { %7160 = dma.vmem_to_hbm [thread:$0]  (%p7383_p5), %s9882_s14, 16, %s9880_s20, %s5120_s12  }
 0x40d PF: > { %p7170_p7 = scmp.ge.s32.totalorder %s7303_s24, 2  ;;  %s5168_s25 = sand.u32 1, %s7291_s21  }
 0x40e   : > { %s5169_s19 = scalar_lea.sflag [#allocation3], %s5168_s25 }
 0x40f   : > { %p7164_p8 = pnand %p7170_p7, %p7387_p6 }
 0x411   : > { %7282 = dma.done.wait (!%p7164_p8), %s5169_s19, 16  }
 0x412   : > { %7284 = vsyncadd (!%p7164_p8), %s5169_s19, 4294967280  ;;  %s5177_s15 = scalar_lea.sflag [#allocation5], %s5168_s25 }
 0x413   : > { %7286 = dma.done.wait (!%p7164_p8), %s5177_s15, 16  }
 0x414   : > { %7288 = vsyncadd (!%p7164_p8), %s5177_s15, 4294967280  ;;  %p20_p5 = scmp.ge.s32.totalorder %s7370_s27, 4   ;;  %s9985_s21 = smov %s7295_s22 }
 0x415   : > { %s9986_s22 = smov %s7299_s23  ;;  %s9987_s23 = smov %s7381_s30 }
 0x416   : > { %s9988_s24 = smov %s7370_s27  ;;  %22 = sbr.rel (!%p20_p5) target bundleno = 5 (0x5), region = 108 }
 0x41d   :  { %5181 = vsyncpa [#allocation3], 1 }
 0x41e   :  { %5183 = vsyncpa [#allocation3 + $0x1], 1 }
 0x41f   :  { %5184 = vsyncpa [#allocation5], 1 }
 0x420   :  { %5186 = vsyncpa [#allocation5 + $0x1], 1 }

// kernel: bridge_up.5
= control target key start
LH: loop header
LB: loop body
LE: loop exit
PB: predicated region body
PF: predicated region fallthrough
CT: control target
= control target key end

     0   :  { %s7175_s21 = smov 0   ;;  %s9660_s0 = inlined_call_operand.vmem [shape: f32[2,376,4], index: 0, kind: input, shape index: {}]   ;;  %s9661_s1 = inlined_call_operand.vmem [shape: f32[9,4,4], index: 1, kind: input, shape index: {}]   ;;  %s9662_s2 = inlined_call_operand.vmem [shape: f32[1,4], index: 2, kind: input, shape index: {}]   ;;  %s9663_s3 = inlined_call_operand.vmem [shape: f32[328,1], index: 3, kind: input, shape index: {}]   ;;  %s9664_s4 = inlined_call_operand.vmem [shape: f32[2,376,4], index: 4, kind: output, shape index: {0}]   ;;  %s9665_s5 = inlined_call_operand.vmem [shape: f32[2,1,4], index: 5, kind: output, shape index: {1}]   ;;  %s9666_s6 = inlined_call_operand.vmem [shape: f32[2,1,4], index: 6, kind: output, shape index: {2}]  }
   0x1 LB: > { %s5213_s22 = sadd.s32 4294967295, %s7135_s21   ;;  %p5217_p0 = scmp.ge.s32.totalorder %s7135_s21, 1  ;;  %s7135_s21 = sphi %s7175_s21, %s17_s21  }
   0x2   : > { %p217_p1 = scmp.lt.s32.totalorder %s7135_s21, 3 }
   0x4   : > { %p218_p2 = pnand %p5217_p0, %p217_p1 }
   0x6   : > { %221 = sbr.rel (%p218_p2) target bundleno = 992 (0x3e0), region = 36 }
   0xd   : > { %v5220_v0 = vld [vmem:[%s9661_s1 + $0x4] sm:$0xf]  ;;  %vm478_vm0 = vcmask 1043456   ;;  %p253_p3 = scmp.lt.s32.totalorder %s5213_s22, 1  ;;  %v7137_v1 = vmov 0.0   ;;  %vm7138_vm1 = vmmov 0  }
   0xe   : > { %5987 = vmatprep.subr.mxu0 %v7137_v1  ;;  %7112 = vmatprep.subr.mxu1 %v7137_v1  ;;  %vm354_vm2 = vcmask 31744   ;;  %v5305_v2 = vld [vmem:[%s9661_s1 + $0x8] sm:$0xf]  ;;  %v310_v3 = vld [vmem:[%s9661_s1] sm:$0xf]  ;;  %vm4977_vm3 = vcmask 24576  }
   0xf   : > { %5988 = vmatpush3.msk.msra.mxu0 %vm478_vm0, %v5220_v0  ;;  %7113 = vmatpush3.msk.msra.mxu1 %vm478_vm0, %v5220_v0  ;;  %s9696_s22 = smov (!%p253_p3, %s5213_s22), 1  ;;  %v5348_v46 = vld [vmem:[%s9661_s1 + $0xc] sm:$0xf]  ;;  %v5391_v49 = vld [vmem:[%s9661_s1 + $0x10] sm:$0xf] }
  0x10   : > { %5989 = vmatprep.mubr.msk.f32.mxu0 %vm7138_vm1, %v7137_v1  ;;  %6052 = vmatprep.mubr.msk.f32.mxu1 %vm7138_vm1, %v7137_v1  ;;  %s7114_s25 = smul.u32 376, %s9696_s22  ;;  %s265_s10 = scalar_lea.vmem %s9665_s5, %s9696_s22 }
  0x11   : > { %6237 = vmatprep.subr.mxu0 %v7137_v1  ;;  %6112 = vmatprep.subr.mxu1 %v7137_v1  ;;  %s268_s13 = scalar_lea.vmem %s9666_s6, %s9696_s22 }
  0x12   : > { %s7204_s28 = scalar_lea.vmem %s9660_s0, %s7114_s25  ;;  %s9133_s29 = scalar_lea.vmem %s9664_s4, %s7114_s25 }
  0x13   : > { %v311_v4 = vld [vmem:[%s7204_s28 + $0x6] sm:$0xff]  ;;  %v332_v5 = vld [vmem:[%s7204_s28 + $0xae] sm:$0xff]  ;;  %v333_v7 = vld [vmem:[%s7204_s28 + $0xb6] sm:$0xff]  ;;  %4843 = vst.msk [vmem:[%s9133_s29] sm:$0xff] %vm354_vm2, %v7137_v1 }
  0x14   : > { %5990 = vmatmul.mubr.msk.f32.vlgmr.msra.gmra.mrb[0].mxu0 %vm354_vm2, %v311_v4  ;;  %6053 = vmatmul.mubr.msk.f32.vlgmr.msra.gmra.mrb[0].mxu1 %vm354_vm2, %v332_v5  ;;  %v312_v6 = vld [vmem:[%s7204_s28 + $0xe] sm:$0xff]  ;;  %v313_v8 = vld [vmem:[%s7204_s28 + $0x16] sm:$0xff]  ;;  %v334_v9 = vld [vmem:[%s7204_s28 + $0xbe] sm:$0xff]  ;;  %4844 = vst.msk [vmem:[%s9133_s29 + $0x8] sm:$0xff] %vm354_vm2, %v7137_v1 }
  0x15   : > { %6238 = vmatpush3.msk.msra.mxu0 %vm478_vm0, %v5305_v2  ;;  %6113 = vmatpush3.msk.msra.mxu1 %vm478_vm0, %v310_v3  ;;  %v314_v10 = vld [vmem:[%s7204_s28 + $0x1e] sm:$0xff]  ;;  %v335_v11 = vld [vmem:[%s7204_s28 + $0xc6] sm:$0xff]  ;;  %v336_v13 = vld [vmem:[%s7204_s28 + $0xce] sm:$0xff]  ;;  %4845 = vst.msk [vmem:[%s9133_s29 + $0x10] sm:$0xff] %vm354_vm2, %v7137_v1 }
  0x16   : > { %5992 = vmatprep.mubr.msk.f32.mxu0 %vm7138_vm1, %v7137_v1  ;;  %6055 = vmatprep.mubr.msk.f32.mxu1 %vm7138_vm1, %v7137_v1  ;;  %v315_v12 = vld [vmem:[%s7204_s28 + $0x26] sm:$0xff]  ;;  %v316_v14 = vld [vmem:[%s7204_s28 + $0x2e] sm:$0xff]  ;;  %v337_v15 = vld [vmem:[%s7204_s28 + $0xd6] sm:$0xff]  ;;  %4887 = vst.msk [vmem:[%s9133_s29 + $0x160] sm:$0xff] %vm354_vm2, %v7137_v1 }
  0x17   : > { %6362 = vmatprep.subr.mxu1 %v7137_v1  ;;  %6487 = vmatprep.subr.mxu0 %v7137_v1  ;;  %v317_v16 = vld [vmem:[%s7204_s28 + $0x36] sm:$0xff]  ;;  %v338_v17 = vld [vmem:[%s7204_s28 + $0xde] sm:$0xff]  ;;  %v339_v19 = vld [vmem:[%s7204_s28 + $0xe6] sm:$0xff]  ;;  %4888 = vst.msk [vmem:[%s9133_s29 + $0x168] sm:$0xff] %vm354_vm2, %v7137_v1 }
  0x18   : > { %5993 = vmatmul.mubr.msk.f32.gmra.mrb[2].mxu0 %vm354_vm2, %v312_v6  ;;  %6056 = vmatmul.mubr.msk.f32.gmra.mrb[2].mxu1 %vm354_vm2, %v333_v7  ;;  %v318_v18 = vld [vmem:[%s7204_s28 + $0x3e] sm:$0xff]  ;;  %v319_v20 = vld [vmem:[%s7204_s28 + $0x46] sm:$0xff]  ;;  %v340_v21 = vld [vmem:[%s7204_s28 + $0xee] sm:$0xff]  ;;  %4889 = vst.msk [vmem:[%s9133_s29 + $0x170] sm:$0xff] %vm354_vm2, %v7137_v1 }
  0x19   : > { %5995 = vmatprep.mubr.msk.f32.mxu0 %vm7138_vm1, %v7137_v1  ;;  %6058 = vmatprep.mubr.msk.f32.mxu1 %vm7138_vm1, %v7137_v1  ;;  %v320_v22 = vld [vmem:[%s7204_s28 + $0x4e] sm:$0xff]  ;;  %v341_v23 = vld [vmem:[%s7204_s28 + $0xf6] sm:$0xff]  ;;  %v342_v25 = vld [vmem:[%s7204_s28 + $0xfe] sm:$0xff] }
  0x1a   : > { %v321_v24 = vld [vmem:[%s7204_s28 + $0x56] sm:$0xff]  ;;  %v322_v26 = vld [vmem:[%s7204_s28 + $0x5e] sm:$0xff]  ;;  %v343_v27 = vld [vmem:[%s7204_s28 + $0x106] sm:$0xff] }
  0x1b   : > { %v323_v28 = vld [vmem:[%s7204_s28 + $0x66] sm:$0xff]  ;;  %v344_v29 = vld [vmem:[%s7204_s28 + $0x10e] sm:$0xff]  ;;  %v345_v31 = vld [vmem:[%s7204_s28 + $0x116] sm:$0xff] }
  0x1c   : > { %5996 = vmatmul.mubr.msk.f32.gmra.mrb[4].mxu0 %vm354_vm2, %v313_v8  ;;  %6059 = vmatmul.mubr.msk.f32.gmra.mrb[4].mxu1 %vm354_vm2, %v334_v9  ;;  %v324_v30 = vld [vmem:[%s7204_s28 + $0x6e] sm:$0xff]  ;;  %v325_v32 = vld [vmem:[%s7204_s28 + $0x76] sm:$0xff]  ;;  %v346_v33 = vld [vmem:[%s7204_s28 + $0x11e] sm:$0xff] }
  0x1d   : > { %5998 = vmatprep.mubr.msk.f32.mxu0 %vm7138_vm1, %v7137_v1  ;;  %6061 = vmatprep.mubr.msk.f32.mxu1 %vm7138_vm1, %v7137_v1  ;;  %v326_v34 = vld [vmem:[%s7204_s28 + $0x7e] sm:$0xff]  ;;  %v347_v35 = vld [vmem:[%s7204_s28 + $0x126] sm:$0xff]  ;;  %v348_v37 = vld [vmem:[%s7204_s28 + $0x12e] sm:$0xff] }
  0x1e   : > { %v327_v36 = vld [vmem:[%s7204_s28 + $0x86] sm:$0xff]  ;;  %v328_v38 = vld [vmem:[%s7204_s28 + $0x8e] sm:$0xff]  ;;  %v349_v39 = vld [vmem:[%s7204_s28 + $0x136] sm:$0xff] }
  0x1f   : > { %v329_v40 = vld [vmem:[%s7204_s28 + $0x96] sm:$0xff]  ;;  %v350_v41 = vld [vmem:[%s7204_s28 + $0x13e] sm:$0xff]  ;;  %v351_v43 = vld [vmem:[%s7204_s28 + $0x146] sm:$0xff] }
  0x20   : > { %5999 = vmatmul.mubr.msk.f32.gmra.mrb[6].mxu0 %vm354_vm2, %v314_v10  ;;  %6062 = vmatmul.mubr.msk.f32.gmra.mrb[6].mxu1 %vm354_vm2, %v335_v11  ;;  %v330_v42 = vld [vmem:[%s7204_s28 + $0x9e] sm:$0xff]  ;;  %v331_v44 = vld [vmem:[%s7204_s28 + $0xa6] sm:$0xff]  ;;  %v271_v50 = vld [vmem:[%s7204_s28 + $0x15] sm:$0xff] }
  0x21   : > { %6001 = vmatprep.mubr.msk.f32.mxu0 %vm7138_vm1, %v7137_v1  ;;  %6064 = vmatprep.mubr.msk.f32.mxu1 %vm7138_vm1, %v7137_v1  ;;  %v269_v45 = vld [vmem:[%s7204_s28 + $0x5] sm:$0xff]  ;;  %v270_v47 = vld [vmem:[%s7204_s28 + $0xd] sm:$0xff]  ;;  %v272_v52 = vld [vmem:[%s7204_s28 + $0x1d] sm:$0xff] }
  0x22   : > { %v1148_v48 = vld [vmem:[%s7204_s28 + $0x7] sm:$0xff]  ;;  %v1149_v51 = vld [vmem:[%s7204_s28 + $0xf] sm:$0xff]  ;;  %v7412_v53 = vld [vmem:[%s7204_s28 + $0x17] sm:$0xff] }
  0x23   : > { %v273_v54 = vld [vmem:[%s7204_s28 + $0x25] sm:$0xff]  ;;  %v274_v56 = vld [vmem:[%s7204_s28 + $0x2d] sm:$0xff]  ;;  %v275_v58 = vld [vmem:[%s7204_s28 + $0x35] sm:$0xff] }
  0x24   : > { %6002 = vmatmul.mubr.msk.f32.gmra.mrb[8].mxu0 %vm354_vm2, %v315_v12  ;;  %6065 = vmatmul.mubr.msk.f32.gmra.mrb[8].mxu1 %vm354_vm2, %v336_v13  ;;  %v7423_v55 = vld [vmem:[%s7204_s28 + $0x1f] sm:$0xff]  ;;  %v7434_v57 = vld [vmem:[%s7204_s28 + $0x27] sm:$0xff]  ;;  %v7445_v59 = vld [vmem:[%s7204_s28 + $0x2f] sm:$0xff] }
  0x25   : > { %6004 = vmatprep.mubr.msk.f32.mxu0 %vm7138_vm1, %v7137_v1  ;;  %6067 = vmatprep.mubr.msk.f32.mxu1 %vm7138_vm1, %v7137_v1  ;;  %v276_v60 = vld [vmem:[%s7204_s28 + $0x3d] sm:$0xff]  ;;  %v277_v62 = vld [vmem:[%s7204_s28 + $0x45] sm:$0xff]  ;;  %v278_v0 = vld [vmem:[%s7204_s28 + $0x4d] sm:$0xff] }
  0x26   : > { %v7456_v61 = vld [vmem:[%s7204_s28 + $0x37] sm:$0xff]  ;;  %v7467_v63 = vld [vmem:[%s7204_s28 + $0x3f] sm:$0xff]  ;;  %v7478_v2 = vld [vmem:[%s7204_s28 + $0x47] sm:$0xff] }
  0x27   : > { %v279_v3 = vld [vmem:[%s7204_s28 + $0x55] sm:$0xff]  ;;  %v280_v5 = vld [vmem:[%s7204_s28 + $0x5d] sm:$0xff]  ;;  %v281_v7 = vld [vmem:[%s7204_s28 + $0x65] sm:$0xff] }
  0x28   : > { %6005 = vmatmul.mubr.msk.f32.gmra.mrb[10].mxu0 %vm354_vm2, %v316_v14  ;;  %6068 = vmatmul.mubr.msk.f32.gmra.mrb[10].mxu1 %vm354_vm2, %v337_v15  ;;  %v7489_v4 = vld [vmem:[%s7204_s28 + $0x4f] sm:$0xff]  ;;  %v7500_v6 = vld [vmem:[%s7204_s28 + $0x57] sm:$0xff]  ;;  %v7511_v8 = vld [vmem:[%s7204_s28 + $0x5f] sm:$0xff] }
  0x29   : > { %6007 = vmatprep.mubr.msk.f32.mxu0 %vm7138_vm1, %v7137_v1  ;;  %6070 = vmatprep.mubr.msk.f32.mxu1 %vm7138_vm1, %v7137_v1  ;;  %v282_v9 = vld [vmem:[%s7204_s28 + $0x6d] sm:$0xff]  ;;  %v283_v11 = vld [vmem:[%s7204_s28 + $0x75] sm:$0xff]  ;;  %v284_v13 = vld [vmem:[%s7204_s28 + $0x7d] sm:$0xff] }
  0x2a   : > { %v7522_v10 = vld [vmem:[%s7204_s28 + $0x67] sm:$0xff]  ;;  %v7533_v12 = vld [vmem:[%s7204_s28 + $0x6f] sm:$0xff]  ;;  %v7544_v14 = vld [vmem:[%s7204_s28 + $0x77] sm:$0xff] }
  0x2b   : > { %v285_v15 = vld [vmem:[%s7204_s28 + $0x85] sm:$0xff] }
  0x2c   : > { %6008 = vmatmul.mubr.msk.f32.gmra.mrb[12].mxu0 %vm354_vm2, %v317_v16  ;;  %6071 = vmatmul.mubr.msk.f32.gmra.mrb[12].mxu1 %vm354_vm2, %v338_v17  ;;  %v7555_v16 = vld [vmem:[%s7204_s28 + $0x7f] sm:$0xff]  ;;  %v286_v17 = vld [vmem:[%s7204_s28 + $0x8d] sm:$0xff] }
  0x2d   : > { %6010 = vmatprep.mubr.msk.f32.mxu0 %vm7138_vm1, %v7137_v1  ;;  %6073 = vmatprep.mubr.msk.f32.mxu1 %vm7138_vm1, %v7137_v1 }
  0x30   : > { %6011 = vmatmul.mubr.msk.f32.gmra.mrb[14].mxu0 %vm354_vm2, %v318_v18  ;;  %6074 = vmatmul.mubr.msk.f32.gmra.mrb[14].mxu1 %vm354_vm2, %v339_v19  ;;  %v7566_v18 = vld [vmem:[%s7204_s28 + $0x87] sm:$0xff]  ;;  %v287_v19 = vld [vmem:[%s7204_s28 + $0x95] sm:$0xff] }
  0x31   : > { %6013 = vmatprep.mubr.msk.f32.mxu0 %vm7138_vm1, %v7137_v1  ;;  %6076 = vmatprep.mubr.msk.f32.mxu1 %vm7138_vm1, %v7137_v1 }
  0x34   : > { %6014 = vmatmul.mubr.msk.f32.gmra.mrb[16].mxu0 %vm354_vm2, %v319_v20  ;;  %6077 = vmatmul.mubr.msk.f32.gmra.mrb[16].mxu1 %vm354_vm2, %v340_v21  ;;  %v7577_v20 = vld [vmem:[%s7204_s28 + $0x8f] sm:$0xff]  ;;  %v288_v21 = vld [vmem:[%s7204_s28 + $0x9d] sm:$0xff] }
  0x35   : > { %6016 = vmatprep.mubr.msk.f32.mxu0 %vm7138_vm1, %v7137_v1  ;;  %6079 = vmatprep.mubr.msk.f32.mxu1 %vm7138_vm1, %v7137_v1 }
  0x38   : > { %6017 = vmatmul.mubr.msk.f32.gmra.mrb[18].mxu0 %vm354_vm2, %v320_v22  ;;  %6080 = vmatmul.mubr.msk.f32.gmra.mrb[18].mxu1 %vm354_vm2, %v341_v23  ;;  %v7588_v22 = vld [vmem:[%s7204_s28 + $0x97] sm:$0xff]  ;;  %v289_v23 = vld [vmem:[%s7204_s28 + $0xa5] sm:$0xff] }
  0x39   : > { %6019 = vmatprep.mubr.msk.f32.mxu0 %vm7138_vm1, %v7137_v1  ;;  %6082 = vmatprep.mubr.msk.f32.mxu1 %vm7138_vm1, %v7137_v1 }
  0x3c   : > { %6020 = vmatmul.mubr.msk.f32.gmra.mrb[20].mxu0 %vm354_vm2, %v321_v24  ;;  %6083 = vmatmul.mubr.msk.f32.gmra.mrb[20].mxu1 %vm354_vm2, %v342_v25  ;;  %v7599_v24 = vld [vmem:[%s7204_s28 + $0x9f] sm:$0xff]  ;;  %v290_v25 = vld [vmem:[%s7204_s28 + $0xad] sm:$0xff] }
  0x3d   : > { %6022 = vmatprep.mubr.msk.f32.mxu0 %vm7138_vm1, %v7137_v1  ;;  %6085 = vmatprep.mubr.msk.f32.mxu1 %vm7138_vm1, %v7137_v1 }
  0x40   : > { %6023 = vmatmul.mubr.msk.f32.gmra.mrb[22].mxu0 %vm354_vm2, %v322_v26  ;;  %6086 = vmatmul.mubr.msk.f32.gmra.mrb[22].mxu1 %vm354_vm2, %v343_v27  ;;  %v7610_v26 = vld [vmem:[%s7204_s28 + $0xa7] sm:$0xff]  ;;  %v291_v27 = vld [vmem:[%s7204_s28 + $0xb5] sm:$0xff] }
  0x41   : > { %6025 = vmatprep.mubr.msk.f32.mxu0 %vm7138_vm1, %v7137_v1  ;;  %6088 = vmatprep.mubr.msk.f32.mxu1 %vm7138_vm1, %v7137_v1 }
  0x44   : > { %6026 = vmatmul.mubr.msk.f32.gmra.mrb[24].mxu0 %vm354_vm2, %v323_v28  ;;  %6089 = vmatmul.mubr.msk.f32.gmra.mrb[24].mxu1 %vm354_vm2, %v344_v29  ;;  %v7621_v28 = vld [vmem:[%s7204_s28 + $0xaf] sm:$0xff]  ;;  %v292_v29 = vld [vmem:[%s7204_s28 + $0xbd] sm:$0xff] }
  0x45   : > { %6028 = vmatprep.mubr.msk.f32.mxu0 %vm7138_vm1, %v7137_v1  ;;  %6091 = vmatprep.mubr.msk.f32.mxu1 %vm7138_vm1, %v7137_v1 }
  0x48   : > { %6029 = vmatmul.mubr.msk.f32.gmra.mrb[26].mxu0 %vm354_vm2, %v324_v30  ;;  %6092 = vmatmul.mubr.msk.f32.gmra.mrb[26].mxu1 %vm354_vm2, %v345_v31  ;;  %v7632_v30 = vld [vmem:[%s7204_s28 + $0xb7] sm:$0xff]  ;;  %v293_v31 = vld [vmem:[%s7204_s28 + $0xc5] sm:$0xff] }
  0x49   : > { %6031 = vmatprep.mubr.msk.f32.mxu0 %vm7138_vm1, %v7137_v1  ;;  %6094 = vmatprep.mubr.msk.f32.mxu1 %vm7138_vm1, %v7137_v1 }
  0x4c   : > { %6032 = vmatmul.mubr.msk.f32.gmra.mrb[28].mxu0 %vm354_vm2, %v325_v32  ;;  %6095 = vmatmul.mubr.msk.f32.gmra.mrb[28].mxu1 %vm354_vm2, %v346_v33  ;;  %v7643_v32 = vld [vmem:[%s7204_s28 + $0xbf] sm:$0xff]  ;;  %v294_v33 = vld [vmem:[%s7204_s28 + $0xcd] sm:$0xff] }
  0x4d   : > { %6034 = vmatprep.mubr.msk.f32.mxu0 %vm7138_vm1, %v7137_v1  ;;  %6097 = vmatprep.mubr.msk.f32.mxu1 %vm7138_vm1, %v7137_v1 }
  0x50   : > { %6035 = vmatmul.mubr.msk.f32.gmra.mrb[30].mxu0 %vm354_vm2, %v326_v34  ;;  %6098 = vmatmul.mubr.msk.f32.gmra.mrb[30].mxu1 %vm354_vm2, %v347_v35  ;;  %v7654_v34 = vld [vmem:[%s7204_s28 + $0xc7] sm:$0xff]  ;;  %v295_v35 = vld [vmem:[%s7204_s28 + $0xd5] sm:$0xff] }
  0x51   : > { %6037 = vmatprep.mubr.msk.f32.mxu0 %vm7138_vm1, %v7137_v1  ;;  %6100 = vmatprep.mubr.msk.f32.mxu1 %vm7138_vm1, %v7137_v1 }
  0x54   : > { %6038 = vmatmul.mubr.msk.f32.gmra.mrb[32].mxu0 %vm354_vm2, %v327_v36  ;;  %6101 = vmatmul.mubr.msk.f32.gmra.mrb[32].mxu1 %vm354_vm2, %v348_v37  ;;  %v7665_v36 = vld [vmem:[%s7204_s28 + $0xcf] sm:$0xff]  ;;  %v296_v37 = vld [vmem:[%s7204_s28 + $0xdd] sm:$0xff] }
  0x55   : > { %6040 = vmatprep.mubr.msk.f32.mxu0 %vm7138_vm1, %v7137_v1  ;;  %6103 = vmatprep.mubr.msk.f32.mxu1 %vm7138_vm1, %v7137_v1 }
  0x58   : > { %6041 = vmatmul.mubr.msk.f32.gmra.mrb[34].mxu0 %vm354_vm2, %v328_v38  ;;  %6104 = vmatmul.mubr.msk.f32.gmra.mrb[34].mxu1 %vm354_vm2, %v349_v39  ;;  %v7676_v38 = vld [vmem:[%s7204_s28 + $0xd7] sm:$0xff]  ;;  %v297_v39 = vld [vmem:[%s7204_s28 + $0xe5] sm:$0xff] }
  0x59   : > { %6043 = vmatprep.mubr.msk.f32.mxu0 %vm7138_vm1, %v7137_v1  ;;  %6106 = vmatprep.mubr.msk.f32.mxu1 %vm7138_vm1, %v7137_v1 }
  0x5c   : > { %6044 = vmatmul.mubr.msk.f32.gmra.mrb[36].mxu0 %vm354_vm2, %v329_v40  ;;  %6107 = vmatmul.mubr.msk.f32.gmra.mrb[36].mxu1 %vm354_vm2, %v350_v41  ;;  %v7687_v40 = vld [vmem:[%s7204_s28 + $0xdf] sm:$0xff]  ;;  %v298_v41 = vld [vmem:[%s7204_s28 + $0xed] sm:$0xff] }
  0x5d   : > { %6046 = vmatprep.mubr.msk.f32.mxu0 %vm7138_vm1, %v7137_v1  ;;  %6109 = vmatprep.mubr.msk.f32.mxu1 %vm7138_vm1, %v7137_v1 }
  0x60   : > { %6047 = vmatmul.mubr.msk.f32.gmra.mrb[38].mxu0 %vm354_vm2, %v330_v42  ;;  %6110 = vmatmul.mubr.msk.f32.gmra.mrb[38].mxu1 %vm354_vm2, %v351_v43  ;;  %v7698_v42 = vld [vmem:[%s7204_s28 + $0xe7] sm:$0xff]  ;;  %v299_v43 = vld [vmem:[%s7204_s28 + $0xf5] sm:$0xff] }
  0x61   : > { %6049 = vmatprep.mubr.msk.f32.mxu0 %vm7138_vm1, %v7137_v1  ;;  %6114 = vmatprep.mubr.msk.f32.mxu1 %vm7138_vm1, %v7137_v1 }
  0x64   : > { %6050 = vmatmul.mubr.msk.f32.gmra.mrb[40].mxu0 %vm354_vm2, %v331_v44  ;;  %6115 = vmatmul.mubr.msk.f32.vlgmr.msra.gmra.mrb[40].mxu1 %vm354_vm2, %v269_v45  ;;  %v7709_v44 = vld [vmem:[%s7204_s28 + $0xef] sm:$0xff]  ;;  %v300_v45 = vld [vmem:[%s7204_s28 + $0xfd] sm:$0xff] }
  0x65   : > { %6363 = vmatpush3.msk.msra.mxu1 %vm478_vm0, %v5348_v46  ;;  %6117 = vmatprep.mubr.msk.f32.mxu1 %vm7138_vm1, %v7137_v1  ;;  %v7720_v46 = vld [vmem:[%s7204_s28 + $0xf7] sm:$0xff] }
  0x66   : > { %6239 = vmatprep.mubr.msk.f32.mxu0 %vm7138_vm1, %v7137_v1  ;;  %6612 = vmatprep.subr.mxu1 %v7137_v1 }
  0x68   : > { %6118 = vmatmul.mubr.msk.f32.gmra.mrb[42].mxu1 %vm354_vm2, %v270_v47  ;;  %6240 = vmatmul.mubr.msk.f32.vlgmr.msra.gmra.mrb[42].mxu0 %vm354_vm2, %v1148_v48  ;;  %v301_v47 = vld [vmem:[%s7204_s28 + $0x105] sm:$0xff] }
  0x69   : > { %6488 = vmatpush3.msk.msra.mxu0 %vm478_vm0, %v5391_v49  ;;  %6120 = vmatprep.mubr.msk.f32.mxu1 %vm7138_vm1, %v7137_v1  ;;  %v7731_v48 = vld [vmem:[%s7204_s28 + $0xff] sm:$0xff]  ;;  %v302_v49 = vld [vmem:[%s7204_s28 + $0x10d] sm:$0xff] }
  0x6a   : > { %6242 = vmatprep.mubr.msk.f32.mxu0 %vm7138_vm1, %v7137_v1  ;;  %6737 = vmatprep.subr.mxu0 %v7137_v1 }
  0x6c   : > { %6121 = vmatmul.mubr.msk.f32.gmra.mrb[44].mxu1 %vm354_vm2, %v271_v50  ;;  %6243 = vmatmul.mubr.msk.f32.gmra.mrb[44].mxu0 %vm354_vm2, %v1149_v51  ;;  %v7742_v50 = vld [vmem:[%s7204_s28 + $0x107] sm:$0xff] }
  0x6d   : > { %6123 = vmatprep.mubr.msk.f32.mxu1 %vm7138_vm1, %v7137_v1  ;;  %6245 = vmatprep.mubr.msk.f32.mxu0 %vm7138_vm1, %v7137_v1 }
  0x70   : > { %6124 = vmatmul.mubr.msk.f32.gmra.mrb[46].mxu1 %vm354_vm2, %v272_v52  ;;  %6246 = vmatmul.mubr.msk.f32.gmra.mrb[46].mxu0 %vm354_vm2, %v7412_v53 }
  0x71   : > { %6126 = vmatprep.mubr.msk.f32.mxu1 %vm7138_vm1, %v7137_v1  ;;  %6248 = vmatprep.mubr.msk.f32.mxu0 %vm7138_vm1, %v7137_v1 }
  0x74   : > { %6127 = vmatmul.mubr.msk.f32.gmra.mrb[48].mxu1 %vm354_vm2, %v273_v54  ;;  %6249 = vmatmul.mubr.msk.f32.gmra.mrb[48].mxu0 %vm354_vm2, %v7423_v55 }
  0x75   : > { %6129 = vmatprep.mubr.msk.f32.mxu1 %vm7138_vm1, %v7137_v1  ;;  %6251 = vmatprep.mubr.msk.f32.mxu0 %vm7138_vm1, %v7137_v1 }
  0x78   : > { %6130 = vmatmul.mubr.msk.f32.gmra.mrb[50].mxu1 %vm354_vm2, %v274_v56  ;;  %6252 = vmatmul.mubr.msk.f32.gmra.mrb[50].mxu0 %vm354_vm2, %v7434_v57 }
  0x79   : > { %6132 = vmatprep.mubr.msk.f32.mxu1 %vm7138_vm1, %v7137_v1  ;;  %6254 = vmatprep.mubr.msk.f32.mxu0 %vm7138_vm1, %v7137_v1 }
  0x7c   : > { %6133 = vmatmul.mubr.msk.f32.gmra.mrb[52].mxu1 %vm354_vm2, %v275_v58  ;;  %6255 = vmatmul.mubr.msk.f32.gmra.mrb[52].mxu0 %vm354_vm2, %v7445_v59  ;;  %v303_v58 = vld [vmem:[%s7204_s28 + $0x115] sm:$0xff] }
  0x7d   : > { %6135 = vmatprep.mubr.msk.f32.mxu1 %vm7138_vm1, %v7137_v1  ;;  %6257 = vmatprep.mubr.msk.f32.mxu0 %vm7138_vm1, %v7137_v1 }
  0x80   : > { %6136 = vmatmul.mubr.msk.f32.gmra.mrb[54].mxu1 %vm354_vm2, %v276_v60  ;;  %6258 = vmatmul.mubr.msk.f32.gmra.mrb[54].mxu0 %vm354_vm2, %v7456_v61  ;;  %v7757_v60 = vld [vmem:[%s7204_s28 + $0x10f] sm:$0xff] }
  0x81   : > { %6138 = vmatprep.mubr.msk.f32.mxu1 %vm7138_vm1, %v7137_v1  ;;  %6260 = vmatprep.mubr.msk.f32.mxu0 %vm7138_vm1, %v7137_v1 }
  0x84   : > { %6139 = vmatmul.mubr.msk.f32.gmra.mrb[56].mxu1 %vm354_vm2, %v277_v62  ;;  %6261 = vmatmul.mubr.msk.f32.gmra.mrb[56].mxu0 %vm354_vm2, %v7467_v63 }
  0x85   : > { %6141 = vmatprep.mubr.msk.f32.mxu1 %vm7138_vm1, %v7137_v1  ;;  %6263 = vmatprep.mubr.msk.f32.mxu0 %vm7138_vm1, %v7137_v1 }
  0x88   : > { %6142 = vmatmul.mubr.msk.f32.gmra.mrb[58].mxu1 %vm354_vm2, %v278_v0  ;;  %6264 = vmatmul.mubr.msk.f32.gmra.mrb[58].mxu0 %vm354_vm2, %v7478_v2 }
  0x89   : > { %6144 = vmatprep.mubr.msk.f32.mxu1 %vm7138_vm1, %v7137_v1  ;;  %6266 = vmatprep.mubr.msk.f32.mxu0 %vm7138_vm1, %v7137_v1 }
  0x8c   : > { %6145 = vmatmul.mubr.msk.f32.gmra.mrb[60].mxu1 %vm354_vm2, %v279_v3  ;;  %6267 = vmatmul.mubr.msk.f32.gmra.mrb[60].mxu0 %vm354_vm2, %v7489_v4 }
  0x8d   : > { %6147 = vmatprep.mubr.msk.f32.mxu1 %vm7138_vm1, %v7137_v1  ;;  %6269 = vmatprep.mubr.msk.f32.mxu0 %vm7138_vm1, %v7137_v1 }
  0x90   : > { %6148 = vmatmul.mubr.msk.f32.gmra.mrb[62].mxu1 %vm354_vm2, %v280_v5  ;;  %6270 = vmatmul.mubr.msk.f32.gmra.mrb[62].mxu0 %vm354_vm2, %v7500_v6 }
  0x91   : > { %6150 = vmatprep.mubr.msk.f32.mxu1 %vm7138_vm1, %v7137_v1  ;;  %6272 = vmatprep.mubr.msk.f32.mxu0 %vm7138_vm1, %v7137_v1 }
  0x94   : > { %6151 = vmatmul.mubr.msk.f32.gmra.mrb[64].mxu1 %vm354_vm2, %v281_v7  ;;  %6273 = vmatmul.mubr.msk.f32.gmra.mrb[64].mxu0 %vm354_vm2, %v7511_v8  ;;  %v304_v7 = vld [vmem:[%s7204_s28 + $0x11d] sm:$0xff] }
  0x95   : > { %6153 = vmatprep.mubr.msk.f32.mxu1 %vm7138_vm1, %v7137_v1  ;;  %6275 = vmatprep.mubr.msk.f32.mxu0 %vm7138_vm1, %v7137_v1 }
  0x98   : > { %6154 = vmatmul.mubr.msk.f32.gmra.mrb[66].mxu1 %vm354_vm2, %v282_v9  ;;  %6276 = vmatmul.mubr.msk.f32.gmra.mrb[66].mxu0 %vm354_vm2, %v7522_v10  ;;  %v7772_v9 = vld [vmem:[%s7204_s28 + $0x117] sm:$0xff] }
  0x99   : > { %6156 = vmatprep.mubr.msk.f32.mxu1 %vm7138_vm1, %v7137_v1  ;;  %6278 = vmatprep.mubr.msk.f32.mxu0 %vm7138_vm1, %v7137_v1 }
  0x9c   : > { %6157 = vmatmul.mubr.msk.f32.gmra.mrb[68].mxu1 %vm354_vm2, %v283_v11  ;;  %6279 = vmatmul.mubr.msk.f32.gmra.mrb[68].mxu0 %vm354_vm2, %v7533_v12 }
  0x9d   : > { %6159 = vmatprep.mubr.msk.f32.mxu1 %vm7138_vm1, %v7137_v1  ;;  %6281 = vmatprep.mubr.msk.f32.mxu0 %vm7138_vm1, %v7137_v1 }
  0xa0   : > { %6160 = vmatmul.mubr.msk.f32.gmra.mrb[70].mxu1 %vm354_vm2, %v284_v13  ;;  %6282 = vmatmul.mubr.msk.f32.gmra.mrb[70].mxu0 %vm354_vm2, %v7544_v14 }
  0xa1   : > { %6162 = vmatprep.mubr.msk.f32.mxu1 %vm7138_vm1, %v7137_v1  ;;  %6284 = vmatprep.mubr.msk.f32.mxu0 %vm7138_vm1, %v7137_v1 }
  0xa4   : > { %6163 = vmatmul.mubr.msk.f32.gmra.mrb[72].mxu1 %vm354_vm2, %v285_v15  ;;  %6285 = vmatmul.mubr.msk.f32.gmra.mrb[72].mxu0 %vm354_vm2, %v7555_v16 }
  0xa5   : > { %6165 = vmatprep.mubr.msk.f32.mxu1 %vm7138_vm1, %v7137_v1  ;;  %6287 = vmatprep.mubr.msk.f32.mxu0 %vm7138_vm1, %v7137_v1 }
  0xa8   : > { %6166 = vmatmul.mubr.msk.f32.gmra.mrb[74].mxu1 %vm354_vm2, %v286_v17  ;;  %6288 = vmatmul.mubr.msk.f32.gmra.mrb[74].mxu0 %vm354_vm2, %v7566_v18 }
  0xa9   : > { %6168 = vmatprep.mubr.msk.f32.mxu1 %vm7138_vm1, %v7137_v1  ;;  %6290 = vmatprep.mubr.msk.f32.mxu0 %vm7138_vm1, %v7137_v1 }
  0xac   : > { %6169 = vmatmul.mubr.msk.f32.gmra.mrb[76].mxu1 %vm354_vm2, %v287_v19  ;;  %6291 = vmatmul.mubr.msk.f32.gmra.mrb[76].mxu0 %vm354_vm2, %v7577_v20  ;;  %v305_v19 = vld [vmem:[%s7204_s28 + $0x125] sm:$0xff] }
  0xad   : > { %6171 = vmatprep.mubr.msk.f32.mxu1 %vm7138_vm1, %v7137_v1  ;;  %6293 = vmatprep.mubr.msk.f32.mxu0 %vm7138_vm1, %v7137_v1 }
  0xb0   : > { %6172 = vmatmul.mubr.msk.f32.gmra.mrb[78].mxu1 %vm354_vm2, %v288_v21  ;;  %6294 = vmatmul.mubr.msk.f32.gmra.mrb[78].mxu0 %vm354_vm2, %v7588_v22  ;;  %v7787_v21 = vld [vmem:[%s7204_s28 + $0x11f] sm:$0xff] }
  0xb1   : > { %6174 = vmatprep.mubr.msk.f32.mxu1 %vm7138_vm1, %v7137_v1  ;;  %6296 = vmatprep.mubr.msk.f32.mxu0 %vm7138_vm1, %v7137_v1 }
  0xb4   : > { %6175 = vmatmul.mubr.msk.f32.gmra.mrb[80].mxu1 %vm354_vm2, %v289_v23  ;;  %6297 = vmatmul.mubr.msk.f32.gmra.mrb[80].mxu0 %vm354_vm2, %v7599_v24 }
  0xb5   : > { %6177 = vmatprep.mubr.msk.f32.mxu1 %vm7138_vm1, %v7137_v1  ;;  %6299 = vmatprep.mubr.msk.f32.mxu0 %vm7138_vm1, %v7137_v1 }
  0xb8   : > { %6178 = vmatmul.mubr.msk.f32.gmra.mrb[82].mxu1 %vm354_vm2, %v290_v25  ;;  %6300 = vmatmul.mubr.msk.f32.gmra.mrb[82].mxu0 %vm354_vm2, %v7610_v26 }
  0xb9   : > { %6180 = vmatprep.mubr.msk.f32.mxu1 %vm7138_vm1, %v7137_v1  ;;  %6302 = vmatprep.mubr.msk.f32.mxu0 %vm7138_vm1, %v7137_v1 }
  0xbc   : > { %6181 = vmatmul.mubr.msk.f32.gmra.mrb[84].mxu1 %vm354_vm2, %v291_v27  ;;  %6303 = vmatmul.mubr.msk.f32.gmra.mrb[84].mxu0 %vm354_vm2, %v7621_v28 }
  0xbd   : > { %6183 = vmatprep.mubr.msk.f32.mxu1 %vm7138_vm1, %v7137_v1  ;;  %6305 = vmatprep.mubr.msk.f32.mxu0 %vm7138_vm1, %v7137_v1 }
  0xc0   : > { %6184 = vmatmul.mubr.msk.f32.gmra.mrb[86].mxu1 %vm354_vm2, %v292_v29  ;;  %6306 = vmatmul.mubr.msk.f32.gmra.mrb[86].mxu0 %vm354_vm2, %v7632_v30 }
  0xc1   : > { %6186 = vmatprep.mubr.msk.f32.mxu1 %vm7138_vm1, %v7137_v1  ;;  %6308 = vmatprep.mubr.msk.f32.mxu0 %vm7138_vm1, %v7137_v1 }
  0xc4   : > { %6187 = vmatmul.mubr.msk.f32.gmra.mrb[88].mxu1 %vm354_vm2, %v293_v31  ;;  %6309 = vmatmul.mubr.msk.f32.gmra.mrb[88].mxu0 %vm354_vm2, %v7643_v32  ;;  %v306_v31 = vld [vmem:[%s7204_s28 + $0x12d] sm:$0xff] }
  0xc5   : > { %6189 = vmatprep.mubr.msk.f32.mxu1 %vm7138_vm1, %v7137_v1  ;;  %6311 = vmatprep.mubr.msk.f32.mxu0 %vm7138_vm1, %v7137_v1 }
  0xc8   : > { %6190 = vmatmul.mubr.msk.f32.gmra.mrb[90].mxu1 %vm354_vm2, %v294_v33  ;;  %6312 = vmatmul.mubr.msk.f32.gmra.mrb[90].mxu0 %vm354_vm2, %v7654_v34  ;;  %v7802_v33 = vld [vmem:[%s7204_s28 + $0x127] sm:$0xff] }
  0xc9   : > { %6192 = vmatprep.mubr.msk.f32.mxu1 %vm7138_vm1, %v7137_v1  ;;  %6314 = vmatprep.mubr.msk.f32.mxu0 %vm7138_vm1, %v7137_v1 }
  0xcc   : > { %6193 = vmatmul.mubr.msk.f32.gmra.mrb[92].mxu1 %vm354_vm2, %v295_v35  ;;  %6315 = vmatmul.mubr.msk.f32.gmra.mrb[92].mxu0 %vm354_vm2, %v7665_v36 }
  0xcd   : > { %6195 = vmatprep.mubr.msk.f32.mxu1 %vm7138_vm1, %v7137_v1  ;;  %6317 = vmatprep.mubr.msk.f32.mxu0 %vm7138_vm1, %v7137_v1 }
  0xd0   : > { %6196 = vmatmul.mubr.msk.f32.gmra.mrb[94].mxu1 %vm354_vm2, %v296_v37  ;;  %6318 = vmatmul.mubr.msk.f32.gmra.mrb[94].mxu0 %vm354_vm2, %v7676_v38 }
  0xd1   : > { %6198 = vmatprep.mubr.msk.f32.mxu1 %vm7138_vm1, %v7137_v1  ;;  %6320 = vmatprep.mubr.msk.f32.mxu0 %vm7138_vm1, %v7137_v1 }
  0xd4   : > { %6199 = vmatmul.mubr.msk.f32.gmra.mrb[96].mxu1 %vm354_vm2, %v297_v39  ;;  %6321 = vmatmul.mubr.msk.f32.gmra.mrb[96].mxu0 %vm354_vm2, %v7687_v40 }
  0xd5   : > { %6201 = vmatprep.mubr.msk.f32.mxu1 %vm7138_vm1, %v7137_v1  ;;  %6323 = vmatprep.mubr.msk.f32.mxu0 %vm7138_vm1, %v7137_v1 }
  0xd8   : > { %6202 = vmatmul.mubr.msk.f32.gmra.mrb[98].mxu1 %vm354_vm2, %v298_v41  ;;  %6324 = vmatmul.mubr.msk.f32.gmra.mrb[98].mxu0 %vm354_vm2, %v7698_v42 }
  0xd9   : > { %6204 = vmatprep.mubr.msk.f32.mxu1 %vm7138_vm1, %v7137_v1  ;;  %6326 = vmatprep.mubr.msk.f32.mxu0 %vm7138_vm1, %v7137_v1 }
  0xdc   : > { %6205 = vmatmul.mubr.msk.f32.gmra.mrb[100].mxu1 %vm354_vm2, %v299_v43  ;;  %6327 = vmatmul.mubr.msk.f32.gmra.mrb[100].mxu0 %vm354_vm2, %v7709_v44  ;;  %v307_v43 = vld [vmem:[%s7204_s28 + $0x135] sm:$0xff] }
  0xdd   : > { %6207 = vmatprep.mubr.msk.f32.mxu1 %vm7138_vm1, %v7137_v1  ;;  %6329 = vmatprep.mubr.msk.f32.mxu0 %vm7138_vm1, %v7137_v1 }
  0xe0   : > { %6208 = vmatmul.mubr.msk.f32.gmra.mrb[102].mxu1 %vm354_vm2, %v300_v45  ;;  %6330 = vmatmul.mubr.msk.f32.gmra.mrb[102].mxu0 %vm354_vm2, %v7720_v46  ;;  %v7817_v45 = vld [vmem:[%s7204_s28 + $0x12f] sm:$0xff] }
  0xe1   : > { %6210 = vmatprep.mubr.msk.f32.mxu1 %vm7138_vm1, %v7137_v1  ;;  %6332 = vmatprep.mubr.msk.f32.mxu0 %vm7138_vm1, %v7137_v1 }
  0xe4   : > { %6211 = vmatmul.mubr.msk.f32.gmra.mrb[104].mxu1 %vm354_vm2, %v301_v47  ;;  %6333 = vmatmul.mubr.msk.f32.gmra.mrb[104].mxu0 %vm354_vm2, %v7731_v48 }
  0xe5   : > { %6213 = vmatprep.mubr.msk.f32.mxu1 %vm7138_vm1, %v7137_v1  ;;  %6335 = vmatprep.mubr.msk.f32.mxu0 %vm7138_vm1, %v7137_v1 }
  0xe7   : > { %v7744_v51 = vpop.f32.mrb[0].mxu0  ;;  %v7746_v52 = vpop.f32.mrb[0].mxu1 }
  0xe8   : > { %v5991_v54 = vpop.f32.mrb[1].mxu0  ;;  %6214 = vmatmul.mubr.msk.f32.gmra.mrb[106].mxu1 %vm354_vm2, %v302_v49  ;;  %6336 = vmatmul.mubr.msk.f32.gmra.mrb[106].mxu0 %vm354_vm2, %v7742_v50  ;;  %v6054_v56 = vpop.f32.mrb[1].mxu1 }
  0xe9   : > { %6216 = vmatprep.mubr.msk.f32.mxu1 %vm7138_vm1, %v7137_v1  ;;  %6338 = vmatprep.mubr.msk.f32.mxu0 %vm7138_vm1, %v7137_v1 }
  0xeb   : > { %v7759_v62 = vpop.f32.mrb[2].mxu0  ;;  %v7761_v0 = vpop.f32.mrb[2].mxu1 }
  0xec   : > { %v5994_v3 = vpop.f32.mrb[3].mxu0  ;;  %6217 = vmatmul.mubr.msk.f32.gmra.mrb[108].mxu1 %vm354_vm2, %v303_v58  ;;  %6339 = vmatmul.mubr.msk.f32.gmra.mrb[108].mxu0 %vm354_vm2, %v7757_v60  ;;  %v6057_v5 = vpop.f32.mrb[3].mxu1  ;;  %v308_v58 = vld [vmem:[%s7204_s28 + $0x13d] sm:$0xff] }
  0xed   : > { %6219 = vmatprep.mubr.msk.f32.mxu1 %vm7138_vm1, %v7137_v1  ;;  %6341 = vmatprep.mubr.msk.f32.mxu0 %vm7138_vm1, %v7137_v1  ;;  %v7832_v3 = vld [vmem:[%s7204_s28 + $0x137] sm:$0xff] }
  0xef   : > { %v7774_v11 = vpop.f32.mrb[4].mxu0  ;;  %v7776_v13 = vpop.f32.mrb[4].mxu1 }
  0xf0   : > { %v5997_v15 = vpop.f32.mrb[5].mxu0  ;;  %6220 = vmatmul.mubr.msk.f32.gmra.mrb[110].mxu1 %vm354_vm2, %v304_v7  ;;  %6342 = vmatmul.mubr.msk.f32.gmra.mrb[110].mxu0 %vm354_vm2, %v7772_v9  ;;  %v6060_v17 = vpop.f32.mrb[5].mxu1 }
  0xf1   : > { %6222 = vmatprep.mubr.msk.f32.mxu1 %vm7138_vm1, %v7137_v1  ;;  %6344 = vmatprep.mubr.msk.f32.mxu0 %vm7138_vm1, %v7137_v1 }
  0xf3   : > { %v7789_v23 = vpop.f32.mrb[6].mxu0  ;;  %v7791_v25 = vpop.f32.mrb[6].mxu1 }
  0xf4   : > { %v6000_v27 = vpop.f32.mrb[7].mxu0  ;;  %6223 = vmatmul.mubr.msk.f32.gmra.mrb[112].mxu1 %vm354_vm2, %v305_v19  ;;  %6345 = vmatmul.mubr.msk.f32.gmra.mrb[112].mxu0 %vm354_vm2, %v7787_v21  ;;  %v6063_v29 = vpop.f32.mrb[7].mxu1  ;;  %v309_v19 = vld [vmem:[%s7204_s28 + $0x145] sm:$0xff] }
  0xf5   : > { %6225 = vmatprep.mubr.msk.f32.mxu1 %vm7138_vm1, %v7137_v1  ;;  %6347 = vmatprep.mubr.msk.f32.mxu0 %vm7138_vm1, %v7137_v1  ;;  %v7847_v27 = vld [vmem:[%s7204_s28 + $0x13f] sm:$0xff] }
  0xf7   : > { %v7804_v35 = vpop.f32.mrb[8].mxu0  ;;  %v7806_v37 = vpop.f32.mrb[8].mxu1 }
  0xf8   : > { %v6003_v39 = vpop.f32.mrb[9].mxu0  ;;  %6226 = vmatmul.mubr.msk.f32.gmra.mrb[114].mxu1 %vm354_vm2, %v306_v31  ;;  %6348 = vmatmul.mubr.msk.f32.gmra.mrb[114].mxu0 %vm354_vm2, %v7802_v33  ;;  %v6066_v41 = vpop.f32.mrb[9].mxu1 }
  0xf9   : > { %6228 = vmatprep.mubr.msk.f32.mxu1 %vm7138_vm1, %v7137_v1  ;;  %6350 = vmatprep.mubr.msk.f32.mxu0 %vm7138_vm1, %v7137_v1 }
  0xfb   : > { %v7819_v47 = vpop.f32.mrb[10].mxu0  ;;  %v7821_v49 = vpop.f32.mrb[10].mxu1 }
  0xfc   : > { %v6006_v54 = vpop.f32.mrb[11].mxu0  ;;  %6229 = vmatmul.mubr.msk.f32.gmra.mrb[116].mxu1 %vm354_vm2, %v307_v43  ;;  %6351 = vmatmul.mubr.msk.f32.gmra.mrb[116].mxu0 %vm354_vm2, %v7817_v45  ;;  %v6069_v56 = vpop.f32.mrb[11].mxu1  ;;  %v7861_v43 = vld [vmem:[%s7204_s28 + $0x147] sm:$0xff] }
  0xfd   : > { %6231 = vmatprep.mubr.msk.f32.mxu1 %vm7138_vm1, %v7137_v1  ;;  %6353 = vmatprep.mubr.msk.f32.mxu0 %vm7138_vm1, %v7137_v1  ;;  %v5434_v54 = vld [vmem:[%s9661_s1 + $0x14] sm:$0xf] }
  0xff   : > { %v7834_v5 = vpop.f32.mrb[12].mxu0  ;;  %v7836_v7 = vpop.f32.mrb[12].mxu1 }
 0x100   : > { %9667 = vst [vmem:[#allocation2_spill] sm:$0xff] %v7836_v7  ;;  %v6009_v15 = vpop.f32.mrb[13].mxu0  ;;  %6232 = vmatmul.mubr.msk.f32.gmra.mrb[118].mxu1 %vm354_vm2, %v308_v58  ;;  %6354 = vmatmul.mubr.msk.f32.gmra.mrb[118].mxu0 %vm354_vm2, %v7832_v3  ;;  %v6072_v17 = vpop.f32.mrb[13].mxu1 }
 0x101   : > { %6234 = vmatprep.mubr.msk.f32.mxu1 %vm7138_vm1, %v7137_v1  ;;  %6356 = vmatprep.mubr.msk.f32.mxu0 %vm7138_vm1, %v7137_v1 }
 0x103   : > { %v7849_v29 = vpop.f32.mrb[14].mxu0  ;;  %v7851_v31 = vpop.f32.mrb[14].mxu1 }
 0x104   : > { %9668 = vst [vmem:[#allocation3_spill] sm:$0xff] %v7851_v31  ;;  %v6012_v39 = vpop.f32.mrb[15].mxu0  ;;  %6235 = vmatmul.mubr.msk.f32.gmra.mrb[120].mxu1 %vm354_vm2, %v309_v19  ;;  %6357 = vmatmul.mubr.msk.f32.gmra.mrb[120].mxu0 %vm354_vm2, %v7847_v27  ;;  %v6075_v41 = vpop.f32.mrb[15].mxu1  ;;  %v2108_v19 = vld [vmem:[%s7204_s28 + $0x18] sm:$0xff] }
 0x105   : > { %6359 = vmatprep.mubr.msk.f32.mxu0 %vm7138_vm1, %v7137_v1  ;;  %6364 = vmatprep.mubr.msk.f32.mxu1 %vm7138_vm1, %v7137_v1  ;;  %v5477_v39 = vld [vmem:[%s9661_s1 + $0x18] sm:$0xf] }
 0x107   : > { %v7866_v56 = vpop.f32.mrb[16].mxu0  ;;  %v7868_v58 = vpop.f32.mrb[16].mxu1 }
 0x108   : > { %9669 = vst [vmem:[#allocation4_spill] sm:$0xff] %v7868_v58  ;;  %v6015_v15 = vpop.f32.mrb[17].mxu0  ;;  %6360 = vmatmul.mubr.msk.f32.gmra.mrb[122].mxu0 %vm354_vm2, %v7861_v43  ;;  %6365 = vmatmul.mubr.msk.f32.vlgmr.msra.gmra.mrb[122].mxu1 %vm354_vm2, %v7412_v53  ;;  %v6078_v17 = vpop.f32.mrb[17].mxu1 }
 0x109   : > { %6613 = vmatpush3.msk.msra.mxu1 %vm478_vm0, %v5434_v54  ;;  %6367 = vmatprep.mubr.msk.f32.mxu1 %vm7138_vm1, %v7137_v1  ;;  %v2109_v17 = vld [vmem:[%s7204_s28 + $0x20] sm:$0xff] }
 0x10a   : > { %6489 = vmatprep.mubr.msk.f32.mxu0 %vm7138_vm1, %v7137_v1  ;;  %6862 = vmatprep.subr.mxu1 %v7137_v1 }
 0x10b   : > { %v7884_v41 = vpop.f32.mrb[18].mxu0  ;;  %v7886_v53 = vpop.f32.mrb[18].mxu1 }
 0x10c   : > { %9670 = vst [vmem:[#allocation5_spill] sm:$0xff] %v7886_v53  ;;  %v6018_v15 = vpop.f32.mrb[19].mxu0  ;;  %6368 = vmatmul.mubr.msk.f32.gmra.mrb[124].mxu1 %vm354_vm2, %v7423_v55  ;;  %6490 = vmatmul.mubr.msk.f32.vlgmr.msra.gmra.mrb[124].mxu0 %vm354_vm2, %v2108_v19  ;;  %v6081_v54 = vpop.f32.mrb[19].mxu1 }
 0x10d   : > { %6738 = vmatpush3.msk.msra.mxu0 %vm478_vm0, %v5477_v39  ;;  %6370 = vmatprep.mubr.msk.f32.mxu1 %vm7138_vm1, %v7137_v1  ;;  %v2110_v39 = vld [vmem:[%s7204_s28 + $0x28] sm:$0xff] }
 0x10e   : > { %6492 = vmatprep.mubr.msk.f32.mxu0 %vm7138_vm1, %v7137_v1  ;;  %6987 = vmatprep.subr.mxu0 %v7137_v1 }
 0x10f   : > { %v7898_v53 = vpop.f32.mrb[20].mxu0  ;;  %v7900_v15 = vpop.f32.mrb[20].mxu1 }
 0x110   : > { %9671 = vst [vmem:[#allocation6_spill] sm:$0xff] %v7900_v15  ;;  %v6021_v55 = vpop.f32.mrb[21].mxu0  ;;  %6371 = vmatmul.mubr.msk.f32.gmra.mrb[126].mxu1 %vm354_vm2, %v7434_v57  ;;  %6493 = vmatmul.mubr.msk.f32.gmra.mrb[126].mxu0 %vm354_vm2, %v2109_v17  ;;  %v6084_v19 = vpop.f32.mrb[21].mxu1  ;;  %v2111_v17 = vld [vmem:[%s7204_s28 + $0x30] sm:$0xff] }
 0x111   : > { %6373 = vmatprep.mubr.msk.f32.mxu1 %vm7138_vm1, %v7137_v1  ;;  %6495 = vmatprep.mubr.msk.f32.mxu0 %vm7138_vm1, %v7137_v1 }
 0x113   : > { %v7910_v54 = vpop.f32.mrb[22].mxu0  ;;  %v7912_v58 = vpop.f32.mrb[22].mxu1 }
 0x114   : > { %9672 = vst [vmem:[#allocation7_spill] sm:$0xff] %v7912_v58  ;;  %v6024_v15 = vpop.f32.mrb[23].mxu0  ;;  %6374 = vmatmul.mubr.msk.f32.gmra.mrb[128].mxu1 %vm354_vm2, %v7445_v59  ;;  %6496 = vmatmul.mubr.msk.f32.gmra.mrb[128].mxu0 %vm354_vm2, %v2110_v39  ;;  %v6087_v57 = vpop.f32.mrb[23].mxu1 }
 0x115   : > { %6376 = vmatprep.mubr.msk.f32.mxu1 %vm7138_vm1, %v7137_v1  ;;  %6498 = vmatprep.mubr.msk.f32.mxu0 %vm7138_vm1, %v7137_v1  ;;  %v2112_v15 = vld [vmem:[%s7204_s28 + $0x38] sm:$0xff] }
 0x117   : > { %v7922_v55 = vpop.f32.mrb[24].mxu0  ;;  %v7924_v19 = vpop.f32.mrb[24].mxu1 }
 0x118   : > { %9673 = vst [vmem:[#allocation8_spill] sm:$0xff] %v7924_v19  ;;  %v6027_v58 = vpop.f32.mrb[25].mxu0  ;;  %6377 = vmatmul.mubr.msk.f32.gmra.mrb[130].mxu1 %vm354_vm2, %v7456_v61  ;;  %6499 = vmatmul.mubr.msk.f32.gmra.mrb[130].mxu0 %vm354_vm2, %v2111_v17  ;;  %v6090_v59 = vpop.f32.mrb[25].mxu1 }
 0x119   : > { %6379 = vmatprep.mubr.msk.f32.mxu1 %vm7138_vm1, %v7137_v1  ;;  %6501 = vmatprep.mubr.msk.f32.mxu0 %vm7138_vm1, %v7137_v1  ;;  %v2113_v58 = vld [vmem:[%s7204_s28 + $0x40] sm:$0xff] }
 0x11b   : > { %v7934_v39 = vpop.f32.mrb[26].mxu0  ;;  %v7936_v57 = vpop.f32.mrb[26].mxu1 }
 0x11c   : > { %9674 = vst [vmem:[#allocation9_spill] sm:$0xff] %v7936_v57  ;;  %v6030_v19 = vpop.f32.mrb[27].mxu0  ;;  %6380 = vmatmul.mubr.msk.f32.gmra.mrb[132].mxu1 %vm354_vm2, %v7467_v63  ;;  %6502 = vmatmul.mubr.msk.f32.gmra.mrb[132].mxu0 %vm354_vm2, %v2112_v15  ;;  %v6093_v61 = vpop.f32.mrb[27].mxu1 }
 0x11d   : > { %6382 = vmatprep.mubr.msk.f32.mxu1 %vm7138_vm1, %v7137_v1  ;;  %6504 = vmatprep.mubr.msk.f32.mxu0 %vm7138_vm1, %v7137_v1  ;;  %v2114_v19 = vld [vmem:[%s7204_s28 + $0x48] sm:$0xff] }
 0x11f   : > { %v7946_v17 = vpop.f32.mrb[28].mxu0  ;;  %v7948_v59 = vpop.f32.mrb[28].mxu1 }
 0x120   : > { %9675 = vst [vmem:[#allocation10_spill] sm:$0xff] %v7948_v59  ;;  %v6033_v57 = vpop.f32.mrb[29].mxu0  ;;  %6383 = vmatmul.mubr.msk.f32.gmra.mrb[134].mxu1 %vm354_vm2, %v7478_v2  ;;  %6505 = vmatmul.mubr.msk.f32.gmra.mrb[134].mxu0 %vm354_vm2, %v2113_v58  ;;  %v6096_v63 = vpop.f32.mrb[29].mxu1 }
 0x121   : > { %6385 = vmatprep.mubr.msk.f32.mxu1 %vm7138_vm1, %v7137_v1  ;;  %6507 = vmatprep.mubr.msk.f32.mxu0 %vm7138_vm1, %v7137_v1  ;;  %v2115_v57 = vld [vmem:[%s7204_s28 + $0x50] sm:$0xff] }
 0x123   : > { %v7958_v15 = vpop.f32.mrb[30].mxu0  ;;  %v7960_v61 = vpop.f32.mrb[30].mxu1 }
 0x124   : > { %9676 = vst [vmem:[#allocation11_spill] sm:$0xff] %v7960_v61  ;;  %v6036_v59 = vpop.f32.mrb[31].mxu0  ;;  %6386 = vmatmul.mubr.msk.f32.gmra.mrb[136].mxu1 %vm354_vm2, %v7489_v4  ;;  %6508 = vmatmul.mubr.msk.f32.gmra.mrb[136].mxu0 %vm354_vm2, %v2114_v19  ;;  %v6099_v2 = vpop.f32.mrb[31].mxu1 }
 0x125   : > { %6388 = vmatprep.mubr.msk.f32.mxu1 %vm7138_vm1, %v7137_v1  ;;  %6510 = vmatprep.mubr.msk.f32.mxu0 %vm7138_vm1, %v7137_v1  ;;  %v2116_v59 = vld [vmem:[%s7204_s28 + $0x58] sm:$0xff] }
 0x127   : > { %v7970_v58 = vpop.f32.mrb[32].mxu0  ;;  %v7972_v63 = vpop.f32.mrb[32].mxu1 }
 0x128   : > { %9677 = vst [vmem:[#allocation12_spill] sm:$0xff] %v7972_v63  ;;  %v6039_v61 = vpop.f32.mrb[33].mxu0  ;;  %6389 = vmatmul.mubr.msk.f32.gmra.mrb[138].mxu1 %vm354_vm2, %v7500_v6  ;;  %6511 = vmatmul.mubr.msk.f32.gmra.mrb[138].mxu0 %vm354_vm2, %v2115_v57  ;;  %v6102_v4 = vpop.f32.mrb[33].mxu1 }
 0x129   : > { %6391 = vmatprep.mubr.msk.f32.mxu1 %vm7138_vm1, %v7137_v1  ;;  %6513 = vmatprep.mubr.msk.f32.mxu0 %vm7138_vm1, %v7137_v1  ;;  %v2117_v61 = vld [vmem:[%s7204_s28 + $0x60] sm:$0xff] }
 0x12b   : > { %v7982_v19 = vpop.f32.mrb[34].mxu0  ;;  %v7984_v2 = vpop.f32.mrb[34].mxu1 }
 0x12c   : > { %9678 = vst [vmem:[#allocation13_spill] sm:$0xff] %v7984_v2  ;;  %v6042_v63 = vpop.f32.mrb[35].mxu0  ;;  %6392 = vmatmul.mubr.msk.f32.gmra.mrb[140].mxu1 %vm354_vm2, %v7511_v8  ;;  %6514 = vmatmul.mubr.msk.f32.gmra.mrb[140].mxu0 %vm354_vm2, %v2116_v59  ;;  %v6105_v6 = vpop.f32.mrb[35].mxu1 }
 0x12d   : > { %6394 = vmatprep.mubr.msk.f32.mxu1 %vm7138_vm1, %v7137_v1  ;;  %6516 = vmatprep.mubr.msk.f32.mxu0 %vm7138_vm1, %v7137_v1  ;;  %v2118_v63 = vld [vmem:[%s7204_s28 + $0x68] sm:$0xff] }
 0x12f   : > { %v7994_v57 = vpop.f32.mrb[36].mxu0  ;;  %v7996_v4 = vpop.f32.mrb[36].mxu1 }
 0x130   : > { %9679 = vst [vmem:[#allocation14_spill] sm:$0xff] %v7996_v4  ;;  %v6045_v2 = vpop.f32.mrb[37].mxu0  ;;  %6395 = vmatmul.mubr.msk.f32.gmra.mrb[142].mxu1 %vm354_vm2, %v7522_v10  ;;  %6517 = vmatmul.mubr.msk.f32.gmra.mrb[142].mxu0 %vm354_vm2, %v2117_v61  ;;  %v6108_v8 = vpop.f32.mrb[37].mxu1 }
 0x131   : > { %6397 = vmatprep.mubr.msk.f32.mxu1 %vm7138_vm1, %v7137_v1  ;;  %6519 = vmatprep.mubr.msk.f32.mxu0 %vm7138_vm1, %v7137_v1  ;;  %v2119_v2 = vld [vmem:[%s7204_s28 + $0x70] sm:$0xff] }
 0x133   : > { %v8006_v59 = vpop.f32.mrb[38].mxu0  ;;  %v8008_v6 = vpop.f32.mrb[38].mxu1 }
 0x134   : > { %9680 = vst [vmem:[#allocation15_spill] sm:$0xff] %v8008_v6  ;;  %v6048_v4 = vpop.f32.mrb[39].mxu0  ;;  %6398 = vmatmul.mubr.msk.f32.gmra.mrb[144].mxu1 %vm354_vm2, %v7533_v12  ;;  %6520 = vmatmul.mubr.msk.f32.gmra.mrb[144].mxu0 %vm354_vm2, %v2118_v63  ;;  %v6111_v10 = vpop.f32.mrb[39].mxu1  ;;  %v2120_v63 = vld [vmem:[%s7204_s28 + $0x78] sm:$0xff] }
 0x135   : > { %6400 = vmatprep.mubr.msk.f32.mxu1 %vm7138_vm1, %v7137_v1  ;;  %6522 = vmatprep.mubr.msk.f32.mxu0 %vm7138_vm1, %v7137_v1 }
 0x137   : > { %v8018_v61 = vpop.f32.mrb[40].mxu0  ;;  %v944_v8 = vpop.f32.mrb[40].mxu1 }
 0x138   : > { %v945_v6 = vadd.f32 %v944_v8, %v7744_v51  ;;  %v6051_v4 = vpop.f32.mrb[41].mxu0  ;;  %6401 = vmatmul.mubr.msk.f32.gmra.mrb[146].mxu1 %vm354_vm2, %v7544_v14  ;;  %6523 = vmatmul.mubr.msk.f32.gmra.mrb[146].mxu0 %vm354_vm2, %v2119_v2  ;;  %v6116_v12 = vpop.f32.mrb[41].mxu1  ;;  %v2121_v8 = vld [vmem:[%s7204_s28 + $0x80] sm:$0xff] }
 0x139   : > { %6403 = vmatprep.mubr.msk.f32.mxu1 %vm7138_vm1, %v7137_v1  ;;  %6525 = vmatprep.mubr.msk.f32.mxu0 %vm7138_vm1, %v7137_v1 }
 0x13b   : > { %v949_v10 = vpop.f32.mrb[42].mxu1  ;;  %v1383_v31 = vpop.f32.mrb[42].mxu0 }
 0x13c   : > { %v950_v7 = vadd.f32 %v949_v10, %v7759_v62  ;;  %v6241_v51 = vpop.f32.mrb[43].mxu0  ;;  %6404 = vmatmul.mubr.msk.f32.gmra.mrb[148].mxu1 %vm354_vm2, %v7555_v16  ;;  %6526 = vmatmul.mubr.msk.f32.gmra.mrb[148].mxu0 %vm354_vm2, %v2120_v63  ;;  %v6119_v14 = vpop.f32.mrb[43].mxu1  ;;  %v8033_v2 = vadd.f32 %v1383_v31, %v945_v6  ;;  %v2122_v6 = vld [vmem:[%s7204_s28 + $0x88] sm:$0xff] }
 0x13d   : > { %6406 = vmatprep.mubr.msk.f32.mxu1 %vm7138_vm1, %v7137_v1  ;;  %6528 = vmatprep.mubr.msk.f32.mxu0 %vm7138_vm1, %v7137_v1 }
 0x13f   : > { %v954_v4 = vpop.f32.mrb[44].mxu1  ;;  %v1388_v12 = vpop.f32.mrb[44].mxu0 }
 0x140   : > { %v955_v62 = vadd.f32 %v954_v4, %v7774_v11  ;;  %v6244_v10 = vpop.f32.mrb[45].mxu0  ;;  %6407 = vmatmul.mubr.msk.f32.gmra.mrb[150].mxu1 %vm354_vm2, %v7566_v18  ;;  %6529 = vmatmul.mubr.msk.f32.gmra.mrb[150].mxu0 %vm354_vm2, %v2121_v8  ;;  %v6122_v16 = vpop.f32.mrb[45].mxu1  ;;  %v8044_v31 = vadd.f32 %v1388_v12, %v950_v7  ;;  %v2123_v8 = vld [vmem:[%s7204_s28 + $0x90] sm:$0xff] }
 0x141   : > { %6409 = vmatprep.mubr.msk.f32.mxu1 %vm7138_vm1, %v7137_v1  ;;  %6531 = vmatprep.mubr.msk.f32.mxu0 %vm7138_vm1, %v7137_v1  ;;  %v2124_v16 = vld [vmem:[%s7204_s28 + $0x98] sm:$0xff] }
 0x143   : > { %v959_v63 = vpop.f32.mrb[46].mxu1  ;;  %v1393_v51 = vpop.f32.mrb[46].mxu0 }
 0x144   : > { %v960_v11 = vadd.f32 %v959_v63, %v7789_v23  ;;  %v6247_v14 = vpop.f32.mrb[47].mxu0  ;;  %6410 = vmatmul.mubr.msk.f32.gmra.mrb[152].mxu1 %vm354_vm2, %v7577_v20  ;;  %6532 = vmatmul.mubr.msk.f32.gmra.mrb[152].mxu0 %vm354_vm2, %v2122_v6  ;;  %v6125_v18 = vpop.f32.mrb[47].mxu1  ;;  %v8055_v7 = vadd.f32 %v1393_v51, %v955_v62 }
 0x145   : > { %6412 = vmatprep.mubr.msk.f32.mxu1 %vm7138_vm1, %v7137_v1  ;;  %6534 = vmatprep.mubr.msk.f32.mxu0 %vm7138_vm1, %v7137_v1  ;;  %v2125_v14 = vld [vmem:[%s7204_s28 + $0xa0] sm:$0xff] }
 0x147   : > { %v964_v4 = vpop.f32.mrb[48].mxu1  ;;  %v1398_v12 = vpop.f32.mrb[48].mxu0 }
 0x148   : > { %v965_v23 = vadd.f32 %v964_v4, %v7804_v35  ;;  %v6250_v10 = vpop.f32.mrb[49].mxu0  ;;  %6413 = vmatmul.mubr.msk.f32.gmra.mrb[154].mxu1 %vm354_vm2, %v7588_v22  ;;  %6535 = vmatmul.mubr.msk.f32.gmra.mrb[154].mxu0 %vm354_vm2, %v2123_v8  ;;  %v6128_v20 = vpop.f32.mrb[49].mxu1  ;;  %v8066_v62 = vadd.f32 %v1398_v12, %v960_v11 }
 0x149   : > { %6415 = vmatprep.mubr.msk.f32.mxu1 %vm7138_vm1, %v7137_v1  ;;  %6537 = vmatprep.mubr.msk.f32.mxu0 %vm7138_vm1, %v7137_v1 }
 0x14b   : > { %v969_v6 = vpop.f32.mrb[50].mxu1  ;;  %v1403_v63 = vpop.f32.mrb[50].mxu0 }
 0x14c   : > { %v970_v35 = vadd.f32 %v969_v6, %v7819_v47  ;;  %v6253_v51 = vpop.f32.mrb[51].mxu0  ;;  %6416 = vmatmul.mubr.msk.f32.gmra.mrb[156].mxu1 %vm354_vm2, %v7599_v24  ;;  %6538 = vmatmul.mubr.msk.f32.gmra.mrb[156].mxu0 %vm354_vm2, %v2124_v16  ;;  %v6131_v22 = vpop.f32.mrb[51].mxu1  ;;  %v8077_v11 = vadd.f32 %v1403_v63, %v965_v23  ;;  %v2126_v23 = vld [vmem:[%s7204_s28 + $0xa8] sm:$0xff]  ;;  %v2127_v63 = vld [vmem:[%s7204_s28 + $0xb0] sm:$0xff] }
 0x14d   : > { %6418 = vmatprep.mubr.msk.f32.mxu1 %vm7138_vm1, %v7137_v1  ;;  %6540 = vmatprep.mubr.msk.f32.mxu0 %vm7138_vm1, %v7137_v1 }
 0x14f   : > { %v974_v18 = vpop.f32.mrb[52].mxu1  ;;  %v1408_v8 = vpop.f32.mrb[52].mxu0 }
 0x150   : > { %v975_v47 = vadd.f32 %v974_v18, %v7834_v5  ;;  %v6256_v4 = vpop.f32.mrb[53].mxu0  ;;  %6419 = vmatmul.mubr.msk.f32.gmra.mrb[158].mxu1 %vm354_vm2, %v7610_v26  ;;  %6541 = vmatmul.mubr.msk.f32.gmra.mrb[158].mxu0 %vm354_vm2, %v2125_v14  ;;  %v6134_v24 = vpop.f32.mrb[53].mxu1  ;;  %v8088_v12 = vadd.f32 %v1408_v8, %v970_v35  ;;  %v2128_v18 = vld [vmem:[%s7204_s28 + $0xb8] sm:$0xff] }
 0x151   : > { %6421 = vmatprep.mubr.msk.f32.mxu1 %vm7138_vm1, %v7137_v1  ;;  %6543 = vmatprep.mubr.msk.f32.mxu0 %vm7138_vm1, %v7137_v1 }
 0x153   : > { %v979_v10 = vpop.f32.mrb[54].mxu1  ;;  %v1413_v20 = vpop.f32.mrb[54].mxu0 }
 0x154   : > { %v980_v5 = vadd.f32 %v979_v10, %v7849_v29  ;;  %v6259_v16 = vpop.f32.mrb[55].mxu0  ;;  %6422 = vmatmul.mubr.msk.f32.gmra.mrb[160].mxu1 %vm354_vm2, %v7621_v28  ;;  %6544 = vmatmul.mubr.msk.f32.gmra.mrb[160].mxu0 %vm354_vm2, %v2126_v23  ;;  %v6137_v26 = vpop.f32.mrb[55].mxu1  ;;  %v8099_v6 = vadd.f32 %v1413_v20, %v975_v47  ;;  %v2129_v23 = vld [vmem:[%s7204_s28 + $0xc0] sm:$0xff] }
 0x155   : > { %6424 = vmatprep.mubr.msk.f32.mxu1 %vm7138_vm1, %v7137_v1  ;;  %6546 = vmatprep.mubr.msk.f32.mxu0 %vm7138_vm1, %v7137_v1  ;;  %v2130_v26 = vld [vmem:[%s7204_s28 + $0xc8] sm:$0xff] }
 0x157   : > { %v984_v35 = vpop.f32.mrb[56].mxu1  ;;  %v1418_v51 = vpop.f32.mrb[56].mxu0 }
 0x158   : > { %v985_v29 = vadd.f32 %v984_v35, %v7866_v56  ;;  %v6262_v22 = vpop.f32.mrb[57].mxu0  ;;  %6425 = vmatmul.mubr.msk.f32.gmra.mrb[162].mxu1 %vm354_vm2, %v7632_v30  ;;  %6547 = vmatmul.mubr.msk.f32.gmra.mrb[162].mxu0 %vm354_vm2, %v2127_v63  ;;  %v6140_v28 = vpop.f32.mrb[57].mxu1  ;;  %v8110_v14 = vadd.f32 %v1418_v51, %v980_v5 }
 0x159   : > { %6427 = vmatprep.mubr.msk.f32.mxu1 %vm7138_vm1, %v7137_v1  ;;  %6549 = vmatprep.mubr.msk.f32.mxu0 %vm7138_vm1, %v7137_v1  ;;  %v2131_v22 = vld [vmem:[%s7204_s28 + $0xd0] sm:$0xff] }
 0x15b   : > { %v989_v8 = vpop.f32.mrb[58].mxu1  ;;  %v1423_v47 = vpop.f32.mrb[58].mxu0 }
 0x15c   : > { %v990_v56 = vadd.f32 %v989_v8, %v7884_v41  ;;  %v6265_v4 = vpop.f32.mrb[59].mxu0  ;;  %6428 = vmatmul.mubr.msk.f32.gmra.mrb[164].mxu1 %vm354_vm2, %v7643_v32  ;;  %6550 = vmatmul.mubr.msk.f32.gmra.mrb[164].mxu0 %vm354_vm2, %v2128_v18  ;;  %v6143_v30 = vpop.f32.mrb[59].mxu1  ;;  %v8121_v24 = vadd.f32 %v1423_v47, %v985_v29 }
 0x15d   : > { %6430 = vmatprep.mubr.msk.f32.mxu1 %vm7138_vm1, %v7137_v1  ;;  %6552 = vmatprep.mubr.msk.f32.mxu0 %vm7138_vm1, %v7137_v1 }
 0x15f   : > { %v994_v10 = vpop.f32.mrb[60].mxu1  ;;  %v1428_v20 = vpop.f32.mrb[60].mxu0 }
 0x160   : > { %v995_v41 = vadd.f32 %v994_v10, %v7898_v53  ;;  %v6268_v5 = vpop.f32.mrb[61].mxu0  ;;  %6431 = vmatmul.mubr.msk.f32.gmra.mrb[166].mxu1 %vm354_vm2, %v7654_v34  ;;  %6553 = vmatmul.mubr.msk.f32.gmra.mrb[166].mxu0 %vm354_vm2, %v2129_v23  ;;  %v6146_v32 = vpop.f32.mrb[61].mxu1  ;;  %v8132_v16 = vadd.f32 %v1428_v20, %v990_v56  ;;  %v2132_v56 = vld [vmem:[%s7204_s28 + $0xd8] sm:$0xff]  ;;  %v2133_v20 = vld [vmem:[%s7204_s28 + $0xe0] sm:$0xff] }
 0x161   : > { %6433 = vmatprep.mubr.msk.f32.mxu1 %vm7138_vm1, %v7137_v1  ;;  %6555 = vmatprep.mubr.msk.f32.mxu0 %vm7138_vm1, %v7137_v1 }
 0x163   : > { %v999_v63 = vpop.f32.mrb[62].mxu1  ;;  %v1433_v35 = vpop.f32.mrb[62].mxu0 }
 0x164   : > { %v1000_v53 = vadd.f32 %v999_v63, %v7910_v54  ;;  %v6271_v51 = vpop.f32.mrb[63].mxu0  ;;  %6434 = vmatmul.mubr.msk.f32.gmra.mrb[168].mxu1 %vm354_vm2, %v7665_v36  ;;  %6556 = vmatmul.mubr.msk.f32.gmra.mrb[168].mxu0 %vm354_vm2, %v2130_v26  ;;  %v6149_v34 = vpop.f32.mrb[63].mxu1  ;;  %v8143_v29 = vadd.f32 %v1433_v35, %v995_v41  ;;  %v2134_v63 = vld [vmem:[%s7204_s28 + $0xe8] sm:$0xff] }
 0x165   : > { %6436 = vmatprep.mubr.msk.f32.mxu1 %vm7138_vm1, %v7137_v1  ;;  %6558 = vmatprep.mubr.msk.f32.mxu0 %vm7138_vm1, %v7137_v1 }
 0x167   : > { %v1004_v28 = vpop.f32.mrb[64].mxu1  ;;  %v1438_v18 = vpop.f32.mrb[64].mxu0 }
 0x168   : > { %v1005_v54 = vadd.f32 %v1004_v28, %v7922_v55  ;;  %v6274_v8 = vpop.f32.mrb[65].mxu0  ;;  %6437 = vmatmul.mubr.msk.f32.gmra.mrb[170].mxu1 %vm354_vm2, %v7676_v38  ;;  %6559 = vmatmul.mubr.msk.f32.gmra.mrb[170].mxu0 %vm354_vm2, %v2131_v22  ;;  %v6152_v36 = vpop.f32.mrb[65].mxu1  ;;  %v8154_v47 = vadd.f32 %v1438_v18, %v1000_v53  ;;  %v2135_v22 = vld [vmem:[%s7204_s28 + $0xf0] sm:$0xff] }
 0x169   : > { %6439 = vmatprep.mubr.msk.f32.mxu1 %vm7138_vm1, %v7137_v1  ;;  %6561 = vmatprep.mubr.msk.f32.mxu0 %vm7138_vm1, %v7137_v1  ;;  %v2136_v36 = vld [vmem:[%s7204_s28 + $0xf8] sm:$0xff] }
 0x16b   : > { %v1009_v4 = vpop.f32.mrb[66].mxu1  ;;  %v1443_v30 = vpop.f32.mrb[66].mxu0 }
 0x16c   : > { %v1010_v55 = vadd.f32 %v1009_v4, %v7934_v39  ;;  %v6277_v23 = vpop.f32.mrb[67].mxu0  ;;  %6440 = vmatmul.mubr.msk.f32.gmra.mrb[172].mxu1 %vm354_vm2, %v7687_v40  ;;  %6562 = vmatmul.mubr.msk.f32.gmra.mrb[172].mxu0 %vm354_vm2, %v2132_v56  ;;  %v6155_v38 = vpop.f32.mrb[67].mxu1  ;;  %v8165_v10 = vadd.f32 %v1443_v30, %v1005_v54 }
 0x16d   : > { %6442 = vmatprep.mubr.msk.f32.mxu1 %vm7138_vm1, %v7137_v1  ;;  %6564 = vmatprep.mubr.msk.f32.mxu0 %vm7138_vm1, %v7137_v1  ;;  %v2137_v23 = vld [vmem:[%s7204_s28 + $0x100] sm:$0xff] }
 0x16f   : > { %v1014_v41 = vpop.f32.mrb[68].mxu1  ;;  %v1448_v5 = vpop.f32.mrb[68].mxu0 }
 0x170   : > { %v1015_v39 = vadd.f32 %v1014_v41, %v7946_v17  ;;  %v6280_v32 = vpop.f32.mrb[69].mxu0  ;;  %6443 = vmatmul.mubr.msk.f32.gmra.mrb[174].mxu1 %vm354_vm2, %v7698_v42  ;;  %6565 = vmatmul.mubr.msk.f32.gmra.mrb[174].mxu0 %vm354_vm2, %v2133_v20  ;;  %v6158_v40 = vpop.f32.mrb[69].mxu1  ;;  %v8176_v26 = vadd.f32 %v1448_v5, %v1010_v55 }
 0x171   : > { %6445 = vmatprep.mubr.msk.f32.mxu1 %vm7138_vm1, %v7137_v1  ;;  %6567 = vmatprep.mubr.msk.f32.mxu0 %vm7138_vm1, %v7137_v1 }
 0x173   : > { %v1019_v35 = vpop.f32.mrb[70].mxu1  ;;  %v1453_v53 = vpop.f32.mrb[70].mxu0 }
 0x174   : > { %v1020_v17 = vadd.f32 %v1019_v35, %v7958_v15  ;;  %v6283_v51 = vpop.f32.mrb[71].mxu0  ;;  %6446 = vmatmul.mubr.msk.f32.gmra.mrb[176].mxu1 %vm354_vm2, %v7709_v44  ;;  %6568 = vmatmul.mubr.msk.f32.gmra.mrb[176].mxu0 %vm354_vm2, %v2134_v63  ;;  %v6161_v42 = vpop.f32.mrb[71].mxu1  ;;  %v8187_v34 = vadd.f32 %v1453_v53, %v1015_v39  ;;  %v2138_v39 = vld [vmem:[%s7204_s28 + $0x108] sm:$0xff]  ;;  %v2139_v53 = vld [vmem:[%s7204_s28 + $0x110] sm:$0xff] }
 0x175   : > { %6448 = vmatprep.mubr.msk.f32.mxu1 %vm7138_vm1, %v7137_v1  ;;  %6570 = vmatprep.mubr.msk.f32.mxu0 %vm7138_vm1, %v7137_v1 }
 0x177   : > { %v1024_v28 = vpop.f32.mrb[72].mxu1  ;;  %v1458_v18 = vpop.f32.mrb[72].mxu0 }
 0x178   : > { %v1025_v15 = vadd.f32 %v1024_v28, %v7970_v58  ;;  %v6286_v54 = vpop.f32.mrb[73].mxu0  ;;  %6449 = vmatmul.mubr.msk.f32.gmra.mrb[178].mxu1 %vm354_vm2, %v7720_v46  ;;  %6571 = vmatmul.mubr.msk.f32.gmra.mrb[178].mxu0 %vm354_vm2, %v2135_v22  ;;  %v6164_v44 = vpop.f32.mrb[73].mxu1  ;;  %v8198_v8 = vadd.f32 %v1458_v18, %v1020_v17  ;;  %v2140_v28 = vld [vmem:[%s7204_s28 + $0x118] sm:$0xff] }
 0x179   : > { %6451 = vmatprep.mubr.msk.f32.mxu1 %vm7138_vm1, %v7137_v1  ;;  %6573 = vmatprep.mubr.msk.f32.mxu0 %vm7138_vm1, %v7137_v1 }
 0x17b   : > { %v1029_v56 = vpop.f32.mrb[74].mxu1  ;;  %v1463_v4 = vpop.f32.mrb[74].mxu0 }
 0x17c   : > { %v1030_v58 = vadd.f32 %v1029_v56, %v7982_v19  ;;  %v6289_v30 = vpop.f32.mrb[75].mxu0  ;;  %6452 = vmatmul.mubr.msk.f32.gmra.mrb[180].mxu1 %vm354_vm2, %v7731_v48  ;;  %6574 = vmatmul.mubr.msk.f32.gmra.mrb[180].mxu0 %vm354_vm2, %v2136_v36  ;;  %v6167_v46 = vpop.f32.mrb[75].mxu1  ;;  %v8209_v55 = vadd.f32 %v1463_v4, %v1025_v15  ;;  %v2141_v36 = vld [vmem:[%s7204_s28 + $0x120] sm:$0xff] }
 0x17d   : > { %6454 = vmatprep.mubr.msk.f32.mxu1 %vm7138_vm1, %v7137_v1  ;;  %6576 = vmatprep.mubr.msk.f32.mxu0 %vm7138_vm1, %v7137_v1  ;;  %v2142_v46 = vld [vmem:[%s7204_s28 + $0x128] sm:$0xff] }
 0x17f   : > { %v1034_v38 = vpop.f32.mrb[76].mxu1  ;;  %v1468_v20 = vpop.f32.mrb[76].mxu0 }
 0x180   : > { %v1035_v19 = vadd.f32 %v1034_v38, %v7994_v57  ;;  %v6292_v41 = vpop.f32.mrb[77].mxu0  ;;  %6455 = vmatmul.mubr.msk.f32.gmra.mrb[182].mxu1 %vm354_vm2, %v7742_v50  ;;  %6577 = vmatmul.mubr.msk.f32.gmra.mrb[182].mxu0 %vm354_vm2, %v2137_v23  ;;  %v6170_v48 = vpop.f32.mrb[77].mxu1  ;;  %v8220_v5 = vadd.f32 %v1468_v20, %v1030_v58 }
 0x181   : > { %6457 = vmatprep.mubr.msk.f32.mxu1 %vm7138_vm1, %v7137_v1  ;;  %6579 = vmatprep.mubr.msk.f32.mxu0 %vm7138_vm1, %v7137_v1  ;;  %v2143_v41 = vld [vmem:[%s7204_s28 + $0x130] sm:$0xff] }
 0x183   : > { %v1039_v32 = vpop.f32.mrb[78].mxu1  ;;  %v1473_v40 = vpop.f32.mrb[78].mxu0 }
 0x184   : > { %v1040_v57 = vadd.f32 %v1039_v32, %v8006_v59  ;;  %v6295_v63 = vpop.f32.mrb[79].mxu0  ;;  %6458 = vmatmul.mubr.msk.f32.gmra.mrb[184].mxu1 %vm354_vm2, %v7757_v60  ;;  %6580 = vmatmul.mubr.msk.f32.gmra.mrb[184].mxu0 %vm354_vm2, %v2138_v39  ;;  %v6173_v50 = vpop.f32.mrb[79].mxu1  ;;  %v8231_v35 = vadd.f32 %v1473_v40, %v1035_v19 }
 0x185   : > { %6460 = vmatprep.mubr.msk.f32.mxu1 %vm7138_vm1, %v7137_v1  ;;  %6582 = vmatprep.mubr.msk.f32.mxu0 %vm7138_vm1, %v7137_v1 }
 0x187   : > { %v1044_v17 = vpop.f32.mrb[80].mxu1  ;;  %v1478_v51 = vpop.f32.mrb[80].mxu0 }
 0x188   : > { %v1045_v59 = vadd.f32 %v1044_v17, %v8018_v61  ;;  %v6298_v42 = vpop.f32.mrb[81].mxu0  ;;  %6461 = vmatmul.mubr.msk.f32.gmra.mrb[186].mxu1 %vm354_vm2, %v7772_v9  ;;  %6583 = vmatmul.mubr.msk.f32.gmra.mrb[186].mxu0 %vm354_vm2, %v2139_v53  ;;  %v6176_v60 = vpop.f32.mrb[81].mxu1  ;;  %v8242_v22 = vadd.f32 %v1478_v51, %v1040_v57  ;;  %v2144_v57 = vld [vmem:[%s7204_s28 + $0x138] sm:$0xff]  ;;  %v2145_v51 = vld [vmem:[%s7204_s28 + $0x140] sm:$0xff] }
 0x189   : > { %6463 = vmatprep.mubr.msk.f32.mxu1 %vm7138_vm1, %v7137_v1  ;;  %6585 = vmatprep.mubr.msk.f32.mxu0 %vm7138_vm1, %v7137_v1 }
 0x18b   : > { %v1049_v18 = vpop.f32.mrb[82].mxu1  ;;  %v1483_v15 = vpop.f32.mrb[82].mxu0 }
 0x18c   : > { %v1050_v61 = vadd.f32 %v1049_v18, %v7746_v52  ;;  %v6301_v54 = vpop.f32.mrb[83].mxu0  ;;  %6464 = vmatmul.mubr.msk.f32.gmra.mrb[188].mxu1 %vm354_vm2, %v7787_v21  ;;  %6586 = vmatmul.mubr.msk.f32.gmra.mrb[188].mxu0 %vm354_vm2, %v2140_v28  ;;  %v6179_v9 = vpop.f32.mrb[83].mxu1  ;;  %v8253_v44 = vadd.f32 %v1483_v15, %v1045_v59  ;;  %v1667_v18 = vld [vmem:[%s7204_s28 + $0x14f] sm:$0xff] }
 0x18d   : > { %6466 = vmatprep.mubr.msk.f32.mxu1 %vm7138_vm1, %v7137_v1  ;;  %6588 = vmatprep.mubr.msk.f32.mxu0 %vm7138_vm1, %v7137_v1  ;;  %v2146_v15 = vld [vmem:[%s7204_s28 + $0x148] sm:$0xff]  ;;  %v9681_v54 = vld [vmem:[#allocation2_spill] sm:$0xff] }
 0x18f   : > { %v1054_v56 = vpop.f32.mrb[84].mxu1  ;;  %v1488_v4 = vpop.f32.mrb[84].mxu0 }
 0x190   : > { %v1055_v52 = vadd.f32 %v1054_v56, %v7761_v0  ;;  %v6304_v58 = vpop.f32.mrb[85].mxu0  ;;  %6467 = vmatmul.mubr.msk.f32.gmra.mrb[190].mxu1 %vm354_vm2, %v7802_v33  ;;  %6589 = vmatmul.mubr.msk.f32.gmra.mrb[190].mxu0 %vm354_vm2, %v2141_v36  ;;  %v6182_v21 = vpop.f32.mrb[85].mxu1  ;;  %v8264_v30 = vadd.f32 %v1488_v4, %v1050_v61  ;;  %v1668_v4 = vld [vmem:[%s7204_s28 + $0x157] sm:$0xff] }
 0x191   : > { %6469 = vmatprep.mubr.msk.f32.mxu1 %vm7138_vm1, %v7137_v1  ;;  %6591 = vmatprep.mubr.msk.f32.mxu0 %vm7138_vm1, %v7137_v1 }
 0x193   : > { %v1059_v23 = vpop.f32.mrb[86].mxu1  ;;  %v1493_v38 = vpop.f32.mrb[86].mxu0 }
 0x194   : > { %v1060_v0 = vadd.f32 %v1059_v23, %v7776_v13  ;;  %v6307_v20 = vpop.f32.mrb[87].mxu0  ;;  %6470 = vmatmul.mubr.msk.f32.gmra.mrb[192].mxu1 %vm354_vm2, %v7817_v45  ;;  %6592 = vmatmul.mubr.msk.f32.gmra.mrb[192].mxu0 %vm354_vm2, %v2142_v46  ;;  %v6185_v33 = vpop.f32.mrb[87].mxu1  ;;  %v8275_v19 = vadd.f32 %v1493_v38, %v1055_v52  ;;  %v2147_v52 = vld [vmem:[%s7204_s28 + $0x150] sm:$0xff]  ;;  %v9682_v46 = vld [vmem:[#allocation3_spill] sm:$0xff] }
 0x195   : > { %6472 = vmatprep.mubr.msk.f32.mxu1 %vm7138_vm1, %v7137_v1  ;;  %6594 = vmatprep.mubr.msk.f32.mxu0 %vm7138_vm1, %v7137_v1  ;;  %v2148_v33 = vld [vmem:[%s7204_s28 + $0x158] sm:$0xff] }
 0x197   : > { %v1064_v48 = vpop.f32.mrb[88].mxu1  ;;  %v1498_v39 = vpop.f32.mrb[88].mxu0 }
 0x198   : > { %v1065_v13 = vadd.f32 %v1064_v48, %v7791_v25  ;;  %v6310_v32 = vpop.f32.mrb[89].mxu0  ;;  %6473 = vmatmul.mubr.msk.f32.gmra.mrb[194].mxu1 %vm354_vm2, %v7832_v3  ;;  %6595 = vmatmul.mubr.msk.f32.gmra.mrb[194].mxu0 %vm354_vm2, %v2143_v41  ;;  %v6188_v45 = vpop.f32.mrb[89].mxu1  ;;  %v8286_v40 = vadd.f32 %v1498_v39, %v1060_v0  ;;  %v2588_v41 = vld [vmem:[%s7204_s28 + $0x19] sm:$0xff] }
 0x199   : > { %6475 = vmatprep.mubr.msk.f32.mxu1 %vm7138_vm1, %v7137_v1  ;;  %6597 = vmatprep.mubr.msk.f32.mxu0 %vm7138_vm1, %v7137_v1  ;;  %v5520_v48 = vld [vmem:[%s9661_s1 + $0x1c] sm:$0xf]  ;;  %v9683_v32 = vld [vmem:[#allocation4_spill] sm:$0xff] }
 0x19b   : > { %v1069_v63 = vpop.f32.mrb[90].mxu1  ;;  %v1503_v50 = vpop.f32.mrb[90].mxu0 }
 0x19c   : > { %v1070_v25 = vadd.f32 %v1069_v63, %v7806_v37  ;;  %v6313_v53 = vpop.f32.mrb[91].mxu0  ;;  %6476 = vmatmul.mubr.msk.f32.gmra.mrb[196].mxu1 %vm354_vm2, %v7847_v27  ;;  %6598 = vmatmul.mubr.msk.f32.gmra.mrb[196].mxu0 %vm354_vm2, %v2144_v57  ;;  %v6191_v3 = vpop.f32.mrb[91].mxu1  ;;  %v8297_v17 = vadd.f32 %v1503_v50, %v1065_v13 }
 0x19d   : > { %6478 = vmatprep.mubr.msk.f32.mxu1 %vm7138_vm1, %v7137_v1  ;;  %6600 = vmatprep.mubr.msk.f32.mxu0 %vm7138_vm1, %v7137_v1  ;;  %v3068_v53 = vld [vmem:[%s7204_s28 + $0x29] sm:$0xff]  ;;  %v5563_v3 = vld [vmem:[%s9661_s1 + $0x20] sm:$0xf] }
 0x19f   : > { %v1074_v59 = vpop.f32.mrb[92].mxu1  ;;  %v1508_v37 = vpop.f32.mrb[92].mxu0 }
 0x1a0   : > { %v1075_v42 = vadd.f32 %v1074_v59, %v7821_v49  ;;  %v6316_v60 = vpop.f32.mrb[93].mxu0  ;;  %6479 = vmatmul.mubr.msk.f32.gmra.mrb[198].mxu1 %vm354_vm2, %v7861_v43  ;;  %6601 = vmatmul.mubr.msk.f32.gmra.mrb[198].mxu0 %vm354_vm2, %v2145_v51  ;;  %v6194_v27 = vpop.f32.mrb[93].mxu1  ;;  %v8308_v28 = vadd.f32 %v1508_v37, %v1070_v25  ;;  %v2589_v25 = vld [vmem:[%s7204_s28 + $0x21] sm:$0xff]  ;;  %v9684_v37 = vld [vmem:[#allocation5_spill] sm:$0xff] }
 0x1a1   : > { %6481 = vmatprep.mubr.msk.f32.mxu1 %vm7138_vm1, %v7137_v1  ;;  %6603 = vmatprep.mubr.msk.f32.mxu0 %vm7138_vm1, %v7137_v1 }
 0x1a3   : > { %v1079_v49 = vpop.f32.mrb[94].mxu1  ;;  %v1513_v61 = vpop.f32.mrb[94].mxu0 }
 0x1a4   : > { %v1080_v9 = vadd.f32 %v1079_v49, %v9681_v54  ;;  %v6319_v43 = vpop.f32.mrb[95].mxu0  ;;  %6482 = vmatmul.mubr.msk.f32.gmra.mrb[200].mxu1 %vm354_vm2, %v1667_v18  ;;  %6604 = vmatmul.mubr.msk.f32.gmra.mrb[200].mxu0 %vm354_vm2, %v2146_v15  ;;  %v6197_v36 = vpop.f32.mrb[95].mxu1  ;;  %v8319_v56 = vadd.f32 %v1513_v61, %v1075_v42  ;;  %v3069_v15 = vld [vmem:[%s7204_s28 + $0x31] sm:$0xff]  ;;  %v9685_v54 = vld [vmem:[#allocation6_spill] sm:$0xff] }
 0x1a5   : > { %6484 = vmatprep.mubr.msk.f32.mxu1 %vm7138_vm1, %v7137_v1  ;;  %6606 = vmatprep.mubr.msk.f32.mxu0 %vm7138_vm1, %v7137_v1 }
 0x1a7   : > { %v1084_v58 = vpop.f32.mrb[96].mxu1  ;;  %v1518_v21 = vpop.f32.mrb[96].mxu0 }
 0x1a8   : > { %v1085_v23 = vadd.f32 %v1084_v58, %v9682_v46  ;;  %v6322_v38 = vpop.f32.mrb[97].mxu0  ;;  %6485 = vmatmul.mubr.msk.f32.gmra.mrb[202].mxu1 %vm354_vm2, %v1668_v4  ;;  %6607 = vmatmul.mubr.msk.f32.gmra.mrb[202].mxu0 %vm354_vm2, %v2147_v52  ;;  %v6200_v0 = vpop.f32.mrb[97].mxu1  ;;  %v8330_v20 = vadd.f32 %v1518_v21, %v1080_v9  ;;  %v3070_v52 = vld [vmem:[%s7204_s28 + $0x39] sm:$0xff]  ;;  %v9686_v46 = vld [vmem:[#allocation7_spill] sm:$0xff] }
 0x1a9   : > { %6609 = vmatprep.mubr.msk.f32.mxu0 %vm7138_vm1, %v7137_v1  ;;  %6614 = vmatprep.mubr.msk.f32.mxu1 %vm7138_vm1, %v7137_v1 }
 0x1ab   : > { %v1089_v39 = vpop.f32.mrb[98].mxu1  ;;  %v1523_v13 = vpop.f32.mrb[98].mxu0 }
 0x1ac   : > { %v1090_v45 = vadd.f32 %v1089_v39, %v9683_v32  ;;  %v6325_v57 = vpop.f32.mrb[99].mxu0  ;;  %6610 = vmatmul.mubr.msk.f32.gmra.mrb[204].mxu0 %vm354_vm2, %v2148_v33  ;;  %6615 = vmatmul.mubr.msk.f32.vlgmr.msra.gmra.mrb[204].mxu1 %vm354_vm2, %v2588_v41  ;;  %v6203_v63 = vpop.f32.mrb[99].mxu1  ;;  %v8344_v50 = vadd.f32 %v1523_v13, %v1085_v23  ;;  %v3071_v41 = vld [vmem:[%s7204_s28 + $0x41] sm:$0xff]  ;;  %v9687_v13 = vld [vmem:[#allocation8_spill] sm:$0xff] }
 0x1ad   : > { %6863 = vmatpush3.msk.msra.mxu1 %vm478_vm0, %v5520_v48  ;;  %6617 = vmatprep.mubr.msk.f32.mxu1 %vm7138_vm1, %v7137_v1 }
 0x1ae   : > { %6739 = vmatprep.mubr.msk.f32.mxu0 %vm7138_vm1, %v7137_v1 }
 0x1af   : > { %v1094_v51 = vpop.f32.mrb[100].mxu1  ;;  %v1528_v59 = vpop.f32.mrb[100].mxu0 }
 0x1b0   : > { %v1095_v42 = vadd.f32 %v1094_v51, %v9684_v37  ;;  %v6328_v60 = vpop.f32.mrb[101].mxu0  ;;  %6618 = vmatmul.mubr.msk.f32.gmra.mrb[206].mxu1 %vm354_vm2, %v2589_v25  ;;  %6740 = vmatmul.mubr.msk.f32.vlgmr.msra.gmra.mrb[206].mxu0 %vm354_vm2, %v3068_v53  ;;  %v6206_v27 = vpop.f32.mrb[101].mxu1  ;;  %v8359_v18 = vadd.f32 %v1528_v59, %v1090_v45  ;;  %v3072_v25 = vld [vmem:[%s7204_s28 + $0x49] sm:$0xff]  ;;  %v9688_v51 = vld [vmem:[#allocation9_spill] sm:$0xff] }
 0x1b1   : > { %6988 = vmatpush3.msk.msra.mxu0 %vm478_vm0, %v5563_v3  ;;  %6620 = vmatprep.mubr.msk.f32.mxu1 %vm7138_vm1, %v7137_v1  ;;  %v3073_v27 = vld [vmem:[%s7204_s28 + $0x51] sm:$0xff] }
 0x1b2   : > { %6742 = vmatprep.mubr.msk.f32.mxu0 %vm7138_vm1, %v7137_v1 }
 0x1b3   : > { %v1099_v49 = vpop.f32.mrb[102].mxu1  ;;  %v1533_v61 = vpop.f32.mrb[102].mxu0 }
 0x1b4   : > { %v1100_v9 = vadd.f32 %v1099_v49, %v9685_v54  ;;  %v6331_v43 = vpop.f32.mrb[103].mxu0  ;;  %6621 = vmatmul.mubr.msk.f32.gmra.mrb[208].mxu1 %vm354_vm2, %v3068_v53  ;;  %6743 = vmatmul.mubr.msk.f32.gmra.mrb[208].mxu0 %vm354_vm2, %v3069_v15  ;;  %v6209_v36 = vpop.f32.mrb[103].mxu1  ;;  %v8370_v4 = vadd.f32 %v1533_v61, %v1095_v42  ;;  %v9689_v61 = vld [vmem:[#allocation10_spill] sm:$0xff] }
 0x1b5   : > { %6623 = vmatprep.mubr.msk.f32.mxu1 %vm7138_vm1, %v7137_v1  ;;  %6745 = vmatprep.mubr.msk.f32.mxu0 %vm7138_vm1, %v7137_v1 }
 0x1b7   : > { %v1104_v58 = vpop.f32.mrb[104].mxu1  ;;  %v1538_v21 = vpop.f32.mrb[104].mxu0 }
 0x1b8   : > { %v1105_v23 = vadd.f32 %v1104_v58, %v9686_v46  ;;  %v6334_v38 = vpop.f32.mrb[105].mxu0  ;;  %6624 = vmatmul.mubr.msk.f32.gmra.mrb[210].mxu1 %vm354_vm2, %v3069_v15  ;;  %6746 = vmatmul.mubr.msk.f32.gmra.mrb[210].mxu0 %vm354_vm2, %v3070_v52  ;;  %v6212_v0 = vpop.f32.mrb[105].mxu1  ;;  %v8380_v33 = vadd.f32 %v1538_v21, %v1100_v9  ;;  %v9690_v46 = vld [vmem:[#allocation11_spill] sm:$0xff] }
 0x1b9   : > { %6626 = vmatprep.mubr.msk.f32.mxu1 %vm7138_vm1, %v7137_v1  ;;  %6748 = vmatprep.mubr.msk.f32.mxu0 %vm7138_vm1, %v7137_v1 }
 0x1bb   : > { %v1109_v48 = vpop.f32.mrb[106].mxu1  ;;  %v1543_v39 = vpop.f32.mrb[106].mxu0 }
 0x1bc   : > { %v1110_v32 = vadd.f32 %v1109_v48, %v9687_v13  ;;  %v6337_v45 = vpop.f32.mrb[107].mxu0  ;;  %6627 = vmatmul.mubr.msk.f32.gmra.mrb[212].mxu1 %vm354_vm2, %v3070_v52  ;;  %6749 = vmatmul.mubr.msk.f32.gmra.mrb[212].mxu0 %vm354_vm2, %v3071_v41  ;;  %v6215_v57 = vpop.f32.mrb[107].mxu1  ;;  %v8390_v63 = vadd.f32 %v1543_v39, %v1105_v23  ;;  %v3074_v52 = vld [vmem:[%s7204_s28 + $0x59] sm:$0xff]  ;;  %v3075_v48 = vld [vmem:[%s7204_s28 + $0x61] sm:$0xff] }
 0x1bd   : > { %6629 = vmatprep.mubr.msk.f32.mxu1 %vm7138_vm1, %v7137_v1  ;;  %6751 = vmatprep.mubr.msk.f32.mxu0 %vm7138_vm1, %v7137_v1 }
 0x1bf   : > { %v1114_v53 = vpop.f32.mrb[108].mxu1  ;;  %v1548_v3 = vpop.f32.mrb[108].mxu0 }
 0x1c0   : > { %v1115_v59 = vadd.f32 %v1114_v53, %v9688_v51  ;;  %v6340_v37 = vpop.f32.mrb[109].mxu0  ;;  %6630 = vmatmul.mubr.msk.f32.gmra.mrb[214].mxu1 %vm354_vm2, %v3071_v41  ;;  %6752 = vmatmul.mubr.msk.f32.gmra.mrb[214].mxu0 %vm354_vm2, %v3072_v25  ;;  %v6218_v42 = vpop.f32.mrb[109].mxu1  ;;  %v8400_v60 = vadd.f32 %v1548_v3, %v1110_v32  ;;  %v9691_v32 = vld [vmem:[#allocation12_spill] sm:$0xff] }
 0x1c1   : > { %6632 = vmatprep.mubr.msk.f32.mxu1 %vm7138_vm1, %v7137_v1  ;;  %6754 = vmatprep.mubr.msk.f32.mxu0 %vm7138_vm1, %v7137_v1  ;;  %v3076_v3 = vld [vmem:[%s7204_s28 + $0x69] sm:$0xff]  ;;  %v9692_v37 = vld [vmem:[#allocation13_spill] sm:$0xff] }
 0x1c3   : > { %v1119_v15 = vpop.f32.mrb[110].mxu1  ;;  %v1553_v49 = vpop.f32.mrb[110].mxu0 }
 0x1c4   : > { %v1120_v54 = vadd.f32 %v1119_v15, %v9689_v61  ;;  %v6343_v9 = vpop.f32.mrb[111].mxu0  ;;  %6633 = vmatmul.mubr.msk.f32.gmra.mrb[216].mxu1 %vm354_vm2, %v3072_v25  ;;  %6755 = vmatmul.mubr.msk.f32.gmra.mrb[216].mxu0 %vm354_vm2, %v3073_v27  ;;  %v6221_v43 = vpop.f32.mrb[111].mxu1  ;;  %v8410_v36 = vadd.f32 %v1553_v49, %v1115_v59  ;;  %v3077_v61 = vld [vmem:[%s7204_s28 + $0x71] sm:$0xff] }
 0x1c5   : > { %6635 = vmatprep.mubr.msk.f32.mxu1 %vm7138_vm1, %v7137_v1  ;;  %6757 = vmatprep.mubr.msk.f32.mxu0 %vm7138_vm1, %v7137_v1  ;;  %v9693_v43 = vld [vmem:[#allocation14_spill] sm:$0xff] }
 0x1c7   : > { %v1124_v58 = vpop.f32.mrb[112].mxu1  ;;  %v1558_v21 = vpop.f32.mrb[112].mxu0 }
 0x1c8   : > { %v1125_v23 = vadd.f32 %v1124_v58, %v9690_v46  ;;  %v6346_v38 = vpop.f32.mrb[113].mxu0  ;;  %6636 = vmatmul.mubr.msk.f32.gmra.mrb[218].mxu1 %vm354_vm2, %v3073_v27  ;;  %6758 = vmatmul.mubr.msk.f32.gmra.mrb[218].mxu0 %vm354_vm2, %v3074_v52  ;;  %v6224_v0 = vpop.f32.mrb[113].mxu1  ;;  %v8420_v41 = vadd.f32 %v1558_v21, %v1120_v54 }
 0x1c9   : > { %6638 = vmatprep.mubr.msk.f32.mxu1 %vm7138_vm1, %v7137_v1  ;;  %6760 = vmatprep.mubr.msk.f32.mxu0 %vm7138_vm1, %v7137_v1 }
 0x1cb   : > { %v1129_v39 = vpop.f32.mrb[114].mxu1  ;;  %v1563_v13 = vpop.f32.mrb[114].mxu0 }
 0x1cc   : > { %v1130_v45 = vadd.f32 %v1129_v39, %v9691_v32  ;;  %v8428_v57 = vadd.f32 %v1563_v13, %v1125_v23  ;;  %v6349_v25 = vpop.f32.mrb[115].mxu0  ;;  %6639 = vmatmul.mubr.msk.f32.gmra.mrb[220].mxu1 %vm354_vm2, %v3074_v52  ;;  %6761 = vmatmul.mubr.msk.f32.gmra.mrb[220].mxu0 %vm354_vm2, %v3075_v48  ;;  %v6227_v53 = vpop.f32.mrb[115].mxu1  ;;  %v3078_v23 = vld [vmem:[%s7204_s28 + $0x79] sm:$0xff] }
 0x1cd   : > { %6641 = vmatprep.mubr.msk.f32.mxu1 %vm7138_vm1, %v7137_v1  ;;  %6763 = vmatprep.mubr.msk.f32.mxu0 %vm7138_vm1, %v7137_v1  ;;  %v3079_v25 = vld [vmem:[%s7204_s28 + $0x81] sm:$0xff] }
 0x1cf   : > { %v1134_v51 = vpop.f32.mrb[116].mxu1  ;;  %v1568_v59 = vpop.f32.mrb[116].mxu0 }
 0x1d0   : > { %v1135_v42 = vadd.f32 %v1134_v51, %v9692_v37  ;;  %v8438_v27 = vadd.f32 %v1568_v59, %v1130_v45  ;;  %v6352_v15 = vpop.f32.mrb[117].mxu0  ;;  %6642 = vmatmul.mubr.msk.f32.gmra.mrb[222].mxu1 %vm354_vm2, %v3075_v48  ;;  %6764 = vmatmul.mubr.msk.f32.gmra.mrb[222].mxu0 %vm354_vm2, %v3076_v3  ;;  %v6230_v49 = vpop.f32.mrb[117].mxu1  ;;  %v9694_v48 = vld [vmem:[#allocation15_spill] sm:$0xff] }
 0x1d1   : > { %6644 = vmatprep.mubr.msk.f32.mxu1 %vm7138_vm1, %v7137_v1  ;;  %6766 = vmatprep.mubr.msk.f32.mxu0 %vm7138_vm1, %v7137_v1  ;;  %v3080_v15 = vld [vmem:[%s7204_s28 + $0x89] sm:$0xff] }
 0x1d3   : > { %v1139_v54 = vpop.f32.mrb[118].mxu1  ;;  %v1573_v9 = vpop.f32.mrb[118].mxu0 }
 0x1d4   : > { %v1140_v52 = vadd.f32 %v1139_v54, %v9693_v43  ;;  %v8448_v58 = vadd.f32 %v1573_v9, %v1135_v42  ;;  %v6355_v21 = vpop.f32.mrb[119].mxu0  ;;  %6645 = vmatmul.mubr.msk.f32.gmra.mrb[224].mxu1 %vm354_vm2, %v3076_v3  ;;  %6767 = vmatmul.mubr.msk.f32.gmra.mrb[224].mxu0 %vm354_vm2, %v3077_v61  ;;  %v6233_v46 = vpop.f32.mrb[119].mxu1 }
 0x1d5   : > { %6647 = vmatprep.mubr.msk.f32.mxu1 %vm7138_vm1, %v7137_v1  ;;  %6769 = vmatprep.mubr.msk.f32.mxu0 %vm7138_vm1, %v7137_v1 }
 0x1d7   : > { %v1144_v38 = vpop.f32.mrb[120].mxu1  ;;  %v1578_v0 = vpop.f32.mrb[120].mxu0 }
 0x1d8   : > { %v1145_v39 = vadd.f32 %v1144_v38, %v9694_v48  ;;  %v8458_v13 = vadd.f32 %v1578_v0, %v1140_v52  ;;  %v6358_v32 = vpop.f32.mrb[121].mxu0  ;;  %6648 = vmatmul.mubr.msk.f32.gmra.mrb[226].mxu1 %vm354_vm2, %v3077_v61  ;;  %6770 = vmatmul.mubr.msk.f32.gmra.mrb[226].mxu0 %vm354_vm2, %v3078_v23  ;;  %v6236_v45 = vpop.f32.mrb[121].mxu1  ;;  %v3081_v52 = vld [vmem:[%s7204_s28 + $0x91] sm:$0xff]  ;;  %v3082_v48 = vld [vmem:[%s7204_s28 + $0x99] sm:$0xff] }
 0x1d9   : > { %6650 = vmatprep.mubr.msk.f32.mxu1 %vm7138_vm1, %v7137_v1  ;;  %6772 = vmatprep.mubr.msk.f32.mxu0 %vm7138_vm1, %v7137_v1 }
 0x1db   : > { %v1583_v53 = vpop.f32.mrb[122].mxu0  ;;  %v1863_v3 = vpop.f32.mrb[122].mxu1 }
 0x1dc   : > { %v8467_v51 = vadd.f32 %v1583_v53, %v1145_v39  ;;  %v2067_v59 = vadd.f32 %v1863_v3, %v8033_v2  ;;  %v6361_v37 = vpop.f32.mrb[123].mxu0  ;;  %6651 = vmatmul.mubr.msk.f32.gmra.mrb[228].mxu1 %vm354_vm2, %v3078_v23  ;;  %6773 = vmatmul.mubr.msk.f32.gmra.mrb[228].mxu0 %vm354_vm2, %v3079_v25  ;;  %v6366_v42 = vpop.f32.mrb[123].mxu1  ;;  %v3083_v3 = vld [vmem:[%s7204_s28 + $0xa1] sm:$0xff] }
 0x1dd   : > { %6653 = vmatprep.mubr.msk.f32.mxu1 %vm7138_vm1, %v7137_v1  ;;  %6775 = vmatprep.mubr.msk.f32.mxu0 %vm7138_vm1, %v7137_v1 }
 0x1df   : > { %v1868_v49 = vpop.f32.mrb[124].mxu1  ;;  %v2343_v61 = vpop.f32.mrb[124].mxu0 }
 0x1e0   : > { %v2068_v54 = vadd.f32 %v1868_v49, %v8044_v31  ;;  %v8478_v9 = vadd.f32 %v2343_v61, %v2067_v59  ;;  %v6491_v2 = vpop.f32.mrb[125].mxu0  ;;  %6654 = vmatmul.mubr.msk.f32.gmra.mrb[230].mxu1 %vm354_vm2, %v3079_v25  ;;  %6776 = vmatmul.mubr.msk.f32.gmra.mrb[230].mxu0 %vm354_vm2, %v3080_v15  ;;  %v6369_v43 = vpop.f32.mrb[125].mxu1  ;;  %v3084_v61 = vld [vmem:[%s7204_s28 + $0xa9] sm:$0xff] }
 0x1e1   : > { %6656 = vmatprep.mubr.msk.f32.mxu1 %vm7138_vm1, %v7137_v1  ;;  %6778 = vmatprep.mubr.msk.f32.mxu0 %vm7138_vm1, %v7137_v1 }
 0x1e3   : > { %v1873_v21 = vpop.f32.mrb[126].mxu1  ;;  %v2348_v46 = vpop.f32.mrb[126].mxu0 }
 0x1e4   : > { %v2069_v31 = vadd.f32 %v1873_v21, %v8055_v7  ;;  %v8488_v23 = vadd.f32 %v2348_v46, %v2068_v54  ;;  %v6494_v38 = vpop.f32.mrb[127].mxu0  ;;  %6657 = vmatmul.mubr.msk.f32.gmra.mrb[232].mxu1 %vm354_vm2, %v3080_v15  ;;  %6779 = vmatmul.mubr.msk.f32.gmra.mrb[232].mxu0 %vm354_vm2, %v3081_v52  ;;  %v6372_v0 = vpop.f32.mrb[127].mxu1  ;;  %v3085_v46 = vld [vmem:[%s7204_s28 + $0xb1] sm:$0xff] }
 0x1e5   : > { %6659 = vmatprep.mubr.msk.f32.mxu1 %vm7138_vm1, %v7137_v1  ;;  %6781 = vmatprep.mubr.msk.f32.mxu0 %vm7138_vm1, %v7137_v1 }
 0x1e7   : > { %v1878_v39 = vpop.f32.mrb[128].mxu1  ;;  %v2353_v32 = vpop.f32.mrb[128].mxu0 }
 0x1e8   : > { %v2070_v7 = vadd.f32 %v1878_v39, %v8066_v62  ;;  %v8498_v45 = vadd.f32 %v2353_v32, %v2069_v31  ;;  %v6497_v25 = vpop.f32.mrb[129].mxu0  ;;  %6660 = vmatmul.mubr.msk.f32.gmra.mrb[234].mxu1 %vm354_vm2, %v3081_v52  ;;  %6782 = vmatmul.mubr.msk.f32.gmra.mrb[234].mxu0 %vm354_vm2, %v3082_v48  ;;  %v6375_v53 = vpop.f32.mrb[129].mxu1  ;;  %v3086_v32 = vld [vmem:[%s7204_s28 + $0xb9] sm:$0xff] }
 0x1e9   : > { %6662 = vmatprep.mubr.msk.f32.mxu1 %vm7138_vm1, %v7137_v1  ;;  %6784 = vmatprep.mubr.msk.f32.mxu0 %vm7138_vm1, %v7137_v1 }
 0x1eb   : > { %v1883_v59 = vpop.f32.mrb[130].mxu1  ;;  %v2358_v37 = vpop.f32.mrb[130].mxu0 }
 0x1ec   : > { %v2071_v62 = vadd.f32 %v1883_v59, %v8077_v11  ;;  %v8508_v42 = vadd.f32 %v2358_v37, %v2070_v7  ;;  %v6500_v15 = vpop.f32.mrb[131].mxu0  ;;  %6663 = vmatmul.mubr.msk.f32.gmra.mrb[236].mxu1 %vm354_vm2, %v3082_v48  ;;  %6785 = vmatmul.mubr.msk.f32.gmra.mrb[236].mxu0 %vm354_vm2, %v3083_v3  ;;  %v6378_v49 = vpop.f32.mrb[131].mxu1  ;;  %v3087_v37 = vld [vmem:[%s7204_s28 + $0xc1] sm:$0xff] }
 0x1ed   : > { %6665 = vmatprep.mubr.msk.f32.mxu1 %vm7138_vm1, %v7137_v1  ;;  %6787 = vmatprep.mubr.msk.f32.mxu0 %vm7138_vm1, %v7137_v1 }
 0x1ef   : > { %v1888_v54 = vpop.f32.mrb[132].mxu1  ;;  %v2363_v2 = vpop.f32.mrb[132].mxu0 }
 0x1f0   : > { %v2072_v11 = vadd.f32 %v1888_v54, %v8088_v12  ;;  %v8518_v43 = vadd.f32 %v2363_v2, %v2071_v62  ;;  %v6503_v52 = vpop.f32.mrb[133].mxu0  ;;  %6666 = vmatmul.mubr.msk.f32.gmra.mrb[238].mxu1 %vm354_vm2, %v3083_v3  ;;  %6788 = vmatmul.mubr.msk.f32.gmra.mrb[238].mxu0 %vm354_vm2, %v3084_v61  ;;  %v6381_v21 = vpop.f32.mrb[133].mxu1  ;;  %v3088_v2 = vld [vmem:[%s7204_s28 + $0xc9] sm:$0xff] }
 0x1f1   : > { %6668 = vmatprep.mubr.msk.f32.mxu1 %vm7138_vm1, %v7137_v1  ;;  %6790 = vmatprep.mubr.msk.f32.mxu0 %vm7138_vm1, %v7137_v1 }
 0x1f3   : > { %v1893_v31 = vpop.f32.mrb[134].mxu1  ;;  %v2368_v38 = vpop.f32.mrb[134].mxu0 }
 0x1f4   : > { %v2073_v12 = vadd.f32 %v1893_v31, %v8099_v6  ;;  %v8528_v0 = vadd.f32 %v2368_v38, %v2072_v11  ;;  %v6506_v48 = vpop.f32.mrb[135].mxu0  ;;  %6669 = vmatmul.mubr.msk.f32.gmra.mrb[240].mxu1 %vm354_vm2, %v3084_v61  ;;  %6791 = vmatmul.mubr.msk.f32.gmra.mrb[240].mxu0 %vm354_vm2, %v3085_v46  ;;  %v6384_v39 = vpop.f32.mrb[135].mxu1  ;;  %v3089_v38 = vld [vmem:[%s7204_s28 + $0xd1] sm:$0xff] }
 0x1f5   : > { %6671 = vmatprep.mubr.msk.f32.mxu1 %vm7138_vm1, %v7137_v1  ;;  %6793 = vmatprep.mubr.msk.f32.mxu0 %vm7138_vm1, %v7137_v1 }
 0x1f7   : > { %v1898_v7 = vpop.f32.mrb[136].mxu1  ;;  %v2373_v25 = vpop.f32.mrb[136].mxu0 }
 0x1f8   : > { %v2074_v6 = vadd.f32 %v1898_v7, %v8110_v14  ;;  %v8538_v53 = vadd.f32 %v2373_v25, %v2073_v12  ;;  %v6509_v3 = vpop.f32.mrb[137].mxu0  ;;  %6672 = vmatmul.mubr.msk.f32.gmra.mrb[242].mxu1 %vm354_vm2, %v3085_v46  ;;  %6794 = vmatmul.mubr.msk.f32.gmra.mrb[242].mxu0 %vm354_vm2, %v3086_v32  ;;  %v6387_v59 = vpop.f32.mrb[137].mxu1  ;;  %v3090_v25 = vld [vmem:[%s7204_s28 + $0xd9] sm:$0xff] }
 0x1f9   : > { %6674 = vmatprep.mubr.msk.f32.mxu1 %vm7138_vm1, %v7137_v1  ;;  %6796 = vmatprep.mubr.msk.f32.mxu0 %vm7138_vm1, %v7137_v1 }
 0x1fb   : > { %v1903_v62 = vpop.f32.mrb[138].mxu1  ;;  %v2378_v15 = vpop.f32.mrb[138].mxu0 }
 0x1fc   : > { %v2075_v14 = vadd.f32 %v1903_v62, %v8121_v24  ;;  %v8548_v49 = vadd.f32 %v2378_v15, %v2074_v6  ;;  %v6512_v61 = vpop.f32.mrb[139].mxu0  ;;  %6675 = vmatmul.mubr.msk.f32.gmra.mrb[244].mxu1 %vm354_vm2, %v3086_v32  ;;  %6797 = vmatmul.mubr.msk.f32.gmra.mrb[244].mxu0 %vm354_vm2, %v3087_v37  ;;  %v6390_v54 = vpop.f32.mrb[139].mxu1  ;;  %v3091_v15 = vld [vmem:[%s7204_s28 + $0xe1] sm:$0xff] }
 0x1fd   : > { %6677 = vmatprep.mubr.msk.f32.mxu1 %vm7138_vm1, %v7137_v1  ;;  %6799 = vmatprep.mubr.msk.f32.mxu0 %vm7138_vm1, %v7137_v1 }
 0x1ff   : > { %v1908_v11 = vpop.f32.mrb[140].mxu1  ;;  %v2383_v52 = vpop.f32.mrb[140].mxu0 }
 0x200   : > { %v2076_v24 = vadd.f32 %v1908_v11, %v8132_v16  ;;  %v8558_v21 = vadd.f32 %v2383_v52, %v2075_v14  ;;  %v6515_v46 = vpop.f32.mrb[141].mxu0  ;;  %6678 = vmatmul.mubr.msk.f32.gmra.mrb[246].mxu1 %vm354_vm2, %v3087_v37  ;;  %6800 = vmatmul.mubr.msk.f32.gmra.mrb[246].mxu0 %vm354_vm2, %v3088_v2  ;;  %v6393_v31 = vpop.f32.mrb[141].mxu1  ;;  %v3092_v52 = vld [vmem:[%s7204_s28 + $0xe9] sm:$0xff] }
 0x201   : > { %6680 = vmatprep.mubr.msk.f32.mxu1 %vm7138_vm1, %v7137_v1  ;;  %6802 = vmatprep.mubr.msk.f32.mxu0 %vm7138_vm1, %v7137_v1 }
 0x203   : > { %v1913_v12 = vpop.f32.mrb[142].mxu1  ;;  %v2388_v48 = vpop.f32.mrb[142].mxu0 }
 0x204   : > { %v2077_v16 = vadd.f32 %v1913_v12, %v8143_v29  ;;  %v8568_v39 = vadd.f32 %v2388_v48, %v2076_v24  ;;  %v6518_v32 = vpop.f32.mrb[143].mxu0  ;;  %6681 = vmatmul.mubr.msk.f32.gmra.mrb[248].mxu1 %vm354_vm2, %v3088_v2  ;;  %6803 = vmatmul.mubr.msk.f32.gmra.mrb[248].mxu0 %vm354_vm2, %v3089_v38  ;;  %v6396_v7 = vpop.f32.mrb[143].mxu1  ;;  %v3093_v48 = vld [vmem:[%s7204_s28 + $0xf1] sm:$0xff] }
 0x205   : > { %6683 = vmatprep.mubr.msk.f32.mxu1 %vm7138_vm1, %v7137_v1  ;;  %6805 = vmatprep.mubr.msk.f32.mxu0 %vm7138_vm1, %v7137_v1 }
 0x207   : > { %v1918_v6 = vpop.f32.mrb[144].mxu1  ;;  %v2393_v3 = vpop.f32.mrb[144].mxu0 }
 0x208   : > { %v2078_v29 = vadd.f32 %v1918_v6, %v8154_v47  ;;  %v8578_v59 = vadd.f32 %v2393_v3, %v2077_v16  ;;  %v6521_v37 = vpop.f32.mrb[145].mxu0  ;;  %6684 = vmatmul.mubr.msk.f32.gmra.mrb[250].mxu1 %vm354_vm2, %v3089_v38  ;;  %6806 = vmatmul.mubr.msk.f32.gmra.mrb[250].mxu0 %vm354_vm2, %v3090_v25  ;;  %v6399_v62 = vpop.f32.mrb[145].mxu1  ;;  %v3094_v3 = vld [vmem:[%s7204_s28 + $0xf9] sm:$0xff] }
 0x209   : > { %6686 = vmatprep.mubr.msk.f32.mxu1 %vm7138_vm1, %v7137_v1  ;;  %6808 = vmatprep.mubr.msk.f32.mxu0 %vm7138_vm1, %v7137_v1 }
 0x20b   : > { %v1923_v14 = vpop.f32.mrb[146].mxu1  ;;  %v2398_v61 = vpop.f32.mrb[146].mxu0 }
 0x20c   : > { %v2079_v47 = vadd.f32 %v1923_v14, %v8165_v10  ;;  %v8588_v54 = vadd.f32 %v2398_v61, %v2078_v29  ;;  %v6524_v2 = vpop.f32.mrb[147].mxu0  ;;  %6687 = vmatmul.mubr.msk.f32.gmra.mrb[252].mxu1 %vm354_vm2, %v3090_v25  ;;  %6809 = vmatmul.mubr.msk.f32.gmra.mrb[252].mxu0 %vm354_vm2, %v3091_v15  ;;  %v6402_v11 = vpop.f32.mrb[147].mxu1  ;;  %v3095_v61 = vld [vmem:[%s7204_s28 + $0x101] sm:$0xff] }
 0x20d   : > { %6689 = vmatprep.mubr.msk.f32.mxu1 %vm7138_vm1, %v7137_v1  ;;  %6811 = vmatprep.mubr.msk.f32.mxu0 %vm7138_vm1, %v7137_v1 }
 0x20f   : > { %v1928_v24 = vpop.f32.mrb[148].mxu1  ;;  %v2403_v46 = vpop.f32.mrb[148].mxu0 }
 0x210   : > { %v2080_v10 = vadd.f32 %v1928_v24, %v8176_v26  ;;  %v8598_v31 = vadd.f32 %v2403_v46, %v2079_v47  ;;  %v6527_v38 = vpop.f32.mrb[149].mxu0  ;;  %6690 = vmatmul.mubr.msk.f32.gmra.mrb[254].mxu1 %vm354_vm2, %v3091_v15  ;;  %6812 = vmatmul.mubr.msk.f32.gmra.mrb[254].mxu0 %vm354_vm2, %v3092_v52  ;;  %v6405_v12 = vpop.f32.mrb[149].mxu1  ;;  %v3096_v46 = vld [vmem:[%s7204_s28 + $0x109] sm:$0xff] }
 0x211   : > { %6692 = vmatprep.mubr.msk.f32.mxu1 %vm7138_vm1, %v7137_v1  ;;  %6814 = vmatprep.mubr.msk.f32.mxu0 %vm7138_vm1, %v7137_v1 }
 0x213   : > { %v1933_v16 = vpop.f32.mrb[150].mxu1  ;;  %v2408_v32 = vpop.f32.mrb[150].mxu0 }
 0x214   : > { %v2081_v26 = vadd.f32 %v1933_v16, %v8187_v34  ;;  %v8608_v7 = vadd.f32 %v2408_v32, %v2080_v10  ;;  %v6530_v25 = vpop.f32.mrb[151].mxu0  ;;  %6693 = vmatmul.mubr.msk.f32.gmra.mrb[0].mxu1 %vm354_vm2, %v3092_v52  ;;  %6815 = vmatmul.mubr.msk.f32.gmra.mrb[0].mxu0 %vm354_vm2, %v3093_v48  ;;  %v6408_v6 = vpop.f32.mrb[151].mxu1  ;;  %v3097_v32 = vld [vmem:[%s7204_s28 + $0x111] sm:$0xff] }
 0x215   : > { %6695 = vmatprep.mubr.msk.f32.mxu1 %vm7138_vm1, %v7137_v1  ;;  %6817 = vmatprep.mubr.msk.f32.mxu0 %vm7138_vm1, %v7137_v1 }
 0x217   : > { %v1938_v29 = vpop.f32.mrb[152].mxu1  ;;  %v2413_v37 = vpop.f32.mrb[152].mxu0 }
 0x218   : > { %v2082_v34 = vadd.f32 %v1938_v29, %v8198_v8  ;;  %v8618_v62 = vadd.f32 %v2413_v37, %v2081_v26  ;;  %v6533_v15 = vpop.f32.mrb[153].mxu0  ;;  %6696 = vmatmul.mubr.msk.f32.gmra.mrb[2].mxu1 %vm354_vm2, %v3093_v48  ;;  %6818 = vmatmul.mubr.msk.f32.gmra.mrb[2].mxu0 %vm354_vm2, %v3094_v3  ;;  %v6411_v14 = vpop.f32.mrb[153].mxu1  ;;  %v3098_v37 = vld [vmem:[%s7204_s28 + $0x119] sm:$0xff] }
 0x219   : > { %6698 = vmatprep.mubr.msk.f32.mxu1 %vm7138_vm1, %v7137_v1  ;;  %6820 = vmatprep.mubr.msk.f32.mxu0 %vm7138_vm1, %v7137_v1 }
 0x21b   : > { %v1943_v47 = vpop.f32.mrb[154].mxu1  ;;  %v2418_v2 = vpop.f32.mrb[154].mxu0 }
 0x21c   : > { %v2083_v8 = vadd.f32 %v1943_v47, %v8209_v55  ;;  %v8628_v11 = vadd.f32 %v2418_v2, %v2082_v34  ;;  %v6536_v52 = vpop.f32.mrb[155].mxu0  ;;  %6699 = vmatmul.mubr.msk.f32.gmra.mrb[4].mxu1 %vm354_vm2, %v3094_v3  ;;  %6821 = vmatmul.mubr.msk.f32.gmra.mrb[4].mxu0 %vm354_vm2, %v3095_v61  ;;  %v6414_v24 = vpop.f32.mrb[155].mxu1  ;;  %v4556_v2 = vld [vmem:[%s9663_s3] sm:$0xff] }
 0x21d   : > { %6701 = vmatprep.mubr.msk.f32.mxu1 %vm7138_vm1, %v7137_v1  ;;  %6823 = vmatprep.mubr.msk.f32.mxu0 %vm7138_vm1, %v7137_v1 }
 0x21f   : > { %v1948_v10 = vpop.f32.mrb[156].mxu1  ;;  %v2423_v38 = vpop.f32.mrb[156].mxu0 }
 0x220   : > { %v2084_v55 = vadd.f32 %v1948_v10, %v8220_v5  ;;  %v8638_v12 = vadd.f32 %v2423_v38, %v2083_v8  ;;  %v6539_v48 = vpop.f32.mrb[157].mxu0  ;;  %6702 = vmatmul.mubr.msk.f32.gmra.mrb[6].mxu1 %vm354_vm2, %v3095_v61  ;;  %6824 = vmatmul.mubr.msk.f32.gmra.mrb[6].mxu0 %vm354_vm2, %v3096_v46  ;;  %v6417_v16 = vpop.f32.mrb[157].mxu1  ;;  %v3099_v8 = vld [vmem:[%s7204_s28 + $0x121] sm:$0xff] }
 0x221   : > { %6704 = vmatprep.mubr.msk.f32.mxu1 %vm7138_vm1, %v7137_v1  ;;  %6826 = vmatprep.mubr.msk.f32.mxu0 %vm7138_vm1, %v7137_v1  ;;  %v4557_v48 = vld [vmem:[%s9663_s3 + $0x8] sm:$0xff] }
 0x223   : > { %v1953_v26 = vpop.f32.mrb[158].mxu1  ;;  %v2428_v25 = vpop.f32.mrb[158].mxu0 }
 0x224   : > { %v2085_v5 = vadd.f32 %v1953_v26, %v8231_v35  ;;  %v8648_v6 = vadd.f32 %v2428_v25, %v2084_v55  ;;  %v6542_v3 = vpop.f32.mrb[159].mxu0  ;;  %6705 = vmatmul.mubr.msk.f32.gmra.mrb[8].mxu1 %vm354_vm2, %v3096_v46  ;;  %6827 = vmatmul.mubr.msk.f32.gmra.mrb[8].mxu0 %vm354_vm2, %v3097_v32  ;;  %v6420_v29 = vpop.f32.mrb[159].mxu1 }
 0x225   : > { %6707 = vmatprep.mubr.msk.f32.mxu1 %vm7138_vm1, %v7137_v1  ;;  %6829 = vmatprep.mubr.msk.f32.mxu0 %vm7138_vm1, %v7137_v1  ;;  %v4558_v29 = vld [vmem:[%s9663_s3 + $0x10] sm:$0xff] }
 0x227   : > { %v1958_v34 = vpop.f32.mrb[160].mxu1  ;;  %v2433_v15 = vpop.f32.mrb[160].mxu0 }
 0x228   : > { %v2086_v35 = vadd.f32 %v1958_v34, %v8242_v22  ;;  %v8658_v14 = vadd.f32 %v2433_v15, %v2085_v5  ;;  %v6545_v61 = vpop.f32.mrb[161].mxu0  ;;  %6708 = vmatmul.mubr.msk.f32.gmra.mrb[10].mxu1 %vm354_vm2, %v3097_v32  ;;  %6830 = vmatmul.mubr.msk.f32.gmra.mrb[10].mxu0 %vm354_vm2, %v3098_v37  ;;  %v6423_v47 = vpop.f32.mrb[161].mxu1  ;;  %v7139_v22 = vmov 0  }
 0x229   : > { %6710 = vmatprep.mubr.msk.f32.mxu1 %vm7138_vm1, %v7137_v1  ;;  %6832 = vmatprep.mubr.msk.f32.mxu0 %vm7138_vm1, %v7137_v1 }
 0x22a   : > { %7126 = vset.pattern.permute.xlu0 %v7139_v22  ;;  %7127 = vset.pattern.permute.xlu1 %v7139_v22  ;;  %v4562_v22 = vld [vmem:[%s9663_s3 + $0x30] sm:$0xff] }
 0x22b   : > { %v1963_v52 = vpop.f32.mrb[162].mxu1  ;;  %v2438_v24 = vpop.f32.mrb[162].mxu0  ;;  %4599 = vperm.xlu0 %7126, %v4556_v2   ;;  %4609 = vperm.xlu1 %7127, %v4558_v29  }
 0x22c   : > { %v2087_v46 = vadd.f32 %v1963_v52, %v8253_v44  ;;  %v8671_v10 = vadd.f32 %v2438_v24, %v2086_v35  ;;  %v6548_v38 = vpop.f32.mrb[163].mxu0  ;;  %6711 = vmatmul.mubr.msk.f32.gmra.mrb[12].mxu1 %vm354_vm2, %v3098_v37  ;;  %6833 = vmatmul.mubr.msk.f32.gmra.mrb[12].mxu0 %vm354_vm2, %v3099_v8  ;;  %v6426_v55 = vpop.f32.mrb[163].mxu1  ;;  %v3100_v44 = vld [vmem:[%s7204_s28 + $0x129] sm:$0xff]  ;;  %v4560_v37 = vld [vmem:[%s9663_s3 + $0x20] sm:$0xff] }
 0x22d   : > { %6713 = vmatprep.mubr.msk.f32.mxu1 %vm7138_vm1, %v7137_v1  ;;  %6835 = vmatprep.mubr.msk.f32.mxu0 %vm7138_vm1, %v7137_v1 }
 0x22f   : > { %v1968_v16 = vpop.f32.mrb[164].mxu1  ;;  %v2443_v32 = vpop.f32.mrb[164].mxu0  ;;  %4604 = vperm.xlu0 %7126, %v4557_v48  }
 0x230   : > { %v2088_v26 = vadd.f32 %v1968_v16, %v8264_v30  ;;  %v8684_v25 = vadd.f32 %v2443_v32, %v2087_v46  ;;  %v6551_v5 = vpop.f32.mrb[165].mxu0  ;;  %6714 = vmatmul.mubr.msk.f32.gmra.mrb[14].mxu1 %vm354_vm2, %v3099_v8  ;;  %6836 = vmatmul.mubr.msk.f32.gmra.mrb[14].mxu0 %vm354_vm2, %v3100_v44  ;;  %v6429_v3 = vpop.f32.mrb[165].mxu1  ;;  %v3101_v30 = vld [vmem:[%s7204_s28 + $0x131] sm:$0xff]  ;;  %v4564_v16 = vld [vmem:[%s9663_s3 + $0x40] sm:$0xff] }
 0x231   : > { %6716 = vmatprep.mubr.msk.f32.mxu1 %vm7138_vm1, %v7137_v1  ;;  %6838 = vmatprep.mubr.msk.f32.mxu0 %vm7138_vm1, %v7137_v1  ;;  %v4559_v8 = vld [vmem:[%s9663_s3 + $0x18] sm:$0xff] }
 0x232   : > { %4614 = vperm.xlu1 %7127, %v4559_v8  }
 0x233   : > { %v1973_v34 = vpop.f32.mrb[166].mxu1  ;;  %v2448_v15 = vpop.f32.mrb[166].mxu0  ;;  %4619 = vperm.xlu0 %7126, %v4560_v37  }
 0x234   : > { %v2089_v35 = vadd.f32 %v1973_v34, %v8275_v19  ;;  %v8700_v61 = vadd.f32 %v2448_v15, %v2088_v26  ;;  %v6554_v47 = vpop.f32.mrb[167].mxu0  ;;  %6717 = vmatmul.mubr.msk.f32.gmra.mrb[16].mxu1 %vm354_vm2, %v3100_v44  ;;  %6839 = vmatmul.mubr.msk.f32.gmra.mrb[16].mxu0 %vm354_vm2, %v3101_v30  ;;  %v6432_v2 = vpop.f32.mrb[167].mxu1  ;;  %v3102_v19 = vld [vmem:[%s7204_s28 + $0x139] sm:$0xff]  ;;  %v4561_v44 = vld [vmem:[%s9663_s3 + $0x28] sm:$0xff]  ;;  %v4566_v34 = vld [vmem:[%s9663_s3 + $0x50] sm:$0xff] }
 0x235   : > { %6719 = vmatprep.mubr.msk.f32.mxu1 %vm7138_vm1, %v7137_v1  ;;  %6841 = vmatprep.mubr.msk.f32.mxu0 %vm7138_vm1, %v7137_v1 }
 0x236   : > { %4624 = vperm.xlu1 %7127, %v4561_v44  }
 0x237   : > { %v1978_v52 = vpop.f32.mrb[168].mxu1  ;;  %v2453_v24 = vpop.f32.mrb[168].mxu0  ;;  %4629 = vperm.xlu0 %7126, %v4562_v22  }
 0x238   : > { %v2090_v46 = vadd.f32 %v1978_v52, %v8286_v40  ;;  %v8716_v38 = vadd.f32 %v2453_v24, %v2089_v35  ;;  %v6557_v55 = vpop.f32.mrb[169].mxu0  ;;  %6720 = vmatmul.mubr.msk.f32.gmra.mrb[18].mxu1 %vm354_vm2, %v3101_v30  ;;  %6842 = vmatmul.mubr.msk.f32.gmra.mrb[18].mxu0 %vm354_vm2, %v3102_v19  ;;  %v6435_v48 = vpop.f32.mrb[169].mxu1  ;;  %v3103_v40 = vld [vmem:[%s7204_s28 + $0x141] sm:$0xff]  ;;  %v4563_v30 = vld [vmem:[%s9663_s3 + $0x38] sm:$0xff] }
 0x239   : > { %6722 = vmatprep.mubr.msk.f32.mxu1 %vm7138_vm1, %v7137_v1  ;;  %6844 = vmatprep.mubr.msk.f32.mxu0 %vm7138_vm1, %v7137_v1  ;;  %v4568_v52 = vld [vmem:[%s9663_s3 + $0x60] sm:$0xff] }
 0x23a   : > { %4634 = vperm.xlu1 %7127, %v4563_v30  }
 0x23b   : > { %v1983_v32 = vpop.f32.mrb[170].mxu1  ;;  %v2458_v26 = vpop.f32.mrb[170].mxu0  ;;  %4639 = vperm.xlu0 %7126, %v4564_v16  }
 0x23c   : > { %v2091_v5 = vadd.f32 %v1983_v32, %v8297_v17  ;;  %v8732_v3 = vadd.f32 %v2458_v26, %v2090_v46  ;;  %v6560_v29 = vpop.f32.mrb[171].mxu0  ;;  %6723 = vmatmul.mubr.msk.f32.gmra.mrb[20].mxu1 %vm354_vm2, %v3102_v19  ;;  %6845 = vmatmul.mubr.msk.f32.gmra.mrb[20].mxu0 %vm354_vm2, %v3103_v40  ;;  %v6438_v37 = vpop.f32.mrb[171].mxu1  ;;  %v3104_v17 = vld [vmem:[%s7204_s28 + $0x149] sm:$0xff] }
 0x23d   : > { %6725 = vmatprep.mubr.msk.f32.mxu1 %vm7138_vm1, %v7137_v1  ;;  %6847 = vmatprep.mubr.msk.f32.mxu0 %vm7138_vm1, %v7137_v1  ;;  %v4565_v19 = vld [vmem:[%s9663_s3 + $0x48] sm:$0xff]  ;;  %v4570_v32 = vld [vmem:[%s9663_s3 + $0x70] sm:$0xff] }
 0x23e   : > { %4644 = vperm.xlu1 %7127, %v4565_v19  }
 0x23f   : > { %v1988_v15 = vpop.f32.mrb[172].mxu1  ;;  %v2463_v35 = vpop.f32.mrb[172].mxu0  ;;  %4649 = vperm.xlu0 %7126, %v4566_v34  }
 0x240   : > { %v2092_v47 = vadd.f32 %v1988_v15, %v8308_v28  ;;  %v8748_v2 = vadd.f32 %v2463_v35, %v2091_v5  ;;  %v6563_v8 = vpop.f32.mrb[173].mxu0  ;;  %6726 = vmatmul.mubr.msk.f32.gmra.mrb[22].mxu1 %vm354_vm2, %v3103_v40  ;;  %6848 = vmatmul.mubr.msk.f32.gmra.mrb[22].mxu0 %vm354_vm2, %v3104_v17  ;;  %v6441_v22 = vpop.f32.mrb[173].mxu1  ;;  %v3105_v28 = vld [vmem:[%s7204_s28 + $0x151] sm:$0xff]  ;;  %v4572_v15 = vld [vmem:[%s9663_s3 + $0x80] sm:$0xff] }
 0x241   : > { %6728 = vmatprep.mubr.msk.f32.mxu1 %vm7138_vm1, %v7137_v1  ;;  %6850 = vmatprep.mubr.msk.f32.mxu0 %vm7138_vm1, %v7137_v1  ;;  %v4567_v40 = vld [vmem:[%s9663_s3 + $0x58] sm:$0xff] }
 0x242   : > { %4654 = vperm.xlu1 %7127, %v4567_v40  }
 0x243   : > { %v1993_v24 = vpop.f32.mrb[174].mxu1  ;;  %v2468_v46 = vpop.f32.mrb[174].mxu0  ;;  %4659 = vperm.xlu0 %7126, %v4568_v52  }
 0x244   : > { %v2093_v55 = vadd.f32 %v1993_v24, %v8319_v56  ;;  %v8764_v48 = vadd.f32 %v2468_v46, %v2092_v47  ;;  %v6566_v44 = vpop.f32.mrb[175].mxu0  ;;  %6729 = vmatmul.mubr.msk.f32.gmra.mrb[24].mxu1 %vm354_vm2, %v3104_v17  ;;  %6851 = vmatmul.mubr.msk.f32.gmra.mrb[24].mxu0 %vm354_vm2, %v3105_v28  ;;  %v6444_v16 = vpop.f32.mrb[175].mxu1  ;;  %v3106_v56 = vld [vmem:[%s7204_s28 + $0x159] sm:$0xff]  ;;  %v4569_v17 = vld [vmem:[%s9663_s3 + $0x68] sm:$0xff]  ;;  %v4574_v24 = vld [vmem:[%s9663_s3 + $0x90] sm:$0xff] }
 0x245   : > { %6731 = vmatprep.mubr.msk.f32.mxu1 %vm7138_vm1, %v7137_v1  ;;  %6853 = vmatprep.mubr.msk.f32.mxu0 %vm7138_vm1, %v7137_v1  ;;  %v3548_v46 = vld [vmem:[%s7204_s28 + $0x2a] sm:$0xff] }
 0x246   : > { %4664 = vperm.xlu1 %7127, %v4569_v17  }
 0x247   : > { %v1998_v26 = vpop.f32.mrb[176].mxu1  ;;  %v2473_v5 = vpop.f32.mrb[176].mxu0  ;;  %4669 = vperm.xlu0 %7126, %v4570_v32  }
 0x248   : > { %v2094_v29 = vadd.f32 %v1998_v26, %v8330_v20  ;;  %v8780_v37 = vadd.f32 %v2473_v5, %v2093_v55  ;;  %v6569_v30 = vpop.f32.mrb[177].mxu0  ;;  %6732 = vmatmul.mubr.msk.f32.gmra.mrb[26].mxu1 %vm354_vm2, %v3105_v28  ;;  %6854 = vmatmul.mubr.msk.f32.gmra.mrb[26].mxu0 %vm354_vm2, %v3106_v56  ;;  %v6447_v34 = vpop.f32.mrb[177].mxu1  ;;  %v3107_v20 = vld [vmem:[%s7204_s28 + $0x161] sm:$0xff]  ;;  %v4571_v28 = vld [vmem:[%s9663_s3 + $0x78] sm:$0xff] }
 0x249   : > { %6734 = vmatprep.mubr.msk.f32.mxu1 %vm7138_vm1, %v7137_v1  ;;  %6856 = vmatprep.mubr.msk.f32.mxu0 %vm7138_vm1, %v7137_v1  ;;  %v4573_v26 = vld [vmem:[%s9663_s3 + $0x88] sm:$0xff]  ;;  %v4576_v5 = vld [vmem:[%s9663_s3 + $0xa0] sm:$0xff] }
 0x24a   : > { %4674 = vperm.xlu1 %7127, %v4571_v28  }
 0x24b   : > { %v2003_v35 = vpop.f32.mrb[178].mxu1  ;;  %v2478_v47 = vpop.f32.mrb[178].mxu0  ;;  %4679 = vperm.xlu0 %7126, %v4572_v15  }
 0x24c   : > { %v2095_v8 = vadd.f32 %v2003_v35, %v8344_v50  ;;  %v8796_v22 = vadd.f32 %v2478_v47, %v2094_v29  ;;  %v6572_v19 = vpop.f32.mrb[179].mxu0  ;;  %6735 = vmatmul.mubr.msk.f32.gmra.mrb[28].mxu1 %vm354_vm2, %v3106_v56  ;;  %6857 = vmatmul.mubr.msk.f32.gmra.mrb[28].mxu0 %vm354_vm2, %v3107_v20  ;;  %v6450_v52 = vpop.f32.mrb[179].mxu1  ;;  %v3108_v50 = vld [vmem:[%s7204_s28 + $0x169] sm:$0xff]  ;;  %v4575_v47 = vld [vmem:[%s9663_s3 + $0x98] sm:$0xff] }
 0x24d   : > { %6859 = vmatprep.mubr.msk.f32.mxu0 %vm7138_vm1, %v7137_v1  ;;  %6864 = vmatprep.mubr.msk.f32.mxu1 %vm7138_vm1, %v7137_v1  ;;  %v4028_v29 = vld [vmem:[%s7204_s28 + $0x2b] sm:$0xff]  ;;  %v4029_v19 = vld [vmem:[%s7204_s28 + $0x33] sm:$0xff] }
 0x24e   : > { %4684 = vperm.xlu1 %7127, %v4573_v26  }
 0x24f   : > { %v2008_v55 = vpop.f32.mrb[180].mxu1  ;;  %v2483_v44 = vpop.f32.mrb[180].mxu0  ;;  %4689 = vperm.xlu0 %7126, %v4574_v24  }
 0x250   : > { %v2096_v16 = vadd.f32 %v2008_v55, %v8359_v18  ;;  %v8813_v40 = vadd.f32 %v2483_v44, %v2095_v8  ;;  %v6575_v32 = vpop.f32.mrb[181].mxu0  ;;  %6860 = vmatmul.mubr.msk.f32.gmra.mrb[30].mxu0 %vm354_vm2, %v3108_v50  ;;  %6865 = vmatmul.mubr.msk.f32.vlgmr.msra.gmra.mrb[30].mxu1 %vm354_vm2, %v3548_v46  ;;  %v6453_v56 = vpop.f32.mrb[181].mxu1  ;;  %v3549_v18 = vld [vmem:[%s7204_s28 + $0x32] sm:$0xff]  ;;  %v4577_v44 = vld [vmem:[%s9663_s3 + $0xa8] sm:$0xff] }
 0x251   : > { %6867 = vmatprep.mubr.msk.f32.mxu1 %vm7138_vm1, %v7137_v1  ;;  %6989 = vmatprep.mubr.msk.f32.mxu0 %vm7138_vm1, %v7137_v1  ;;  %v4578_v8 = vld [vmem:[%s9663_s3 + $0xb0] sm:$0xff]  ;;  %v4030_v32 = vld [vmem:[%s7204_s28 + $0x3b] sm:$0xff] }
 0x252   : > { %4694 = vperm.xlu1 %7127, %v4575_v47  }
 0x253   : > { %v2013_v30 = vpop.f32.mrb[182].mxu1  ;;  %v2488_v34 = vpop.f32.mrb[182].mxu0  ;;  %4699 = vperm.xlu0 %7126, %v4576_v5  }
 0x254   : > { %v2097_v17 = vadd.f32 %v2013_v30, %v8370_v4  ;;  %v8830_v15 = vadd.f32 %v2488_v34, %v2096_v16  ;;  %v6578_v20 = vpop.f32.mrb[183].mxu0  ;;  %6868 = vmatmul.mubr.msk.f32.gmra.mrb[32].mxu1 %vm354_vm2, %v3549_v18  ;;  %6990 = vmatmul.mubr.msk.f32.vlgmr.msra.gmra.mrb[32].mxu0 %vm354_vm2, %v4028_v29  ;;  %v6456_v35 = vpop.f32.mrb[183].mxu1  ;;  %v3550_v4 = vld [vmem:[%s7204_s28 + $0x3a] sm:$0xff] }
 0x255   : > { %6870 = vmatprep.mubr.msk.f32.mxu1 %vm7138_vm1, %v7137_v1  ;;  %6992 = vmatprep.mubr.msk.f32.mxu0 %vm7138_vm1, %v7137_v1  ;;  %v4580_v16 = vld [vmem:[%s9663_s3 + $0xc0] sm:$0xff]  ;;  %v4579_v34 = vld [vmem:[%s9663_s3 + $0xb8] sm:$0xff] }
 0x256   : > { %4704 = vperm.xlu1 %7127, %v4577_v44   ;;  %v4031_v20 = vld [vmem:[%s7204_s28 + $0x43] sm:$0xff] }
 0x257   : > { %v2018_v52 = vpop.f32.mrb[184].mxu1  ;;  %v2493_v28 = vpop.f32.mrb[184].mxu0  ;;  %4709 = vperm.xlu0 %7126, %v4578_v8  }
 0x258   : > { %v2098_v24 = vadd.f32 %v2018_v52, %v8380_v33  ;;  %v8847_v50 = vadd.f32 %v2493_v28, %v2097_v17  ;;  %v6581_v46 = vpop.f32.mrb[185].mxu0  ;;  %6871 = vmatmul.mubr.msk.f32.gmra.mrb[34].mxu1 %vm354_vm2, %v3550_v4  ;;  %6993 = vmatmul.mubr.msk.f32.gmra.mrb[34].mxu0 %vm354_vm2, %v4029_v19  ;;  %v6459_v55 = vpop.f32.mrb[185].mxu1  ;;  %v3551_v33 = vld [vmem:[%s7204_s28 + $0x42] sm:$0xff]  ;;  %v4582_v17 = vld [vmem:[%s9663_s3 + $0xd0] sm:$0xff] }
 0x259   : > { %6873 = vmatprep.mubr.msk.f32.mxu1 %vm7138_vm1, %v7137_v1  ;;  %6995 = vmatprep.mubr.msk.f32.mxu0 %vm7138_vm1, %v7137_v1  ;;  %v4581_v28 = vld [vmem:[%s9663_s3 + $0xc8] sm:$0xff] }
 0x25a   : > { %4714 = vperm.xlu1 %7127, %v4579_v34   ;;  %v4032_v46 = vld [vmem:[%s7204_s28 + $0x4b] sm:$0xff] }
 0x25b   : > { %v2023_v56 = vpop.f32.mrb[186].mxu1  ;;  %v2498_v26 = vpop.f32.mrb[186].mxu0  ;;  %4719 = vperm.xlu0 %7126, %v4580_v16  }
 0x25c   : > { %v2099_v5 = vadd.f32 %v2023_v56, %v8390_v63  ;;  %v8864_v18 = vadd.f32 %v2498_v26, %v2098_v24  ;;  %v6584_v29 = vpop.f32.mrb[187].mxu0  ;;  %6874 = vmatmul.mubr.msk.f32.gmra.mrb[36].mxu1 %vm354_vm2, %v3551_v33  ;;  %6996 = vmatmul.mubr.msk.f32.gmra.mrb[36].mxu0 %vm354_vm2, %v4030_v32  ;;  %v6462_v30 = vpop.f32.mrb[187].mxu1  ;;  %v3552_v63 = vld [vmem:[%s7204_s28 + $0x4a] sm:$0xff]  ;;  %v4584_v24 = vld [vmem:[%s9663_s3 + $0xe0] sm:$0xff]  ;;  %v4583_v26 = vld [vmem:[%s9663_s3 + $0xd8] sm:$0xff] }
 0x25d   : > { %6876 = vmatprep.mubr.msk.f32.mxu1 %vm7138_vm1, %v7137_v1  ;;  %6998 = vmatprep.mubr.msk.f32.mxu0 %vm7138_vm1, %v7137_v1  ;;  %v4033_v29 = vld [vmem:[%s7204_s28 + $0x53] sm:$0xff] }
 0x25e   : > { %4724 = vperm.xlu1 %7127, %v4581_v28  }
 0x25f   : > { %v2028_v35 = vpop.f32.mrb[188].mxu1  ;;  %v2503_v47 = vpop.f32.mrb[188].mxu0  ;;  %4729 = vperm.xlu0 %7126, %v4582_v17  }
 0x260   : > { %v2100_v8 = vadd.f32 %v2028_v35, %v8400_v60  ;;  %v8881_v4 = vadd.f32 %v2503_v47, %v2099_v5  ;;  %v6587_v19 = vpop.f32.mrb[189].mxu0  ;;  %6877 = vmatmul.mubr.msk.f32.gmra.mrb[38].mxu1 %vm354_vm2, %v3552_v63  ;;  %6999 = vmatmul.mubr.msk.f32.gmra.mrb[38].mxu0 %vm354_vm2, %v4031_v20  ;;  %v6465_v52 = vpop.f32.mrb[189].mxu1  ;;  %v3553_v60 = vld [vmem:[%s7204_s28 + $0x52] sm:$0xff]  ;;  %v4585_v47 = vld [vmem:[%s9663_s3 + $0xe8] sm:$0xff] }
 0x261   : > { %6879 = vmatprep.mubr.msk.f32.mxu1 %vm7138_vm1, %v7137_v1  ;;  %7001 = vmatprep.mubr.msk.f32.mxu0 %vm7138_vm1, %v7137_v1  ;;  %v4586_v5 = vld [vmem:[%s9663_s3 + $0xf0] sm:$0xff]  ;;  %v4034_v19 = vld [vmem:[%s7204_s28 + $0x5b] sm:$0xff] }
 0x262   : > { %4734 = vperm.xlu1 %7127, %v4583_v26  }
 0x263   : > { %v2033_v55 = vpop.f32.mrb[190].mxu1  ;;  %v2508_v44 = vpop.f32.mrb[190].mxu0  ;;  %4739 = vperm.xlu0 %7126, %v4584_v24  }
 0x264   : > { %v2101_v16 = vadd.f32 %v2033_v55, %v8410_v36  ;;  %v8898_v33 = vadd.f32 %v2508_v44, %v2100_v8  ;;  %v6590_v32 = vpop.f32.mrb[191].mxu0  ;;  %6880 = vmatmul.mubr.msk.f32.gmra.mrb[40].mxu1 %vm354_vm2, %v3553_v60  ;;  %7002 = vmatmul.mubr.msk.f32.gmra.mrb[40].mxu0 %vm354_vm2, %v4032_v46  ;;  %v6468_v56 = vpop.f32.mrb[191].mxu1  ;;  %v3554_v36 = vld [vmem:[%s7204_s28 + $0x5a] sm:$0xff] }
 0x265   : > { %6882 = vmatprep.mubr.msk.f32.mxu1 %vm7138_vm1, %v7137_v1  ;;  %7004 = vmatprep.mubr.msk.f32.mxu0 %vm7138_vm1, %v7137_v1  ;;  %v4588_v8 = vld [vmem:[%s9663_s3 + $0x100] sm:$0xff]  ;;  %v4587_v44 = vld [vmem:[%s9663_s3 + $0xf8] sm:$0xff] }
 0x266   : > { %4744 = vperm.xlu1 %7127, %v4585_v47   ;;  %v4035_v32 = vld [vmem:[%s7204_s28 + $0x63] sm:$0xff] }
 0x267   : > { %v2038_v30 = vpop.f32.mrb[192].mxu1  ;;  %v2513_v34 = vpop.f32.mrb[192].mxu0  ;;  %4749 = vperm.xlu0 %7126, %v4586_v5  }
 0x268   : > { %v2102_v17 = vadd.f32 %v2038_v30, %v8420_v41  ;;  %v8915_v63 = vadd.f32 %v2513_v34, %v2101_v16  ;;  %v6593_v20 = vpop.f32.mrb[193].mxu0  ;;  %6883 = vmatmul.mubr.msk.f32.gmra.mrb[42].mxu1 %vm354_vm2, %v3554_v36  ;;  %7005 = vmatmul.mubr.msk.f32.gmra.mrb[42].mxu0 %vm354_vm2, %v4033_v29  ;;  %v6471_v35 = vpop.f32.mrb[193].mxu1  ;;  %v3555_v41 = vld [vmem:[%s7204_s28 + $0x62] sm:$0xff]  ;;  %v4590_v16 = vld [vmem:[%s9663_s3 + $0x110] sm:$0xff] }
 0x269   : > { %6885 = vmatprep.mubr.msk.f32.mxu1 %vm7138_vm1, %v7137_v1  ;;  %7007 = vmatprep.mubr.msk.f32.mxu0 %vm7138_vm1, %v7137_v1  ;;  %v4589_v34 = vld [vmem:[%s9663_s3 + $0x108] sm:$0xff] }
 0x26a   : > { %4754 = vperm.xlu1 %7127, %v4587_v44   ;;  %v4036_v20 = vld [vmem:[%s7204_s28 + $0x6b] sm:$0xff] }
 0x26b   : > { %v2043_v52 = vpop.f32.mrb[194].mxu1  ;;  %v2518_v28 = vpop.f32.mrb[194].mxu0  ;;  %4759 = vperm.xlu0 %7126, %v4588_v8  }
 0x26c   : > { %v2103_v24 = vadd.f32 %v2043_v52, %v8428_v57  ;;  %v8932_v60 = vadd.f32 %v2518_v28, %v2102_v17  ;;  %v6596_v46 = vpop.f32.mrb[195].mxu0  ;;  %6886 = vmatmul.mubr.msk.f32.gmra.mrb[44].mxu1 %vm354_vm2, %v3555_v41  ;;  %7008 = vmatmul.mubr.msk.f32.gmra.mrb[44].mxu0 %vm354_vm2, %v4034_v19  ;;  %v6474_v55 = vpop.f32.mrb[195].mxu1  ;;  %v3556_v57 = vld [vmem:[%s7204_s28 + $0x6a] sm:$0xff]  ;;  %v4592_v17 = vld [vmem:[%s9663_s3 + $0x120] sm:$0xff]  ;;  %v4591_v28 = vld [vmem:[%s9663_s3 + $0x118] sm:$0xff] }
 0x26d   : > { %6888 = vmatprep.mubr.msk.f32.mxu1 %vm7138_vm1, %v7137_v1  ;;  %7010 = vmatprep.mubr.msk.f32.mxu0 %vm7138_vm1, %v7137_v1  ;;  %v4037_v46 = vld [vmem:[%s7204_s28 + $0x73] sm:$0xff] }
 0x26e   : > { %4764 = vperm.xlu1 %7127, %v4589_v34  }
 0x26f   : > { %v2048_v56 = vpop.f32.mrb[196].mxu1  ;;  %v2523_v26 = vpop.f32.mrb[196].mxu0  ;;  %4769 = vperm.xlu0 %7126, %v4590_v16  }
 0x270   : > { %v2104_v5 = vadd.f32 %v2048_v56, %v8438_v27  ;;  %v8949_v36 = vadd.f32 %v2523_v26, %v2103_v24  ;;  %v6599_v29 = vpop.f32.mrb[197].mxu0  ;;  %6889 = vmatmul.mubr.msk.f32.gmra.mrb[46].mxu1 %vm354_vm2, %v3556_v57  ;;  %7011 = vmatmul.mubr.msk.f32.gmra.mrb[46].mxu0 %vm354_vm2, %v4035_v32  ;;  %v6477_v30 = vpop.f32.mrb[197].mxu1  ;;  %v3557_v27 = vld [vmem:[%s7204_s28 + $0x72] sm:$0xff]  ;;  %v4593_v26 = vld [vmem:[%s9663_s3 + $0x128] sm:$0xff] }
 0x271   : > { %6891 = vmatprep.mubr.msk.f32.mxu1 %vm7138_vm1, %v7137_v1  ;;  %7013 = vmatprep.mubr.msk.f32.mxu0 %vm7138_vm1, %v7137_v1  ;;  %v4594_v24 = vld [vmem:[%s9663_s3 + $0x130] sm:$0xff]  ;;  %v4038_v29 = vld [vmem:[%s7204_s28 + $0x7b] sm:$0xff] }
 0x272   : > { %4774 = vperm.xlu1 %7127, %v4591_v28  }
 0x273   : > { %v2053_v35 = vpop.f32.mrb[198].mxu1  ;;  %v2528_v47 = vpop.f32.mrb[198].mxu0  ;;  %4779 = vperm.xlu0 %7126, %v4592_v17  }
 0x274   : > { %v2105_v8 = vadd.f32 %v2053_v35, %v8448_v58  ;;  %v8966_v41 = vadd.f32 %v2528_v47, %v2104_v5  ;;  %v6602_v19 = vpop.f32.mrb[199].mxu0  ;;  %6892 = vmatmul.mubr.msk.f32.gmra.mrb[48].mxu1 %vm354_vm2, %v3557_v27  ;;  %7014 = vmatmul.mubr.msk.f32.gmra.mrb[48].mxu0 %vm354_vm2, %v4036_v20  ;;  %v6480_v52 = vpop.f32.mrb[199].mxu1  ;;  %v3558_v58 = vld [vmem:[%s7204_s28 + $0x7a] sm:$0xff] }
 0x275   : > { %6894 = vmatprep.mubr.msk.f32.mxu1 %vm7138_vm1, %v7137_v1  ;;  %7016 = vmatprep.mubr.msk.f32.mxu0 %vm7138_vm1, %v7137_v1  ;;  %v4596_v5 = vld [vmem:[%s9663_s3 + $0x140] sm:$0xff]  ;;  %v4595_v47 = vld [vmem:[%s9663_s3 + $0x138] sm:$0xff] }
 0x276   : > { %4784 = vperm.xlu1 %7127, %v4593_v26  }
 0x277   : > { %v2058_v55 = vpop.f32.mrb[200].mxu1  ;;  %v2533_v44 = vpop.f32.mrb[200].mxu0  ;;  %4789 = vperm.xlu0 %7126, %v4594_v24  }
 0x278   : > { %v2106_v16 = vadd.f32 %v2058_v55, %v8458_v13  ;;  %v8983_v57 = vadd.f32 %v2533_v44, %v2105_v8  ;;  %v6605_v32 = vpop.f32.mrb[201].mxu0  ;;  %6895 = vmatmul.mubr.msk.f32.gmra.mrb[50].mxu1 %vm354_vm2, %v3558_v58  ;;  %7017 = vmatmul.mubr.msk.f32.gmra.mrb[50].mxu0 %vm354_vm2, %v4037_v46  ;;  %v6483_v56 = vpop.f32.mrb[201].mxu1  ;;  %v3559_v13 = vld [vmem:[%s7204_s28 + $0x82] sm:$0xff]  ;;  %v3561_v55 = vld [vmem:[%s7204_s28 + $0x92] sm:$0xff] }
 0x279   : > { %6897 = vmatprep.mubr.msk.f32.mxu1 %vm7138_vm1, %v7137_v1  ;;  %7019 = vmatprep.mubr.msk.f32.mxu0 %vm7138_vm1, %v7137_v1  ;;  %v4039_v8 = vld [vmem:[%s7204_s28 + $0x83] sm:$0xff]  ;;  %v4040_v44 = vld [vmem:[%s7204_s28 + $0x8b] sm:$0xff] }
 0x27a   : > { %4794 = vperm.xlu1 %7127, %v4595_v47   ;;  %v3563_v47 = vld [vmem:[%s7204_s28 + $0xa2] sm:$0xff] }
 0x27b   : > { %v2063_v30 = vpop.f32.mrb[202].mxu1  ;;  %v2538_v34 = vpop.f32.mrb[202].mxu0  ;;  %4799 = vperm.xlu0 %7126, %v4596_v5  }
 0x27c   : > { %v2107_v17 = vadd.f32 %v2063_v30, %v8467_v51  ;;  %v9000_v27 = vadd.f32 %v2538_v34, %v2106_v16  ;;  %v6608_v20 = vpop.f32.mrb[203].mxu0  ;;  %6898 = vmatmul.mubr.msk.f32.gmra.mrb[52].mxu1 %vm354_vm2, %v3559_v13  ;;  %7020 = vmatmul.mubr.msk.f32.gmra.mrb[52].mxu0 %vm354_vm2, %v4038_v29  ;;  %v6486_v35 = vpop.f32.mrb[203].mxu1  ;;  %v3560_v51 = vld [vmem:[%s7204_s28 + $0x8a] sm:$0xff]  ;;  %v3562_v13 = vld [vmem:[%s7204_s28 + $0x9a] sm:$0xff] }
 0x27d   : > { %6900 = vmatprep.mubr.msk.f32.mxu1 %vm7138_vm1, %v7137_v1  ;;  %7022 = vmatprep.mubr.msk.f32.mxu0 %vm7138_vm1, %v7137_v1  ;;  %v4041_v29 = vld [vmem:[%s7204_s28 + $0x93] sm:$0xff] }
 0x27f   : > { %v2543_v19 = vpop.f32.mrb[204].mxu0  ;;  %v2823_v52 = vpop.f32.mrb[204].mxu1 }
 0x280   : > { %v9013_v28 = vadd.f32 %v2543_v19, %v2107_v17  ;;  %v3027_v24 = vadd.f32 %v2823_v52, %v8478_v9  ;;  %v6611_v58 = vpop.f32.mrb[205].mxu0  ;;  %6901 = vmatmul.mubr.msk.f32.gmra.mrb[54].mxu1 %vm354_vm2, %v3560_v51  ;;  %7023 = vmatmul.mubr.msk.f32.gmra.mrb[54].mxu0 %vm354_vm2, %v4039_v8  ;;  %v6616_v46 = vpop.f32.mrb[205].mxu1  ;;  %v4042_v51 = vld [vmem:[%s7204_s28 + $0x9b] sm:$0xff] }
 0x281   : > { %6903 = vmatprep.mubr.msk.f32.mxu1 %vm7138_vm1, %v7137_v1  ;;  %7025 = vmatprep.mubr.msk.f32.mxu0 %vm7138_vm1, %v7137_v1  ;;  %v3564_v46 = vld [vmem:[%s7204_s28 + $0xaa] sm:$0xff] }
 0x283   : > { %v2828_v16 = vpop.f32.mrb[206].mxu1  ;;  %v3303_v32 = vpop.f32.mrb[206].mxu0 }
 0x284   : > { %v3028_v9 = vadd.f32 %v2828_v16, %v8488_v23  ;;  %v9025_v56 = vadd.f32 %v3303_v32, %v3027_v24  ;;  %v6741_v26 = vpop.f32.mrb[207].mxu0  ;;  %6904 = vmatmul.mubr.msk.f32.gmra.mrb[56].mxu1 %vm354_vm2, %v3561_v55  ;;  %7026 = vmatmul.mubr.msk.f32.gmra.mrb[56].mxu0 %vm354_vm2, %v4040_v44  ;;  %v6619_v5 = vpop.f32.mrb[207].mxu1  ;;  %v4043_v55 = vld [vmem:[%s7204_s28 + $0xa3] sm:$0xff] }
 0x285   : > { %6906 = vmatprep.mubr.msk.f32.mxu1 %vm7138_vm1, %v7137_v1  ;;  %7028 = vmatprep.mubr.msk.f32.mxu0 %vm7138_vm1, %v7137_v1  ;;  %v3565_v5 = vld [vmem:[%s7204_s28 + $0xb2] sm:$0xff] }
 0x287   : > { %v2833_v30 = vpop.f32.mrb[208].mxu1  ;;  %v3308_v23 = vpop.f32.mrb[208].mxu0 }
 0x288   : > { %v3029_v34 = vadd.f32 %v2833_v30, %v8498_v45  ;;  %v9036_v17 = vadd.f32 %v3308_v23, %v3028_v9  ;;  %v6744_v20 = vpop.f32.mrb[209].mxu0  ;;  %6907 = vmatmul.mubr.msk.f32.gmra.mrb[58].mxu1 %vm354_vm2, %v3562_v13  ;;  %7029 = vmatmul.mubr.msk.f32.gmra.mrb[58].mxu0 %vm354_vm2, %v4041_v29  ;;  %v6622_v35 = vpop.f32.mrb[209].mxu1  ;;  %v4044_v13 = vld [vmem:[%s7204_s28 + $0xab] sm:$0xff] }
 0x289   : > { %6909 = vmatprep.mubr.msk.f32.mxu1 %vm7138_vm1, %v7137_v1  ;;  %7031 = vmatprep.mubr.msk.f32.mxu0 %vm7138_vm1, %v7137_v1  ;;  %v3566_v35 = vld [vmem:[%s7204_s28 + $0xba] sm:$0xff] }
 0x28b   : > { %v2838_v8 = vpop.f32.mrb[210].mxu1  ;;  %v3313_v45 = vpop.f32.mrb[210].mxu0 }
 0x28c   : > { %v3030_v19 = vadd.f32 %v2838_v8, %v8508_v42  ;;  %v9047_v52 = vadd.f32 %v3313_v45, %v3029_v34  ;;  %v6747_v24 = vpop.f32.mrb[211].mxu0  ;;  %6910 = vmatmul.mubr.msk.f32.gmra.mrb[60].mxu1 %vm354_vm2, %v3563_v47  ;;  %7032 = vmatmul.mubr.msk.f32.gmra.mrb[60].mxu0 %vm354_vm2, %v4042_v51  ;;  %v6625_v58 = vpop.f32.mrb[211].mxu1  ;;  %v4045_v47 = vld [vmem:[%s7204_s28 + $0xb3] sm:$0xff] }
 0x28d   : > { %6912 = vmatprep.mubr.msk.f32.mxu1 %vm7138_vm1, %v7137_v1  ;;  %7034 = vmatprep.mubr.msk.f32.mxu0 %vm7138_vm1, %v7137_v1  ;;  %v3567_v58 = vld [vmem:[%s7204_s28 + $0xc2] sm:$0xff] }
 0x28f   : > { %v2843_v44 = vpop.f32.mrb[212].mxu1  ;;  %v3318_v42 = vpop.f32.mrb[212].mxu0 }
 0x290   : > { %v3031_v16 = vadd.f32 %v2843_v44, %v8518_v43  ;;  %v9058_v32 = vadd.f32 %v3318_v42, %v3030_v19  ;;  %v6750_v9 = vpop.f32.mrb[213].mxu0  ;;  %6913 = vmatmul.mubr.msk.f32.gmra.mrb[62].mxu1 %vm354_vm2, %v3564_v46  ;;  %7035 = vmatmul.mubr.msk.f32.gmra.mrb[62].mxu0 %vm354_vm2, %v4043_v55  ;;  %v6628_v26 = vpop.f32.mrb[213].mxu1  ;;  %v4046_v46 = vld [vmem:[%s7204_s28 + $0xbb] sm:$0xff] }
 0x291   : > { %6915 = vmatprep.mubr.msk.f32.mxu1 %vm7138_vm1, %v7137_v1  ;;  %7037 = vmatprep.mubr.msk.f32.mxu0 %vm7138_vm1, %v7137_v1  ;;  %v3568_v26 = vld [vmem:[%s7204_s28 + $0xca] sm:$0xff] }
 0x293   : > { %v2848_v29 = vpop.f32.mrb[214].mxu1  ;;  %v3323_v43 = vpop.f32.mrb[214].mxu0 }
 0x294   : > { %v3032_v30 = vadd.f32 %v2848_v29, %v8528_v0  ;;  %v9069_v23 = vadd.f32 %v3323_v43, %v3031_v16  ;;  %v6753_v34 = vpop.f32.mrb[215].mxu0  ;;  %6916 = vmatmul.mubr.msk.f32.gmra.mrb[64].mxu1 %vm354_vm2, %v3565_v5  ;;  %7038 = vmatmul.mubr.msk.f32.gmra.mrb[64].mxu0 %vm354_vm2, %v4044_v13  ;;  %v6631_v20 = vpop.f32.mrb[215].mxu1  ;;  %v4047_v5 = vld [vmem:[%s7204_s28 + $0xc3] sm:$0xff] }
 0x295   : > { %6918 = vmatprep.mubr.msk.f32.mxu1 %vm7138_vm1, %v7137_v1  ;;  %7040 = vmatprep.mubr.msk.f32.mxu0 %vm7138_vm1, %v7137_v1  ;;  %v3569_v20 = vld [vmem:[%s7204_s28 + $0xd2] sm:$0xff] }
 0x297   : > { %v2853_v51 = vpop.f32.mrb[216].mxu1  ;;  %v3328_v0 = vpop.f32.mrb[216].mxu0 }
 0x298   : > { %v3033_v8 = vadd.f32 %v2853_v51, %v8538_v53  ;;  %v9080_v45 = vadd.f32 %v3328_v0, %v3032_v30  ;;  %v6756_v19 = vpop.f32.mrb[217].mxu0  ;;  %6919 = vmatmul.mubr.msk.f32.gmra.mrb[66].mxu1 %vm354_vm2, %v3566_v35  ;;  %7041 = vmatmul.mubr.msk.f32.gmra.mrb[66].mxu0 %vm354_vm2, %v4045_v47  ;;  %v6634_v24 = vpop.f32.mrb[217].mxu1  ;;  %v4048_v35 = vld [vmem:[%s7204_s28 + $0xcb] sm:$0xff] }
 0x299   : > { %6921 = vmatprep.mubr.msk.f32.mxu1 %vm7138_vm1, %v7137_v1  ;;  %7043 = vmatprep.mubr.msk.f32.mxu0 %vm7138_vm1, %v7137_v1  ;;  %v3570_v24 = vld [vmem:[%s7204_s28 + $0xda] sm:$0xff] }
 0x29b   : > { %v2858_v55 = vpop.f32.mrb[218].mxu1  ;;  %v3333_v53 = vpop.f32.mrb[218].mxu0 }
 0x29c   : > { %v3034_v44 = vadd.f32 %v2858_v55, %v8548_v49  ;;  %v9091_v42 = vadd.f32 %v3333_v53, %v3033_v8  ;;  %v6759_v16 = vpop.f32.mrb[219].mxu0  ;;  %6922 = vmatmul.mubr.msk.f32.gmra.mrb[68].mxu1 %vm354_vm2, %v3567_v58  ;;  %7044 = vmatmul.mubr.msk.f32.gmra.mrb[68].mxu0 %vm354_vm2, %v4046_v46  ;;  %v6637_v9 = vpop.f32.mrb[219].mxu1  ;;  %v4049_v58 = vld [vmem:[%s7204_s28 + $0xd3] sm:$0xff] }
 0x29d   : > { %6924 = vmatprep.mubr.msk.f32.mxu1 %vm7138_vm1, %v7137_v1  ;;  %7046 = vmatprep.mubr.msk.f32.mxu0 %vm7138_vm1, %v7137_v1  ;;  %v4050_v9 = vld [vmem:[%s7204_s28 + $0xdb] sm:$0xff] }
 0x29f   : > { %v2863_v13 = vpop.f32.mrb[220].mxu1  ;;  %v3338_v49 = vpop.f32.mrb[220].mxu0 }
 0x2a0   : > { %v3035_v29 = vadd.f32 %v2863_v13, %v8558_v21  ;;  %v9102_v43 = vadd.f32 %v3338_v49, %v3034_v44  ;;  %v6762_v30 = vpop.f32.mrb[221].mxu0  ;;  %6925 = vmatmul.mubr.msk.f32.gmra.mrb[70].mxu1 %vm354_vm2, %v3568_v26  ;;  %7047 = vmatmul.mubr.msk.f32.gmra.mrb[70].mxu0 %vm354_vm2, %v4047_v5  ;;  %v6640_v34 = vpop.f32.mrb[221].mxu1 }
 0x2a1   : > { %6927 = vmatprep.mubr.msk.f32.mxu1 %vm7138_vm1, %v7137_v1  ;;  %7049 = vmatprep.mubr.msk.f32.mxu0 %vm7138_vm1, %v7137_v1  ;;  %v3572_v34 = vld [vmem:[%s7204_s28 + $0xea] sm:$0xff] }
 0x2a3   : > { %v2868_v47 = vpop.f32.mrb[222].mxu1  ;;  %v3343_v21 = vpop.f32.mrb[222].mxu0 }
 0x2a4   : > { %v3036_v51 = vadd.f32 %v2868_v47, %v8568_v39  ;;  %v9113_v0 = vadd.f32 %v3343_v21, %v3035_v29  ;;  %v6765_v8 = vpop.f32.mrb[223].mxu0  ;;  %6928 = vmatmul.mubr.msk.f32.gmra.mrb[72].mxu1 %vm354_vm2, %v3569_v20  ;;  %7050 = vmatmul.mubr.msk.f32.gmra.mrb[72].mxu0 %vm354_vm2, %v4048_v35  ;;  %v6643_v19 = vpop.f32.mrb[223].mxu1  ;;  %v4051_v20 = vld [vmem:[%s7204_s28 + $0xe3] sm:$0xff] }
 0x2a5   : > { %6930 = vmatprep.mubr.msk.f32.mxu1 %vm7138_vm1, %v7137_v1  ;;  %7052 = vmatprep.mubr.msk.f32.mxu0 %vm7138_vm1, %v7137_v1  ;;  %v3573_v19 = vld [vmem:[%s7204_s28 + $0xf2] sm:$0xff] }
 0x2a7   : > { %v2873_v39 = vpop.f32.mrb[224].mxu1  ;;  %v3348_v46 = vpop.f32.mrb[224].mxu0 }
 0x2a8   : > { %v3037_v55 = vadd.f32 %v2873_v39, %v8578_v59  ;;  %v9124_v53 = vadd.f32 %v3348_v46, %v3036_v51  ;;  %v6768_v44 = vpop.f32.mrb[225].mxu0  ;;  %6931 = vmatmul.mubr.msk.f32.gmra.mrb[74].mxu1 %vm354_vm2, %v3570_v24  ;;  %7053 = vmatmul.mubr.msk.f32.gmra.mrb[74].mxu0 %vm354_vm2, %v4049_v58  ;;  %v6646_v16 = vpop.f32.mrb[225].mxu1  ;;  %v3571_v59 = vld [vmem:[%s7204_s28 + $0xe2] sm:$0xff]  ;;  %v4052_v24 = vld [vmem:[%s7204_s28 + $0xeb] sm:$0xff] }
 0x2a9   : > { %6933 = vmatprep.mubr.msk.f32.mxu1 %vm7138_vm1, %v7137_v1  ;;  %7055 = vmatprep.mubr.msk.f32.mxu0 %vm7138_vm1, %v7137_v1  ;;  %v3574_v16 = vld [vmem:[%s7204_s28 + $0xfa] sm:$0xff] }
 0x2ab   : > { %v2878_v26 = vpop.f32.mrb[226].mxu1  ;;  %v3353_v5 = vpop.f32.mrb[226].mxu0 }
 0x2ac   : > { %v3038_v13 = vadd.f32 %v2878_v26, %v8588_v54  ;;  %v9160_v49 = vadd.f32 %v3353_v5, %v3037_v55  ;;  %v6771_v29 = vpop.f32.mrb[227].mxu0  ;;  %6934 = vmatmul.mubr.msk.f32.gmra.mrb[76].mxu1 %vm354_vm2, %v3571_v59  ;;  %7056 = vmatmul.mubr.msk.f32.gmra.mrb[76].mxu0 %vm354_vm2, %v4050_v9  ;;  %v6649_v30 = vpop.f32.mrb[227].mxu1  ;;  %v4053_v59 = vld [vmem:[%s7204_s28 + $0xf3] sm:$0xff] }
 0x2ad   : > { %6936 = vmatprep.mubr.msk.f32.mxu1 %vm7138_vm1, %v7137_v1  ;;  %7058 = vmatprep.mubr.msk.f32.mxu0 %vm7138_vm1, %v7137_v1  ;;  %v3575_v30 = vld [vmem:[%s7204_s28 + $0x102] sm:$0xff] }
 0x2af   : > { %v2883_v35 = vpop.f32.mrb[228].mxu1  ;;  %v3358_v54 = vpop.f32.mrb[228].mxu0 }
 0x2b0   : > { %v3039_v47 = vadd.f32 %v2883_v35, %v8598_v31  ;;  %v9171_v21 = vadd.f32 %v3358_v54, %v3038_v13  ;;  %v6774_v51 = vpop.f32.mrb[229].mxu0  ;;  %6937 = vmatmul.mubr.msk.f32.gmra.mrb[78].mxu1 %vm354_vm2, %v3572_v34  ;;  %7059 = vmatmul.mubr.msk.f32.gmra.mrb[78].mxu0 %vm354_vm2, %v4051_v20  ;;  %v6652_v8 = vpop.f32.mrb[229].mxu1  ;;  %v4054_v34 = vld [vmem:[%s7204_s28 + $0xfb] sm:$0xff] }
 0x2b1   : > { %6939 = vmatprep.mubr.msk.f32.mxu1 %vm7138_vm1, %v7137_v1  ;;  %7061 = vmatprep.mubr.msk.f32.mxu0 %vm7138_vm1, %v7137_v1  ;;  %v3576_v8 = vld [vmem:[%s7204_s28 + $0x10a] sm:$0xff] }
 0x2b3   : > { %v2888_v58 = vpop.f32.mrb[230].mxu1  ;;  %v3363_v31 = vpop.f32.mrb[230].mxu0 }
 0x2b4   : > { %v3040_v39 = vadd.f32 %v2888_v58, %v8608_v7  ;;  %v9182_v46 = vadd.f32 %v3363_v31, %v3039_v47  ;;  %v6777_v55 = vpop.f32.mrb[231].mxu0  ;;  %6940 = vmatmul.mubr.msk.f32.gmra.mrb[80].mxu1 %vm354_vm2, %v3573_v19  ;;  %7062 = vmatmul.mubr.msk.f32.gmra.mrb[80].mxu0 %vm354_vm2, %v4052_v24  ;;  %v6655_v44 = vpop.f32.mrb[231].mxu1  ;;  %v4055_v19 = vld [vmem:[%s7204_s28 + $0x103] sm:$0xff] }
 0x2b5   : > { %6942 = vmatprep.mubr.msk.f32.mxu1 %vm7138_vm1, %v7137_v1  ;;  %7064 = vmatprep.mubr.msk.f32.mxu0 %vm7138_vm1, %v7137_v1  ;;  %v3577_v44 = vld [vmem:[%s7204_s28 + $0x112] sm:$0xff] }
 0x2b7   : > { %v2893_v9 = vpop.f32.mrb[232].mxu1  ;;  %v3368_v7 = vpop.f32.mrb[232].mxu0 }
 0x2b8   : > { %v3041_v26 = vadd.f32 %v2893_v9, %v8618_v62  ;;  %v9193_v5 = vadd.f32 %v3368_v7, %v3040_v39  ;;  %v6780_v13 = vpop.f32.mrb[233].mxu0  ;;  %6943 = vmatmul.mubr.msk.f32.gmra.mrb[82].mxu1 %vm354_vm2, %v3574_v16  ;;  %7065 = vmatmul.mubr.msk.f32.gmra.mrb[82].mxu0 %vm354_vm2, %v4053_v59  ;;  %v6658_v29 = vpop.f32.mrb[233].mxu1  ;;  %v4056_v16 = vld [vmem:[%s7204_s28 + $0x10b] sm:$0xff] }
 0x2b9   : > { %6945 = vmatprep.mubr.msk.f32.mxu1 %vm7138_vm1, %v7137_v1  ;;  %7067 = vmatprep.mubr.msk.f32.mxu0 %vm7138_vm1, %v7137_v1  ;;  %v3578_v29 = vld [vmem:[%s7204_s28 + $0x11a] sm:$0xff] }
 0x2bb   : > { %v2898_v20 = vpop.f32.mrb[234].mxu1  ;;  %v3373_v62 = vpop.f32.mrb[234].mxu0 }
 0x2bc   : > { %v3042_v35 = vadd.f32 %v2898_v20, %v8628_v11  ;;  %v9204_v54 = vadd.f32 %v3373_v62, %v3041_v26  ;;  %v6783_v47 = vpop.f32.mrb[235].mxu0  ;;  %6946 = vmatmul.mubr.msk.f32.gmra.mrb[84].mxu1 %vm354_vm2, %v3575_v30  ;;  %7068 = vmatmul.mubr.msk.f32.gmra.mrb[84].mxu0 %vm354_vm2, %v4054_v34  ;;  %v6661_v51 = vpop.f32.mrb[235].mxu1  ;;  %v4057_v30 = vld [vmem:[%s7204_s28 + $0x113] sm:$0xff] }
 0x2bd   : > { %6948 = vmatprep.mubr.msk.f32.mxu1 %vm7138_vm1, %v7137_v1  ;;  %7070 = vmatprep.mubr.msk.f32.mxu0 %vm7138_vm1, %v7137_v1  ;;  %v3579_v51 = vld [vmem:[%s7204_s28 + $0x122] sm:$0xff] }
 0x2bf   : > { %v2903_v24 = vpop.f32.mrb[236].mxu1  ;;  %v3378_v11 = vpop.f32.mrb[236].mxu0 }
 0x2c0   : > { %v3043_v58 = vadd.f32 %v2903_v24, %v8638_v12  ;;  %v9215_v31 = vadd.f32 %v3378_v11, %v3042_v35  ;;  %v6786_v39 = vpop.f32.mrb[237].mxu0  ;;  %6949 = vmatmul.mubr.msk.f32.gmra.mrb[86].mxu1 %vm354_vm2, %v3576_v8  ;;  %7071 = vmatmul.mubr.msk.f32.gmra.mrb[86].mxu0 %vm354_vm2, %v4055_v19  ;;  %v6664_v55 = vpop.f32.mrb[237].mxu1  ;;  %v4058_v8 = vld [vmem:[%s7204_s28 + $0x11b] sm:$0xff] }
 0x2c1   : > { %6951 = vmatprep.mubr.msk.f32.mxu1 %vm7138_vm1, %v7137_v1  ;;  %7073 = vmatprep.mubr.msk.f32.mxu0 %vm7138_vm1, %v7137_v1  ;;  %v3580_v55 = vld [vmem:[%s7204_s28 + $0x12a] sm:$0xff] }
 0x2c3   : > { %v2908_v59 = vpop.f32.mrb[238].mxu1  ;;  %v3383_v12 = vpop.f32.mrb[238].mxu0 }
 0x2c4   : > { %v3044_v9 = vadd.f32 %v2908_v59, %v8648_v6  ;;  %v9226_v7 = vadd.f32 %v3383_v12, %v3043_v58  ;;  %v6789_v26 = vpop.f32.mrb[239].mxu0  ;;  %6952 = vmatmul.mubr.msk.f32.gmra.mrb[88].mxu1 %vm354_vm2, %v3577_v44  ;;  %7074 = vmatmul.mubr.msk.f32.gmra.mrb[88].mxu0 %vm354_vm2, %v4056_v16  ;;  %v6667_v13 = vpop.f32.mrb[239].mxu1  ;;  %v4059_v44 = vld [vmem:[%s7204_s28 + $0x123] sm:$0xff] }
 0x2c5   : > { %6954 = vmatprep.mubr.msk.f32.mxu1 %vm7138_vm1, %v7137_v1  ;;  %7076 = vmatprep.mubr.msk.f32.mxu0 %vm7138_vm1, %v7137_v1  ;;  %v3581_v13 = vld [vmem:[%s7204_s28 + $0x132] sm:$0xff] }
 0x2c7   : > { %v2913_v34 = vpop.f32.mrb[240].mxu1  ;;  %v3388_v6 = vpop.f32.mrb[240].mxu0 }
 0x2c8   : > { %v3045_v20 = vadd.f32 %v2913_v34, %v8658_v14  ;;  %v9237_v62 = vadd.f32 %v3388_v6, %v3044_v9  ;;  %v6792_v35 = vpop.f32.mrb[241].mxu0  ;;  %6955 = vmatmul.mubr.msk.f32.gmra.mrb[90].mxu1 %vm354_vm2, %v3578_v29  ;;  %7077 = vmatmul.mubr.msk.f32.gmra.mrb[90].mxu0 %vm354_vm2, %v4057_v30  ;;  %v6670_v47 = vpop.f32.mrb[241].mxu1  ;;  %v4060_v29 = vld [vmem:[%s7204_s28 + $0x12b] sm:$0xff] }
 0x2c9   : > { %6957 = vmatprep.mubr.msk.f32.mxu1 %vm7138_vm1, %v7137_v1  ;;  %7079 = vmatprep.mubr.msk.f32.mxu0 %vm7138_vm1, %v7137_v1  ;;  %v3582_v47 = vld [vmem:[%s7204_s28 + $0x13a] sm:$0xff] }
 0x2cb   : > { %v2918_v19 = vpop.f32.mrb[242].mxu1  ;;  %v3393_v14 = vpop.f32.mrb[242].mxu0 }
 0x2cc   : > { %v3046_v24 = vadd.f32 %v2918_v19, %v8671_v10  ;;  %v9248_v11 = vadd.f32 %v3393_v14, %v3045_v20  ;;  %v6795_v58 = vpop.f32.mrb[243].mxu0  ;;  %6958 = vmatmul.mubr.msk.f32.gmra.mrb[92].mxu1 %vm354_vm2, %v3579_v51  ;;  %7080 = vmatmul.mubr.msk.f32.gmra.mrb[92].mxu0 %vm354_vm2, %v4058_v8  ;;  %v6673_v39 = vpop.f32.mrb[243].mxu1  ;;  %v4061_v51 = vld [vmem:[%s7204_s28 + $0x133] sm:$0xff] }
 0x2cd   : > { %6960 = vmatprep.mubr.msk.f32.mxu1 %vm7138_vm1, %v7137_v1  ;;  %7082 = vmatprep.mubr.msk.f32.mxu0 %vm7138_vm1, %v7137_v1  ;;  %v3583_v39 = vld [vmem:[%s7204_s28 + $0x142] sm:$0xff] }
 0x2cf   : > { %v2923_v16 = vpop.f32.mrb[244].mxu1  ;;  %v3398_v10 = vpop.f32.mrb[244].mxu0 }
 0x2d0   : > { %v3047_v59 = vadd.f32 %v2923_v16, %v8684_v25  ;;  %v9259_v12 = vadd.f32 %v3398_v10, %v3046_v24  ;;  %v6798_v9 = vpop.f32.mrb[245].mxu0  ;;  %6961 = vmatmul.mubr.msk.f32.gmra.mrb[94].mxu1 %vm354_vm2, %v3580_v55  ;;  %7083 = vmatmul.mubr.msk.f32.gmra.mrb[94].mxu0 %vm354_vm2, %v4059_v44  ;;  %v6676_v26 = vpop.f32.mrb[245].mxu1  ;;  %v4062_v55 = vld [vmem:[%s7204_s28 + $0x13b] sm:$0xff] }
 0x2d1   : > { %6963 = vmatprep.mubr.msk.f32.mxu1 %vm7138_vm1, %v7137_v1  ;;  %7085 = vmatprep.mubr.msk.f32.mxu0 %vm7138_vm1, %v7137_v1  ;;  %v3584_v26 = vld [vmem:[%s7204_s28 + $0x14a] sm:$0xff] }
 0x2d3   : > { %v2928_v30 = vpop.f32.mrb[246].mxu1  ;;  %v3403_v25 = vpop.f32.mrb[246].mxu0 }
 0x2d4   : > { %v3048_v34 = vadd.f32 %v2928_v30, %v8700_v61  ;;  %v9270_v6 = vadd.f32 %v3403_v25, %v3047_v59  ;;  %v6801_v20 = vpop.f32.mrb[247].mxu0  ;;  %6964 = vmatmul.mubr.msk.f32.gmra.mrb[96].mxu1 %vm354_vm2, %v3581_v13  ;;  %7086 = vmatmul.mubr.msk.f32.gmra.mrb[96].mxu0 %vm354_vm2, %v4060_v29  ;;  %v6679_v35 = vpop.f32.mrb[247].mxu1  ;;  %v4063_v13 = vld [vmem:[%s7204_s28 + $0x143] sm:$0xff] }
 0x2d5   : > { %6966 = vmatprep.mubr.msk.f32.mxu1 %vm7138_vm1, %v7137_v1  ;;  %7088 = vmatprep.mubr.msk.f32.mxu0 %vm7138_vm1, %v7137_v1  ;;  %v3585_v35 = vld [vmem:[%s7204_s28 + $0x152] sm:$0xff] }
 0x2d7   : > { %v2933_v8 = vpop.f32.mrb[248].mxu1  ;;  %v3408_v61 = vpop.f32.mrb[248].mxu0 }
 0x2d8   : > { %v3049_v19 = vadd.f32 %v2933_v8, %v8716_v38  ;;  %v9281_v14 = vadd.f32 %v3408_v61, %v3048_v34  ;;  %v6804_v24 = vpop.f32.mrb[249].mxu0  ;;  %6967 = vmatmul.mubr.msk.f32.gmra.mrb[98].mxu1 %vm354_vm2, %v3582_v47  ;;  %7089 = vmatmul.mubr.msk.f32.gmra.mrb[98].mxu0 %vm354_vm2, %v4061_v51  ;;  %v6682_v58 = vpop.f32.mrb[249].mxu1  ;;  %v4064_v47 = vld [vmem:[%s7204_s28 + $0x14b] sm:$0xff] }
 0x2d9   : > { %6969 = vmatprep.mubr.msk.f32.mxu1 %vm7138_vm1, %v7137_v1  ;;  %7091 = vmatprep.mubr.msk.f32.mxu0 %vm7138_vm1, %v7137_v1  ;;  %v3586_v58 = vld [vmem:[%s7204_s28 + $0x15a] sm:$0xff] }
 0x2db   : > { %v2938_v44 = vpop.f32.mrb[250].mxu1  ;;  %v3413_v38 = vpop.f32.mrb[250].mxu0 }
 0x2dc   : > { %v3050_v16 = vadd.f32 %v2938_v44, %v8732_v3  ;;  %v9292_v10 = vadd.f32 %v3413_v38, %v3049_v19  ;;  %v6807_v59 = vpop.f32.mrb[251].mxu0  ;;  %6970 = vmatmul.mubr.msk.f32.gmra.mrb[100].mxu1 %vm354_vm2, %v3583_v39  ;;  %7092 = vmatmul.mubr.msk.f32.gmra.mrb[100].mxu0 %vm354_vm2, %v4062_v55  ;;  %v6685_v9 = vpop.f32.mrb[251].mxu1  ;;  %v4065_v39 = vld [vmem:[%s7204_s28 + $0x153] sm:$0xff] }
 0x2dd   : > { %6972 = vmatprep.mubr.msk.f32.mxu1 %vm7138_vm1, %v7137_v1  ;;  %7094 = vmatprep.mubr.msk.f32.mxu0 %vm7138_vm1, %v7137_v1  ;;  %v3587_v9 = vld [vmem:[%s7204_s28 + $0x162] sm:$0xff] }
 0x2df   : > { %v2943_v29 = vpop.f32.mrb[252].mxu1  ;;  %v3418_v3 = vpop.f32.mrb[252].mxu0 }
 0x2e0   : > { %v3051_v30 = vadd.f32 %v2943_v29, %v8748_v2  ;;  %v9303_v25 = vadd.f32 %v3418_v3, %v3050_v16  ;;  %v6810_v34 = vpop.f32.mrb[253].mxu0  ;;  %6973 = vmatmul.mubr.msk.f32.gmra.mrb[102].mxu1 %vm354_vm2, %v3584_v26  ;;  %7095 = vmatmul.mubr.msk.f32.gmra.mrb[102].mxu0 %vm354_vm2, %v4063_v13  ;;  %v6688_v20 = vpop.f32.mrb[253].mxu1  ;;  %v4066_v26 = vld [vmem:[%s7204_s28 + $0x15b] sm:$0xff] }
 0x2e1   : > { %6975 = vmatprep.mubr.msk.f32.mxu1 %vm7138_vm1, %v7137_v1  ;;  %7097 = vmatprep.mubr.msk.f32.mxu0 %vm7138_vm1, %v7137_v1  ;;  %v3588_v20 = vld [vmem:[%s7204_s28 + $0x16a] sm:$0xff] }
 0x2e3   : > { %v2948_v51 = vpop.f32.mrb[254].mxu1  ;;  %v3423_v2 = vpop.f32.mrb[254].mxu0 }
 0x2e4   : > { %v3052_v8 = vadd.f32 %v2948_v51, %v8764_v48  ;;  %v9314_v61 = vadd.f32 %v3423_v2, %v3051_v30  ;;  %v6813_v19 = vpop.f32.mrb[255].mxu0  ;;  %6976 = vmatmul.mubr.msk.f32.gmra.mrb[104].mxu1 %vm354_vm2, %v3585_v35  ;;  %7098 = vmatmul.mubr.msk.f32.gmra.mrb[104].mxu0 %vm354_vm2, %v4064_v47  ;;  %v6691_v24 = vpop.f32.mrb[255].mxu1  ;;  %v4067_v35 = vld [vmem:[%s7204_s28 + $0x163] sm:$0xff] }
 0x2e5   : > { %6978 = vmatprep.mubr.msk.f32.mxu1 %vm7138_vm1, %v7137_v1  ;;  %7100 = vmatprep.mubr.msk.f32.mxu0 %vm7138_vm1, %v7137_v1  ;;  %v4068_v24 = vld [vmem:[%s7204_s28 + $0x16b] sm:$0xff] }
 0x2e7   : > { %v2953_v55 = vpop.f32.mrb[0].mxu1  ;;  %v3428_v48 = vpop.f32.mrb[0].mxu0 }
 0x2e8   : > { %v3053_v44 = vadd.f32 %v2953_v55, %v8780_v37  ;;  %v9325_v38 = vadd.f32 %v3428_v48, %v3052_v8  ;;  %v6816_v16 = vpop.f32.mrb[1].mxu0  ;;  %6979 = vmatmul.mubr.msk.f32.gmra.mrb[106].mxu1 %vm354_vm2, %v3586_v58  ;;  %7101 = vmatmul.mubr.msk.f32.gmra.mrb[106].mxu0 %vm354_vm2, %v4065_v39  ;;  %v6694_v59 = vpop.f32.mrb[1].mxu1 }
 0x2e9   : > { %6981 = vmatprep.mubr.msk.f32.mxu1 %vm7138_vm1, %v7137_v1  ;;  %7103 = vmatprep.mubr.msk.f32.mxu0 %vm7138_vm1, %v7137_v1 }
 0x2eb   : > { %v2958_v13 = vpop.f32.mrb[2].mxu1  ;;  %v3433_v37 = vpop.f32.mrb[2].mxu0 }
 0x2ec   : > { %v3054_v29 = vadd.f32 %v2958_v13, %v8796_v22  ;;  %v9336_v3 = vadd.f32 %v3433_v37, %v3053_v44  ;;  %v6819_v30 = vpop.f32.mrb[3].mxu0  ;;  %6982 = vmatmul.mubr.msk.f32.gmra.mrb[108].mxu1 %vm354_vm2, %v3587_v9  ;;  %7104 = vmatmul.mubr.msk.f32.gmra.mrb[108].mxu0 %vm354_vm2, %v4066_v26  ;;  %v6697_v34 = vpop.f32.mrb[3].mxu1 }
 0x2ed   : > { %6984 = vmatprep.mubr.msk.f32.mxu1 %vm7138_vm1, %v7137_v1  ;;  %7106 = vmatprep.mubr.msk.f32.mxu0 %vm7138_vm1, %v7137_v1 }
 0x2ef   : > { %v2963_v47 = vpop.f32.mrb[4].mxu1  ;;  %v3438_v51 = vpop.f32.mrb[4].mxu0 }
 0x2f0   : > { %v3055_v22 = vadd.f32 %v2963_v47, %v8813_v40  ;;  %v9347_v2 = vadd.f32 %v3438_v51, %v3054_v29  ;;  %v6822_v8 = vpop.f32.mrb[5].mxu0  ;;  %6985 = vmatmul.mubr.msk.f32.gmra.mrb[110].mxu1 %vm354_vm2, %v3588_v20  ;;  %7107 = vmatmul.mubr.msk.f32.gmra.mrb[110].mxu0 %vm354_vm2, %v4067_v35  ;;  %v6700_v19 = vpop.f32.mrb[5].mxu1 }
 0x2f1   : > { %7109 = vmatprep.mubr.msk.f32.mxu0 %vm7138_vm1, %v7137_v1 }
 0x2f3   : > { %v2968_v58 = vpop.f32.mrb[6].mxu1  ;;  %v3443_v39 = vpop.f32.mrb[6].mxu0 }
 0x2f4   : > { %v3056_v55 = vadd.f32 %v2968_v58, %v8830_v15  ;;  %v9355_v48 = vadd.f32 %v3443_v39, %v3055_v22  ;;  %v6825_v44 = vpop.f32.mrb[7].mxu0  ;;  %7110 = vmatmul.mubr.msk.f32.gmra.mrb[112].mxu0 %vm354_vm2, %v4068_v24  ;;  %v6703_v40 = vpop.f32.mrb[7].mxu1 }
 0x2f7   : > { %v2973_v16 = vpop.f32.mrb[8].mxu1  ;;  %v3448_v59 = vpop.f32.mrb[8].mxu0 }
 0x2f8   : > { %v3057_v9 = vadd.f32 %v2973_v16, %v8847_v50  ;;  %v9359_v26 = vadd.f32 %v3448_v59, %v3056_v55  ;;  %v6828_v13 = vpop.f32.mrb[9].mxu0  ;;  %v6706_v37 = vpop.f32.mrb[9].mxu1 }
 0x2fb   : > { %v2978_v1 = vpop.f32.mrb[10].mxu1  ;;  %v3453_v29 = vpop.f32.mrb[10].mxu0 }
 0x2fc   : > { %v3058_v30 = vadd.f32 %v2978_v1, %v8864_v18  ;;  %v9362_v34 = vadd.f32 %v3453_v29, %v3057_v9  ;;  %v6831_v15 = vpop.f32.mrb[11].mxu0  ;;  %v6709_v20 = vpop.f32.mrb[11].mxu1 }
 0x2ff   : > { %v2983_v35 = vpop.f32.mrb[12].mxu1  ;;  %v3458_v47 = vpop.f32.mrb[12].mxu0 }
 0x300   : > { %v3059_v51 = vadd.f32 %v2983_v35, %v8881_v4  ;;  %v9365_v22 = vadd.f32 %v3458_v47, %v3058_v30  ;;  %v6834_v8 = vpop.f32.mrb[13].mxu0  ;;  %v6712_v50 = vpop.f32.mrb[13].mxu1 }
 0x303   : > { %v2988_v19 = vpop.f32.mrb[14].mxu1  ;;  %v3463_v24 = vpop.f32.mrb[14].mxu0 }
 0x304   : > { %v3060_v58 = vadd.f32 %v2988_v19, %v8898_v33  ;;  %v9368_v39 = vadd.f32 %v3463_v24, %v3059_v51  ;;  %v6837_v55 = vpop.f32.mrb[15].mxu0  ;;  %v6715_v18 = vpop.f32.mrb[15].mxu1 }
 0x307   : > { %v2993_v44 = vpop.f32.mrb[16].mxu1  ;;  %v3468_v40 = vpop.f32.mrb[16].mxu0 }
 0x308   : > { %v3061_v16 = vadd.f32 %v2993_v44, %v8915_v63  ;;  %v9371_v59 = vadd.f32 %v3468_v40, %v3060_v58  ;;  %v6840_v9 = vpop.f32.mrb[17].mxu0  ;;  %v6718_v4 = vpop.f32.mrb[17].mxu1 }
 0x30b   : > { %v2998_v13 = vpop.f32.mrb[18].mxu1  ;;  %v3473_v37 = vpop.f32.mrb[18].mxu0 }
 0x30c   : > { %v3062_v1 = vadd.f32 %v2998_v13, %v8932_v60  ;;  %v9374_v29 = vadd.f32 %v3473_v37, %v3061_v16  ;;  %v6843_v30 = vpop.f32.mrb[19].mxu0  ;;  %v6721_v33 = vpop.f32.mrb[19].mxu1 }
 0x30f   : > { %v3003_v15 = vpop.f32.mrb[20].mxu1  ;;  %v3478_v20 = vpop.f32.mrb[20].mxu0 }
 0x310   : > { %v3063_v35 = vadd.f32 %v3003_v15, %v8949_v36  ;;  %v9377_v47 = vadd.f32 %v3478_v20, %v3062_v1  ;;  %v6846_v51 = vpop.f32.mrb[21].mxu0  ;;  %v6724_v63 = vpop.f32.mrb[21].mxu1 }
 0x313   : > { %v3008_v8 = vpop.f32.mrb[22].mxu1  ;;  %v3483_v50 = vpop.f32.mrb[22].mxu0 }
 0x314   : > { %v3064_v19 = vadd.f32 %v3008_v8, %v8966_v41  ;;  %v9380_v24 = vadd.f32 %v3483_v50, %v3063_v35  ;;  %v6849_v58 = vpop.f32.mrb[23].mxu0  ;;  %v6727_v60 = vpop.f32.mrb[23].mxu1 }
 0x315   : > { %v4600_v58 = vpop.permute.xlu0 %4599 }
 0x317   : > { %v3013_v55 = vpop.f32.mrb[24].mxu1  ;;  %v3488_v18 = vpop.f32.mrb[24].mxu0 }
 0x318   : > { %v3065_v44 = vadd.f32 %v3013_v55, %v8983_v57  ;;  %v9383_v40 = vadd.f32 %v3488_v18, %v3064_v19  ;;  %v6852_v16 = vpop.f32.mrb[25].mxu0  ;;  %v6730_v36 = vpop.f32.mrb[25].mxu1 }
 0x31b   : > { %v3018_v9 = vpop.f32.mrb[26].mxu1  ;;  %v3493_v4 = vpop.f32.mrb[26].mxu0 }
 0x31c   : > { %v3066_v13 = vadd.f32 %v3018_v9, %v9000_v27  ;;  %v9386_v37 = vadd.f32 %v3493_v4, %v3065_v44  ;;  %v6855_v1 = vpop.f32.mrb[27].mxu0  ;;  %v6733_v41 = vpop.f32.mrb[27].mxu1 }
 0x31f   : > { %v3023_v30 = vpop.f32.mrb[28].mxu1  ;;  %v3498_v33 = vpop.f32.mrb[28].mxu0 }
 0x320   : > { %v3067_v15 = vadd.f32 %v3023_v30, %v9013_v28  ;;  %v9389_v20 = vadd.f32 %v3498_v33, %v3066_v13  ;;  %v6858_v35 = vpop.f32.mrb[29].mxu0  ;;  %v6736_v57 = vpop.f32.mrb[29].mxu1  ;;  %v9397_v28 = vld [vmem:[%s9662_s2] ss:$0 sm:$0xff] }
 0x323   : > { %v3503_v51 = vpop.f32.mrb[30].mxu0  ;;  %v3783_v63 = vpop.f32.mrb[30].mxu1 }
 0x324   : > { %v9391_v8 = vadd.f32 %v3503_v51, %v3067_v15  ;;  %v3987_v50 = vadd.f32 %v3783_v63, %v9025_v56  ;;  %v6861_v19 = vpop.f32.mrb[31].mxu0  ;;  %v6866_v27 = vpop.f32.mrb[31].mxu1 }
 0x325   : > { %v4605_v15 = vpop.permute.xlu0 %4604 }
 0x327   : > { %v3788_v60 = vpop.f32.mrb[32].mxu1  ;;  %v4263_v55 = vpop.f32.mrb[32].mxu0 }
 0x328   : > { %v3988_v18 = vadd.f32 %v3788_v60, %v9036_v17  ;;  %v4467_v44 = vadd.f32 %v4263_v55, %v3987_v50  ;;  %v6991_v16 = vpop.f32.mrb[33].mxu0  ;;  %v6869_v36 = vpop.f32.mrb[33].mxu1 }
 0x329   : > { %v4610_v17 = vpop.permute.xlu1 %4609 }
 0x32a   : > { %v4515_v9 = vadd.f32 %v9397_v28, %v4467_v44 }
 0x32b   : > { %v3793_v4 = vpop.f32.mrb[34].mxu1  ;;  %v4268_v56 = vpop.f32.mrb[34].mxu0 }
 0x32c   : > { %v4802_v13 = vmul.f32 %v4600_v58, %v4515_v9  ;;  %v3989_v1 = vadd.f32 %v3793_v4, %v9047_v52  ;;  %v4468_v41 = vadd.f32 %v4268_v56, %v3988_v18  ;;  %v6994_v30 = vpop.f32.mrb[35].mxu0  ;;  %v6872_v33 = vpop.f32.mrb[35].mxu1 }
 0x32e   : > { %4846 = vst.msk [vmem:[%s9133_s29 + $0x18] sm:$0xff] %vm354_vm2, %v4802_v13  ;;  %v4516_v35 = vadd.f32 %v9397_v28, %v4468_v41  ;;  %v4979_v57 = vmul.f32 %v4802_v13, %v4802_v13  ;;  %v4890_v52 = vsel %vm354_vm2, %v4802_v13, 0.0 }
 0x32f   : > { %v3798_v51 = vpop.f32.mrb[36].mxu1  ;;  %v4273_v63 = vpop.f32.mrb[36].mxu0 }
 0x330   : > { %v4803_v50 = vmul.f32 %v4605_v15, %v4516_v35  ;;  %v3990_v19 = vadd.f32 %v3798_v51, %v9058_v32  ;;  %v4469_v27 = vadd.f32 %v4273_v63, %v3989_v1  ;;  %v6997_v58 = vpop.f32.mrb[37].mxu0  ;;  %v6875_v60 = vpop.f32.mrb[37].mxu1  ;;  %v5020_v16 = vsel %vm354_vm2, %v4979_v57, 0.0 }
 0x331   : > { %v4615_v51 = vpop.permute.xlu1 %4614 }
 0x332   : > { %4847 = vst.msk [vmem:[%s9133_s29 + $0x20] sm:$0xff] %vm354_vm2, %v4803_v50  ;;  %v4891_v55 = vsel %vm354_vm2, %v4803_v50, 0.0  ;;  %v4980_v18 = vmul.f32 %v4803_v50, %v4803_v50  ;;  %v4517_v44 = vadd.f32 %v9397_v28, %v4469_v27 }
 0x333   : > { %v4892_v36 = vadd.f32 %v4891_v55, %v4890_v52  ;;  %v3803_v9 = vpop.f32.mrb[38].mxu1  ;;  %v4278_v4 = vpop.f32.mrb[38].mxu0 }
 0x334   : > { %v5021_v32 = vsel %vm354_vm2, %v4980_v18, 0.0  ;;  %v4804_v56 = vmul.f32 %v4610_v17, %v4517_v44  ;;  %v3991_v1 = vadd.f32 %v3803_v9, %v9069_v23  ;;  %v4470_v41 = vadd.f32 %v4278_v4, %v3990_v19  ;;  %v7000_v13 = vpop.f32.mrb[39].mxu0  ;;  %v6878_v30 = vpop.f32.mrb[39].mxu1 }
 0x335   : > { %v5022_v33 = vadd.f32 %v5021_v32, %v5020_v16  ;;  %v4620_v18 = vpop.permute.xlu0 %4619 }
 0x336   : > { %4848 = vst.msk [vmem:[%s9133_s29 + $0x28] sm:$0xff] %vm354_vm2, %v4804_v56  ;;  %v4893_v15 = vsel %vm354_vm2, %v4804_v56, 0.0  ;;  %v4981_v35 = vmul.f32 %v4804_v56, %v4804_v56  ;;  %v4518_v57 = vadd.f32 %v9397_v28, %v4470_v41 }
 0x337   : > { %v4894_v63 = vadd.f32 %v4893_v15, %v4892_v36  ;;  %v3808_v50 = vpop.f32.mrb[40].mxu1  ;;  %v4283_v27 = vpop.f32.mrb[40].mxu0 }
 0x338   : > { %v5023_v17 = vsel %vm354_vm2, %v4981_v35, 0.0  ;;  %v4805_v58 = vmul.f32 %v4615_v51, %v4518_v57  ;;  %v3992_v23 = vadd.f32 %v3808_v50, %v9080_v45  ;;  %v4471_v19 = vadd.f32 %v4283_v27, %v3991_v1  ;;  %v7003_v60 = vpop.f32.mrb[41].mxu0  ;;  %v6881_v52 = vpop.f32.mrb[41].mxu1 }
 0x339   : > { %v5024_v55 = vadd.f32 %v5023_v17, %v5022_v33  ;;  %v4625_v51 = vpop.permute.xlu1 %4624 }
 0x33a   : > { %4849 = vst.msk [vmem:[%s9133_s29 + $0x30] sm:$0xff] %vm354_vm2, %v4805_v58  ;;  %v4895_v44 = vsel %vm354_vm2, %v4805_v58, 0.0  ;;  %v4982_v16 = vmul.f32 %v4805_v58, %v4805_v58  ;;  %v4519_v36 = vadd.f32 %v9397_v28, %v4471_v19 }
 0x33b   : > { %v4896_v9 = vadd.f32 %v4895_v44, %v4894_v63  ;;  %v3813_v4 = vpop.f32.mrb[42].mxu1  ;;  %v4288_v32 = vpop.f32.mrb[42].mxu0 }
 0x33c   : > { %v5025_v56 = vsel %vm354_vm2, %v4982_v16, 0.0  ;;  %v4806_v41 = vmul.f32 %v4620_v18, %v4519_v36  ;;  %v3993_v45 = vadd.f32 %v3813_v4, %v9091_v42  ;;  %v4472_v1 = vadd.f32 %v4288_v32, %v3992_v23  ;;  %v7006_v13 = vpop.f32.mrb[43].mxu0  ;;  %v6884_v30 = vpop.f32.mrb[43].mxu1 }
 0x33d   : > { %v5026_v33 = vadd.f32 %v5025_v56, %v5024_v55  ;;  %v4630_v55 = vpop.permute.xlu0 %4629  ;;  %v4635_v30 = vpop.permute.xlu1 %4634 }
 0x33e   : > { %4850 = vst.msk [vmem:[%s9133_s29 + $0x38] sm:$0xff] %vm354_vm2, %v4806_v41  ;;  %v4897_v15 = vsel %vm354_vm2, %v4806_v41, 0.0  ;;  %v4983_v35 = vmul.f32 %v4806_v41, %v4806_v41  ;;  %v4520_v57 = vadd.f32 %v9397_v28, %v4472_v1 }
 0x33f   : > { %v4898_v63 = vadd.f32 %v4897_v15, %v4896_v9  ;;  %v3818_v50 = vpop.f32.mrb[44].mxu1  ;;  %v4293_v27 = vpop.f32.mrb[44].mxu0 }
 0x340   : > { %v5027_v17 = vsel %vm354_vm2, %v4983_v35, 0.0  ;;  %v4807_v58 = vmul.f32 %v4625_v51, %v4520_v57  ;;  %v3994_v42 = vadd.f32 %v3818_v50, %v9102_v43  ;;  %v4473_v23 = vadd.f32 %v4293_v27, %v3993_v45  ;;  %v7009_v19 = vpop.f32.mrb[45].mxu0  ;;  %v6887_v60 = vpop.f32.mrb[45].mxu1 }
 0x341   : > { %v5028_v52 = vadd.f32 %v5027_v17, %v5026_v33  ;;  %v4640_v19 = vpop.permute.xlu0 %4639 }
 0x342   : > { %4851 = vst.msk [vmem:[%s9133_s29 + $0x40] sm:$0xff] %vm354_vm2, %v4807_v58  ;;  %v4899_v18 = vsel %vm354_vm2, %v4807_v58, 0.0  ;;  %v4984_v44 = vmul.f32 %v4807_v58, %v4807_v58  ;;  %v4521_v16 = vadd.f32 %v9397_v28, %v4473_v23 }
 0x343   : > { %v4900_v36 = vadd.f32 %v4899_v18, %v4898_v63  ;;  %v3823_v9 = vpop.f32.mrb[46].mxu1  ;;  %v4298_v4 = vpop.f32.mrb[46].mxu0 }
 0x344   : > { %v5029_v32 = vsel %vm354_vm2, %v4984_v44, 0.0  ;;  %v4808_v56 = vmul.f32 %v4630_v55, %v4521_v16  ;;  %v3995_v43 = vadd.f32 %v3823_v9, %v9113_v0  ;;  %v4474_v41 = vadd.f32 %v4298_v4, %v3994_v42  ;;  %v7012_v45 = vpop.f32.mrb[47].mxu0  ;;  %v6890_v1 = vpop.f32.mrb[47].mxu1 }
 0x345   : > { %v5030_v13 = vadd.f32 %v5029_v32, %v5028_v52 }
 0x346   : > { %4852 = vst.msk [vmem:[%s9133_s29 + $0x48] sm:$0xff] %vm354_vm2, %v4808_v56  ;;  %v4901_v33 = vsel %vm354_vm2, %v4808_v56, 0.0  ;;  %v4985_v15 = vmul.f32 %v4808_v56, %v4808_v56  ;;  %v4522_v35 = vadd.f32 %v9397_v28, %v4474_v41  ;;  %v4645_v41 = vpop.permute.xlu1 %4644 }
 0x347   : > { %v4902_v51 = vadd.f32 %v4901_v33, %v4900_v36  ;;  %v3828_v57 = vpop.f32.mrb[48].mxu1  ;;  %v4303_v63 = vpop.f32.mrb[48].mxu0 }
 0x348   : > { %v5031_v50 = vsel %vm354_vm2, %v4985_v15, 0.0  ;;  %v4809_v27 = vmul.f32 %v4635_v30, %v4522_v35  ;;  %v3996_v0 = vadd.f32 %v3828_v57, %v9124_v53  ;;  %v4475_v17 = vadd.f32 %v4303_v63, %v3995_v43  ;;  %v7015_v58 = vpop.f32.mrb[49].mxu0  ;;  %v6893_v42 = vpop.f32.mrb[49].mxu1 }
 0x349   : > { %v5032_v23 = vadd.f32 %v5031_v50, %v5030_v13 }
 0x34a   : > { %4853 = vst.msk [vmem:[%s9133_s29 + $0x50] sm:$0xff] %vm354_vm2, %v4809_v27  ;;  %v4903_v60 = vsel %vm354_vm2, %v4809_v27, 0.0  ;;  %v4986_v52 = vmul.f32 %v4809_v27, %v4809_v27  ;;  %v4523_v55 = vadd.f32 %v9397_v28, %v4475_v17 }
 0x34b   : > { %v4904_v18 = vadd.f32 %v4903_v60, %v4902_v51  ;;  %v3833_v44 = vpop.f32.mrb[50].mxu1  ;;  %v4308_v16 = vpop.f32.mrb[50].mxu0 }
 0x34c   : > { %v5033_v36 = vsel %vm354_vm2, %v4986_v52, 0.0  ;;  %v4810_v9 = vmul.f32 %v4640_v19, %v4523_v55  ;;  %v3997_v53 = vadd.f32 %v3833_v44, %v9160_v49  ;;  %v4476_v4 = vadd.f32 %v4308_v16, %v3996_v0  ;;  %v7018_v32 = vpop.f32.mrb[51].mxu0  ;;  %v6896_v56 = vpop.f32.mrb[51].mxu1 }
 0x34d   : > { %v5034_v43 = vadd.f32 %v5033_v36, %v5032_v23  ;;  %v4650_v0 = vpop.permute.xlu0 %4649 }
 0x34e   : > { %4854 = vst.msk [vmem:[%s9133_s29 + $0x58] sm:$0xff] %vm354_vm2, %v4810_v9  ;;  %v4905_v45 = vsel %vm354_vm2, %v4810_v9, 0.0  ;;  %v4987_v1 = vmul.f32 %v4810_v9, %v4810_v9  ;;  %v4524_v13 = vadd.f32 %v9397_v28, %v4476_v4  ;;  %v4655_v9 = vpop.permute.xlu1 %4654 }
 0x34f   : > { %v4906_v30 = vadd.f32 %v4905_v45, %v4904_v18  ;;  %v3838_v33 = vpop.f32.mrb[52].mxu1  ;;  %v4313_v15 = vpop.f32.mrb[52].mxu0 }
 0x350   : > { %v5035_v35 = vsel %vm354_vm2, %v4987_v1, 0.0  ;;  %v4811_v51 = vmul.f32 %v4645_v41, %v4524_v13  ;;  %v3998_v49 = vadd.f32 %v3838_v33, %v9171_v21  ;;  %v4477_v57 = vadd.f32 %v4313_v15, %v3997_v53  ;;  %v7021_v63 = vpop.f32.mrb[53].mxu0  ;;  %v6899_v50 = vpop.f32.mrb[53].mxu1 }
 0x351   : > { %v5036_v27 = vadd.f32 %v5035_v35, %v5034_v43  ;;  %v4660_v35 = vpop.permute.xlu0 %4659 }
 0x352   : > { %4855 = vst.msk [vmem:[%s9133_s29 + $0x60] sm:$0xff] %vm354_vm2, %v4811_v51  ;;  %v4907_v17 = vsel %vm354_vm2, %v4811_v51, 0.0  ;;  %v4988_v58 = vmul.f32 %v4811_v51, %v4811_v51  ;;  %v4525_v42 = vadd.f32 %v9397_v28, %v4477_v57 }
 0x353   : > { %v4908_v23 = vadd.f32 %v4907_v17, %v4906_v30  ;;  %v3843_v19 = vpop.f32.mrb[54].mxu1  ;;  %v4318_v60 = vpop.f32.mrb[54].mxu0 }
 0x354   : > { %v5037_v52 = vsel %vm354_vm2, %v4988_v58, 0.0  ;;  %v4812_v55 = vmul.f32 %v4650_v0, %v4525_v42  ;;  %v3999_v21 = vadd.f32 %v3843_v19, %v9182_v46  ;;  %v4478_v18 = vadd.f32 %v4318_v60, %v3998_v49  ;;  %v7024_v44 = vpop.f32.mrb[55].mxu0  ;;  %v6902_v16 = vpop.f32.mrb[55].mxu1 }
 0x355   : > { %v5038_v36 = vadd.f32 %v5037_v52, %v5036_v27  ;;  %v4665_v60 = vpop.permute.xlu1 %4664 }
 0x356   : > { %4856 = vst.msk [vmem:[%s9133_s29 + $0x68] sm:$0xff] %vm354_vm2, %v4812_v55  ;;  %v4909_v53 = vsel %vm354_vm2, %v4812_v55, 0.0  ;;  %v4989_v4 = vmul.f32 %v4812_v55, %v4812_v55  ;;  %v4526_v32 = vadd.f32 %v9397_v28, %v4478_v18 }
 0x357   : > { %v4910_v56 = vadd.f32 %v4909_v53, %v4908_v23  ;;  %v3848_v43 = vpop.f32.mrb[56].mxu1  ;;  %v4323_v41 = vpop.f32.mrb[56].mxu0 }
 0x358   : > { %v5039_v45 = vsel %vm354_vm2, %v4989_v4, 0.0  ;;  %v4813_v1 = vmul.f32 %v4655_v9, %v4526_v32  ;;  %v4000_v46 = vadd.f32 %v3848_v43, %v9193_v5  ;;  %v4479_v13 = vadd.f32 %v4323_v41, %v3999_v21  ;;  %v7027_v30 = vpop.f32.mrb[57].mxu0  ;;  %v6905_v33 = vpop.f32.mrb[57].mxu1 }
 0x359   : > { %v5040_v15 = vadd.f32 %v5039_v45, %v5038_v36  ;;  %v4670_v43 = vpop.permute.xlu0 %4669 }
 0x35a   : > { %4857 = vst.msk [vmem:[%s9133_s29 + $0x70] sm:$0xff] %vm354_vm2, %v4813_v1  ;;  %v4911_v51 = vsel %vm354_vm2, %v4813_v1, 0.0  ;;  %v4990_v49 = vmul.f32 %v4813_v1, %v4813_v1  ;;  %v4527_v57 = vadd.f32 %v9397_v28, %v4479_v13 }
 0x35b   : > { %v4912_v63 = vadd.f32 %v4911_v51, %v4910_v56  ;;  %v3853_v50 = vpop.f32.mrb[58].mxu1  ;;  %v4328_v27 = vpop.f32.mrb[58].mxu0 }
 0x35c   : > { %v5041_v0 = vsel %vm354_vm2, %v4990_v49, 0.0  ;;  %v4814_v17 = vmul.f32 %v4660_v35, %v4527_v57  ;;  %v4001_v5 = vadd.f32 %v3853_v50, %v9204_v54  ;;  %v4480_v58 = vadd.f32 %v4328_v27, %v4000_v46  ;;  %v7030_v42 = vpop.f32.mrb[59].mxu0  ;;  %v6908_v23 = vpop.f32.mrb[59].mxu1 }
 0x35d   : > { %v5042_v19 = vadd.f32 %v5041_v0, %v5040_v15 }
 0x35e   : > { %4858 = vst.msk [vmem:[%s9133_s29 + $0x78] sm:$0xff] %vm354_vm2, %v4814_v17  ;;  %v4913_v52 = vsel %vm354_vm2, %v4814_v17, 0.0  ;;  %v4991_v55 = vmul.f32 %v4814_v17, %v4814_v17  ;;  %v4528_v21 = vadd.f32 %v9397_v28, %v4480_v58 }
 0x35f   : > { %v4914_v18 = vadd.f32 %v4913_v52, %v4912_v63  ;;  %v3858_v44 = vpop.f32.mrb[60].mxu1  ;;  %v4333_v16 = vpop.f32.mrb[60].mxu0 }
 0x360   : > { %v5043_v36 = vsel %vm354_vm2, %v4991_v55, 0.0  ;;  %v4815_v9 = vmul.f32 %v4665_v60, %v4528_v21  ;;  %v4002_v54 = vadd.f32 %v3858_v44, %v9215_v31  ;;  %v4481_v53 = vadd.f32 %v4333_v16, %v4001_v5  ;;  %v7033_v4 = vpop.f32.mrb[61].mxu0  ;;  %v6911_v32 = vpop.f32.mrb[61].mxu1 }
 0x361   : > { %v5044_v56 = vadd.f32 %v5043_v36, %v5042_v19  ;;  %v4675_v63 = vpop.permute.xlu1 %4674  ;;  %v4680_v21 = vpop.permute.xlu0 %4679 }
 0x362   : > { %4859 = vst.msk [vmem:[%s9133_s29 + $0x80] sm:$0xff] %vm354_vm2, %v4815_v9  ;;  %v4915_v41 = vsel %vm354_vm2, %v4815_v9, 0.0  ;;  %v4992_v45 = vmul.f32 %v4815_v9, %v4815_v9  ;;  %v4529_v1 = vadd.f32 %v9397_v28, %v4481_v53 }
 0x363   : > { %v4916_v46 = vadd.f32 %v4915_v41, %v4914_v18  ;;  %v3863_v13 = vpop.f32.mrb[62].mxu1  ;;  %v4338_v30 = vpop.f32.mrb[62].mxu0 }
 0x364   : > { %v5045_v33 = vsel %vm354_vm2, %v4992_v45, 0.0  ;;  %v4816_v15 = vmul.f32 %v4670_v43, %v4529_v1  ;;  %v4003_v31 = vadd.f32 %v3863_v13, %v9226_v7  ;;  %v4482_v35 = vadd.f32 %v4338_v30, %v4002_v54  ;;  %v7036_v51 = vpop.f32.mrb[63].mxu0  ;;  %v6914_v49 = vpop.f32.mrb[63].mxu1 }
 0x365   : > { %v5046_v57 = vadd.f32 %v5045_v33, %v5044_v56  ;;  %v4685_v45 = vpop.permute.xlu1 %4684 }
 0x366   : > { %4860 = vst.msk [vmem:[%s9133_s29 + $0x88] sm:$0xff] %vm354_vm2, %v4816_v15  ;;  %v4917_v50 = vsel %vm354_vm2, %v4816_v15, 0.0  ;;  %v4993_v27 = vmul.f32 %v4816_v15, %v4816_v15  ;;  %v4530_v0 = vadd.f32 %v9397_v28, %v4482_v35 }
 0x367   : > { %v4918_v17 = vadd.f32 %v4917_v50, %v4916_v46  ;;  %v3868_v5 = vpop.f32.mrb[64].mxu1  ;;  %v4343_v58 = vpop.f32.mrb[64].mxu0 }
 0x368   : > { %v5047_v42 = vsel %vm354_vm2, %v4993_v27, 0.0  ;;  %v4817_v23 = vmul.f32 %v4675_v63, %v4530_v0  ;;  %v4004_v7 = vadd.f32 %v3868_v5, %v9237_v62  ;;  %v4483_v19 = vadd.f32 %v4343_v58, %v4003_v31  ;;  %v7039_v60 = vpop.f32.mrb[65].mxu0  ;;  %v6917_v52 = vpop.f32.mrb[65].mxu1 }
 0x369   : > { %v5048_v55 = vadd.f32 %v5047_v42, %v5046_v57  ;;  %v4690_v50 = vpop.permute.xlu0 %4689 }
 0x36a   : > { %4861 = vst.msk [vmem:[%s9133_s29 + $0x90] sm:$0xff] %vm354_vm2, %v4817_v23  ;;  %v4919_v18 = vsel %vm354_vm2, %v4817_v23, 0.0  ;;  %v4994_v44 = vmul.f32 %v4817_v23, %v4817_v23  ;;  %v4531_v16 = vadd.f32 %v9397_v28, %v4483_v19 }
 0x36b   : > { %v4920_v36 = vadd.f32 %v4919_v18, %v4918_v17  ;;  %v3873_v9 = vpop.f32.mrb[66].mxu1  ;;  %v4348_v54 = vpop.f32.mrb[66].mxu0 }
 0x36c   : > { %v5049_v53 = vsel %vm354_vm2, %v4994_v44, 0.0  ;;  %v4818_v4 = vmul.f32 %v4680_v21, %v4531_v16  ;;  %v4005_v62 = vadd.f32 %v3873_v9, %v9248_v11  ;;  %v4484_v32 = vadd.f32 %v4348_v54, %v4004_v7  ;;  %v7042_v56 = vpop.f32.mrb[67].mxu0  ;;  %v6920_v43 = vpop.f32.mrb[67].mxu1 }
 0x36d   : > { %v5050_v41 = vadd.f32 %v5049_v53, %v5048_v55  ;;  %v4695_v21 = vpop.permute.xlu1 %4694 }
 0x36e   : > { %4862 = vst.msk [vmem:[%s9133_s29 + $0x98] sm:$0xff] %vm354_vm2, %v4818_v4  ;;  %v4921_v1 = vsel %vm354_vm2, %v4818_v4, 0.0  ;;  %v4995_v46 = vmul.f32 %v4818_v4, %v4818_v4  ;;  %v4532_v13 = vadd.f32 %v9397_v28, %v4484_v32 }
 0x36f   : > { %v4922_v30 = vadd.f32 %v4921_v1, %v4920_v36  ;;  %v3878_v33 = vpop.f32.mrb[68].mxu1  ;;  %v4353_v15 = vpop.f32.mrb[68].mxu0 }
 0x370   : > { %v5051_v31 = vsel %vm354_vm2, %v4995_v46, 0.0  ;;  %v4819_v35 = vmul.f32 %v4685_v45, %v4532_v13  ;;  %v4006_v11 = vadd.f32 %v3878_v33, %v9259_v12  ;;  %v4485_v51 = vadd.f32 %v4353_v15, %v4005_v62  ;;  %v7045_v49 = vpop.f32.mrb[69].mxu0  ;;  %v6923_v57 = vpop.f32.mrb[69].mxu1 }
 0x371   : > { %v5052_v63 = vadd.f32 %v5051_v31, %v5050_v41  ;;  %v4700_v41 = vpop.permute.xlu0 %4699  ;;  %v4705_v57 = vpop.permute.xlu1 %4704 }
 0x372   : > { %4863 = vst.msk [vmem:[%s9133_s29 + $0xa0] sm:$0xff] %vm354_vm2, %v4819_v35  ;;  %v4923_v27 = vsel %vm354_vm2, %v4819_v35, 0.0  ;;  %v4996_v0 = vmul.f32 %v4819_v35, %v4819_v35  ;;  %v4533_v17 = vadd.f32 %v9397_v28, %v4485_v51 }
 0x373   : > { %v4924_v5 = vadd.f32 %v4923_v27, %v4922_v30  ;;  %v3883_v58 = vpop.f32.mrb[70].mxu1  ;;  %v4358_v42 = vpop.f32.mrb[70].mxu0 }
 0x374   : > { %v5053_v23 = vsel %vm354_vm2, %v4996_v0, 0.0  ;;  %v4820_v7 = vmul.f32 %v4690_v50, %v4533_v17  ;;  %v4007_v12 = vadd.f32 %v3883_v58, %v9270_v6  ;;  %v4486_v19 = vadd.f32 %v4358_v42, %v4006_v11  ;;  %v7048_v60 = vpop.f32.mrb[71].mxu0  ;;  %v6926_v52 = vpop.f32.mrb[71].mxu1 }
 0x375   : > { %v5054_v55 = vadd.f32 %v5053_v23, %v5052_v63  ;;  %v4710_v60 = vpop.permute.xlu0 %4709 }
 0x376   : > { %4864 = vst.msk [vmem:[%s9133_s29 + $0xa8] sm:$0xff] %vm354_vm2, %v4820_v7  ;;  %v4925_v18 = vsel %vm354_vm2, %v4820_v7, 0.0  ;;  %v4997_v44 = vmul.f32 %v4820_v7, %v4820_v7  ;;  %v4534_v16 = vadd.f32 %v9397_v28, %v4486_v19 }
 0x377   : > { %v4926_v36 = vadd.f32 %v4925_v18, %v4924_v5  ;;  %v3888_v9 = vpop.f32.mrb[72].mxu1  ;;  %v4363_v54 = vpop.f32.mrb[72].mxu0 }
 0x378   : > { %v5055_v53 = vsel %vm354_vm2, %v4997_v44, 0.0  ;;  %v4821_v4 = vmul.f32 %v4695_v21, %v4534_v16  ;;  %v4008_v6 = vadd.f32 %v3888_v9, %v9281_v14  ;;  %v4487_v62 = vadd.f32 %v4363_v54, %v4007_v12  ;;  %v7051_v32 = vpop.f32.mrb[73].mxu0  ;;  %v6929_v56 = vpop.f32.mrb[73].mxu1 }
 0x379   : > { %v5056_v43 = vadd.f32 %v5055_v53, %v5054_v55 }
 0x37a   : > { %4865 = vst.msk [vmem:[%s9133_s29 + $0xb0] sm:$0xff] %vm354_vm2, %v4821_v4  ;;  %v4927_v45 = vsel %vm354_vm2, %v4821_v4, 0.0  ;;  %v4998_v1 = vmul.f32 %v4821_v4, %v4821_v4  ;;  %v4535_v46 = vadd.f32 %v9397_v28, %v4487_v62  ;;  %v4715_v62 = vpop.permute.xlu1 %4714 }
 0x37b   : > { %v4928_v13 = vadd.f32 %v4927_v45, %v4926_v36  ;;  %v3893_v30 = vpop.f32.mrb[74].mxu1  ;;  %v4368_v33 = vpop.f32.mrb[74].mxu0 }
 0x37c   : > { %v5057_v15 = vsel %vm354_vm2, %v4998_v1, 0.0  ;;  %v4822_v31 = vmul.f32 %v4700_v41, %v4535_v46  ;;  %v4009_v14 = vadd.f32 %v3893_v30, %v9292_v10  ;;  %v4488_v35 = vadd.f32 %v4368_v33, %v4008_v6  ;;  %v7054_v11 = vpop.f32.mrb[75].mxu0  ;;  %v6932_v51 = vpop.f32.mrb[75].mxu1 }
 0x37d   : > { %v5058_v49 = vadd.f32 %v5057_v15, %v5056_v43 }
 0x37e   : > { %4866 = vst.msk [vmem:[%s9133_s29 + $0xb8] sm:$0xff] %vm354_vm2, %v4822_v31  ;;  %v4929_v63 = vsel %vm354_vm2, %v4822_v31, 0.0  ;;  %v4999_v50 = vmul.f32 %v4822_v31, %v4822_v31  ;;  %v4536_v27 = vadd.f32 %v9397_v28, %v4488_v35 }
 0x37f   : > { %v4930_v0 = vadd.f32 %v4929_v63, %v4928_v13  ;;  %v3898_v17 = vpop.f32.mrb[76].mxu1  ;;  %v4373_v5 = vpop.f32.mrb[76].mxu0 }
 0x380   : > { %v5059_v58 = vsel %vm354_vm2, %v4999_v50, 0.0  ;;  %v4823_v42 = vmul.f32 %v4705_v57, %v4536_v27  ;;  %v4010_v10 = vadd.f32 %v3898_v17, %v9303_v25  ;;  %v4489_v23 = vadd.f32 %v4373_v5, %v4009_v14  ;;  %v7057_v7 = vpop.f32.mrb[77].mxu0  ;;  %v6935_v12 = vpop.f32.mrb[77].mxu1 }
 0x381   : > { %v5060_v19 = vadd.f32 %v5059_v58, %v5058_v49  ;;  %v4720_v14 = vpop.permute.xlu0 %4719 }
 0x382   : > { %4867 = vst.msk [vmem:[%s9133_s29 + $0xc0] sm:$0xff] %vm354_vm2, %v4823_v42  ;;  %v4931_v52 = vsel %vm354_vm2, %v4823_v42, 0.0  ;;  %v5000_v55 = vmul.f32 %v4823_v42, %v4823_v42  ;;  %v4537_v21 = vadd.f32 %v9397_v28, %v4489_v23  ;;  %v4725_v42 = vpop.permute.xlu1 %4724 }
 0x383   : > { %v4932_v18 = vadd.f32 %v4931_v52, %v4930_v0  ;;  %v3903_v44 = vpop.f32.mrb[78].mxu1  ;;  %v4378_v16 = vpop.f32.mrb[78].mxu0 }
 0x384   : > { %v5061_v36 = vsel %vm354_vm2, %v5000_v55, 0.0  ;;  %v4824_v9 = vmul.f32 %v4710_v60, %v4537_v21  ;;  %v4011_v25 = vadd.f32 %v3903_v44, %v9314_v61  ;;  %v4490_v54 = vadd.f32 %v4378_v16, %v4010_v10  ;;  %v7060_v53 = vpop.f32.mrb[79].mxu0  ;;  %v6938_v4 = vpop.f32.mrb[79].mxu1 }
 0x385   : > { %v5062_v6 = vadd.f32 %v5061_v36, %v5060_v19  ;;  %v4730_v36 = vpop.permute.xlu0 %4729 }
 0x386   : > { %4868 = vst.msk [vmem:[%s9133_s29 + $0xc8] sm:$0xff] %vm354_vm2, %v4824_v9  ;;  %v4933_v32 = vsel %vm354_vm2, %v4824_v9, 0.0  ;;  %v5001_v56 = vmul.f32 %v4824_v9, %v4824_v9  ;;  %v4538_v43 = vadd.f32 %v9397_v28, %v4490_v54 }
 0x387   : > { %v4934_v41 = vadd.f32 %v4933_v32, %v4932_v18  ;;  %v3908_v45 = vpop.f32.mrb[80].mxu1  ;;  %v4383_v1 = vpop.f32.mrb[80].mxu0 }
 0x388   : > { %v5063_v46 = vsel %vm354_vm2, %v5001_v56, 0.0  ;;  %v4825_v13 = vmul.f32 %v4715_v62, %v4538_v43  ;;  %v4012_v61 = vadd.f32 %v3908_v45, %v9325_v38  ;;  %v4491_v30 = vadd.f32 %v4383_v1, %v4011_v25  ;;  %v7063_v33 = vpop.f32.mrb[81].mxu0  ;;  %v6941_v15 = vpop.f32.mrb[81].mxu1 }
 0x389   : > { %v5064_v31 = vadd.f32 %v5063_v46, %v5062_v6  ;;  %v4735_v1 = vpop.permute.xlu1 %4734 }
 0x38a   : > { %4869 = vst.msk [vmem:[%s9133_s29 + $0xd0] sm:$0xff] %vm354_vm2, %v4825_v13  ;;  %v4935_v35 = vsel %vm354_vm2, %v4825_v13, 0.0  ;;  %v5002_v11 = vmul.f32 %v4825_v13, %v4825_v13  ;;  %v4539_v51 = vadd.f32 %v9397_v28, %v4491_v30 }
 0x38b   : > { %v4936_v49 = vadd.f32 %v4935_v35, %v4934_v41  ;;  %v3913_v57 = vpop.f32.mrb[82].mxu1  ;;  %v4388_v63 = vpop.f32.mrb[82].mxu0 }
 0x38c   : > { %v5065_v50 = vsel %vm354_vm2, %v5002_v11, 0.0  ;;  %v4826_v27 = vmul.f32 %v4720_v14, %v4539_v51  ;;  %v4013_v38 = vadd.f32 %v3913_v57, %v9336_v3  ;;  %v4492_v0 = vadd.f32 %v4388_v63, %v4012_v61  ;;  %v7066_v17 = vpop.f32.mrb[83].mxu0  ;;  %v6944_v5 = vpop.f32.mrb[83].mxu1 }
 0x38d   : > { %v5066_v58 = vadd.f32 %v5065_v50, %v5064_v31  ;;  %v4740_v57 = vpop.permute.xlu0 %4739 }
 0x38e   : > { %4870 = vst.msk [vmem:[%s9133_s29 + $0xd8] sm:$0xff] %vm354_vm2, %v4826_v27  ;;  %v4937_v10 = vsel %vm354_vm2, %v4826_v27, 0.0  ;;  %v5003_v23 = vmul.f32 %v4826_v27, %v4826_v27  ;;  %v4540_v7 = vadd.f32 %v9397_v28, %v4492_v0 }
 0x38f   : > { %v4938_v12 = vadd.f32 %v4937_v10, %v4936_v49  ;;  %v3918_v19 = vpop.f32.mrb[84].mxu1  ;;  %v4393_v60 = vpop.f32.mrb[84].mxu0 }
 0x390   : > { %v5067_v52 = vsel %vm354_vm2, %v5003_v23, 0.0  ;;  %v4827_v55 = vmul.f32 %v4725_v42, %v4540_v7  ;;  %v4014_v3 = vadd.f32 %v3918_v19, %v9347_v2  ;;  %v4493_v21 = vadd.f32 %v4393_v60, %v4013_v38  ;;  %v7069_v18 = vpop.f32.mrb[85].mxu0  ;;  %v6947_v44 = vpop.f32.mrb[85].mxu1 }
 0x391   : > { %v5068_v16 = vadd.f32 %v5067_v52, %v5066_v58 }
 0x392   : > { %4871 = vst.msk [vmem:[%s9133_s29 + $0xe0] sm:$0xff] %vm354_vm2, %v4827_v55  ;;  %v4939_v9 = vsel %vm354_vm2, %v4827_v55, 0.0  ;;  %v5004_v25 = vmul.f32 %v4827_v55, %v4827_v55  ;;  %v4541_v54 = vadd.f32 %v9397_v28, %v4493_v21 }
 0x393   : > { %v4940_v53 = vadd.f32 %v4939_v9, %v4938_v12  ;;  %v3923_v4 = vpop.f32.mrb[86].mxu1  ;;  %v4398_v6 = vpop.f32.mrb[86].mxu0 }
 0x394   : > { %v5069_v62 = vsel %vm354_vm2, %v5004_v25, 0.0  ;;  %v4828_v32 = vmul.f32 %v4730_v36, %v4541_v54  ;;  %v4015_v2 = vadd.f32 %v3923_v4, %v9355_v48  ;;  %v4494_v56 = vadd.f32 %v4398_v6, %v4014_v3  ;;  %v7072_v43 = vpop.f32.mrb[87].mxu0  ;;  %v6950_v41 = vpop.f32.mrb[87].mxu1 }
 0x395   : > { %v5070_v45 = vadd.f32 %v5069_v62, %v5068_v16  ;;  %v4745_v12 = vpop.permute.xlu1 %4744  ;;  %v4750_v54 = vpop.permute.xlu0 %4749 }
 0x396   : > { %4872 = vst.msk [vmem:[%s9133_s29 + $0xe8] sm:$0xff] %vm354_vm2, %v4828_v32  ;;  %v4941_v46 = vsel %vm354_vm2, %v4828_v32, 0.0  ;;  %v5005_v13 = vmul.f32 %v4828_v32, %v4828_v32  ;;  %v4542_v61 = vadd.f32 %v9397_v28, %v4494_v56 }
 0x397   : > { %v4942_v30 = vadd.f32 %v4941_v46, %v4940_v53  ;;  %v3928_v33 = vpop.f32.mrb[88].mxu1  ;;  %v4403_v15 = vpop.f32.mrb[88].mxu0 }
 0x398   : > { %v5071_v31 = vsel %vm354_vm2, %v5005_v13, 0.0  ;;  %v4829_v14 = vmul.f32 %v4735_v1, %v4542_v61  ;;  %v4016_v48 = vadd.f32 %v3928_v33, %v9359_v26  ;;  %v4495_v35 = vadd.f32 %v4403_v15, %v4015_v2  ;;  %v7075_v11 = vpop.f32.mrb[89].mxu0  ;;  %v6953_v51 = vpop.f32.mrb[89].mxu1 }
 0x399   : > { %v5072_v49 = vadd.f32 %v5071_v31, %v5070_v45  ;;  %v4755_v13 = vpop.permute.xlu1 %4754 }
 0x39a   : > { %4873 = vst.msk [vmem:[%s9133_s29 + $0xf0] sm:$0xff] %vm354_vm2, %v4829_v14  ;;  %v4943_v63 = vsel %vm354_vm2, %v4829_v14, 0.0  ;;  %v5006_v50 = vmul.f32 %v4829_v14, %v4829_v14  ;;  %v4543_v27 = vadd.f32 %v9397_v28, %v4495_v35 }
 0x39b   : > { %v4944_v38 = vadd.f32 %v4943_v63, %v4942_v30  ;;  %v3933_v0 = vpop.f32.mrb[90].mxu1  ;;  %v4408_v17 = vpop.f32.mrb[90].mxu0 }
 0x39c   : > { %v5073_v5 = vsel %vm354_vm2, %v5006_v50, 0.0  ;;  %v4830_v58 = vmul.f32 %v4740_v57, %v4543_v27  ;;  %v4017_v26 = vadd.f32 %v3933_v0, %v9362_v34  ;;  %v4496_v42 = vadd.f32 %v4408_v17, %v4016_v48  ;;  %v7078_v10 = vpop.f32.mrb[91].mxu0  ;;  %v6956_v23 = vpop.f32.mrb[91].mxu1 }
 0x39d   : > { %v5074_v7 = vadd.f32 %v5073_v5, %v5072_v49  ;;  %v4760_v63 = vpop.permute.xlu0 %4759 }
 0x39e   : > { %4874 = vst.msk [vmem:[%s9133_s29 + $0xf8] sm:$0xff] %vm354_vm2, %v4830_v58  ;;  %v4945_v19 = vsel %vm354_vm2, %v4830_v58, 0.0  ;;  %v5007_v60 = vmul.f32 %v4830_v58, %v4830_v58  ;;  %v4544_v52 = vadd.f32 %v9397_v28, %v4496_v42 }
 0x39f   : > { %v4946_v55 = vadd.f32 %v4945_v19, %v4944_v38  ;;  %v3938_v3 = vpop.f32.mrb[92].mxu1  ;;  %v4413_v21 = vpop.f32.mrb[92].mxu0 }
 0x3a0   : > { %v5075_v18 = vsel %vm354_vm2, %v5007_v60, 0.0  ;;  %v4831_v44 = vmul.f32 %v4745_v12, %v4544_v52  ;;  %v4018_v34 = vadd.f32 %v3938_v3, %v9365_v22  ;;  %v4497_v16 = vadd.f32 %v4413_v21, %v4017_v26  ;;  %v7081_v36 = vpop.f32.mrb[93].mxu0  ;;  %v6959_v9 = vpop.f32.mrb[93].mxu1 }
 0x3a1   : > { %v5076_v25 = vadd.f32 %v5075_v18, %v5074_v7  ;;  %v4765_v12 = vpop.permute.xlu1 %4764 }
 0x3a2   : > { %4875 = vst.msk [vmem:[%s9133_s29 + $0x100] sm:$0xff] %vm354_vm2, %v4831_v44  ;;  %v4947_v53 = vsel %vm354_vm2, %v4831_v44, 0.0  ;;  %v5008_v4 = vmul.f32 %v4831_v44, %v4831_v44  ;;  %v4545_v6 = vadd.f32 %v9397_v28, %v4497_v16 }
 0x3a3   : > { %v4948_v62 = vadd.f32 %v4947_v53, %v4946_v55  ;;  %v3943_v32 = vpop.f32.mrb[94].mxu1  ;;  %v4418_v2 = vpop.f32.mrb[94].mxu0 }
 0x3a4   : > { %v5077_v56 = vsel %vm354_vm2, %v5008_v4, 0.0  ;;  %v4832_v43 = vmul.f32 %v4750_v54, %v4545_v6  ;;  %v4019_v22 = vadd.f32 %v3943_v32, %v9368_v39  ;;  %v4498_v41 = vadd.f32 %v4418_v2, %v4018_v34  ;;  %v7084_v45 = vpop.f32.mrb[95].mxu0  ;;  %v6962_v1 = vpop.f32.mrb[95].mxu1 }
 0x3a5   : > { %v5078_v46 = vadd.f32 %v5077_v56, %v5076_v25  ;;  %v4770_v25 = vpop.permute.xlu0 %4769  ;;  %v4775_v1 = vpop.permute.xlu1 %4774 }
 0x3a6   : > { %4876 = vst.msk [vmem:[%s9133_s29 + $0x108] sm:$0xff] %vm354_vm2, %v4832_v43  ;;  %v4949_v61 = vsel %vm354_vm2, %v4832_v43, 0.0  ;;  %v5009_v30 = vmul.f32 %v4832_v43, %v4832_v43  ;;  %v4546_v33 = vadd.f32 %v9397_v28, %v4498_v41 }
 0x3a7   : > { %v4950_v15 = vadd.f32 %v4949_v61, %v4948_v62  ;;  %v3948_v31 = vpop.f32.mrb[96].mxu1  ;;  %v4423_v14 = vpop.f32.mrb[96].mxu0 }
 0x3a8   : > { %v5079_v48 = vsel %vm354_vm2, %v5009_v30, 0.0  ;;  %v4833_v35 = vmul.f32 %v4755_v13, %v4546_v33  ;;  %v4020_v39 = vadd.f32 %v3948_v31, %v9371_v59  ;;  %v4499_v11 = vadd.f32 %v4423_v14, %v4019_v22  ;;  %v7087_v51 = vpop.f32.mrb[97].mxu0  ;;  %v6965_v49 = vpop.f32.mrb[97].mxu1 }
 0x3a9   : > { %v5080_v57 = vadd.f32 %v5079_v48, %v5078_v46  ;;  %v4780_v51 = vpop.permute.xlu0 %4779 }
 0x3aa   : > { %4877 = vst.msk [vmem:[%s9133_s29 + $0x110] sm:$0xff] %vm354_vm2, %v4833_v35  ;;  %v4951_v50 = vsel %vm354_vm2, %v4833_v35, 0.0  ;;  %v5010_v27 = vmul.f32 %v4833_v35, %v4833_v35  ;;  %v4547_v38 = vadd.f32 %v9397_v28, %v4499_v11 }
 0x3ab   : > { %v4952_v0 = vadd.f32 %v4951_v50, %v4950_v15  ;;  %v3953_v17 = vpop.f32.mrb[98].mxu1  ;;  %v4428_v5 = vpop.f32.mrb[98].mxu0 }
 0x3ac   : > { %v5081_v58 = vsel %vm354_vm2, %v5010_v27, 0.0  ;;  %v4834_v26 = vmul.f32 %v4760_v63, %v4547_v38  ;;  %v4021_v59 = vadd.f32 %v3953_v17, %v9374_v29  ;;  %v4500_v42 = vadd.f32 %v4428_v5, %v4020_v39  ;;  %v7090_v10 = vpop.f32.mrb[99].mxu0  ;;  %v6968_v23 = vpop.f32.mrb[99].mxu1 }
 0x3ad   : > { %v5082_v7 = vadd.f32 %v5081_v58, %v5080_v57 }
 0x3ae   : > { %4878 = vst.msk [vmem:[%s9133_s29 + $0x118] sm:$0xff] %vm354_vm2, %v4834_v26  ;;  %v4953_v19 = vsel %vm354_vm2, %v4834_v26, 0.0  ;;  %v5011_v60 = vmul.f32 %v4834_v26, %v4834_v26  ;;  %v4548_v52 = vadd.f32 %v9397_v28, %v4500_v42  ;;  %v4785_v42 = vpop.permute.xlu1 %4784 }
 0x3af   : > { %v4954_v55 = vadd.f32 %v4953_v19, %v4952_v0  ;;  %v3958_v3 = vpop.f32.mrb[100].mxu1  ;;  %v4433_v21 = vpop.f32.mrb[100].mxu0 }
 0x3b0   : > { %v5083_v18 = vsel %vm354_vm2, %v5011_v60, 0.0  ;;  %v4835_v44 = vmul.f32 %v4765_v12, %v4548_v52  ;;  %v4022_v29 = vadd.f32 %v3958_v3, %v9377_v47  ;;  %v4501_v34 = vadd.f32 %v4433_v21, %v4021_v59  ;;  %v7093_v16 = vpop.f32.mrb[101].mxu0  ;;  %v6971_v36 = vpop.f32.mrb[101].mxu1 }
 0x3b1   : > { %v5084_v9 = vadd.f32 %v5083_v18, %v5082_v7 }
 0x3b2   : > { %4879 = vst.msk [vmem:[%s9133_s29 + $0x120] sm:$0xff] %vm354_vm2, %v4835_v44  ;;  %v4955_v54 = vsel %vm354_vm2, %v4835_v44, 0.0  ;;  %v5012_v53 = vmul.f32 %v4835_v44, %v4835_v44  ;;  %v4549_v4 = vadd.f32 %v9397_v28, %v4501_v34  ;;  %v9612_v28 = vld [vmem:[%s9662_s2] ss:$0 sm:$0xff] }
 0x3b3   : > { %v4956_v6 = vadd.f32 %v4955_v54, %v4954_v55  ;;  %v3963_v62 = vpop.f32.mrb[102].mxu1  ;;  %v4438_v32 = vpop.f32.mrb[102].mxu0 }
 0x3b4   : > { %v5085_v2 = vsel %vm354_vm2, %v5012_v53, 0.0  ;;  %v4836_v56 = vmul.f32 %v4770_v25, %v4549_v4  ;;  %v4023_v47 = vadd.f32 %v3963_v62, %v9380_v24  ;;  %v4502_v43 = vadd.f32 %v4438_v32, %v4022_v29  ;;  %v7096_v22 = vpop.f32.mrb[103].mxu0  ;;  %v6974_v41 = vpop.f32.mrb[103].mxu1 }
 0x3b5   : > { %v5086_v45 = vadd.f32 %v5085_v2, %v5084_v9  ;;  %v4790_v29 = vpop.permute.xlu0 %4789  ;;  %v4795_v22 = vpop.permute.xlu1 %4794 }
 0x3b6   : > { %4880 = vst.msk [vmem:[%s9133_s29 + $0x128] sm:$0xff] %vm354_vm2, %v4836_v56  ;;  %v4957_v46 = vsel %vm354_vm2, %v4836_v56, 0.0  ;;  %v5013_v13 = vmul.f32 %v4836_v56, %v4836_v56  ;;  %v4550_v61 = vadd.f32 %v9612_v28, %v4502_v43 }
 0x3b7   : > { %v4958_v30 = vadd.f32 %v4957_v46, %v4956_v6  ;;  %v3968_v24 = vpop.f32.mrb[104].mxu1  ;;  %v4443_v33 = vpop.f32.mrb[104].mxu0 }
 0x3b8   : > { %v5087_v15 = vsel %vm354_vm2, %v5013_v13, 0.0  ;;  %v4837_v31 = vmul.f32 %v4775_v1, %v4550_v61  ;;  %v4024_v14 = vadd.f32 %v3968_v24, %v9383_v40  ;;  %v4503_v48 = vadd.f32 %v4443_v33, %v4023_v47  ;;  %v7099_v35 = vpop.f32.mrb[105].mxu0  ;;  %v6977_v39 = vpop.f32.mrb[105].mxu1 }
 0x3b9   : > { %v5088_v11 = vadd.f32 %v5087_v15, %v5086_v45  ;;  %v4800_v15 = vpop.permute.xlu0 %4799 }
 0x3ba   : > { %4881 = vst.msk [vmem:[%s9133_s29 + $0x130] sm:$0xff] %vm354_vm2, %v4837_v31  ;;  %v4959_v49 = vsel %vm354_vm2, %v4837_v31, 0.0  ;;  %v5014_v57 = vmul.f32 %v4837_v31, %v4837_v31  ;;  %v4551_v63 = vadd.f32 %v9612_v28, %v4503_v48 }
 0x3bb   : > { %v4960_v50 = vadd.f32 %v4959_v49, %v4958_v30  ;;  %v3973_v27 = vpop.f32.mrb[106].mxu1  ;;  %v4448_v38 = vpop.f32.mrb[106].mxu0 }
 0x3bc   : > { %v5089_v0 = vsel %vm354_vm2, %v5014_v57, 0.0  ;;  %v4838_v17 = vmul.f32 %v4780_v51, %v4551_v63  ;;  %v4025_v40 = vadd.f32 %v3973_v27, %v9386_v37  ;;  %v4504_v5 = vadd.f32 %v4448_v38, %v4024_v14  ;;  %v7102_v58 = vpop.f32.mrb[107].mxu0  ;;  %v6980_v26 = vpop.f32.mrb[107].mxu1 }
 0x3bd   : > { %v5090_v59 = vadd.f32 %v5089_v0, %v5088_v11 }
 0x3be   : > { %4882 = vst.msk [vmem:[%s9133_s29 + $0x138] sm:$0xff] %vm354_vm2, %v4838_v17  ;;  %v4961_v10 = vsel %vm354_vm2, %v4838_v17, 0.0  ;;  %v5015_v23 = vmul.f32 %v4838_v17, %v4838_v17  ;;  %v4552_v7 = vadd.f32 %v9612_v28, %v4504_v5 }
 0x3bf   : > { %v4962_v12 = vadd.f32 %v4961_v10, %v4960_v50  ;;  %v3978_v19 = vpop.f32.mrb[108].mxu1  ;;  %v4453_v60 = vpop.f32.mrb[108].mxu0 }
 0x3c0   : > { %v5091_v52 = vsel %vm354_vm2, %v5015_v23, 0.0  ;;  %v4839_v55 = vmul.f32 %v4785_v42, %v4552_v7  ;;  %v4026_v37 = vadd.f32 %v3978_v19, %v9389_v20  ;;  %v4505_v3 = vadd.f32 %v4453_v60, %v4025_v40  ;;  %v7105_v21 = vpop.f32.mrb[109].mxu0  ;;  %v6983_v18 = vpop.f32.mrb[109].mxu1 }
 0x3c1   : > { %v5092_v44 = vadd.f32 %v5091_v52, %v5090_v59 }
 0x3c2   : > { %4883 = vst.msk [vmem:[%s9133_s29 + $0x140] sm:$0xff] %vm354_vm2, %v4839_v55  ;;  %v4963_v34 = vsel %vm354_vm2, %v4839_v55, 0.0  ;;  %v5016_v16 = vmul.f32 %v4839_v55, %v4839_v55  ;;  %v4553_v36 = vadd.f32 %v9612_v28, %v4505_v3 }
 0x3c3   : > { %v4964_v9 = vadd.f32 %v4963_v34, %v4962_v12  ;;  %v3983_v25 = vpop.f32.mrb[110].mxu1  ;;  %v4458_v54 = vpop.f32.mrb[110].mxu0 }
 0x3c4   : > { %v5093_v53 = vsel %vm354_vm2, %v5016_v16, 0.0  ;;  %v4840_v4 = vmul.f32 %v4790_v29, %v4553_v36  ;;  %v4027_v20 = vadd.f32 %v3983_v25, %v9391_v8  ;;  %v4506_v6 = vadd.f32 %v4458_v54, %v4026_v37  ;;  %v7108_v62 = vpop.f32.mrb[111].mxu0  ;;  %v6986_v32 = vpop.f32.mrb[111].mxu1 }
 0x3c5   : > { %v5094_v2 = vadd.f32 %v5093_v53, %v5092_v44 }
 0x3c6   : > { %4884 = vst.msk [vmem:[%s9133_s29 + $0x148] sm:$0xff] %vm354_vm2, %v4840_v4  ;;  %v4965_v56 = vsel %vm354_vm2, %v4840_v4, 0.0  ;;  %v5017_v47 = vmul.f32 %v4840_v4, %v4840_v4  ;;  %v4554_v43 = vadd.f32 %v9612_v28, %v4506_v6 }
 0x3c7   : > { %v4966_v41 = vadd.f32 %v4965_v56, %v4964_v9  ;;  %v4463_v45 = vpop.f32.mrb[112].mxu0 }
 0x3c8   : > { %v5095_v1 = vsel %vm354_vm2, %v5017_v47, 0.0  ;;  %v4841_v46 = vmul.f32 %v4795_v22, %v4554_v43  ;;  %v4507_v8 = vadd.f32 %v4463_v45, %v4027_v20  ;;  %v7111_v13 = vpop.f32.mrb[113].mxu0 }
 0x3c9   : > { %v5096_v61 = vadd.f32 %v5095_v1, %v5094_v2 }
 0x3ca   : > { %4885 = vst.msk [vmem:[%s9133_s29 + $0x150] sm:$0xff] %vm354_vm2, %v4841_v46  ;;  %v4967_v30 = vsel %vm354_vm2, %v4841_v46, 0.0  ;;  %v5018_v24 = vmul.f32 %v4841_v46, %v4841_v46  ;;  %v4555_v33 = vadd.f32 %v9612_v28, %v4507_v8 }
 0x3cb   : > { %v4968_v31 = vadd.f32 %v4967_v30, %v4966_v41 }
 0x3cc   : > { %v5097_v14 = vsel %vm354_vm2, %v5018_v24, 0.0  ;;  %v4842_v48 = vmul.f32 %v4800_v15, %v4555_v33 }
 0x3cd   : > { %v5098_v35 = vadd.f32 %v5097_v14, %v5096_v61 }
 0x3ce   : > { %4886 = vst.msk [vmem:[%s9133_s29 + $0x158] sm:$0xff] %vm354_vm2, %v4842_v48  ;;  %v4969_v39 = vsel %vm354_vm2, %v4842_v48, 0.0  ;;  %v5019_v11 = vmul.f32 %v4842_v48, %v4842_v48 }
 0x3cf   : > { %v4970_v51 = vadd.f32 %v4969_v39, %v4968_v31 }
 0x3d0   : > { %v5099_v49 = vsel %vm354_vm2, %v5019_v11, 0.0 }
 0x3d1   : > { %v4971_v57 = vrot.slane %v4970_v51, 4  ;;  %v5100_v63 = vadd.f32 %v5099_v49, %v5098_v35 }
 0x3d3   : > { %v4972_v50 = vadd.f32 %v4971_v57, %v4970_v51  ;;  %v5101_v28 = vrot.slane %v5100_v63, 4 }
 0x3d5   : > { %v4973_v27 = vrot.slane %v4972_v50, 2  ;;  %v5102_v38 = vadd.f32 %v5101_v28, %v5100_v63 }
 0x3d7   : > { %v4974_v0 = vadd.f32 %v4973_v27, %v4972_v50  ;;  %v5103_v17 = vrot.slane %v5102_v38, 2 }
 0x3d9   : > { %v4975_v40 = vrot.slane %v4974_v0, 1  ;;  %v5104_v5 = vadd.f32 %v5103_v17, %v5102_v38 }
 0x3db   : > { %v4976_v58 = vadd.f32 %v4975_v40, %v4974_v0  ;;  %v5105_v26 = vrot.slane %v5104_v5, 1 }
 0x3dd   : > { %4978 = vst.msk [vmem:[%s265_s10] sm:$0x1] %vm4977_vm3, %v4976_v58  ;;  %v5106_v59 = vadd.f32 %v5105_v26, %v5104_v5 }
 0x3df   : > { %5107 = vst.msk [vmem:[%s268_s13] sm:$0x1] %vm4977_vm3, %v5106_v59 }
 0x3e0 PF: > { %s17_s21 = sadd.s32 1, %s7135_s21  }
 0x3e1   : > { %p14_p4 = scmp.ge.s32.totalorder %s17_s21, 4  }
 0x3e3   :  { %16 = sbr.rel (!%p14_p4) target bundleno = 1 (0x1), region = 98 }

</bundles_post_ra>
